<compile_context>
chip_gen: v5e
topology: v5e:2x2
jax: 0.10.0
libtpu: 0.0.40
codegen_flags: <defaults>
</compile_context>

<pallas_src>
import functools

import jax
import jax.numpy as jnp
from jax.experimental import pallas as pl
from jax.experimental.pallas import tpu as pltpu

LEAKY_SLOPE = 0.2
BN_EPS = 1e-5


# ---------------------------------------------------------------------------
# Pallas kernels
# ---------------------------------------------------------------------------
def _conv_leaky_kernel(x_ref, w_ref, o_ref):
    """One block of patches[M,K] @ w[K,N] (bf16 in, f32 acc) + LeakyReLU."""
    acc = jnp.dot(x_ref[...], w_ref[...], preferred_element_type=jnp.float32)
    act = jnp.where(acc > 0, acc, LEAKY_SLOPE * acc)
    o_ref[...] = act.astype(o_ref.dtype)


def _tail_kernel(p_ref, w4_ref, g_ref, bb_ref, w5_ref, b5_ref, o_ref, acc_ref,
                 *, n_batch, k_steps):
    """K-tiled conv4 matmul + fused BatchNorm + LeakyReLU + conv5 epilogue.

    conv4: patches[M4, 4096] @ w4[4096, 512] accumulated over the K grid axis.
    Epilogue (last K step): BatchNorm2d over the M4 = n_batch*9 rows (PyTorch
    train-mode batch statistics, biased variance), LeakyReLU(0.2), then the
    final ZeroPad2d(1)+Conv2d(512->1,k4) as a VPU multiply + lane reduction:
    every conv4 output pixel (3x3) contributes to every conv5 output pixel
    (2x2), with the matching weight slice pre-arranged in w5_ref[pix].
    """
    k = pl.program_id(0)

    @pl.when(k == 0)
    def _init():
        acc_ref[...] = jnp.zeros_like(acc_ref)

    acc_ref[...] += jnp.dot(p_ref[...], w4_ref[...],
                            preferred_element_type=jnp.float32)

    @pl.when(k == k_steps - 1)
    def _finalize():
        m_rows = n_batch * 9
        x = acc_ref[...]                                    # [m_rows, 512]
        inv_m = 1.0 / m_rows
        mean = jnp.sum(x, axis=0, keepdims=True) * inv_m    # [1, 512]
        d = x - mean
        var = jnp.sum(d * d, axis=0, keepdims=True) * inv_m
        act = d * jax.lax.rsqrt(var + BN_EPS) * g_ref[...] + bb_ref[...]
        act = jnp.where(act > 0, act, LEAKY_SLOPE * act)    # [m_rows, 512]

        # conv5 as VPU work: per output pixel, elementwise-mul with the
        # pre-arranged weight slab and reduce over lanes (channels).
        col_sums = [jnp.sum(act * w5_ref[pix], axis=1, keepdims=True)
                    for pix in range(4)]                    # 4 x [m_rows, 1]
        s = jnp.concatenate(col_sums, axis=1)               # [m_rows, 4]

        # Sum each batch item's 9 rows (masked sublane reduction).
        # TODO(synk): replace with a selector matmul if n_batch grows past ~8.
        row_idx = jax.lax.broadcasted_iota(jnp.int32, (m_rows, 1), 0)
        rows = []
        for n in range(n_batch):
            in_n = (row_idx >= n * 9) & (row_idx < (n + 1) * 9)
            rows.append(
                jnp.sum(jnp.where(in_n, s, 0.0), axis=0, keepdims=True))
        bias = b5_ref[0, 0]                                  # scalar from SMEM
        o_ref[...] = jnp.concatenate(rows, axis=0) + bias    # [nb, 4]


# ---------------------------------------------------------------------------
# Pallas wrappers
# ---------------------------------------------------------------------------
def pallas_conv_leaky(patches_bf16, w_bf16, m_blocks=1):
    """Conv-as-matmul with fused LeakyReLU; optional M split for megacore."""
    m, k = patches_bf16.shape
    _, n = w_bf16.shape
    assert m % m_blocks == 0
    bm = m // m_blocks
    return pl.pallas_call(
        _conv_leaky_kernel,
        out_shape=jax.ShapeDtypeStruct((m, n), jnp.bfloat16),
        grid=(m_blocks,),
        in_specs=[
            pl.BlockSpec((bm, k), lambda i: (i, 0)),
            pl.BlockSpec((k, n), lambda i: (0, 0)),
        ],
        out_specs=pl.BlockSpec((bm, n), lambda i: (i, 0)),
        compiler_params=pltpu.CompilerParams(
            dimension_semantics=("parallel",)),
    )(patches_bf16, w_bf16)


def pallas_tail(p4_bf16, w4_bf16, gamma, beta, w5sel, b5, *, n_batch, tk=2048):
    """conv4 (K-tiled) + BN + LeakyReLU + conv5, fused in one pallas_call."""
    m4, k4 = p4_bf16.shape
    c4 = w4_bf16.shape[1]
    assert k4 % tk == 0
    k_steps = k4 // tk
    kern = functools.partial(_tail_kernel, n_batch=n_batch, k_steps=k_steps)
    return pl.pallas_call(
        kern,
        out_shape=jax.ShapeDtypeStruct((n_batch, 4), jnp.float32),
        grid=(k_steps,),
        in_specs=[
            pl.BlockSpec((m4, tk), lambda k: (0, k)),          # conv4 patches
            pl.BlockSpec((tk, c4), lambda k: (k, 0)),          # conv4 weight
            pl.BlockSpec((1, c4), lambda k: (0, 0)),           # gamma
            pl.BlockSpec((1, c4), lambda k: (0, 0)),           # beta
            pl.BlockSpec((4, m4, c4), lambda k: (0, 0, 0)),    # conv5 weights
            pl.BlockSpec(memory_space=pltpu.MemorySpace.SMEM), # conv5 bias
        ],
        out_specs=pl.BlockSpec((n_batch, 4), lambda k: (0, 0)),
        scratch_shapes=[pltpu.VMEM((m4, c4), jnp.float32)],
        compiler_params=pltpu.CompilerParams(
            dimension_semantics=("arbitrary",)),
    )(p4_bf16, w4_bf16, gamma, beta, w5sel, b5)


# ---------------------------------------------------------------------------
# XLA-side glue: padding, im2col, weight re-layout (all tiny arrays)
# ---------------------------------------------------------------------------
def _im2col(x_nhwc, k, stride, pad, pad_mode):
    if pad > 0:
        mode = "reflect" if pad_mode == "reflect" else "constant"
        x_nhwc = jnp.pad(
            x_nhwc, ((0, 0), (pad, pad), (pad, pad), (0, 0)), mode=mode)
    n, h, w, c = x_nhwc.shape
    ho = (h - k) // stride + 1
    wo = (w - k) // stride + 1
    cols = []
    for i in range(k):
        for j in range(k):
            cols.append(x_nhwc[:, i:i + stride * ho:stride,
                               j:j + stride * wo:stride, :])
    p = jnp.stack(cols, axis=3)                       # [N, Ho, Wo, k*k, C]
    return p.reshape(n * ho * wo, k * k * c), (ho, wo)


def _prep_weight(w_oihw, cin_pad=None):
    """OIHW -> [(kh*kw*cin), cout] bf16, with optional zero cin padding."""
    _, ci, _, _ = w_oihw.shape
    w = jnp.transpose(w_oihw, (2, 3, 1, 0))           # [kh, kw, ci, co]
    if cin_pad is not None and cin_pad > ci:
        w = jnp.pad(w, ((0, 0), (0, 0), (0, cin_pad - ci), (0, 0)))
    kh, kw, ci2, co2 = w.shape
    return w.reshape(kh * kw * ci2, co2).astype(jnp.bfloat16)


def _prep_w5(w5_oihw, n_batch):
    """Arrange Conv2d(512->1,k4) weights for the in-kernel conv5 reduction.

    On a 3x3 input with ZeroPad2d(1), output pixel (ho,wo) gets the weight
    W5[0, c, h+1-ho, w+1-wo] from input pixel (h,w); every (h,w) is in range.
    Returns [4, n_batch*9, 512] f32, row order matching conv4's (n, h, w) rows.
    """
    mats = []
    for ho in range(2):
        for wo in range(2):
            rows = [w5_oihw[0, :, h + 1 - ho, w + 1 - wo]
                    for h in range(3) for w in range(3)]
            v = jnp.stack(rows, axis=0)               # [9, 512]
            mats.append(jnp.tile(v, (n_batch, 1)))    # [n_batch*9, 512]
    return jnp.stack(mats, axis=0).astype(jnp.float32)


def prepare_params(params, n_batch):
    """One-time weight re-layout/cast; keep out of the jitted forward."""
    return {
        "w1": _prep_weight(params["w1"], cin_pad=8),          # [128, 64]
        "w2": _prep_weight(params["w2"]),                      # [1024, 128]
        "w3": _prep_weight(params["w3"]),                      # [2048, 256]
        "w4": _prep_weight(params["w4"]),                      # [4096, 512]
        "gamma": params["gamma"].reshape(1, -1).astype(jnp.float32),
        "beta": params["beta"].reshape(1, -1).astype(jnp.float32),
        "w5sel": _prep_w5(params["w5"], n_batch),              # [4, nb*9, 512]
        "b5": params["b5"].reshape(1, 1).astype(jnp.float32),  # SMEM scalar
    }


# ---------------------------------------------------------------------------
# Discriminator
# ---------------------------------------------------------------------------
def init_params(key, in_channels=3, out_channels=3):
    ks = jax.random.split(key, 8)
    c0 = in_channels + out_channels

    def w(k, co, ci):
        return jax.random.normal(k, (co, ci, 4, 4), jnp.float32) * 0.05

    return {
        "w1": w(ks[0], 64, c0),
        "w2": w(ks[1], 128, 64),
        "w3": w(ks[2], 256, 128),
        "w4": w(ks[3], 512, 256),
        "gamma": 1.0 + 0.1 * jax.random.normal(ks[4], (512,), jnp.float32),
        "beta": 0.1 * jax.random.normal(ks[5], (512,), jnp.float32),
        "w5": w(ks[6], 1, 512),
        "b5": 0.1 * jax.random.normal(ks[7], (1,), jnp.float32),
    }


@jax.jit
def discriminator_forward(prep, x_nchw, y_nchw):
    # Inputs x, y are NCHW; internal NHWC bf16; output returned as NCHW f32.
    xy = jnp.concatenate([x_nchw, y_nchw], axis=1)             # [N, 6, H, W]
    h = jnp.transpose(xy, (0, 2, 3, 1)).astype(jnp.bfloat16)   # -> NHWC bf16
    nb = h.shape[0]

    # conv1: pad cin 6->8 so K = 16*8 = 128 (lane-dense patches); output stays
    # at its native 64 channels (masked stores are cheap; keeps conv2's K at
    # 1024 instead of 2048).  M split in 2 so a v7x megacore uses both TCs.
    h = jnp.pad(h, ((0, 0), (0, 0), (0, 0), (0, 8 - h.shape[-1])))
    p1, (oh1, ow1) = _im2col(h, 4, 2, 1, "reflect")            # [nb*256, 128]
    a1 = pallas_conv_leaky(p1, prep["w1"], m_blocks=2)         # [nb*256, 64]
    a1 = a1.reshape(nb, oh1, ow1, 64)

    # conv2 (64->128)
    p2, (oh2, ow2) = _im2col(a1, 4, 2, 1, "reflect")           # [nb*64, 1024]
    a2 = pallas_conv_leaky(p2, prep["w2"])                     # [nb*64, 128]
    a2 = a2.reshape(nb, oh2, ow2, 128)

    # conv3 (128->256)
    p3, (oh3, ow3) = _im2col(a2, 4, 2, 1, "reflect")           # [nb*16, 2048]
    a3 = pallas_conv_leaky(p3, prep["w3"])                     # [nb*16, 256]
    a3 = a3.reshape(nb, oh3, ow3, 256)

    # Fused tail: ZeroPad + conv4 + BatchNorm + LeakyReLU + ZeroPad + conv5.
    p4, (oh4, ow4) = _im2col(a3, 4, 1, 1, "zero")              # [nb*9, 4096]
    assert (oh4, ow4) == (3, 3), "tail kernel assumes 32x32 input images"
    out = pallas_tail(
        p4,
        prep["w4"],                                            # [4096, 512]
        prep["gamma"], prep["beta"],
        prep["w5sel"],                                         # [4, nb*9, 512]
        prep["b5"],
        n_batch=nb)                                            # [nb, 4]

    return out.reshape(nb, 1, 2, 2)                            # NCHW


if __name__ == "__main__":
    key = jax.random.PRNGKey(0)
    kp, kx, ky = jax.random.split(key, 3)

    # Smallest spatial size the architecture supports cleanly is 32x32
    # (32 -> 16 -> 8 -> 4 -> pad/conv -> 3 -> pad/conv -> 2).
    N, C, S = 2, 3, 32
    x = jax.random.normal(kx, (N, C, S, S), jnp.float32)
    y = jax.random.normal(ky, (N, C, S, S), jnp.float32)

    params = init_params(kp, in_channels=C, out_channels=C)
    prepped = prepare_params(params, n_batch=N)   # one-time weight re-layout

    out = discriminator_forward(prepped, x, y)
    jax.block_until_ready(out)
    assert out.shape == (N, 1, 2, 2), out.shape
    print("KERNEL_OK")
</pallas_src>

<mosaic_0001>
module attributes {stable_mosaic.version = 11 : i64} {
  func.func @_conv_leaky_kernel(%arg0: i32, %arg1: memref<256x128xbf16, #tpu.memory_space<vmem>>, %arg2: memref<128x64xbf16, #tpu.memory_space<vmem>>, %arg3: memref<256x64xbf16, #tpu.memory_space<vmem>>) attributes {dimension_semantics = [#tpu.dimension_semantics<parallel>], iteration_bounds = array<i64: 2>, scalar_prefetch = 0 : i64, scratch_operands = 0 : i64, tpu.core_type = #tpu.core_type<tc>, window_params = [{transform_indices = @transform_0, window_bounds = array<i64: 256, 128>}, {pipeline_mode = #tpu.pipeline_mode<synchronous>, transform_indices = @transform_1, window_bounds = array<i64: 128, 64>}, {transform_indices = @transform_2, window_bounds = array<i64: 256, 64>}]} {
    %c0 = arith.constant 0 : index
    %c0_0 = arith.constant 0 : index
    %0 = vector.load %arg1[%c0, %c0_0] : memref<256x128xbf16, #tpu.memory_space<vmem>>, vector<256x128xbf16>
    %c0_1 = arith.constant 0 : index
    %c0_2 = arith.constant 0 : index
    %1 = vector.load %arg2[%c0_1, %c0_2] : memref<128x64xbf16, #tpu.memory_space<vmem>>, vector<128x64xbf16>
    %cst = arith.constant dense<0.000000e+00> : vector<256x64xf32>
    %2 = tpu.matmul %0, %1, %cst {dimension_numbers = #tpu.dot_dimension_numbers<[1], [0], [0], [1], [0, 0, 1, 1], [], []>} : vector<256x128xbf16>, vector<128x64xbf16>, vector<256x64xf32> -> vector<256x64xf32>
    %cst_3 = arith.constant 0.000000e+00 : f32
    %3 = vector.broadcast %cst_3 : f32 to vector<256x64xf32>
    %4 = arith.cmpf ogt, %2, %3 : vector<256x64xf32>
    %cst_4 = arith.constant 2.000000e-01 : f32
    %5 = vector.broadcast %cst_4 : f32 to vector<256x64xf32>
    %6 = arith.mulf %5, %2 : vector<256x64xf32>
    %7 = arith.select %4, %2, %6 : vector<256x64xi1>, vector<256x64xf32>
    %8 = arith.truncf %7 : vector<256x64xf32> to vector<256x64xbf16>
    %c0_5 = arith.constant 0 : index
    %c0_6 = arith.constant 0 : index
    %9 = vector.load %arg3[%c0_5, %c0_6] : memref<256x64xbf16, #tpu.memory_space<vmem>>, vector<256x64xbf16>
    tpu.vector_store %arg3[%c0_5, %c0_6], %8 {strides = array<i32>} : memref<256x64xbf16, #tpu.memory_space<vmem>>, vector<256x64xbf16>,
    return
  }
  func.func @transform_0(%arg0: i32) -> (i32, i32) {
    %c0_i32 = arith.constant 0 : i32
    %c0_i32_0 = arith.constant 0 : i32
    return %arg0, %c0_i32 : i32, i32
  }
  func.func @transform_1(%arg0: i32) -> (i32, i32) {
    %c0_i32 = arith.constant 0 : i32
    %c0_i32_0 = arith.constant 0 : i32
    %c0_i32_1 = arith.constant 0 : i32
    return %c0_i32, %c0_i32_0 : i32, i32
  }
  func.func @transform_2(%arg0: i32) -> (i32, i32) {
    %c0_i32 = arith.constant 0 : i32
    %c0_i32_0 = arith.constant 0 : i32
    return %arg0, %c0_i32 : i32, i32
  }
}

module attributes {stable_mosaic.version = 11 : i64} {
  func.func @_conv_leaky_kernel(%arg0: i32, %arg1: memref<128x1024xbf16, #tpu.memory_space<vmem>>, %arg2: memref<1024x128xbf16, #tpu.memory_space<vmem>>, %arg3: memref<128x128xbf16, #tpu.memory_space<vmem>>) attributes {dimension_semantics = [#tpu.dimension_semantics<parallel>], iteration_bounds = array<i64: 1>, scalar_prefetch = 0 : i64, scratch_operands = 0 : i64, tpu.core_type = #tpu.core_type<tc>, window_params = [{transform_indices = @transform_0, window_bounds = array<i64: 128, 1024>}, {pipeline_mode = #tpu.pipeline_mode<synchronous>, transform_indices = @transform_1, window_bounds = array<i64: 1024, 128>}, {transform_indices = @transform_2, window_bounds = array<i64: 128, 128>}]} {
    %c0 = arith.constant 0 : index
    %c0_0 = arith.constant 0 : index
    %0 = vector.load %arg1[%c0, %c0_0] : memref<128x1024xbf16, #tpu.memory_space<vmem>>, vector<128x1024xbf16>
    %c0_1 = arith.constant 0 : index
    %c0_2 = arith.constant 0 : index
    %1 = vector.load %arg2[%c0_1, %c0_2] : memref<1024x128xbf16, #tpu.memory_space<vmem>>, vector<1024x128xbf16>
    %cst = arith.constant dense<0.000000e+00> : vector<128x128xf32>
    %2 = tpu.matmul %0, %1, %cst {dimension_numbers = #tpu.dot_dimension_numbers<[1], [0], [0], [1], [0, 0, 1, 1], [], []>} : vector<128x1024xbf16>, vector<1024x128xbf16>, vector<128x128xf32> -> vector<128x128xf32>
    %cst_3 = arith.constant 0.000000e+00 : f32
    %3 = vector.broadcast %cst_3 : f32 to vector<128x128xf32>
    %4 = arith.cmpf ogt, %2, %3 : vector<128x128xf32>
    %cst_4 = arith.constant 2.000000e-01 : f32
    %5 = vector.broadcast %cst_4 : f32 to vector<128x128xf32>
    %6 = arith.mulf %5, %2 : vector<128x128xf32>
    %7 = arith.select %4, %2, %6 : vector<128x128xi1>, vector<128x128xf32>
    %8 = arith.truncf %7 : vector<128x128xf32> to vector<128x128xbf16>
    %c0_5 = arith.constant 0 : index
    %c0_6 = arith.constant 0 : index
    %9 = vector.load %arg3[%c0_5, %c0_6] : memref<128x128xbf16, #tpu.memory_space<vmem>>, vector<128x128xbf16>
    tpu.vector_store %arg3[%c0_5, %c0_6], %8 {strides = array<i32>} : memref<128x128xbf16, #tpu.memory_space<vmem>>, vector<128x128xbf16>,
    return
  }
  func.func @transform_0(%arg0: i32) -> (i32, i32) {
    %c0_i32 = arith.constant 0 : i32
    %c0_i32_0 = arith.constant 0 : i32
    return %arg0, %c0_i32 : i32, i32
  }
  func.func @transform_1(%arg0: i32) -> (i32, i32) {
    %c0_i32 = arith.constant 0 : i32
    %c0_i32_0 = arith.constant 0 : i32
    %c0_i32_1 = arith.constant 0 : i32
    return %c0_i32, %c0_i32_0 : i32, i32
  }
  func.func @transform_2(%arg0: i32) -> (i32, i32) {
    %c0_i32 = arith.constant 0 : i32
    %c0_i32_0 = arith.constant 0 : i32
    return %arg0, %c0_i32 : i32, i32
  }
}

module attributes {stable_mosaic.version = 11 : i64} {
  func.func @_conv_leaky_kernel(%arg0: i32, %arg1: memref<32x2048xbf16, #tpu.memory_space<vmem>>, %arg2: memref<2048x256xbf16, #tpu.memory_space<vmem>>, %arg3: memref<32x256xbf16, #tpu.memory_space<vmem>>) attributes {dimension_semantics = [#tpu.dimension_semantics<parallel>], iteration_bounds = array<i64: 1>, scalar_prefetch = 0 : i64, scratch_operands = 0 : i64, tpu.core_type = #tpu.core_type<tc>, window_params = [{transform_indices = @transform_0, window_bounds = array<i64: 32, 2048>}, {pipeline_mode = #tpu.pipeline_mode<synchronous>, transform_indices = @transform_1, window_bounds = array<i64: 2048, 256>}, {transform_indices = @transform_2, window_bounds = array<i64: 32, 256>}]} {
    %c0 = arith.constant 0 : index
    %c0_0 = arith.constant 0 : index
    %0 = vector.load %arg1[%c0, %c0_0] : memref<32x2048xbf16, #tpu.memory_space<vmem>>, vector<32x2048xbf16>
    %c0_1 = arith.constant 0 : index
    %c0_2 = arith.constant 0 : index
    %1 = vector.load %arg2[%c0_1, %c0_2] : memref<2048x256xbf16, #tpu.memory_space<vmem>>, vector<2048x256xbf16>
    %cst = arith.constant dense<0.000000e+00> : vector<32x256xf32>
    %2 = tpu.matmul %0, %1, %cst {dimension_numbers = #tpu.dot_dimension_numbers<[1], [0], [0], [1], [0, 0, 1, 1], [], []>} : vector<32x2048xbf16>, vector<2048x256xbf16>, vector<32x256xf32> -> vector<32x256xf32>
    %cst_3 = arith.constant 0.000000e+00 : f32
    %3 = vector.broadcast %cst_3 : f32 to vector<32x256xf32>
    %4 = arith.cmpf ogt, %2, %3 : vector<32x256xf32>
    %cst_4 = arith.constant 2.000000e-01 : f32
    %5 = vector.broadcast %cst_4 : f32 to vector<32x256xf32>
    %6 = arith.mulf %5, %2 : vector<32x256xf32>
    %7 = arith.select %4, %2, %6 : vector<32x256xi1>, vector<32x256xf32>
    %8 = arith.truncf %7 : vector<32x256xf32> to vector<32x256xbf16>
    %c0_5 = arith.constant 0 : index
    %c0_6 = arith.constant 0 : index
    %9 = vector.load %arg3[%c0_5, %c0_6] : memref<32x256xbf16, #tpu.memory_space<vmem>>, vector<32x256xbf16>
    tpu.vector_store %arg3[%c0_5, %c0_6], %8 {strides = array<i32>} : memref<32x256xbf16, #tpu.memory_space<vmem>>, vector<32x256xbf16>,
    return
  }
  func.func @transform_0(%arg0: i32) -> (i32, i32) {
    %c0_i32 = arith.constant 0 : i32
    %c0_i32_0 = arith.constant 0 : i32
    return %arg0, %c0_i32 : i32, i32
  }
  func.func @transform_1(%arg0: i32) -> (i32, i32) {
    %c0_i32 = arith.constant 0 : i32
    %c0_i32_0 = arith.constant 0 : i32
    %c0_i32_1 = arith.constant 0 : i32
    return %c0_i32, %c0_i32_0 : i32, i32
  }
  func.func @transform_2(%arg0: i32) -> (i32, i32) {
    %c0_i32 = arith.constant 0 : i32
    %c0_i32_0 = arith.constant 0 : i32
    return %arg0, %c0_i32 : i32, i32
  }
}

module attributes {stable_mosaic.version = 11 : i64} {
  func.func @_tail_kernel(%arg0: i32, %arg1: memref<18x2048xbf16, #tpu.memory_space<vmem>>, %arg2: memref<2048x512xbf16, #tpu.memory_space<vmem>>, %arg3: memref<1x512xf32, #tpu.memory_space<vmem>>, %arg4: memref<1x512xf32, #tpu.memory_space<vmem>>, %arg5: memref<4x18x512xf32, #tpu.memory_space<vmem>>, %arg6: memref<1x1xf32, #tpu.memory_space<smem>>, %arg7: memref<2x4xf32, #tpu.memory_space<vmem>>, %arg8: memref<18x512xf32, #tpu.memory_space<vmem>>) attributes {dimension_semantics = [#tpu.dimension_semantics<arbitrary>], iteration_bounds = array<i64: 2>, scalar_prefetch = 0 : i64, scratch_operands = 1 : i64, tpu.core_type = #tpu.core_type<tc>, window_params = [{transform_indices = @transform_0, window_bounds = array<i64: 18, 2048>}, {transform_indices = @transform_1, window_bounds = array<i64: 2048, 512>}, {pipeline_mode = #tpu.pipeline_mode<synchronous>, transform_indices = @transform_2, window_bounds = array<i64: 1, 512>}, {pipeline_mode = #tpu.pipeline_mode<synchronous>, transform_indices = @transform_3, window_bounds = array<i64: 1, 512>}, {pipeline_mode = #tpu.pipeline_mode<synchronous>, transform_indices = @transform_4, window_bounds = array<i64: 4, 18, 512>}, {transform_indices = @transform_5, window_bounds = array<i64: 1, 1>}, {pipeline_mode = #tpu.pipeline_mode<synchronous>, transform_indices = @transform_6, window_bounds = array<i64: 2, 4>}]} {
    %c0_i32 = arith.constant 0 : i32
    %0 = arith.cmpi eq, %arg0, %c0_i32 : i32
    %1 = arith.extui %0 : i1 to i32
    %c0_i32_0 = arith.constant 0 : i32
    %2 = arith.cmpi ne, %1, %c0_i32_0 : i32
    scf.if %2 {
      %cst_9 = arith.constant 0.000000e+00 : f32
      %12 = vector.broadcast %cst_9 : f32 to vector<18x512xf32>
      %c0_10 = arith.constant 0 : index
      %c0_11 = arith.constant 0 : index
      %13 = vector.load %arg8[%c0_10, %c0_11] : memref<18x512xf32, #tpu.memory_space<vmem>>, vector<18x512xf32>
      tpu.vector_store %arg8[%c0_10, %c0_11], %12 {strides = array<i32>} : memref<18x512xf32, #tpu.memory_space<vmem>>, vector<18x512xf32>,
    } else {
    }
    %c0 = arith.constant 0 : index
    %c0_1 = arith.constant 0 : index
    %3 = vector.load %arg8[%c0, %c0_1] : memref<18x512xf32, #tpu.memory_space<vmem>>, vector<18x512xf32>
    %c0_2 = arith.constant 0 : index
    %c0_3 = arith.constant 0 : index
    %4 = vector.load %arg1[%c0_2, %c0_3] : memref<18x2048xbf16, #tpu.memory_space<vmem>>, vector<18x2048xbf16>
    %c0_4 = arith.constant 0 : index
    %c0_5 = arith.constant 0 : index
    %5 = vector.load %arg2[%c0_4, %c0_5] : memref<2048x512xbf16, #tpu.memory_space<vmem>>, vector<2048x512xbf16>
    %cst = arith.constant dense<0.000000e+00> : vector<18x512xf32>
    %6 = tpu.matmul %4, %5, %cst {dimension_numbers = #tpu.dot_dimension_numbers<[1], [0], [0], [1], [0, 0, 1, 1], [], []>} : vector<18x2048xbf16>, vector<2048x512xbf16>, vector<18x512xf32> -> vector<18x512xf32>
    %7 = arith.addf %3, %6 : vector<18x512xf32>
    %c0_6 = arith.constant 0 : index
    %c0_7 = arith.constant 0 : index
    %8 = vector.load %arg8[%c0_6, %c0_7] : memref<18x512xf32, #tpu.memory_space<vmem>>, vector<18x512xf32>
    tpu.vector_store %arg8[%c0_6, %c0_7], %7 {strides = array<i32>} : memref<18x512xf32, #tpu.memory_space<vmem>>, vector<18x512xf32>,
    %c1_i32 = arith.constant 1 : i32
    %9 = arith.cmpi eq, %arg0, %c1_i32 : i32
    %10 = arith.extui %9 : i1 to i32
    %c0_i32_8 = arith.constant 0 : i32
    %11 = arith.cmpi ne, %10, %c0_i32_8 : i32
    scf.if %11 {
      %c0_9 = arith.constant 0 : index
      %c0_10 = arith.constant 0 : index
      %12 = vector.load %arg8[%c0_9, %c0_10] : memref<18x512xf32, #tpu.memory_space<vmem>>, vector<18x512xf32>
      %cst_11 = arith.constant dense<0.000000e+00> : vector<512xf32>
      %13 = vector.multi_reduction <add>, %12, %cst_11 [0] : vector<18x512xf32> to vector<512xf32>
      %14 = vector.shape_cast %13 : vector<512xf32> to vector<1x512xf32>
      %cst_12 = arith.constant 0.055555556 : f32
      %15 = vector.broadcast %cst_12 : f32 to vector<1x512xf32>
      %16 = arith.mulf %14, %15 : vector<1x512xf32>
      %17 = vector.broadcast %16 : vector<1x512xf32> to vector<18x512xf32>
      %18 = arith.subf %12, %17 : vector<18x512xf32>
      %19 = arith.mulf %18, %18 : vector<18x512xf32>
      %cst_13 = arith.constant dense<0.000000e+00> : vector<512xf32>
      %20 = vector.multi_reduction <add>, %19, %cst_13 [0] : vector<18x512xf32> to vector<512xf32>
      %21 = vector.shape_cast %20 : vector<512xf32> to vector<1x512xf32>
      %cst_14 = arith.constant 0.055555556 : f32
      %22 = vector.broadcast %cst_14 : f32 to vector<1x512xf32>
      %23 = arith.mulf %21, %22 : vector<1x512xf32>
      %cst_15 = arith.constant 9.99999974E-6 : f32
      %24 = vector.broadcast %cst_15 : f32 to vector<1x512xf32>
      %25 = arith.addf %23, %24 : vector<1x512xf32>
      %26 = math.rsqrt %25 : vector<1x512xf32>
      %27 = vector.broadcast %26 : vector<1x512xf32> to vector<18x512xf32>
      %28 = arith.mulf %18, %27 : vector<18x512xf32>
      %c0_16 = arith.constant 0 : index
      %c0_17 = arith.constant 0 : index
      %29 = vector.load %arg3[%c0_16, %c0_17] : memref<1x512xf32, #tpu.memory_space<vmem>>, vector<1x512xf32>
      %30 = vector.broadcast %29 : vector<1x512xf32> to vector<18x512xf32>
      %31 = arith.mulf %28, %30 : vector<18x512xf32>
      %c0_18 = arith.constant 0 : index
      %c0_19 = arith.constant 0 : index
      %32 = vector.load %arg4[%c0_18, %c0_19] : memref<1x512xf32, #tpu.memory_space<vmem>>, vector<1x512xf32>
      %33 = vector.broadcast %32 : vector<1x512xf32> to vector<18x512xf32>
      %34 = arith.addf %31, %33 : vector<18x512xf32>
      %cst_20 = arith.constant 0.000000e+00 : f32
      %35 = vector.broadcast %cst_20 : f32 to vector<18x512xf32>
      %36 = arith.cmpf ogt, %34, %35 : vector<18x512xf32>
      %cst_21 = arith.constant 2.000000e-01 : f32
      %37 = vector.broadcast %cst_21 : f32 to vector<18x512xf32>
      %38 = arith.mulf %37, %34 : vector<18x512xf32>
      %39 = arith.select %36, %34, %38 : vector<18x512xi1>, vector<18x512xf32>
      %c0_22 = arith.constant 0 : index
      %c0_23 = arith.constant 0 : index
      %c0_24 = arith.constant 0 : index
      %40 = vector.load %arg5[%c0_22, %c0_23, %c0_24] : memref<4x18x512xf32, #tpu.memory_space<vmem>>, vector<1x18x512xf32>
      %41 = vector.shape_cast %40 : vector<1x18x512xf32> to vector<18x512xf32>
      %42 = arith.mulf %39, %41 : vector<18x512xf32>
      %cst_25 = arith.constant dense<0.000000e+00> : vector<18xf32>
      %43 = vector.multi_reduction <add>, %42, %cst_25 [1] : vector<18x512xf32> to vector<18xf32>
      %44 = vector.shape_cast %43 : vector<18xf32> to vector<18x1xf32>
      %c1 = arith.constant 1 : index
      %c0_26 = arith.constant 0 : index
      %c0_27 = arith.constant 0 : index
      %45 = vector.load %arg5[%c1, %c0_26, %c0_27] : memref<4x18x512xf32, #tpu.memory_space<vmem>>, vector<1x18x512xf32>
      %46 = vector.shape_cast %45 : vector<1x18x512xf32> to vector<18x512xf32>
      %47 = arith.mulf %39, %46 : vector<18x512xf32>
      %cst_28 = arith.constant dense<0.000000e+00> : vector<18xf32>
      %48 = vector.multi_reduction <add>, %47, %cst_28 [1] : vector<18x512xf32> to vector<18xf32>
      %49 = vector.shape_cast %48 : vector<18xf32> to vector<18x1xf32>
      %c2 = arith.constant 2 : index
      %c0_29 = arith.constant 0 : index
      %c0_30 = arith.constant 0 : index
      %50 = vector.load %arg5[%c2, %c0_29, %c0_30] : memref<4x18x512xf32, #tpu.memory_space<vmem>>, vector<1x18x512xf32>
      %51 = vector.shape_cast %50 : vector<1x18x512xf32> to vector<18x512xf32>
      %52 = arith.mulf %39, %51 : vector<18x512xf32>
      %cst_31 = arith.constant dense<0.000000e+00> : vector<18xf32>
      %53 = vector.multi_reduction <add>, %52, %cst_31 [1] : vector<18x512xf32> to vector<18xf32>
      %54 = vector.shape_cast %53 : vector<18xf32> to vector<18x1xf32>
      %c3 = arith.constant 3 : index
      %c0_32 = arith.constant 0 : index
      %c0_33 = arith.constant 0 : index
      %55 = vector.load %arg5[%c3, %c0_32, %c0_33] : memref<4x18x512xf32, #tpu.memory_space<vmem>>, vector<1x18x512xf32>
      %56 = vector.shape_cast %55 : vector<1x18x512xf32> to vector<18x512xf32>
      %57 = arith.mulf %39, %56 : vector<18x512xf32>
      %cst_34 = arith.constant dense<0.000000e+00> : vector<18xf32>
      %58 = vector.multi_reduction <add>, %57, %cst_34 [1] : vector<18x512xf32> to vector<18xf32>
      %59 = vector.shape_cast %58 : vector<18xf32> to vector<18x1xf32>
      %60 = tpu.concatenate %44, %49, %54, %59 in 1 : vector<18x1xf32>, vector<18x1xf32>, vector<18x1xf32>, vector<18x1xf32> -> vector<18x4xf32>
      %61 = tpu.iota {dimensions = array<i32: 0>} : vector<18x1xi32>
      %c0_i32_35 = arith.constant 0 : i32
      %62 = vector.broadcast %c0_i32_35 : i32 to vector<18x1xi32>
      %63 = arith.cmpi sge, %61, %62 : vector<18x1xi32>
      %c9_i32 = arith.constant 9 : i32
      %64 = vector.broadcast %c9_i32 : i32 to vector<18x1xi32>
      %65 = arith.cmpi slt, %61, %64 : vector<18x1xi32>
      %66 = arith.andi %63, %65 : vector<18x1xi1>
      %cst_36 = arith.constant 0.000000e+00 : f32
      %67 = vector.shape_cast %66 : vector<18x1xi1> to vector<18x1xi1>
      %68 = vector.broadcast %67 : vector<18x1xi1> to vector<18x4xi1>
      %69 = vector.broadcast %cst_36 : f32 to vector<18x4xf32>
      %70 = arith.select %68, %60, %69 : vector<18x4xi1>, vector<18x4xf32>
      %cst_37 = arith.constant dense<0.000000e+00> : vector<4xf32>
      %71 = vector.multi_reduction <add>, %70, %cst_37 [0] : vector<18x4xf32> to vector<4xf32>
      %72 = vector.shape_cast %71 : vector<4xf32> to vector<1x4xf32>
      %c9_i32_38 = arith.constant 9 : i32
      %73 = vector.broadcast %c9_i32_38 : i32 to vector<18x1xi32>
      %74 = arith.cmpi sge, %61, %73 : vector<18x1xi32>
      %c18_i32 = arith.constant 18 : i32
      %75 = vector.broadcast %c18_i32 : i32 to vector<18x1xi32>
      %76 = arith.cmpi slt, %61, %75 : vector<18x1xi32>
      %77 = arith.andi %74, %76 : vector<18x1xi1>
      %cst_39 = arith.constant 0.000000e+00 : f32
      %78 = vector.shape_cast %77 : vector<18x1xi1> to vector<18x1xi1>
      %79 = vector.broadcast %78 : vector<18x1xi1> to vector<18x4xi1>
      %80 = vector.broadcast %cst_39 : f32 to vector<18x4xf32>
      %81 = arith.select %79, %60, %80 : vector<18x4xi1>, vector<18x4xf32>
      %cst_40 = arith.constant dense<0.000000e+00> : vector<4xf32>
      %82 = vector.multi_reduction <add>, %81, %cst_40 [0] : vector<18x4xf32> to vector<4xf32>
      %83 = vector.shape_cast %82 : vector<4xf32> to vector<1x4xf32>
      %c0_41 = arith.constant 0 : index
      %c0_42 = arith.constant 0 : index
      %84 = memref.load %arg6[%c0_41, %c0_42] : memref<1x1xf32, #tpu.memory_space<smem>>
      %85 = tpu.concatenate %72, %83 in 0 : vector<1x4xf32>, vector<1x4xf32> -> vector<2x4xf32>
      %86 = vector.broadcast %84 : f32 to vector<2x4xf32>
      %87 = arith.addf %85, %86 : vector<2x4xf32>
      %c0_43 = arith.constant 0 : index
      %c0_44 = arith.constant 0 : index
      %88 = vector.load %arg7[%c0_43, %c0_44] : memref<2x4xf32, #tpu.memory_space<vmem>>, vector<2x4xf32>
      tpu.vector_store %arg7[%c0_43, %c0_44], %87 {strides = array<i32>} : memref<2x4xf32, #tpu.memory_space<vmem>>, vector<2x4xf32>,
    } else {
    }
    return
  }
  func.func @transform_0(%arg0: i32) -> (i32, i32) {
    %c0_i32 = arith.constant 0 : i32
    %c0_i32_0 = arith.constant 0 : i32
    return %c0_i32, %arg0 : i32, i32
  }
  func.func @transform_1(%arg0: i32) -> (i32, i32) {
    %c0_i32 = arith.constant 0 : i32
    %c0_i32_0 = arith.constant 0 : i32
    return %arg0, %c0_i32 : i32, i32
  }
  func.func @transform_2(%arg0: i32) -> (i32, i32) {
    %c0_i32 = arith.constant 0 : i32
    %c0_i32_0 = arith.constant 0 : i32
    %c0_i32_1 = arith.constant 0 : i32
    return %c0_i32, %c0_i32_0 : i32, i32
  }
  func.func @transform_3(%arg0: i32) -> (i32, i32) {
    %c0_i32 = arith.constant 0 : i32
    %c0_i32_0 = arith.constant 0 : i32
    %c0_i32_1 = arith.constant 0 : i32
    return %c0_i32, %c0_i32_0 : i32, i32
  }
  func.func @transform_4(%arg0: i32) -> (i32, i32, i32) {
    %c0_i32 = arith.constant 0 : i32
    %c0_i32_0 = arith.constant 0 : i32
    %c0_i32_1 = arith.constant 0 : i32
    %c0_i32_2 = arith.constant 0 : i32
    return %c0_i32, %c0_i32_0, %c0_i32_1 : i32, i32, i32
  }
  func.func @transform_5(%arg0: i32) -> (i32, i32) {
    %c0_i32 = arith.constant 0 : i32
    %c0_i32_0 = arith.constant 0 : i32
    %c0_i32_1 = arith.constant 0 : i32
    return %c0_i32, %c0_i32_0 : i32, i32
  }
  func.func @transform_6(%arg0: i32) -> (i32, i32) {
    %c0_i32 = arith.constant 0 : i32
    %c0_i32_0 = arith.constant 0 : i32
    %c0_i32_1 = arith.constant 0 : i32
    return %c0_i32, %c0_i32_0 : i32, i32
  }
}

</mosaic_0001>

<bundles_post_ra>
// kernel: discriminator_forward.4
= control target key start
LH: loop header
LB: loop body
LE: loop exit
PB: predicated region body
PF: predicated region fallthrough
CT: control target
= control target key end

     0   :  { %s831_s9 = smov 0   ;;  %s963_s0 = inlined_call_operand.vmem [shape: bf16[512,128], index: 0, kind: input, shape index: {}]   ;;  %s964_s1 = inlined_call_operand.vmem [shape: bf16[128,64], index: 1, kind: input, shape index: {}]   ;;  %s965_s2 = inlined_call_operand.vmem [shape: bf16[512,64], index: 2, kind: output, shape index: {}]  }
   0x1 LB: > { %s645_s10 = sadd.s32 4294967295, %s814_s9   ;;  %p649_p0 = scmp.ge.s32.totalorder %s814_s9, 1  ;;  %s814_s9 = sphi %s831_s9, %s12_s9  }
   0x2   : > { %p113_p1 = scmp.lt.s32.totalorder %s814_s9, 3 }
   0x4   : > { %p114_p2 = pnand %p649_p0, %p113_p1 }
   0x5   : > { %s650_s19 = sshll.u32 (!%p114_p2), %s645_s10, 5 }
   0x6   : > { %117 = sbr.rel (%p114_p2) target bundleno = 239 (0xef), region = 28  ;;  %p136_p3 = scmp.lt.s32.totalorder (!%p114_p2), %s650_s19, 63 }
   0xb   : > { %v775_v0 = vld [vmem:[%s964_s1 + $0x38] sm:$0xff]  ;;  %v774_v1 = vld [vmem:[%s964_s1 + $0x30] sm:$0xff]  ;;  %v773_v2 = vld [vmem:[%s964_s1 + $0x28] sm:$0xff]  ;;  %s967_s19 = smov (!%p136_p3, %s650_s19), 63  ;;  %vm556_vm2 = vcmask 519168  }
   0xc   : > { %339 = vmatpush.bf16.msra.mxu0 %v775_v0  ;;  %776 = vmatpush.bf16.msra.mxu1 %v775_v0  ;;  %v772_v3 = vld [vmem:[%s964_s1 + $0x20] sm:$0xff]  ;;  %v771_v4 = vld [vmem:[%s964_s1 + $0x18] sm:$0xff]  ;;  %v770_v5 = vld [vmem:[%s964_s1 + $0x10] sm:$0xff]  ;;  %s651_s26 = sshll.u32 %s967_s19, 2 }
   0xd   : > { %777 = vmatpush.bf16.msra.mxu2 %v775_v0  ;;  %778 = vmatpush.bf16.msra.mxu3 %v775_v0  ;;  %v769_v6 = vld [vmem:[%s964_s1 + $0x8] sm:$0xff]  ;;  %v768_v7 = vld [vmem:[%s964_s1] sm:$0xff]  ;;  %s871_s3 = scalar_lea.vmem %s963_s0, %s651_s26  ;;  %s894_s6 = scalar_lea.vmem %s965_s2, %s651_s26 }
   0xe   : > { %v752_v8 = vld [vmem:[%s871_s3] sm:$0xff]  ;;  %v753_v12 = vld [vmem:[%s871_s3 + $0x8] sm:$0xff]  ;;  %v754_v16 = vld [vmem:[%s871_s3 + $0x10] sm:$0xff] }
   0xf   : > { %v756_v9 = vld [vmem:[%s871_s3 + $0x20] sm:$0xff]  ;;  %v757_v13 = vld [vmem:[%s871_s3 + $0x28] sm:$0xff]  ;;  %v758_v17 = vld [vmem:[%s871_s3 + $0x30] sm:$0xff] }
  0x10   : > { %340 = vmatpush.bf16.msra.mxu0 %v774_v1  ;;  %779 = vmatpush.bf16.msra.mxu1 %v774_v1  ;;  %v760_v10 = vld [vmem:[%s871_s3 + $0x40] sm:$0xff]  ;;  %v761_v14 = vld [vmem:[%s871_s3 + $0x48] sm:$0xff]  ;;  %v762_v18 = vld [vmem:[%s871_s3 + $0x50] sm:$0xff] }
  0x11   : > { %780 = vmatpush.bf16.msra.mxu2 %v774_v1  ;;  %781 = vmatpush.bf16.msra.mxu3 %v774_v1  ;;  %v764_v11 = vld [vmem:[%s871_s3 + $0x60] sm:$0xff]  ;;  %v765_v15 = vld [vmem:[%s871_s3 + $0x68] sm:$0xff]  ;;  %v766_v19 = vld [vmem:[%s871_s3 + $0x70] sm:$0xff] }
  0x12   : > { %v755_v20 = vld [vmem:[%s871_s3 + $0x18] sm:$0xff] }
  0x13   : > { %v759_v21 = vld [vmem:[%s871_s3 + $0x38] sm:$0xff] }
  0x14   : > { %341 = vmatpush.bf16.msra.mxu0 %v773_v2  ;;  %782 = vmatpush.bf16.msra.mxu1 %v773_v2  ;;  %v763_v22 = vld [vmem:[%s871_s3 + $0x58] sm:$0xff] }
  0x15   : > { %783 = vmatpush.bf16.msra.mxu2 %v773_v2  ;;  %784 = vmatpush.bf16.msra.mxu3 %v773_v2  ;;  %v767_v23 = vld [vmem:[%s871_s3 + $0x78] sm:$0xff] }
  0x18   : > { %342 = vmatpush.bf16.msra.mxu0 %v772_v3  ;;  %785 = vmatpush.bf16.msra.mxu1 %v772_v3 }
  0x19   : > { %786 = vmatpush.bf16.msra.mxu2 %v772_v3  ;;  %787 = vmatpush.bf16.msra.mxu3 %v772_v3 }
  0x1c   : > { %343 = vmatpush.bf16.msra.mxu0 %v771_v4  ;;  %788 = vmatpush.bf16.msra.mxu1 %v771_v4 }
  0x1d   : > { %789 = vmatpush.bf16.msra.mxu2 %v771_v4  ;;  %790 = vmatpush.bf16.msra.mxu3 %v771_v4 }
  0x20   : > { %344 = vmatpush.bf16.msra.mxu0 %v770_v5  ;;  %791 = vmatpush.bf16.msra.mxu1 %v770_v5 }
  0x21   : > { %792 = vmatpush.bf16.msra.mxu2 %v770_v5  ;;  %793 = vmatpush.bf16.msra.mxu3 %v770_v5 }
  0x24   : > { %345 = vmatpush.bf16.msra.mxu0 %v769_v6  ;;  %794 = vmatpush.bf16.msra.mxu1 %v769_v6 }
  0x25   : > { %795 = vmatpush.bf16.msra.mxu2 %v769_v6  ;;  %796 = vmatpush.bf16.msra.mxu3 %v769_v6 }
  0x28   : > { %346 = vmatpush.bf16.msra.mxu0 %v768_v7  ;;  %797 = vmatpush.bf16.msra.mxu1 %v768_v7 }
  0x29   : > { %798 = vmatpush.bf16.msra.mxu2 %v768_v7  ;;  %799 = vmatpush.bf16.msra.mxu3 %v768_v7 }
  0x2b   : > { %347 = vmatmul.bf16.vlgmr.msra.gmra.mxu0 %v752_v8  ;;  %367 = vmatmul.bf16.vlgmr.msra.gmra.mxu1 %v756_v9 }
  0x2c   : > { %387 = vmatmul.bf16.vlgmr.msra.gmra.mxu2 %v760_v10  ;;  %407 = vmatmul.bf16.vlgmr.msra.gmra.mxu3 %v764_v11 }
  0x3b   : > { %352 = vmatmul.bf16.gmra.mxu0 %v753_v12  ;;  %372 = vmatmul.bf16.gmra.mxu1 %v757_v13 }
  0x3c   : > { %392 = vmatmul.bf16.gmra.mxu2 %v761_v14  ;;  %412 = vmatmul.bf16.gmra.mxu3 %v765_v15 }
  0x4b   : > { %357 = vmatmul.bf16.gmra.mxu0 %v754_v16  ;;  %377 = vmatmul.bf16.gmra.mxu1 %v758_v17 }
  0x4c   : > { %397 = vmatmul.bf16.gmra.mxu2 %v762_v18  ;;  %417 = vmatmul.bf16.gmra.mxu3 %v766_v19 }
  0x5b   : > { %362 = vmatmul.bf16.gmra.mxu0 %v755_v20  ;;  %382 = vmatmul.bf16.gmra.mxu1 %v759_v21 }
  0x5c   : > { %402 = vmatmul.bf16.gmra.mxu2 %v763_v22  ;;  %422 = vmatmul.bf16.gmra.mxu3 %v767_v23 }
  0xa8   : > { %v348_v24 = vpop.f32.mrf.mxu0  ;;  %v368_v25 = vpop.f32.mrf.mxu1 }
  0xa9   : > { %vm428_vm0 = vcmp.gt.f32.partialorder %v348_v24, 0.0  ;;  %v460_v26 = vmul.f32 0.2, %v348_v24  ;;  %vm436_vm1 = vcmp.gt.f32.partialorder %v368_v25, 0.0  ;;  %v468_v27 = vmul.f32 0.2, %v368_v25 }
  0xab   : > { %v492_v28 = vsel %vm428_vm0, %v348_v24, %v460_v26  ;;  %v500_v29 = vsel %vm436_vm1, %v368_v25, %v468_v27 }
  0xac   : > { %v524_v30 = vpack.c.bf16 %v492_v28, %v492_v28  ;;  %v532_v31 = vpack.c.bf16 %v500_v29, %v500_v29 }
  0xae   : > { %557 = vst.msk [vmem:[%s894_s6] sm:$0xf] %vm556_vm2, %v524_v30 }
  0xaf   : > { %565 = vst.msk [vmem:[%s894_s6 + $0x20] sm:$0xf] %vm556_vm2, %v532_v31  ;;  %v388_v32 = vpop.f32.mrf.mxu2  ;;  %v408_v33 = vpop.f32.mrf.mxu3 }
  0xb0   : > { %vm444_vm3 = vcmp.gt.f32.partialorder %v388_v32, 0.0  ;;  %v476_v34 = vmul.f32 0.2, %v388_v32  ;;  %vm452_vm4 = vcmp.gt.f32.partialorder %v408_v33, 0.0  ;;  %v484_v35 = vmul.f32 0.2, %v408_v33  ;;  %v350_v36 = vpop.f32.mrf.mxu0  ;;  %v370_v37 = vpop.f32.mrf.mxu1 }
  0xb1   : > { %vm429_vm5 = vcmp.gt.f32.partialorder %v350_v36, 0.0  ;;  %v461_v38 = vmul.f32 0.2, %v350_v36  ;;  %vm437_vm6 = vcmp.gt.f32.partialorder %v370_v37, 0.0  ;;  %v469_v39 = vmul.f32 0.2, %v370_v37 }
  0xb2   : > { %v508_v40 = vsel %vm444_vm3, %v388_v32, %v476_v34  ;;  %v516_v41 = vsel %vm452_vm4, %v408_v33, %v484_v35 }
  0xb3   : > { %v540_v42 = vpack.c.bf16 %v508_v40, %v508_v40  ;;  %v548_v43 = vpack.c.bf16 %v516_v41, %v516_v41  ;;  %v493_v44 = vsel %vm429_vm5, %v350_v36, %v461_v38  ;;  %v501_v45 = vsel %vm437_vm6, %v370_v37, %v469_v39 }
  0xb4   : > { %v525_v46 = vpack.c.bf16 %v493_v44, %v493_v44  ;;  %v533_v47 = vpack.c.bf16 %v501_v45, %v501_v45 }
  0xb5   : > { %573 = vst.msk [vmem:[%s894_s6 + $0x40] sm:$0xf] %vm556_vm2, %v540_v42 }
  0xb6   : > { %581 = vst.msk [vmem:[%s894_s6 + $0x60] sm:$0xf] %vm556_vm2, %v548_v43 }
  0xb7   : > { %558 = vst.msk [vmem:[%s894_s6 + $0x4] sm:$0xf] %vm556_vm2, %v525_v46  ;;  %v390_v48 = vpop.f32.mrf.mxu2  ;;  %v410_v49 = vpop.f32.mrf.mxu3 }
  0xb8   : > { %566 = vst.msk [vmem:[%s894_s6 + $0x24] sm:$0xf] %vm556_vm2, %v533_v47  ;;  %vm445_vm7 = vcmp.gt.f32.partialorder %v390_v48, 0.0  ;;  %v477_v50 = vmul.f32 0.2, %v390_v48  ;;  %vm453_vm8 = vcmp.gt.f32.partialorder %v410_v49, 0.0  ;;  %v353_v51 = vpop.f32.mrf.mxu0  ;;  %v373_v52 = vpop.f32.mrf.mxu1 }
  0xb9   : > { %v485_v53 = vmul.f32 0.2, %v410_v49  ;;  %vm430_vm9 = vcmp.gt.f32.partialorder %v353_v51, 0.0  ;;  %v462_v54 = vmul.f32 0.2, %v353_v51  ;;  %vm438_vm10 = vcmp.gt.f32.partialorder %v373_v52, 0.0 }
  0xba   : > { %v509_v55 = vsel %vm445_vm7, %v390_v48, %v477_v50  ;;  %v470_v56 = vmul.f32 0.2, %v373_v52 }
  0xbb   : > { %v541_v57 = vpack.c.bf16 %v509_v55, %v509_v55  ;;  %v517_v58 = vsel %vm453_vm8, %v410_v49, %v485_v53  ;;  %v494_v59 = vsel %vm430_vm9, %v353_v51, %v462_v54 }
  0xbc   : > { %v549_v60 = vpack.c.bf16 %v517_v58, %v517_v58  ;;  %v526_v61 = vpack.c.bf16 %v494_v59, %v494_v59  ;;  %v502_v62 = vsel %vm438_vm10, %v373_v52, %v470_v56 }
  0xbd   : > { %574 = vst.msk [vmem:[%s894_s6 + $0x44] sm:$0xf] %vm556_vm2, %v541_v57  ;;  %v534_v63 = vpack.c.bf16 %v502_v62, %v502_v62 }
  0xbe   : > { %582 = vst.msk [vmem:[%s894_s6 + $0x64] sm:$0xf] %vm556_vm2, %v549_v60 }
  0xbf   : > { %559 = vst.msk [vmem:[%s894_s6 + $0x8] sm:$0xf] %vm556_vm2, %v526_v61  ;;  %v393_v0 = vpop.f32.mrf.mxu2  ;;  %v413_v1 = vpop.f32.mrf.mxu3 }
  0xc0   : > { %567 = vst.msk [vmem:[%s894_s6 + $0x28] sm:$0xf] %vm556_vm2, %v534_v63  ;;  %vm446_vm11 = vcmp.gt.f32.partialorder %v393_v0, 0.0  ;;  %v478_v2 = vmul.f32 0.2, %v393_v0  ;;  %vm454_vm12 = vcmp.gt.f32.partialorder %v413_v1, 0.0  ;;  %v355_v3 = vpop.f32.mrf.mxu0  ;;  %v375_v4 = vpop.f32.mrf.mxu1 }
  0xc1   : > { %v486_v5 = vmul.f32 0.2, %v413_v1  ;;  %vm431_vm13 = vcmp.gt.f32.partialorder %v355_v3, 0.0  ;;  %v463_v6 = vmul.f32 0.2, %v355_v3  ;;  %vm439_vm14 = vcmp.gt.f32.partialorder %v375_v4, 0.0 }
  0xc2   : > { %v510_v7 = vsel %vm446_vm11, %v393_v0, %v478_v2  ;;  %v471_v8 = vmul.f32 0.2, %v375_v4 }
  0xc3   : > { %v542_v9 = vpack.c.bf16 %v510_v7, %v510_v7  ;;  %v518_v10 = vsel %vm454_vm12, %v413_v1, %v486_v5  ;;  %v495_v11 = vsel %vm431_vm13, %v355_v3, %v463_v6 }
  0xc4   : > { %v550_v12 = vpack.c.bf16 %v518_v10, %v518_v10  ;;  %v527_v13 = vpack.c.bf16 %v495_v11, %v495_v11  ;;  %v503_v14 = vsel %vm439_vm14, %v375_v4, %v471_v8 }
  0xc5   : > { %575 = vst.msk [vmem:[%s894_s6 + $0x48] sm:$0xf] %vm556_vm2, %v542_v9  ;;  %v535_v15 = vpack.c.bf16 %v503_v14, %v503_v14 }
  0xc6   : > { %583 = vst.msk [vmem:[%s894_s6 + $0x68] sm:$0xf] %vm556_vm2, %v550_v12 }
  0xc7   : > { %560 = vst.msk [vmem:[%s894_s6 + $0xc] sm:$0xf] %vm556_vm2, %v527_v13  ;;  %v395_v16 = vpop.f32.mrf.mxu2  ;;  %v415_v17 = vpop.f32.mrf.mxu3 }
  0xc8   : > { %568 = vst.msk [vmem:[%s894_s6 + $0x2c] sm:$0xf] %vm556_vm2, %v535_v15  ;;  %vm447_vm15 = vcmp.gt.f32.partialorder %v395_v16, 0.0  ;;  %v479_v18 = vmul.f32 0.2, %v395_v16  ;;  %vm455_vm0 = vcmp.gt.f32.partialorder %v415_v17, 0.0  ;;  %v358_v19 = vpop.f32.mrf.mxu0  ;;  %v378_v20 = vpop.f32.mrf.mxu1 }
  0xc9   : > { %v487_v21 = vmul.f32 0.2, %v415_v17  ;;  %vm432_vm1 = vcmp.gt.f32.partialorder %v358_v19, 0.0  ;;  %v464_v22 = vmul.f32 0.2, %v358_v19  ;;  %vm440_vm3 = vcmp.gt.f32.partialorder %v378_v20, 0.0 }
  0xca   : > { %v511_v23 = vsel %vm447_vm15, %v395_v16, %v479_v18  ;;  %v472_v24 = vmul.f32 0.2, %v378_v20 }
  0xcb   : > { %v543_v25 = vpack.c.bf16 %v511_v23, %v511_v23  ;;  %v519_v26 = vsel %vm455_vm0, %v415_v17, %v487_v21  ;;  %v496_v27 = vsel %vm432_vm1, %v358_v19, %v464_v22 }
  0xcc   : > { %v551_v28 = vpack.c.bf16 %v519_v26, %v519_v26  ;;  %v528_v29 = vpack.c.bf16 %v496_v27, %v496_v27  ;;  %v504_v30 = vsel %vm440_vm3, %v378_v20, %v472_v24 }
  0xcd   : > { %576 = vst.msk [vmem:[%s894_s6 + $0x4c] sm:$0xf] %vm556_vm2, %v543_v25  ;;  %v536_v31 = vpack.c.bf16 %v504_v30, %v504_v30 }
  0xce   : > { %584 = vst.msk [vmem:[%s894_s6 + $0x6c] sm:$0xf] %vm556_vm2, %v551_v28 }
  0xcf   : > { %561 = vst.msk [vmem:[%s894_s6 + $0x10] sm:$0xf] %vm556_vm2, %v528_v29  ;;  %v398_v32 = vpop.f32.mrf.mxu2  ;;  %v418_v33 = vpop.f32.mrf.mxu3 }
  0xd0   : > { %569 = vst.msk [vmem:[%s894_s6 + $0x30] sm:$0xf] %vm556_vm2, %v536_v31  ;;  %vm448_vm4 = vcmp.gt.f32.partialorder %v398_v32, 0.0  ;;  %v480_v34 = vmul.f32 0.2, %v398_v32  ;;  %vm456_vm5 = vcmp.gt.f32.partialorder %v418_v33, 0.0  ;;  %v360_v35 = vpop.f32.mrf.mxu0  ;;  %v380_v36 = vpop.f32.mrf.mxu1 }
  0xd1   : > { %v488_v37 = vmul.f32 0.2, %v418_v33  ;;  %vm433_vm6 = vcmp.gt.f32.partialorder %v360_v35, 0.0  ;;  %v465_v38 = vmul.f32 0.2, %v360_v35  ;;  %vm441_vm7 = vcmp.gt.f32.partialorder %v380_v36, 0.0 }
  0xd2   : > { %v512_v39 = vsel %vm448_vm4, %v398_v32, %v480_v34  ;;  %v473_v40 = vmul.f32 0.2, %v380_v36 }
  0xd3   : > { %v544_v41 = vpack.c.bf16 %v512_v39, %v512_v39  ;;  %v520_v42 = vsel %vm456_vm5, %v418_v33, %v488_v37  ;;  %v497_v43 = vsel %vm433_vm6, %v360_v35, %v465_v38 }
  0xd4   : > { %v552_v44 = vpack.c.bf16 %v520_v42, %v520_v42  ;;  %v529_v45 = vpack.c.bf16 %v497_v43, %v497_v43  ;;  %v505_v46 = vsel %vm441_vm7, %v380_v36, %v473_v40 }
  0xd5   : > { %577 = vst.msk [vmem:[%s894_s6 + $0x50] sm:$0xf] %vm556_vm2, %v544_v41  ;;  %v537_v47 = vpack.c.bf16 %v505_v46, %v505_v46 }
  0xd6   : > { %585 = vst.msk [vmem:[%s894_s6 + $0x70] sm:$0xf] %vm556_vm2, %v552_v44 }
  0xd7   : > { %562 = vst.msk [vmem:[%s894_s6 + $0x14] sm:$0xf] %vm556_vm2, %v529_v45  ;;  %v400_v48 = vpop.f32.mrf.mxu2  ;;  %v420_v49 = vpop.f32.mrf.mxu3 }
  0xd8   : > { %570 = vst.msk [vmem:[%s894_s6 + $0x34] sm:$0xf] %vm556_vm2, %v537_v47  ;;  %vm449_vm8 = vcmp.gt.f32.partialorder %v400_v48, 0.0  ;;  %v481_v50 = vmul.f32 0.2, %v400_v48  ;;  %vm457_vm9 = vcmp.gt.f32.partialorder %v420_v49, 0.0  ;;  %v363_v51 = vpop.f32.mrf.mxu0  ;;  %v383_v52 = vpop.f32.mrf.mxu1 }
  0xd9   : > { %v489_v53 = vmul.f32 0.2, %v420_v49  ;;  %vm434_vm10 = vcmp.gt.f32.partialorder %v363_v51, 0.0  ;;  %v466_v54 = vmul.f32 0.2, %v363_v51  ;;  %vm442_vm11 = vcmp.gt.f32.partialorder %v383_v52, 0.0 }
  0xda   : > { %v513_v55 = vsel %vm449_vm8, %v400_v48, %v481_v50  ;;  %v474_v56 = vmul.f32 0.2, %v383_v52 }
  0xdb   : > { %v545_v57 = vpack.c.bf16 %v513_v55, %v513_v55  ;;  %v521_v58 = vsel %vm457_vm9, %v420_v49, %v489_v53  ;;  %v498_v59 = vsel %vm434_vm10, %v363_v51, %v466_v54 }
  0xdc   : > { %v553_v60 = vpack.c.bf16 %v521_v58, %v521_v58  ;;  %v530_v61 = vpack.c.bf16 %v498_v59, %v498_v59  ;;  %v506_v62 = vsel %vm442_vm11, %v383_v52, %v474_v56 }
  0xdd   : > { %578 = vst.msk [vmem:[%s894_s6 + $0x54] sm:$0xf] %vm556_vm2, %v545_v57  ;;  %v538_v63 = vpack.c.bf16 %v506_v62, %v506_v62 }
  0xde   : > { %586 = vst.msk [vmem:[%s894_s6 + $0x74] sm:$0xf] %vm556_vm2, %v553_v60 }
  0xdf   : > { %563 = vst.msk [vmem:[%s894_s6 + $0x18] sm:$0xf] %vm556_vm2, %v530_v61  ;;  %v403_v0 = vpop.f32.mrf.mxu2  ;;  %v423_v1 = vpop.f32.mrf.mxu3 }
  0xe0   : > { %571 = vst.msk [vmem:[%s894_s6 + $0x38] sm:$0xf] %vm556_vm2, %v538_v63  ;;  %vm450_vm12 = vcmp.gt.f32.partialorder %v403_v0, 0.0  ;;  %v482_v2 = vmul.f32 0.2, %v403_v0  ;;  %vm458_vm13 = vcmp.gt.f32.partialorder %v423_v1, 0.0  ;;  %v365_v3 = vpop.f32.mrf.mxu0  ;;  %v385_v4 = vpop.f32.mrf.mxu1 }
  0xe1   : > { %v490_v5 = vmul.f32 0.2, %v423_v1  ;;  %vm435_vm14 = vcmp.gt.f32.partialorder %v365_v3, 0.0  ;;  %v467_v6 = vmul.f32 0.2, %v365_v3  ;;  %vm443_vm15 = vcmp.gt.f32.partialorder %v385_v4, 0.0 }
  0xe2   : > { %v514_v7 = vsel %vm450_vm12, %v403_v0, %v482_v2  ;;  %v475_v8 = vmul.f32 0.2, %v385_v4 }
  0xe3   : > { %v546_v9 = vpack.c.bf16 %v514_v7, %v514_v7  ;;  %v522_v10 = vsel %vm458_vm13, %v423_v1, %v490_v5  ;;  %v499_v11 = vsel %vm435_vm14, %v365_v3, %v467_v6 }
  0xe4   : > { %v554_v12 = vpack.c.bf16 %v522_v10, %v522_v10  ;;  %v531_v13 = vpack.c.bf16 %v499_v11, %v499_v11  ;;  %v507_v14 = vsel %vm443_vm15, %v385_v4, %v475_v8 }
  0xe5   : > { %579 = vst.msk [vmem:[%s894_s6 + $0x58] sm:$0xf] %vm556_vm2, %v546_v9  ;;  %v539_v15 = vpack.c.bf16 %v507_v14, %v507_v14 }
  0xe6   : > { %587 = vst.msk [vmem:[%s894_s6 + $0x78] sm:$0xf] %vm556_vm2, %v554_v12 }
  0xe7   : > { %564 = vst.msk [vmem:[%s894_s6 + $0x1c] sm:$0xf] %vm556_vm2, %v531_v13  ;;  %v405_v16 = vpop.f32.mrf.mxu2  ;;  %v425_v17 = vpop.f32.mrf.mxu3 }
  0xe8   : > { %572 = vst.msk [vmem:[%s894_s6 + $0x3c] sm:$0xf] %vm556_vm2, %v539_v15  ;;  %vm451_vm0 = vcmp.gt.f32.partialorder %v405_v16, 0.0  ;;  %v483_v18 = vmul.f32 0.2, %v405_v16  ;;  %vm459_vm1 = vcmp.gt.f32.partialorder %v425_v17, 0.0 }
  0xe9   : > { %v491_v19 = vmul.f32 0.2, %v425_v17 }
  0xea   : > { %v515_v20 = vsel %vm451_vm0, %v405_v16, %v483_v18 }
  0xeb   : > { %v547_v21 = vpack.c.bf16 %v515_v20, %v515_v20  ;;  %v523_v22 = vsel %vm459_vm1, %v425_v17, %v491_v19 }
  0xec   : > { %v555_v23 = vpack.c.bf16 %v523_v22, %v523_v22 }
  0xed   : > { %580 = vst.msk [vmem:[%s894_s6 + $0x5c] sm:$0xf] %vm556_vm2, %v547_v21 }
  0xee   : > { %588 = vst.msk [vmem:[%s894_s6 + $0x7c] sm:$0xf] %vm556_vm2, %v555_v23 }
  0xef PF: > { %s12_s9 = sadd.s32 1, %s814_s9  }
  0xf0   : > { %p9_p4 = scmp.ge.s32.totalorder %s12_s9, 4  }
  0xf2   :  { %11 = sbr.rel (!%p9_p4) target bundleno = 1 (0x1), region = 58 }

// kernel: discriminator_forward.5
= control target key start
LH: loop header
LB: loop body
LE: loop exit
PB: predicated region body
PF: predicated region fallthrough
CT: control target
= control target key end

     0   :  { %s2733_s1 = inlined_call_operand.vmem [shape: bf16[1024,128], index: 1, kind: input, shape index: {}]   ;;  %s2734_s0 = inlined_call_operand.vmem [shape: bf16[128,1024], index: 0, kind: input, shape index: {}]   ;;  %s2735_s2 = inlined_call_operand.vmem [shape: bf16[128,128], index: 2, kind: output, shape index: {}]  }
   0x1   :  { %v1966_v0 = vld [vmem:[%s2733_s1 + $0x38] sm:$0xff]  ;;  %v1965_v4 = vld [vmem:[%s2733_s1 + $0x30] sm:$0xff]  ;;  %v1964_v8 = vld [vmem:[%s2733_s1 + $0x28] sm:$0xff] }
   0x2   :  { %v1974_v1 = vld [vmem:[%s2733_s1 + $0x78] sm:$0xff]  ;;  %907 = vmatpush.bf16.msra.mxu0 %v1966_v0  ;;  %v1973_v5 = vld [vmem:[%s2733_s1 + $0x70] sm:$0xff]  ;;  %v1972_v9 = vld [vmem:[%s2733_s1 + $0x68] sm:$0xff] }
   0x3   :  { %v1982_v2 = vld [vmem:[%s2733_s1 + $0xb8] sm:$0xff]  ;;  %956 = vmatpush.bf16.msra.mxu1 %v1974_v1  ;;  %v1981_v6 = vld [vmem:[%s2733_s1 + $0xb0] sm:$0xff]  ;;  %v1980_v10 = vld [vmem:[%s2733_s1 + $0xa8] sm:$0xff] }
   0x4   :  { %v1990_v3 = vld [vmem:[%s2733_s1 + $0xf8] sm:$0xff]  ;;  %1005 = vmatpush.bf16.msra.mxu2 %v1982_v2  ;;  %v1989_v7 = vld [vmem:[%s2733_s1 + $0xf0] sm:$0xff]  ;;  %v1988_v11 = vld [vmem:[%s2733_s1 + $0xe8] sm:$0xff] }
   0x5   :  { %1054 = vmatpush.bf16.msra.mxu3 %v1990_v3  ;;  %v1963_v12 = vld [vmem:[%s2733_s1 + $0x20] sm:$0xff]  ;;  %v1962_v16 = vld [vmem:[%s2733_s1 + $0x18] sm:$0xff]  ;;  %v1961_v20 = vld [vmem:[%s2733_s1 + $0x10] sm:$0xff] }
   0x6   :  { %908 = vmatpush.bf16.msra.mxu0 %v1965_v4  ;;  %v1971_v13 = vld [vmem:[%s2733_s1 + $0x60] sm:$0xff]  ;;  %v1970_v17 = vld [vmem:[%s2733_s1 + $0x58] sm:$0xff]  ;;  %v1969_v21 = vld [vmem:[%s2733_s1 + $0x50] sm:$0xff] }
   0x7   :  { %957 = vmatpush.bf16.msra.mxu1 %v1973_v5  ;;  %v1979_v14 = vld [vmem:[%s2733_s1 + $0xa0] sm:$0xff]  ;;  %v1978_v18 = vld [vmem:[%s2733_s1 + $0x98] sm:$0xff]  ;;  %v1977_v22 = vld [vmem:[%s2733_s1 + $0x90] sm:$0xff] }
   0x8   :  { %1006 = vmatpush.bf16.msra.mxu2 %v1981_v6  ;;  %v1987_v15 = vld [vmem:[%s2733_s1 + $0xe0] sm:$0xff]  ;;  %v1986_v19 = vld [vmem:[%s2733_s1 + $0xd8] sm:$0xff]  ;;  %v1985_v23 = vld [vmem:[%s2733_s1 + $0xd0] sm:$0xff] }
   0x9   :  { %1055 = vmatpush.bf16.msra.mxu3 %v1989_v7  ;;  %v1960_v24 = vld [vmem:[%s2733_s1 + $0x8] sm:$0xff]  ;;  %v1959_v28 = vld [vmem:[%s2733_s1] sm:$0xff]  ;;  %v2014_v40 = vld [vmem:[%s2733_s1 + $0x1b8] sm:$0xff] }
   0xa   :  { %909 = vmatpush.bf16.msra.mxu0 %v1964_v8  ;;  %v1968_v25 = vld [vmem:[%s2733_s1 + $0x48] sm:$0xff]  ;;  %v1967_v29 = vld [vmem:[%s2733_s1 + $0x40] sm:$0xff]  ;;  %v1998_v41 = vld [vmem:[%s2733_s1 + $0x138] sm:$0xff] }
   0xb   :  { %958 = vmatpush.bf16.msra.mxu1 %v1972_v9  ;;  %v1976_v26 = vld [vmem:[%s2733_s1 + $0x88] sm:$0xff]  ;;  %v1975_v30 = vld [vmem:[%s2733_s1 + $0x80] sm:$0xff]  ;;  %v2022_v46 = vld [vmem:[%s2733_s1 + $0x1f8] sm:$0xff] }
   0xc   :  { %1007 = vmatpush.bf16.msra.mxu2 %v1980_v10  ;;  %v1984_v27 = vld [vmem:[%s2733_s1 + $0xc8] sm:$0xff]  ;;  %v1983_v31 = vld [vmem:[%s2733_s1 + $0xc0] sm:$0xff]  ;;  %v2006_v47 = vld [vmem:[%s2733_s1 + $0x178] sm:$0xff] }
   0xd   :  { %1056 = vmatpush.bf16.msra.mxu3 %v1988_v11  ;;  %v1385_v32 = vld [vmem:[%s2734_s0] sm:$0xf]  ;;  %v1895_v34 = vld [vmem:[%s2734_s0 + $0x4] sm:$0xf]  ;;  %v1393_v36 = vld [vmem:[%s2734_s0 + $0x8] sm:$0xf] }
   0xe   :  { %910 = vmatpush.bf16.msra.mxu0 %v1963_v12  ;;  %v1899_v33 = vld [vmem:[%s2734_s0 + $0x1c] sm:$0xf0]  ;;  %v1387_v35 = vld [vmem:[%s2734_s0 + $0x20] sm:$0xf0]  ;;  %v1900_v37 = vld [vmem:[%s2734_s0 + $0x24] sm:$0xf0] }
   0xf   :  { %959 = vmatpush.bf16.msra.mxu1 %v1971_v13  ;;  %v1896_v38 = vld [vmem:[%s2734_s0 + $0xc] sm:$0xf]  ;;  %v1386_v42 = vor.u32 %v1899_v33, %v1385_v32  ;;  %v1390_v43 = vor.u32 %v1895_v34, %v1387_v35  ;;  %v1394_v44 = vor.u32 %v1900_v37, %v1393_v36  ;;  %v2013_v48 = vld [vmem:[%s2733_s1 + $0x1b0] sm:$0xff]  ;;  %v1417_v56 = vld [vmem:[%s2734_s0 + $0x40] sm:$0xf] }
  0x10   :  { %1008 = vmatpush.bf16.msra.mxu2 %v1979_v14  ;;  %v1395_v39 = vld [vmem:[%s2734_s0 + $0x28] sm:$0xf0]  ;;  %v1997_v49 = vld [vmem:[%s2733_s1 + $0x130] sm:$0xff]  ;;  %v1907_v57 = vld [vmem:[%s2734_s0 + $0x5c] sm:$0xf0] }
  0x11   :  { %1057 = vmatpush.bf16.msra.mxu3 %v1987_v15  ;;  %v1398_v45 = vor.u32 %v1896_v38, %v1395_v39  ;;  %v2021_v50 = vld [vmem:[%s2733_s1 + $0x1f0] sm:$0xff]  ;;  %v2012_v52 = vld [vmem:[%s2733_s1 + $0x1a8] sm:$0xff]  ;;  %v1903_v58 = vld [vmem:[%s2734_s0 + $0x44] sm:$0xf]  ;;  %v1418_v0 = vor.u32 %v1907_v57, %v1417_v56 }
  0x12   :  { %911 = vmatpush.bf16.msra.mxu0 %v1962_v16  ;;  %v2005_v51 = vld [vmem:[%s2733_s1 + $0x170] sm:$0xff]  ;;  %v1996_v53 = vld [vmem:[%s2733_s1 + $0x128] sm:$0xff]  ;;  %v1419_v59 = vld [vmem:[%s2734_s0 + $0x60] sm:$0xf0] }
  0x13   :  { %960 = vmatpush.bf16.msra.mxu1 %v1970_v17  ;;  %v2020_v54 = vld [vmem:[%s2733_s1 + $0x1e8] sm:$0xff]  ;;  %v1422_v1 = vor.u32 %v1903_v58, %v1419_v59  ;;  %v2011_v4 = vld [vmem:[%s2733_s1 + $0x1a0] sm:$0xff]  ;;  %v2009_v36 = vld [vmem:[%s2733_s1 + $0x190] sm:$0xff] }
  0x14   :  { %1009 = vmatpush.bf16.msra.mxu2 %v1978_v18  ;;  %v2004_v55 = vld [vmem:[%s2733_s1 + $0x168] sm:$0xff]  ;;  %v1995_v5 = vld [vmem:[%s2733_s1 + $0x120] sm:$0xff]  ;;  %v1993_v37 = vld [vmem:[%s2733_s1 + $0x110] sm:$0xff] }
  0x15   :  { %1058 = vmatpush.bf16.msra.mxu3 %v1986_v19  ;;  %v1425_v60 = vld [vmem:[%s2734_s0 + $0x48] sm:$0xf]  ;;  %v1904_v62 = vld [vmem:[%s2734_s0 + $0x4c] sm:$0xf]  ;;  %v2019_v6 = vld [vmem:[%s2733_s1 + $0x1e0] sm:$0xff] }
  0x16   :  { %912 = vmatpush.bf16.msra.mxu0 %v1961_v20  ;;  %v1908_v61 = vld [vmem:[%s2734_s0 + $0x64] sm:$0xf0]  ;;  %v1427_v63 = vld [vmem:[%s2734_s0 + $0x68] sm:$0xf0]  ;;  %v2003_v7 = vld [vmem:[%s2733_s1 + $0x160] sm:$0xff] }
  0x17   :  { %961 = vmatpush.bf16.msra.mxu1 %v1969_v21  ;;  %v1426_v2 = vor.u32 %v1908_v61, %v1425_v60  ;;  %v1430_v3 = vor.u32 %v1904_v62, %v1427_v63  ;;  %v1449_v8 = vld [vmem:[%s2734_s0 + $0x80] sm:$0xf]  ;;  %v1911_v10 = vld [vmem:[%s2734_s0 + $0x84] sm:$0xf]  ;;  %v1457_v12 = vld [vmem:[%s2734_s0 + $0x88] sm:$0xf] }
  0x18   :  { %1010 = vmatpush.bf16.msra.mxu2 %v1977_v22  ;;  %v1915_v9 = vld [vmem:[%s2734_s0 + $0x9c] sm:$0xf0]  ;;  %v1451_v11 = vld [vmem:[%s2734_s0 + $0xa0] sm:$0xf0]  ;;  %v1916_v13 = vld [vmem:[%s2734_s0 + $0xa4] sm:$0xf0] }
  0x19   :  { %1059 = vmatpush.bf16.msra.mxu3 %v1985_v23  ;;  %v1912_v14 = vld [vmem:[%s2734_s0 + $0x8c] sm:$0xf]  ;;  %v1450_v16 = vor.u32 %v1915_v9, %v1449_v8  ;;  %v1454_v17 = vor.u32 %v1911_v10, %v1451_v11  ;;  %v1458_v18 = vor.u32 %v1916_v13, %v1457_v12  ;;  %v2010_v20 = vld [vmem:[%s2733_s1 + $0x198] sm:$0xff]  ;;  %v2017_v38 = vld [vmem:[%s2733_s1 + $0x1d0] sm:$0xff] }
  0x1a   :  { %913 = vmatpush.bf16.msra.mxu0 %v1960_v24  ;;  %v1459_v15 = vld [vmem:[%s2734_s0 + $0xa8] sm:$0xf0]  ;;  %v1994_v21 = vld [vmem:[%s2733_s1 + $0x118] sm:$0xff]  ;;  %v1481_v24 = vld [vmem:[%s2734_s0 + $0xc0] sm:$0xf] }
  0x1b   :  { %962 = vmatpush.bf16.msra.mxu1 %v1968_v25  ;;  %v1462_v19 = vor.u32 %v1912_v14, %v1459_v15  ;;  %v2018_v22 = vld [vmem:[%s2733_s1 + $0x1d8] sm:$0xff]  ;;  %v1923_v25 = vld [vmem:[%s2734_s0 + $0xdc] sm:$0xf0]  ;;  %v2001_v39 = vld [vmem:[%s2733_s1 + $0x150] sm:$0xff] }
  0x1c   :  { %1011 = vmatpush.bf16.msra.mxu2 %v1976_v26  ;;  %v2002_v23 = vld [vmem:[%s2733_s1 + $0x158] sm:$0xff]  ;;  %v1919_v26 = vld [vmem:[%s2734_s0 + $0xc4] sm:$0xf]  ;;  %v1482_v32 = vor.u32 %v1923_v25, %v1481_v24  ;;  %v1545_v56 = vld [vmem:[%s2734_s0 + $0x140] sm:$0xf] }
  0x1d   :  { %1060 = vmatpush.bf16.msra.mxu3 %v1984_v27  ;;  %v1483_v27 = vld [vmem:[%s2734_s0 + $0xe0] sm:$0xf0]  ;;  %v1939_v57 = vld [vmem:[%s2734_s0 + $0x15c] sm:$0xf0]  ;;  %v1553_v60 = vld [vmem:[%s2734_s0 + $0x148] sm:$0xf] }
  0x1e   :  { %914 = vmatpush.bf16.msra.mxu0 %v1959_v28  ;;  %v1489_v28 = vld [vmem:[%s2734_s0 + $0xc8] sm:$0xf]  ;;  %v1486_v33 = vor.u32 %v1919_v26, %v1483_v27  ;;  %v1935_v58 = vld [vmem:[%s2734_s0 + $0x144] sm:$0xf]  ;;  %v1936_v62 = vld [vmem:[%s2734_s0 + $0x14c] sm:$0xf] }
  0x1f   :  { %963 = vmatpush.bf16.msra.mxu1 %v1967_v29  ;;  %v1924_v29 = vld [vmem:[%s2734_s0 + $0xe4] sm:$0xf0]  ;;  %v1547_v59 = vld [vmem:[%s2734_s0 + $0x160] sm:$0xf0]  ;;  %v1555_v63 = vld [vmem:[%s2734_s0 + $0x168] sm:$0xf0] }
  0x20   :  { %1012 = vmatpush.bf16.msra.mxu2 %v1975_v30  ;;  %v1920_v30 = vld [vmem:[%s2734_s0 + $0xcc] sm:$0xf]  ;;  %v1490_v34 = vor.u32 %v1924_v29, %v1489_v28  ;;  %v1940_v61 = vld [vmem:[%s2734_s0 + $0x164] sm:$0xf0]  ;;  %v1577_v8 = vld [vmem:[%s2734_s0 + $0x180] sm:$0xf] }
  0x21   :  { %1061 = vmatpush.bf16.msra.mxu3 %v1983_v31  ;;  %915 = vmatmul.bf16.vlgmr.msra.gmra.mxu0 %v1386_v42  ;;  %v1491_v31 = vld [vmem:[%s2734_s0 + $0xe8] sm:$0xf0]  ;;  %v1927_v42 = vld [vmem:[%s2734_s0 + $0x104] sm:$0xf]  ;;  %v1947_v9 = vld [vmem:[%s2734_s0 + $0x19c] sm:$0xf0] }
  0x22   :  { %1103 = vmatpush.bf16.msrb.mxu0 %v1998_v41  ;;  %964 = vmatmul.bf16.vlgmr.msra.gmra.mxu1 %v1390_v43  ;;  %v1494_v35 = vor.u32 %v1920_v30, %v1491_v31  ;;  %v1931_v41 = vld [vmem:[%s2734_s0 + $0x11c] sm:$0xf0]  ;;  %v1515_v43 = vld [vmem:[%s2734_s0 + $0x120] sm:$0xf0]  ;;  %v1585_v12 = vld [vmem:[%s2734_s0 + $0x188] sm:$0xf] }
  0x23   :  { %1013 = vmatmul.bf16.vlgmr.msra.gmra.mxu2 %v1394_v44  ;;  %1152 = vmatpush.bf16.msrb.mxu1 %v2006_v47  ;;  %v1521_v44 = vld [vmem:[%s2734_s0 + $0x108] sm:$0xf]  ;;  %v1523_v47 = vld [vmem:[%s2734_s0 + $0x128] sm:$0xf0]  ;;  %v1943_v10 = vld [vmem:[%s2734_s0 + $0x184] sm:$0xf] }
  0x24   :  { %1201 = vmatpush.bf16.msrb.mxu2 %v2014_v40  ;;  %1062 = vmatmul.bf16.vlgmr.msra.gmra.mxu3 %v1398_v45  ;;  %v1513_v40 = vld [vmem:[%s2734_s0 + $0x100] sm:$0xf]  ;;  %v1932_v45 = vld [vmem:[%s2734_s0 + $0x124] sm:$0xf0]  ;;  %v1579_v11 = vld [vmem:[%s2734_s0 + $0x1a0] sm:$0xf0] }
  0x25   :  { %1250 = vmatpush.bf16.msrb.mxu3 %v2022_v46  ;;  %v1928_v46 = vld [vmem:[%s2734_s0 + $0x10c] sm:$0xf]  ;;  %v1948_v13 = vld [vmem:[%s2734_s0 + $0x1a4] sm:$0xf0] }
  0x26   :  { %1104 = vmatpush.bf16.msrb.mxu0 %v1997_v49  ;;  %v1518_v49 = vor.u32 %v1927_v42, %v1515_v43  ;;  %v1944_v14 = vld [vmem:[%s2734_s0 + $0x18c] sm:$0xf]  ;;  %v1617_v24 = vld [vmem:[%s2734_s0 + $0x1c8] sm:$0xf] }
  0x27   :  { %1153 = vmatpush.bf16.msrb.mxu1 %v2005_v51  ;;  %v1526_v51 = vor.u32 %v1928_v46, %v1523_v47  ;;  %v1587_v15 = vld [vmem:[%s2734_s0 + $0x1a8] sm:$0xf0]  ;;  %v1956_v25 = vld [vmem:[%s2734_s0 + $0x1e4] sm:$0xf0] }
  0x28   :  { %1202 = vmatpush.bf16.msrb.mxu2 %v2013_v48  ;;  %v1514_v48 = vor.u32 %v1931_v41, %v1513_v40  ;;  %v1952_v26 = vld [vmem:[%s2734_s0 + $0x1cc] sm:$0xf]  ;;  %v1618_v30 = vor.u32 %v1956_v25, %v1617_v24 }
  0x29   :  { %1251 = vmatpush.bf16.msrb.mxu3 %v2021_v50  ;;  %v1522_v50 = vor.u32 %v1932_v45, %v1521_v44  ;;  %v1619_v27 = vld [vmem:[%s2734_s0 + $0x1e8] sm:$0xf0] }
  0x2a   :  { %1105 = vmatpush.bf16.msrb.mxu0 %v1996_v53  ;;  %v1992_v53 = vld [vmem:[%s2733_s1 + $0x108] sm:$0xff]  ;;  %v1622_v31 = vor.u32 %v1952_v26, %v1619_v27 }
  0x2b   :  { %1154 = vmatpush.bf16.msrb.mxu1 %v2004_v55  ;;  %v2000_v55 = vld [vmem:[%s2733_s1 + $0x148] sm:$0xff] }
  0x2c   :  { %1203 = vmatpush.bf16.msrb.mxu2 %v2012_v52  ;;  %v2008_v52 = vld [vmem:[%s2733_s1 + $0x188] sm:$0xff] }
  0x2d   :  { %1252 = vmatpush.bf16.msrb.mxu3 %v2020_v54  ;;  %v2016_v54 = vld [vmem:[%s2733_s1 + $0x1c8] sm:$0xff] }
  0x2e   :  { %1106 = vmatpush.bf16.msrb.mxu0 %v1995_v5  ;;  %v1991_v5 = vld [vmem:[%s2733_s1 + $0x100] sm:$0xff] }
  0x2f   :  { %1155 = vmatpush.bf16.msrb.mxu1 %v2003_v7  ;;  %v1999_v7 = vld [vmem:[%s2733_s1 + $0x140] sm:$0xff] }
  0x30   :  { %1204 = vmatpush.bf16.msrb.mxu2 %v2011_v4  ;;  %v2007_v4 = vld [vmem:[%s2733_s1 + $0x180] sm:$0xff] }
  0x31   :  { %920 = vmatmul.bf16.gmra.mxu0 %v1418_v0  ;;  %1253 = vmatpush.bf16.msrb.mxu3 %v2019_v6  ;;  %v1546_v0 = vor.u32 %v1939_v57, %v1545_v56  ;;  %v2015_v6 = vld [vmem:[%s2733_s1 + $0x1c0] sm:$0xff]  ;;  %v1905_v56 = vld [vmem:[%s2734_s0 + $0x54] sm:$0xf] }
  0x32   :  { %969 = vmatmul.bf16.gmra.mxu1 %v1422_v1  ;;  %1107 = vmatpush.bf16.msrb.mxu0 %v1994_v21  ;;  %v1550_v1 = vor.u32 %v1935_v58, %v1547_v59  ;;  %v1955_v21 = vld [vmem:[%s2734_s0 + $0x1dc] sm:$0xf0]  ;;  %v1435_v57 = vld [vmem:[%s2734_s0 + $0x70] sm:$0xf0]  ;;  %v1441_v58 = vld [vmem:[%s2734_s0 + $0x58] sm:$0xf] }
  0x33   :  { %1018 = vmatmul.bf16.gmra.mxu2 %v1426_v2  ;;  %1156 = vmatpush.bf16.msrb.mxu1 %v2002_v23  ;;  %v1554_v2 = vor.u32 %v1940_v61, %v1553_v60  ;;  %v1611_v23 = vld [vmem:[%s2734_s0 + $0x1e0] sm:$0xf0]  ;;  %v1910_v59 = vld [vmem:[%s2734_s0 + $0x74] sm:$0xf0]  ;;  %v1906_v60 = vld [vmem:[%s2734_s0 + $0x5c] sm:$0xf] }
  0x34   :  { %1067 = vmatmul.bf16.gmra.mxu3 %v1430_v3  ;;  %1205 = vmatpush.bf16.msrb.mxu2 %v2010_v20  ;;  %v1558_v3 = vor.u32 %v1936_v62, %v1555_v63  ;;  %v1609_v20 = vld [vmem:[%s2734_s0 + $0x1c0] sm:$0xf]  ;;  %v1443_v61 = vld [vmem:[%s2734_s0 + $0x78] sm:$0xf0] }
  0x35   :  { %1254 = vmatpush.bf16.msrb.mxu3 %v2018_v22  ;;  %v1951_v22 = vld [vmem:[%s2734_s0 + $0x1c4] sm:$0xf]  ;;  %v1610_v28 = vor.u32 %v1955_v21, %v1609_v20  ;;  %v1473_v20 = vld [vmem:[%s2734_s0 + $0x98] sm:$0xf] }
  0x36   :  { %1108 = vmatpush.bf16.msrb.mxu0 %v1993_v37  ;;  %v1614_v29 = vor.u32 %v1951_v22, %v1611_v23  ;;  %v1902_v37 = vld [vmem:[%s2734_s0 + $0x34] sm:$0xf0]  ;;  %v1914_v22 = vld [vmem:[%s2734_s0 + $0x9c] sm:$0xf] }
  0x37   :  { %1157 = vmatpush.bf16.msrb.mxu1 %v2001_v39  ;;  %v1411_v39 = vld [vmem:[%s2734_s0 + $0x38] sm:$0xf0]  ;;  %v1918_v21 = vld [vmem:[%s2734_s0 + $0xb4] sm:$0xf0] }
  0x38   :  { %1206 = vmatpush.bf16.msrb.mxu2 %v2009_v36  ;;  %v1409_v36 = vld [vmem:[%s2734_s0 + $0x18] sm:$0xf]  ;;  %v1475_v23 = vld [vmem:[%s2734_s0 + $0xb8] sm:$0xf0] }
  0x39   :  { %1255 = vmatpush.bf16.msrb.mxu3 %v2017_v38  ;;  %v1898_v38 = vld [vmem:[%s2734_s0 + $0x1c] sm:$0xf]  ;;  %v1410_v44 = vor.u32 %v1902_v37, %v1409_v36 }
  0x3a   :  { %1109 = vmatpush.bf16.msrb.mxu0 %v1992_v53  ;;  %v1414_v45 = vor.u32 %v1898_v38, %v1411_v39 }
  0x3b   :  { %1158 = vmatpush.bf16.msrb.mxu1 %v2000_v55  ;;  %v1909_v55 = vld [vmem:[%s2734_s0 + $0x6c] sm:$0xf0] }
  0x3c   :  { %1207 = vmatpush.bf16.msrb.mxu2 %v2008_v52 }
  0x3d   :  { %1256 = vmatpush.bf16.msrb.mxu3 %v2016_v54  ;;  %v1433_v54 = vld [vmem:[%s2734_s0 + $0x50] sm:$0xf] }
  0x3e   :  { %1110 = vmatpush.bf16.msrb.mxu0 %v1991_v5  ;;  %v1442_v5 = vor.u32 %v1910_v59, %v1441_v58 }
  0x3f   :  { %1159 = vmatpush.bf16.msrb.mxu1 %v1999_v7 }
  0x40   :  { %1208 = vmatpush.bf16.msrb.mxu2 %v2007_v4 }
  0x41   :  { %925 = vmatmul.bf16.gmra.mxu0 %v1450_v16  ;;  %1257 = vmatpush.bf16.msrb.mxu3 %v2015_v6  ;;  %v1578_v16 = vor.u32 %v1947_v9, %v1577_v8  ;;  %v1446_v6 = vor.u32 %v1906_v60, %v1443_v61 }
  0x42   :  { %974 = vmatmul.bf16.gmra.mxu1 %v1454_v17  ;;  %v1582_v17 = vor.u32 %v1943_v10, %v1579_v11 }
  0x43   :  { %1023 = vmatmul.bf16.gmra.mxu2 %v1458_v18  ;;  %v1586_v18 = vor.u32 %v1948_v13, %v1585_v12 }
  0x44   :  { %1072 = vmatmul.bf16.gmra.mxu3 %v1462_v19  ;;  %v1590_v19 = vor.u32 %v1944_v14, %v1587_v15 }
  0x51   :  { %930 = vmatmul.bf16.gmra.mxu0 %v1482_v32  ;;  %v1401_v32 = vld [vmem:[%s2734_s0 + $0x10] sm:$0xf] }
  0x52   :  { %979 = vmatmul.bf16.gmra.mxu1 %v1486_v33  ;;  %v1901_v33 = vld [vmem:[%s2734_s0 + $0x2c] sm:$0xf0] }
  0x53   :  { %1028 = vmatmul.bf16.gmra.mxu2 %v1490_v34  ;;  %v1897_v34 = vld [vmem:[%s2734_s0 + $0x14] sm:$0xf]  ;;  %v1402_v40 = vor.u32 %v1901_v33, %v1401_v32  ;;  %v1478_v32 = vor.u32 %v1914_v22, %v1475_v23 }
  0x54   :  { %1077 = vmatmul.bf16.gmra.mxu3 %v1494_v35  ;;  %v1403_v35 = vld [vmem:[%s2734_s0 + $0x30] sm:$0xf0] }
  0x55   :  { %v1406_v41 = vor.u32 %v1897_v34, %v1403_v35 }
  0x61   :  { %935 = vmatmul.bf16.gmra.mxu0 %v1514_v48 }
  0x62   :  { %984 = vmatmul.bf16.gmra.mxu1 %v1518_v49 }
  0x63   :  { %1033 = vmatmul.bf16.gmra.mxu2 %v1522_v50 }
  0x64   :  { %1082 = vmatmul.bf16.gmra.mxu3 %v1526_v51 }
  0x71   :  { %940 = vmatmul.bf16.gmra.mxu0 %v1546_v0  ;;  %v1434_v0 = vor.u32 %v1909_v55, %v1433_v54 }
  0x72   :  { %989 = vmatmul.bf16.gmra.mxu1 %v1550_v1  ;;  %v1438_v1 = vor.u32 %v1905_v56, %v1435_v57 }
  0x73   :  { %1038 = vmatmul.bf16.gmra.mxu2 %v1554_v2 }
  0x74   :  { %1087 = vmatmul.bf16.gmra.mxu3 %v1558_v3 }
  0x81   :  { %945 = vmatmul.bf16.gmra.mxu0 %v1578_v16  ;;  %v1465_v16 = vld [vmem:[%s2734_s0 + $0x90] sm:$0xf] }
  0x82   :  { %994 = vmatmul.bf16.gmra.mxu1 %v1582_v17  ;;  %v1917_v17 = vld [vmem:[%s2734_s0 + $0xac] sm:$0xf0] }
  0x83   :  { %1043 = vmatmul.bf16.gmra.mxu2 %v1586_v18  ;;  %v1913_v18 = vld [vmem:[%s2734_s0 + $0x94] sm:$0xf]  ;;  %v1466_v26 = vor.u32 %v1917_v17, %v1465_v16 }
  0x84   :  { %1092 = vmatmul.bf16.gmra.mxu3 %v1590_v19  ;;  %v1467_v19 = vld [vmem:[%s2734_s0 + $0xb0] sm:$0xf0] }
  0x85   :  { %v1470_v27 = vor.u32 %v1913_v18, %v1467_v19 }
  0x91   :  { %950 = vmatmul.bf16.gmra.mxu0 %v1610_v28 }
  0x92   :  { %999 = vmatmul.bf16.gmra.mxu1 %v1614_v29 }
  0x93   :  { %1048 = vmatmul.bf16.gmra.mxu2 %v1618_v30 }
  0x94   :  { %1097 = vmatmul.bf16.gmra.mxu3 %v1622_v31  ;;  %v1474_v31 = vor.u32 %v1918_v21, %v1473_v20 }
  0x9e   :  { %v916_v42 = vpop.f32.mrf.mxu0 }
  0x9f   :  { %v965_v43 = vpop.f32.mrf.mxu1 }
  0xa0   :  { %v966_v46 = vadd.f32 %v965_v43, %v916_v42  ;;  %v1497_v42 = vld [vmem:[%s2734_s0 + $0xd0] sm:$0xf] }
  0xa1   :  { %1111 = vmatmul.bf16.vlgmr.msrb.gmra.mxu0 %v1402_v40  ;;  %v1925_v43 = vld [vmem:[%s2734_s0 + $0xec] sm:$0xf0] }
  0xa2   :  { %1160 = vmatmul.bf16.vlgmr.msrb.gmra.mxu1 %v1406_v41 }
  0xa3   :  { %1209 = vmatmul.bf16.vlgmr.msrb.gmra.mxu2 %v1410_v44  ;;  %v1921_v44 = vld [vmem:[%s2734_s0 + $0xd4] sm:$0xf] }
  0xa4   :  { %1258 = vmatmul.bf16.vlgmr.msrb.gmra.mxu3 %v1414_v45  ;;  %v1499_v45 = vld [vmem:[%s2734_s0 + $0xf0] sm:$0xf0] }
  0xa5   :  { %v1502_v54 = vor.u32 %v1921_v44, %v1499_v45 }
  0xa6   :  { %v1014_v47 = vpop.f32.mrf.mxu2  ;;  %v918_v50 = vpop.f32.mrf.mxu0 }
  0xa7   :  { %v1063_v48 = vpop.f32.mrf.mxu3  ;;  %v1015_v49 = vadd.f32 %v1014_v47, %v966_v46  ;;  %v967_v51 = vpop.f32.mrf.mxu1  ;;  %v1505_v46 = vld [vmem:[%s2734_s0 + $0xd8] sm:$0xf] }
  0xa8   :  { %v968_v52 = vadd.f32 %v967_v51, %v918_v50  ;;  %v1926_v47 = vld [vmem:[%s2734_s0 + $0xf4] sm:$0xf0] }
  0xa9   :  { %v2493_v53 = vadd.f32 %v1063_v48, %v1015_v49  ;;  %v1922_v48 = vld [vmem:[%s2734_s0 + $0xdc] sm:$0xf]  ;;  %v1506_v58 = vor.u32 %v1926_v47, %v1505_v46 }
  0xaa   :  { %v1507_v49 = vld [vmem:[%s2734_s0 + $0xf8] sm:$0xf0] }
  0xab   :  { %v1510_v59 = vor.u32 %v1922_v48, %v1507_v49 }
  0xae   :  { %v1016_v62 = vpop.f32.mrf.mxu2  ;;  %v921_v3 = vpop.f32.mrf.mxu0 }
  0xaf   :  { %v1065_v63 = vpop.f32.mrf.mxu3  ;;  %v1017_v2 = vadd.f32 %v1016_v62, %v968_v52  ;;  %v970_v4 = vpop.f32.mrf.mxu1  ;;  %v1498_v52 = vor.u32 %v1925_v43, %v1497_v42  ;;  %v1571_v42 = vld [vmem:[%s2734_s0 + $0x178] sm:$0xf0] }
  0xb0   :  { %v971_v7 = vadd.f32 %v970_v4, %v921_v3 }
  0xb1   :  { %v2519_v8 = vadd.f32 %v1065_v63, %v1017_v2  ;;  %1116 = vmatmul.bf16.gmra.mxu0 %v1434_v0 }
  0xb2   :  { %1165 = vmatmul.bf16.gmra.mxu1 %v1438_v1 }
  0xb3   :  { %1214 = vmatmul.bf16.gmra.mxu2 %v1442_v5  ;;  %v1529_v5 = vld [vmem:[%s2734_s0 + $0x110] sm:$0xf] }
  0xb4   :  { %1263 = vmatmul.bf16.gmra.mxu3 %v1446_v6  ;;  %v1933_v6 = vld [vmem:[%s2734_s0 + $0x12c] sm:$0xf0] }
  0xb5   :  { %v1530_v17 = vor.u32 %v1933_v6, %v1529_v5  ;;  %v1950_v5 = vld [vmem:[%s2734_s0 + $0x1b4] sm:$0xf0]  ;;  %v1946_v6 = vld [vmem:[%s2734_s0 + $0x19c] sm:$0xf] }
  0xb6   :  { %v1019_v9 = vpop.f32.mrf.mxu2  ;;  %v923_v12 = vpop.f32.mrf.mxu0 }
  0xb7   :  { %v1068_v10 = vpop.f32.mrf.mxu3  ;;  %v1020_v11 = vadd.f32 %v1019_v9, %v971_v7  ;;  %v972_v13 = vpop.f32.mrf.mxu1  ;;  %v1929_v7 = vld [vmem:[%s2734_s0 + $0x114] sm:$0xf] }
  0xb8   :  { %v973_v14 = vadd.f32 %v972_v13, %v923_v12  ;;  %v1531_v9 = vld [vmem:[%s2734_s0 + $0x130] sm:$0xf0]  ;;  %v1930_v12 = vld [vmem:[%s2734_s0 + $0x11c] sm:$0xf] }
  0xb9   :  { %v2521_v15 = vadd.f32 %v1068_v10, %v1020_v11  ;;  %v1537_v10 = vld [vmem:[%s2734_s0 + $0x118] sm:$0xf]  ;;  %v1539_v13 = vld [vmem:[%s2734_s0 + $0x138] sm:$0xf0]  ;;  %v1534_v18 = vor.u32 %v1929_v7, %v1531_v9 }
  0xba   :  { %v1934_v11 = vld [vmem:[%s2734_s0 + $0x134] sm:$0xf0]  ;;  %v1542_v23 = vor.u32 %v1930_v12, %v1539_v13  ;;  %v1603_v7 = vld [vmem:[%s2734_s0 + $0x1b8] sm:$0xf0] }
  0xbb   :  { %v1538_v22 = vor.u32 %v1934_v11, %v1537_v10 }
  0xbe   :  { %v1021_v24 = vpop.f32.mrf.mxu2  ;;  %v926_v29 = vpop.f32.mrf.mxu0 }
  0xbf   :  { %v1070_v25 = vpop.f32.mrf.mxu3  ;;  %v1022_v28 = vadd.f32 %v1021_v24, %v973_v14  ;;  %v975_v30 = vpop.f32.mrf.mxu1 }
  0xc0   :  { %v976_v33 = vadd.f32 %v975_v30, %v926_v29 }
  0xc1   :  { %v2547_v34 = vadd.f32 %v1070_v25, %v1022_v28  ;;  %1121 = vmatmul.bf16.gmra.mxu0 %v1466_v26 }
  0xc2   :  { %1170 = vmatmul.bf16.gmra.mxu1 %v1470_v27 }
  0xc3   :  { %1219 = vmatmul.bf16.gmra.mxu2 %v1474_v31 }
  0xc4   :  { %1268 = vmatmul.bf16.gmra.mxu3 %v1478_v32 }
  0xc6   :  { %v1024_v35 = vpop.f32.mrf.mxu2  ;;  %v928_v38 = vpop.f32.mrf.mxu0 }
  0xc7   :  { %v1073_v36 = vpop.f32.mrf.mxu3  ;;  %v1025_v37 = vadd.f32 %v1024_v35, %v976_v33  ;;  %v977_v39 = vpop.f32.mrf.mxu1  ;;  %v1561_v33 = vld [vmem:[%s2734_s0 + $0x150] sm:$0xf] }
  0xc8   :  { %v978_v40 = vadd.f32 %v977_v39, %v928_v38  ;;  %v1941_v35 = vld [vmem:[%s2734_s0 + $0x16c] sm:$0xf0]  ;;  %v1569_v38 = vld [vmem:[%s2734_s0 + $0x158] sm:$0xf] }
  0xc9   :  { %v2549_v41 = vadd.f32 %v1073_v36, %v1025_v37  ;;  %v1937_v36 = vld [vmem:[%s2734_s0 + $0x154] sm:$0xf]  ;;  %v1942_v39 = vld [vmem:[%s2734_s0 + $0x174] sm:$0xf0]  ;;  %v1562_v45 = vor.u32 %v1941_v35, %v1561_v33 }
  0xca   :  { %v1563_v37 = vld [vmem:[%s2734_s0 + $0x170] sm:$0xf0]  ;;  %v1633_v35 = vld [vmem:[%s2734_s0 + $0x1d8] sm:$0xf] }
  0xcb   :  { %v1566_v46 = vor.u32 %v1937_v36, %v1563_v37  ;;  %v1627_v33 = vld [vmem:[%s2734_s0 + $0x1f0] sm:$0xf0]  ;;  %v1958_v36 = vld [vmem:[%s2734_s0 + $0x1f4] sm:$0xf0]  ;;  %v1954_v37 = vld [vmem:[%s2734_s0 + $0x1dc] sm:$0xf] }
  0xce   :  { %v1026_v50 = vpop.f32.mrf.mxu2  ;;  %v931_v56 = vpop.f32.mrf.mxu0 }
  0xcf   :  { %v1075_v51 = vpop.f32.mrf.mxu3  ;;  %v1027_v55 = vadd.f32 %v1026_v50, %v978_v40  ;;  %v980_v57 = vpop.f32.mrf.mxu1  ;;  %v1938_v40 = vld [vmem:[%s2734_s0 + $0x15c] sm:$0xf]  ;;  %v1570_v50 = vor.u32 %v1942_v39, %v1569_v38 }
  0xd0   :  { %v981_v60 = vadd.f32 %v980_v57, %v931_v56  ;;  %v1635_v38 = vld [vmem:[%s2734_s0 + $0x1f8] sm:$0xf0] }
  0xd1   :  { %v2575_v61 = vadd.f32 %v1075_v51, %v1027_v55  ;;  %1126 = vmatmul.bf16.gmra.mxu0 %v1498_v52  ;;  %v1574_v51 = vor.u32 %v1938_v40, %v1571_v42 }
  0xd2   :  { %1175 = vmatmul.bf16.gmra.mxu1 %v1502_v54 }
  0xd3   :  { %1224 = vmatmul.bf16.gmra.mxu2 %v1506_v58 }
  0xd4   :  { %1273 = vmatmul.bf16.gmra.mxu3 %v1510_v59 }
  0xd6   :  { %v1029_v62 = vpop.f32.mrf.mxu2  ;;  %v933_v1 = vpop.f32.mrf.mxu0 }
  0xd7   :  { %v1078_v63 = vpop.f32.mrf.mxu3  ;;  %v1030_v0 = vadd.f32 %v1029_v62, %v981_v60  ;;  %v982_v2 = vpop.f32.mrf.mxu1 }
  0xd8   :  { %v983_v3 = vadd.f32 %v982_v2, %v933_v1  ;;  %v1945_v1 = vld [vmem:[%s2734_s0 + $0x194] sm:$0xf] }
  0xd9   :  { %v2577_v4 = vadd.f32 %v1078_v63, %v1030_v0  ;;  %v1593_v63 = vld [vmem:[%s2734_s0 + $0x190] sm:$0xf]  ;;  %v1595_v2 = vld [vmem:[%s2734_s0 + $0x1b0] sm:$0xf0] }
  0xda   :  { %v1949_v0 = vld [vmem:[%s2734_s0 + $0x1ac] sm:$0xf0]  ;;  %v1598_v12 = vor.u32 %v1945_v1, %v1595_v2 }
  0xdb   :  { %v1594_v11 = vor.u32 %v1949_v0, %v1593_v63 }
  0xde   :  { %v1031_v14 = vpop.f32.mrf.mxu2  ;;  %v936_v20 = vpop.f32.mrf.mxu0 }
  0xdf   :  { %v1080_v16 = vpop.f32.mrf.mxu3  ;;  %v1032_v19 = vadd.f32 %v1031_v14, %v983_v3  ;;  %v985_v21 = vpop.f32.mrf.mxu1  ;;  %v1601_v3 = vld [vmem:[%s2734_s0 + $0x198] sm:$0xf] }
  0xe0   :  { %v986_v24 = vadd.f32 %v985_v21, %v936_v20 }
  0xe1   :  { %v2603_v25 = vadd.f32 %v1080_v16, %v1032_v19  ;;  %1131 = vmatmul.bf16.gmra.mxu0 %v1530_v17  ;;  %v1602_v17 = vor.u32 %v1950_v5, %v1601_v3 }
  0xe2   :  { %1180 = vmatmul.bf16.gmra.mxu1 %v1534_v18  ;;  %v1606_v18 = vor.u32 %v1946_v6, %v1603_v7 }
  0xe3   :  { %1229 = vmatmul.bf16.gmra.mxu2 %v1538_v22 }
  0xe4   :  { %1278 = vmatmul.bf16.gmra.mxu3 %v1542_v23 }
  0xe6   :  { %v1034_v26 = vpop.f32.mrf.mxu2  ;;  %v938_v29 = vpop.f32.mrf.mxu0 }
  0xe7   :  { %v1083_v27 = vpop.f32.mrf.mxu3  ;;  %v1035_v28 = vadd.f32 %v1034_v26, %v986_v24  ;;  %v987_v30 = vpop.f32.mrf.mxu1 }
  0xe8   :  { %v988_v31 = vadd.f32 %v987_v30, %v938_v29  ;;  %v1625_v29 = vld [vmem:[%s2734_s0 + $0x1d0] sm:$0xf] }
  0xe9   :  { %v2605_v32 = vadd.f32 %v1083_v27, %v1035_v28  ;;  %v1957_v30 = vld [vmem:[%s2734_s0 + $0x1ec] sm:$0xf0] }
  0xea   :  { %v1626_v42 = vor.u32 %v1957_v30, %v1625_v29 }
  0xee   :  { %v1036_v43 = vpop.f32.mrf.mxu2  ;;  %v941_v48 = vpop.f32.mrf.mxu0 }
  0xef   :  { %v1085_v44 = vpop.f32.mrf.mxu3  ;;  %v1037_v47 = vadd.f32 %v1036_v43, %v988_v31  ;;  %v990_v49 = vpop.f32.mrf.mxu1  ;;  %v1953_v31 = vld [vmem:[%s2734_s0 + $0x1d4] sm:$0xf] }
  0xf0   :  { %v991_v52 = vadd.f32 %v990_v49, %v941_v48  ;;  %v1630_v43 = vor.u32 %v1953_v31, %v1627_v33  ;;  %v1638_v48 = vor.u32 %v1954_v37, %v1635_v38 }
  0xf1   :  { %v2631_v54 = vadd.f32 %v1085_v44, %v1037_v47  ;;  %1136 = vmatmul.bf16.gmra.mxu0 %v1562_v45  ;;  %v1634_v47 = vor.u32 %v1958_v36, %v1633_v35 }
  0xf2   :  { %1185 = vmatmul.bf16.gmra.mxu1 %v1566_v46 }
  0xf3   :  { %1234 = vmatmul.bf16.gmra.mxu2 %v1570_v50 }
  0xf4   :  { %1283 = vmatmul.bf16.gmra.mxu3 %v1574_v51 }
  0xf6   :  { %v1039_v55 = vpop.f32.mrf.mxu2  ;;  %v943_v58 = vpop.f32.mrf.mxu0 }
  0xf7   :  { %v1088_v56 = vpop.f32.mrf.mxu3  ;;  %v1040_v57 = vadd.f32 %v1039_v55, %v991_v52  ;;  %v992_v59 = vpop.f32.mrf.mxu1 }
  0xf8   :  { %v993_v60 = vadd.f32 %v992_v59, %v943_v58 }
  0xf9   :  { %v2633_v62 = vadd.f32 %v1088_v56, %v1040_v57 }
  0xfe   :  { %v1041_v9 = vpop.f32.mrf.mxu2  ;;  %v946_v14 = vpop.f32.mrf.mxu0 }
  0xff   :  { %v1090_v10 = vpop.f32.mrf.mxu3  ;;  %v1042_v13 = vadd.f32 %v1041_v9, %v993_v60  ;;  %v995_v16 = vpop.f32.mrf.mxu1 }
 0x100   :  { %v996_v19 = vadd.f32 %v995_v16, %v946_v14 }
 0x101   :  { %v2659_v20 = vadd.f32 %v1090_v10, %v1042_v13  ;;  %1141 = vmatmul.bf16.gmra.mxu0 %v1594_v11 }
 0x102   :  { %1190 = vmatmul.bf16.gmra.mxu1 %v1598_v12 }
 0x103   :  { %1239 = vmatmul.bf16.gmra.mxu2 %v1602_v17 }
 0x104   :  { %1288 = vmatmul.bf16.gmra.mxu3 %v1606_v18 }
 0x106   :  { %v1044_v21 = vpop.f32.mrf.mxu2  ;;  %v948_v24 = vpop.f32.mrf.mxu0 }
 0x107   :  { %v1093_v22 = vpop.f32.mrf.mxu3  ;;  %v1045_v23 = vadd.f32 %v1044_v21, %v996_v19  ;;  %v997_v26 = vpop.f32.mrf.mxu1 }
 0x108   :  { %v998_v27 = vadd.f32 %v997_v26, %v948_v24 }
 0x109   :  { %v2661_v28 = vadd.f32 %v1093_v22, %v1045_v23 }
 0x10e   :  { %v1046_v39 = vpop.f32.mrf.mxu2  ;;  %v951_v45 = vpop.f32.mrf.mxu0 }
 0x10f   :  { %v1095_v40 = vpop.f32.mrf.mxu3  ;;  %v1047_v44 = vadd.f32 %v1046_v39, %v998_v27  ;;  %v1000_v46 = vpop.f32.mrf.mxu1 }
 0x110   :  { %v1001_v49 = vadd.f32 %v1000_v46, %v951_v45 }
 0x111   :  { %v2687_v50 = vadd.f32 %v1095_v40, %v1047_v44  ;;  %1146 = vmatmul.bf16.gmra.mxu0 %v1626_v42 }
 0x112   :  { %1195 = vmatmul.bf16.gmra.mxu1 %v1630_v43 }
 0x113   :  { %1244 = vmatmul.bf16.gmra.mxu2 %v1634_v47 }
 0x114   :  { %1293 = vmatmul.bf16.gmra.mxu3 %v1638_v48 }
 0x116   :  { %v1049_v51 = vpop.f32.mrf.mxu2  ;;  %v953_v56 = vpop.f32.mrf.mxu0 }
 0x117   :  { %v1098_v52 = vpop.f32.mrf.mxu3  ;;  %v1050_v55 = vadd.f32 %v1049_v51, %v1001_v49  ;;  %v1002_v57 = vpop.f32.mrf.mxu1 }
 0x118   :  { %v1003_v58 = vadd.f32 %v1002_v57, %v953_v56 }
 0x119   :  { %v2689_v59 = vadd.f32 %v1098_v52, %v1050_v55 }
 0x11e   :  { %v1051_v60 = vpop.f32.mrf.mxu2  ;;  %v1112_v1 = vpop.f32.mrf.mxu0 }
 0x11f   :  { %v1100_v63 = vpop.f32.mrf.mxu3  ;;  %v1052_v0 = vadd.f32 %v1051_v60, %v1003_v58  ;;  %v1161_v2 = vpop.f32.mrf.mxu1  ;;  %v1113_v5 = vadd.f32 %v1112_v1, %v2493_v53 }
 0x121   :  { %v2691_v3 = vadd.f32 %v1100_v63, %v1052_v0  ;;  %v1162_v9 = vadd.f32 %v1161_v2, %v1113_v5 }
 0x126   :  { %v1210_v6 = vpop.f32.mrf.mxu2  ;;  %v1114_v10 = vpop.f32.mrf.mxu0 }
 0x127   :  { %v1259_v7 = vpop.f32.mrf.mxu3  ;;  %v1163_v11 = vpop.f32.mrf.mxu1  ;;  %v1211_v12 = vadd.f32 %v1210_v6, %v1162_v9  ;;  %v1115_v13 = vadd.f32 %v1114_v10, %v2519_v8 }
 0x129   :  { %v1260_v14 = vadd.f32 %v1259_v7, %v1211_v12  ;;  %v1164_v16 = vadd.f32 %v1163_v11, %v1115_v13 }
 0x12b   :  { %v1315_v23 = vmul.f32 0.2, %v1260_v14  ;;  %vm1299_vm0 = vcmp.gt.f32.partialorder %v1260_v14, 0.0 }
 0x12d   :  { %v1331_v27 = vsel %vm1299_vm0, %v1260_v14, %v1315_v23 }
 0x12e   :  { %v1212_v17 = vpop.f32.mrf.mxu2  ;;  %v1117_v21 = vpop.f32.mrf.mxu0 }
 0x12f   :  { %v1261_v18 = vpop.f32.mrf.mxu3  ;;  %v1213_v19 = vadd.f32 %v1212_v17, %v1164_v16  ;;  %v1166_v22 = vpop.f32.mrf.mxu1  ;;  %v1118_v26 = vadd.f32 %v1117_v21, %v2521_v15 }
 0x131   :  { %v1262_v24 = vadd.f32 %v1261_v18, %v1213_v19  ;;  %v1167_v8 = vadd.f32 %v1166_v22, %v1118_v26 }
 0x133   :  { %vm1300_vm1 = vcmp.gt.f32.partialorder %v1262_v24, 0.0  ;;  %v1316_v53 = vmul.f32 0.2, %v1262_v24 }
 0x135   :  { %v1332_v29 = vsel %vm1300_vm1, %v1262_v24, %v1316_v53 }
 0x136   :  { %v2026_v30 = vpack.c.bf16 %v1332_v29, %v1331_v27  ;;  %v1215_v31 = vpop.f32.mrf.mxu2  ;;  %v1119_v35 = vpop.f32.mrf.mxu0 }
 0x137   :  { %v1264_v33 = vpop.f32.mrf.mxu3  ;;  %v1168_v36 = vpop.f32.mrf.mxu1  ;;  %v1216_v37 = vadd.f32 %v1215_v31, %v1167_v8  ;;  %v1120_v38 = vadd.f32 %v1119_v35, %v2547_v34 }
 0x138   :  { %2027 = vst [vmem:[%s2735_s2] sm:$0xff] %v2026_v30  }
 0x139   :  { %v1265_v39 = vadd.f32 %v1264_v33, %v1216_v37  ;;  %v1169_v40 = vadd.f32 %v1168_v36, %v1120_v38 }
 0x13b   :  { %v1317_v46 = vmul.f32 0.2, %v1265_v39  ;;  %vm1301_vm2 = vcmp.gt.f32.partialorder %v1265_v39, 0.0 }
 0x13d   :  { %v1333_v51 = vsel %vm1301_vm2, %v1265_v39, %v1317_v46 }
 0x13e   :  { %v1217_v42 = vpop.f32.mrf.mxu2  ;;  %v1122_v44 = vpop.f32.mrf.mxu0 }
 0x13f   :  { %v1266_v43 = vpop.f32.mrf.mxu3  ;;  %v1218_v15 = vadd.f32 %v1217_v42, %v1169_v40  ;;  %v1171_v45 = vpop.f32.mrf.mxu1  ;;  %v1123_v49 = vadd.f32 %v1122_v44, %v2549_v41 }
 0x141   :  { %v1267_v47 = vadd.f32 %v1266_v43, %v1218_v15  ;;  %v1172_v34 = vadd.f32 %v1171_v45, %v1123_v49 }
 0x143   :  { %vm1302_vm3 = vcmp.gt.f32.partialorder %v1267_v47, 0.0  ;;  %v1318_v48 = vmul.f32 0.2, %v1267_v47 }
 0x145   :  { %v1334_v52 = vsel %vm1302_vm3, %v1267_v47, %v1318_v48 }
 0x146   :  { %v2031_v55 = vpack.c.bf16 %v1334_v52, %v1333_v51  ;;  %v1220_v56 = vpop.f32.mrf.mxu2  ;;  %v1124_v58 = vpop.f32.mrf.mxu0 }
 0x147   :  { %v1269_v57 = vpop.f32.mrf.mxu3  ;;  %v1173_v60 = vpop.f32.mrf.mxu1  ;;  %v1221_v63 = vadd.f32 %v1220_v56, %v1172_v34  ;;  %v1125_v0 = vadd.f32 %v1124_v58, %v2575_v61 }
 0x148   :  { %2063 = vst [vmem:[%s2735_s2 + $0x8] sm:$0xff] %v2031_v55  }
 0x149   :  { %v1270_v1 = vadd.f32 %v1269_v57, %v1221_v63  ;;  %v1174_v2 = vadd.f32 %v1173_v60, %v1125_v0 }
 0x14b   :  { %v1319_v10 = vmul.f32 0.2, %v1270_v1  ;;  %vm1303_vm4 = vcmp.gt.f32.partialorder %v1270_v1, 0.0 }
 0x14d   :  { %v1335_v14 = vsel %vm1303_vm4, %v1270_v1, %v1319_v10 }
 0x14e   :  { %v1222_v5 = vpop.f32.mrf.mxu2  ;;  %v1127_v7 = vpop.f32.mrf.mxu0 }
 0x14f   :  { %v1271_v6 = vpop.f32.mrf.mxu3  ;;  %v1223_v41 = vadd.f32 %v1222_v5, %v1174_v2  ;;  %v1176_v9 = vpop.f32.mrf.mxu1  ;;  %v1128_v13 = vadd.f32 %v1127_v7, %v2577_v4 }
 0x151   :  { %v1272_v11 = vadd.f32 %v1271_v6, %v1223_v41  ;;  %v1177_v61 = vadd.f32 %v1176_v9, %v1128_v13 }
 0x153   :  { %vm1304_vm5 = vcmp.gt.f32.partialorder %v1272_v11, 0.0  ;;  %v1320_v12 = vmul.f32 0.2, %v1272_v11 }
 0x155   :  { %v1336_v16 = vsel %vm1304_vm5, %v1272_v11, %v1320_v12 }
 0x156   :  { %v2036_v17 = vpack.c.bf16 %v1336_v16, %v1335_v14  ;;  %v1225_v18 = vpop.f32.mrf.mxu2  ;;  %v1129_v21 = vpop.f32.mrf.mxu0 }
 0x157   :  { %v1274_v19 = vpop.f32.mrf.mxu3  ;;  %v1178_v22 = vpop.f32.mrf.mxu1  ;;  %v1226_v23 = vadd.f32 %v1225_v18, %v1177_v61  ;;  %v1130_v24 = vadd.f32 %v1129_v21, %v2603_v25 }
 0x158   :  { %2064 = vst [vmem:[%s2735_s2 + $0x10] sm:$0xff] %v2036_v17  }
 0x159   :  { %v1275_v53 = vadd.f32 %v1274_v19, %v1226_v23  ;;  %v1179_v26 = vadd.f32 %v1178_v22, %v1130_v24 }
 0x15b   :  { %v1321_v33 = vmul.f32 0.2, %v1275_v53  ;;  %vm1305_vm6 = vcmp.gt.f32.partialorder %v1275_v53, 0.0 }
 0x15d   :  { %v1337_v37 = vsel %vm1305_vm6, %v1275_v53, %v1321_v33 }
 0x15e   :  { %v1227_v27 = vpop.f32.mrf.mxu2  ;;  %v1132_v30 = vpop.f32.mrf.mxu0 }
 0x15f   :  { %v1276_v29 = vpop.f32.mrf.mxu3  ;;  %v1228_v4 = vadd.f32 %v1227_v27, %v1179_v26  ;;  %v1181_v31 = vpop.f32.mrf.mxu1  ;;  %v1133_v36 = vadd.f32 %v1132_v30, %v2605_v32 }
 0x161   :  { %v1277_v8 = vadd.f32 %v1276_v29, %v1228_v4  ;;  %v1182_v25 = vadd.f32 %v1181_v31, %v1133_v36 }
 0x163   :  { %vm1306_vm7 = vcmp.gt.f32.partialorder %v1277_v8, 0.0  ;;  %v1322_v35 = vmul.f32 0.2, %v1277_v8 }
 0x165   :  { %v1338_v38 = vsel %vm1306_vm7, %v1277_v8, %v1322_v35 }
 0x166   :  { %v2041_v39 = vpack.c.bf16 %v1338_v38, %v1337_v37  ;;  %v1230_v40 = vpop.f32.mrf.mxu2  ;;  %v1134_v43 = vpop.f32.mrf.mxu0 }
 0x167   :  { %v1279_v42 = vpop.f32.mrf.mxu3  ;;  %v1183_v15 = vpop.f32.mrf.mxu1  ;;  %v1231_v44 = vadd.f32 %v1230_v40, %v1182_v25  ;;  %v1135_v45 = vadd.f32 %v1134_v43, %v2631_v54 }
 0x168   :  { %2065 = vst [vmem:[%s2735_s2 + $0x18] sm:$0xff] %v2041_v39  }
 0x169   :  { %v1280_v46 = vadd.f32 %v1279_v42, %v1231_v44  ;;  %v1184_v47 = vadd.f32 %v1183_v15, %v1135_v45 }
 0x16b   :  { %v1323_v55 = vmul.f32 0.2, %v1280_v46  ;;  %vm1307_vm8 = vcmp.gt.f32.partialorder %v1280_v46, 0.0 }
 0x16d   :  { %v1339_v58 = vsel %vm1307_vm8, %v1280_v46, %v1323_v55 }
 0x16e   :  { %v1232_v48 = vpop.f32.mrf.mxu2  ;;  %v1137_v51 = vpop.f32.mrf.mxu0 }
 0x16f   :  { %v1281_v49 = vpop.f32.mrf.mxu3  ;;  %v1233_v32 = vadd.f32 %v1232_v48, %v1184_v47  ;;  %v1186_v52 = vpop.f32.mrf.mxu1  ;;  %v1138_v34 = vadd.f32 %v1137_v51, %v2633_v62 }
 0x171   :  { %v1282_v56 = vadd.f32 %v1281_v49, %v1233_v32  ;;  %v1187_v54 = vadd.f32 %v1186_v52, %v1138_v34 }
 0x173   :  { %vm1308_vm9 = vcmp.gt.f32.partialorder %v1282_v56, 0.0  ;;  %v1324_v57 = vmul.f32 0.2, %v1282_v56 }
 0x175   :  { %v1340_v60 = vsel %vm1308_vm9, %v1282_v56, %v1324_v57 }
 0x176   :  { %v2046_v63 = vpack.c.bf16 %v1340_v60, %v1339_v58  ;;  %v1235_v0 = vpop.f32.mrf.mxu2  ;;  %v1139_v2 = vpop.f32.mrf.mxu0 }
 0x177   :  { %v1284_v1 = vpop.f32.mrf.mxu3  ;;  %v1188_v5 = vpop.f32.mrf.mxu1  ;;  %v1236_v6 = vadd.f32 %v1235_v0, %v1187_v54  ;;  %v1140_v41 = vadd.f32 %v1139_v2, %v2659_v20 }
 0x178   :  { %2066 = vst [vmem:[%s2735_s2 + $0x20] sm:$0xff] %v2046_v63  }
 0x179   :  { %v1285_v7 = vadd.f32 %v1284_v1, %v1236_v6  ;;  %v1189_v9 = vadd.f32 %v1188_v5, %v1140_v41 }
 0x17b   :  { %v1325_v14 = vmul.f32 0.2, %v1285_v7  ;;  %vm1309_vm10 = vcmp.gt.f32.partialorder %v1285_v7, 0.0 }
 0x17d   :  { %v1341_v19 = vsel %vm1309_vm10, %v1285_v7, %v1325_v14 }
 0x17e   :  { %v1237_v10 = vpop.f32.mrf.mxu2  ;;  %v1142_v12 = vpop.f32.mrf.mxu0 }
 0x17f   :  { %v1286_v11 = vpop.f32.mrf.mxu3  ;;  %v1238_v62 = vadd.f32 %v1237_v10, %v1189_v9  ;;  %v1191_v13 = vpop.f32.mrf.mxu1  ;;  %v1143_v18 = vadd.f32 %v1142_v12, %v2661_v28 }
 0x181   :  { %v1287_v16 = vadd.f32 %v1286_v11, %v1238_v62  ;;  %v1192_v20 = vadd.f32 %v1191_v13, %v1143_v18 }
 0x183   :  { %vm1310_vm11 = vcmp.gt.f32.partialorder %v1287_v16, 0.0  ;;  %v1326_v17 = vmul.f32 0.2, %v1287_v16 }
 0x185   :  { %v1342_v61 = vsel %vm1310_vm11, %v1287_v16, %v1326_v17 }
 0x186   :  { %v2051_v21 = vpack.c.bf16 %v1342_v61, %v1341_v19  ;;  %v1240_v22 = vpop.f32.mrf.mxu2  ;;  %v1144_v24 = vpop.f32.mrf.mxu0 }
 0x187   :  { %v1289_v23 = vpop.f32.mrf.mxu3  ;;  %v1193_v53 = vpop.f32.mrf.mxu1  ;;  %v1241_v26 = vadd.f32 %v1240_v22, %v1192_v20  ;;  %v1145_v27 = vadd.f32 %v1144_v24, %v2687_v50 }
 0x188   :  { %2067 = vst [vmem:[%s2735_s2 + $0x28] sm:$0xff] %v2051_v21  }
 0x189   :  { %v1290_v29 = vadd.f32 %v1289_v23, %v1241_v26  ;;  %v1194_v4 = vadd.f32 %v1193_v53, %v1145_v27 }
 0x18b   :  { %v1327_v8 = vmul.f32 0.2, %v1290_v29  ;;  %vm1311_vm12 = vcmp.gt.f32.partialorder %v1290_v29, 0.0 }
 0x18d   :  { %v1343_v39 = vsel %vm1311_vm12, %v1290_v29, %v1327_v8 }
 0x18e   :  { %v1242_v30 = vpop.f32.mrf.mxu2  ;;  %v1147_v33 = vpop.f32.mrf.mxu0 }
 0x18f   :  { %v1291_v31 = vpop.f32.mrf.mxu3  ;;  %v1243_v28 = vadd.f32 %v1242_v30, %v1194_v4  ;;  %v1196_v36 = vpop.f32.mrf.mxu1  ;;  %v1148_v38 = vadd.f32 %v1147_v33, %v2689_v59 }
 0x191   :  { %v1292_v35 = vadd.f32 %v1291_v31, %v1243_v28  ;;  %v1197_v50 = vadd.f32 %v1196_v36, %v1148_v38 }
 0x193   :  { %vm1312_vm13 = vcmp.gt.f32.partialorder %v1292_v35, 0.0  ;;  %v1328_v37 = vmul.f32 0.2, %v1292_v35 }
 0x195   :  { %v1344_v40 = vsel %vm1312_vm13, %v1292_v35, %v1328_v37 }
 0x196   :  { %v2056_v42 = vpack.c.bf16 %v1344_v40, %v1343_v39  ;;  %v1245_v25 = vpop.f32.mrf.mxu2  ;;  %v1149_v15 = vpop.f32.mrf.mxu0 }
 0x197   :  { %v1294_v43 = vpop.f32.mrf.mxu3  ;;  %v1246_v44 = vadd.f32 %v1245_v25, %v1197_v50  ;;  %v1150_v45 = vadd.f32 %v1149_v15, %v2691_v3  ;;  %v1198_v46 = vpop.f32.mrf.mxu1 }
 0x198   :  { %2068 = vst [vmem:[%s2735_s2 + $0x30] sm:$0xff] %v2056_v42  }
 0x199   :  { %v1295_v47 = vadd.f32 %v1294_v43, %v1246_v44  ;;  %v1199_v48 = vadd.f32 %v1198_v46, %v1150_v45 }
 0x19b   :  { %v1329_v51 = vmul.f32 0.2, %v1295_v47  ;;  %vm1313_vm14 = vcmp.gt.f32.partialorder %v1295_v47, 0.0 }
 0x19d   :  { %v1345_v56 = vsel %vm1313_vm14, %v1295_v47, %v1329_v51 }
 0x19e   :  { %v1247_v49 = vpop.f32.mrf.mxu2 }
 0x19f   :  { %v1248_v32 = vadd.f32 %v1247_v49, %v1199_v48  ;;  %v1296_v59 = vpop.f32.mrf.mxu3 }
 0x1a1   :  { %v1297_v52 = vadd.f32 %v1296_v59, %v1248_v32 }
 0x1a3   :  { %vm1314_vm15 = vcmp.gt.f32.partialorder %v1297_v52, 0.0  ;;  %v1330_v55 = vmul.f32 0.2, %v1297_v52 }
 0x1a5   :  { %v1346_v57 = vsel %vm1314_vm15, %v1297_v52, %v1330_v55 }
 0x1a6   :  { %v2061_v34 = vpack.c.bf16 %v1346_v57, %v1345_v56 }
 0x1a8   :  { %2069 = vst [vmem:[%s2735_s2 + $0x38] sm:$0xff] %v2061_v34  }

// kernel: discriminator_forward.6
= control target key start
LH: loop header
LB: loop body
LE: loop exit
PB: predicated region body
PF: predicated region fallthrough
CT: control target
= control target key end

     0   :  { %s5753_s1 = inlined_call_operand.vmem [shape: bf16[2048,256], index: 1, kind: input, shape index: {}]   ;;  %s5754_s0 = inlined_call_operand.vmem [shape: bf16[32,2048], index: 0, kind: input, shape index: {}]   ;;  %s5755_s2 = inlined_call_operand.vmem [shape: bf16[32,256], index: 2, kind: output, shape index: {}]  }
   0x1   :  { %v2569_v0 = vld [vmem:[%s5753_s1 + $0x70] sm:$0xf]  ;;  %v3582_v1 = vld [vmem:[%s5753_s1 + $0x74] sm:$0xf0]  ;;  %v2561_v11 = vld [vmem:[%s5753_s1 + $0x60] sm:$0xf] }
   0x2   :  { %v2633_v2 = vld [vmem:[%s5753_s1 + $0xf0] sm:$0xf]  ;;  %v2570_v3 = vor.u32 %v3582_v1, %v2569_v0  ;;  %v3598_v4 = vld [vmem:[%s5753_s1 + $0xf4] sm:$0xf0]  ;;  %v3580_v13 = vld [vmem:[%s5753_s1 + $0x64] sm:$0xf0] }
   0x3   :  { %v2697_v5 = vld [vmem:[%s5753_s1 + $0x170] sm:$0xf]  ;;  %v3614_v6 = vld [vmem:[%s5753_s1 + $0x174] sm:$0xf0]  ;;  %v2634_v7 = vor.u32 %v3598_v4, %v2633_v2  ;;  %v2625_v14 = vld [vmem:[%s5753_s1 + $0xe0] sm:$0xf]  ;;  %v2562_v16 = vor.u32 %v3580_v13, %v2561_v11 }
   0x4   :  { %v2698_v8 = vor.u32 %v3614_v6, %v2697_v5  ;;  %v2761_v9 = vld [vmem:[%s5753_s1 + $0x1f0] sm:$0xf]  ;;  %v3630_v10 = vld [vmem:[%s5753_s1 + $0x1f4] sm:$0xf0]  ;;  %1739 = vmatpush.bf16.msra.mxu0 %v2570_v3  ;;  %v3596_v15 = vld [vmem:[%s5753_s1 + $0xe4] sm:$0xf0] }
   0x5   :  { %v2762_v12 = vor.u32 %v3630_v10, %v2761_v9  ;;  %1758 = vmatpush.bf16.msra.mxu1 %v2634_v7  ;;  %v2626_v17 = vor.u32 %v3596_v15, %v2625_v14  ;;  %v2689_v18 = vld [vmem:[%s5753_s1 + $0x160] sm:$0xf]  ;;  %v3612_v19 = vld [vmem:[%s5753_s1 + $0x164] sm:$0xf0]  ;;  %v2553_v23 = vld [vmem:[%s5753_s1 + $0x50] sm:$0xf] }
   0x6   :  { %1777 = vmatpush.bf16.msra.mxu2 %v2698_v8  ;;  %v2753_v20 = vld [vmem:[%s5753_s1 + $0x1e0] sm:$0xf]  ;;  %v2690_v21 = vor.u32 %v3612_v19, %v2689_v18  ;;  %v3628_v22 = vld [vmem:[%s5753_s1 + $0x1e4] sm:$0xf0]  ;;  %v3578_v24 = vld [vmem:[%s5753_s1 + $0x54] sm:$0xf0] }
   0x7   :  { %1796 = vmatpush.bf16.msra.mxu3 %v2762_v12  ;;  %v2754_v25 = vor.u32 %v3628_v22, %v2753_v20  ;;  %v2617_v26 = vld [vmem:[%s5753_s1 + $0xd0] sm:$0xf]  ;;  %v3594_v27 = vld [vmem:[%s5753_s1 + $0xd4] sm:$0xf0]  ;;  %v2554_v29 = vor.u32 %v3578_v24, %v2553_v23  ;;  %v2545_v35 = vld [vmem:[%s5753_s1 + $0x40] sm:$0xf] }
   0x8   :  { %v2681_v28 = vld [vmem:[%s5753_s1 + $0x150] sm:$0xf]  ;;  %1740 = vmatpush.bf16.msra.mxu0 %v2562_v16  ;;  %v3610_v30 = vld [vmem:[%s5753_s1 + $0x154] sm:$0xf0]  ;;  %v2618_v33 = vor.u32 %v3594_v27, %v2617_v26  ;;  %v3576_v36 = vld [vmem:[%s5753_s1 + $0x44] sm:$0xf0] }
   0x9   :  { %v2745_v31 = vld [vmem:[%s5753_s1 + $0x1d0] sm:$0xf]  ;;  %v3626_v32 = vld [vmem:[%s5753_s1 + $0x1d4] sm:$0xf0]  ;;  %1759 = vmatpush.bf16.msra.mxu1 %v2626_v17  ;;  %v2682_v34 = vor.u32 %v3610_v30, %v2681_v28  ;;  %v2609_v37 = vld [vmem:[%s5753_s1 + $0xc0] sm:$0xf]  ;;  %v2546_v44 = vor.u32 %v3576_v36, %v2545_v35 }
   0xa   :  { %1778 = vmatpush.bf16.msra.mxu2 %v2690_v21  ;;  %v2746_v38 = vor.u32 %v3626_v32, %v2745_v31  ;;  %v3592_v39 = vld [vmem:[%s5753_s1 + $0xc4] sm:$0xf0]  ;;  %v2673_v40 = vld [vmem:[%s5753_s1 + $0x140] sm:$0xf]  ;;  %v2537_v47 = vld [vmem:[%s5753_s1 + $0x30] sm:$0xf] }
   0xb   :  { %1797 = vmatpush.bf16.msra.mxu3 %v2754_v25  ;;  %v3608_v41 = vld [vmem:[%s5753_s1 + $0x144] sm:$0xf0]  ;;  %v2737_v42 = vld [vmem:[%s5753_s1 + $0x1c0] sm:$0xf]  ;;  %v2610_v45 = vor.u32 %v3592_v39, %v2609_v37  ;;  %v3574_v48 = vld [vmem:[%s5753_s1 + $0x34] sm:$0xf0] }
   0xc   :  { %v3624_v43 = vld [vmem:[%s5753_s1 + $0x1c4] sm:$0xf0]  ;;  %1741 = vmatpush.bf16.msra.mxu0 %v2554_v29  ;;  %v2674_v46 = vor.u32 %v3608_v41, %v2673_v40  ;;  %v2601_v49 = vld [vmem:[%s5753_s1 + $0xb0] sm:$0xf]  ;;  %v3590_v51 = vld [vmem:[%s5753_s1 + $0xb4] sm:$0xf0]  ;;  %v2538_v56 = vor.u32 %v3574_v48, %v2537_v47 }
   0xd   :  { %1760 = vmatpush.bf16.msra.mxu1 %v2618_v33  ;;  %v2738_v50 = vor.u32 %v3624_v43, %v2737_v42  ;;  %v2665_v52 = vld [vmem:[%s5753_s1 + $0x130] sm:$0xf]  ;;  %v3606_v53 = vld [vmem:[%s5753_s1 + $0x134] sm:$0xf0]  ;;  %v2602_v57 = vor.u32 %v3590_v51, %v2601_v49  ;;  %v2529_v59 = vld [vmem:[%s5753_s1 + $0x20] sm:$0xf] }
   0xe   :  { %1779 = vmatpush.bf16.msra.mxu2 %v2682_v34  ;;  %v2729_v54 = vld [vmem:[%s5753_s1 + $0x1b0] sm:$0xf]  ;;  %v3622_v55 = vld [vmem:[%s5753_s1 + $0x1b4] sm:$0xf0]  ;;  %v2666_v58 = vor.u32 %v3606_v53, %v2665_v52  ;;  %v3572_v60 = vld [vmem:[%s5753_s1 + $0x24] sm:$0xf0] }
   0xf   :  { %1798 = vmatpush.bf16.msra.mxu3 %v2746_v38  ;;  %v2593_v61 = vld [vmem:[%s5753_s1 + $0xa0] sm:$0xf]  ;;  %v2730_v62 = vor.u32 %v3622_v55, %v2729_v54  ;;  %v3588_v63 = vld [vmem:[%s5753_s1 + $0xa4] sm:$0xf0]  ;;  %v2530_v4 = vor.u32 %v3572_v60, %v2529_v59  ;;  %v2521_v7 = vld [vmem:[%s5753_s1 + $0x10] sm:$0xf] }
  0x10   :  { %1742 = vmatpush.bf16.msra.mxu0 %v2546_v44  ;;  %v2657_v0 = vld [vmem:[%s5753_s1 + $0x120] sm:$0xf]  ;;  %v3604_v1 = vld [vmem:[%s5753_s1 + $0x124] sm:$0xf0]  ;;  %v2594_v5 = vor.u32 %v3588_v63, %v2593_v61  ;;  %v3570_v8 = vld [vmem:[%s5753_s1 + $0x14] sm:$0xf0] }
  0x11   :  { %1761 = vmatpush.bf16.msra.mxu1 %v2610_v45  ;;  %v2721_v2 = vld [vmem:[%s5753_s1 + $0x1a0] sm:$0xf]  ;;  %v3620_v3 = vld [vmem:[%s5753_s1 + $0x1a4] sm:$0xf0]  ;;  %v2658_v6 = vor.u32 %v3604_v1, %v2657_v0  ;;  %v2585_v9 = vld [vmem:[%s5753_s1 + $0x90] sm:$0xf]  ;;  %v2522_v17 = vor.u32 %v3570_v8, %v2521_v7 }
  0x12   :  { %1780 = vmatpush.bf16.msra.mxu2 %v2674_v46  ;;  %v2722_v10 = vor.u32 %v3620_v3, %v2721_v2  ;;  %v3586_v11 = vld [vmem:[%s5753_s1 + $0x94] sm:$0xf0]  ;;  %v2649_v12 = vld [vmem:[%s5753_s1 + $0x110] sm:$0xf]  ;;  %v2513_v16 = vld [vmem:[%s5753_s1] sm:$0xf] }
  0x13   :  { %1799 = vmatpush.bf16.msra.mxu3 %v2738_v50  ;;  %v3602_v13 = vld [vmem:[%s5753_s1 + $0x114] sm:$0xf0]  ;;  %v2713_v14 = vld [vmem:[%s5753_s1 + $0x190] sm:$0xf]  ;;  %v3568_v18 = vld [vmem:[%s5753_s1 + $0x4] sm:$0xf0]  ;;  %v2586_v21 = vor.u32 %v3586_v11, %v2585_v9 }
  0x14   :  { %1743 = vmatpush.bf16.msra.mxu0 %v2538_v56  ;;  %v3618_v15 = vld [vmem:[%s5753_s1 + $0x194] sm:$0xf0]  ;;  %v2577_v19 = vld [vmem:[%s5753_s1 + $0x80] sm:$0xf]  ;;  %v3584_v20 = vld [vmem:[%s5753_s1 + $0x84] sm:$0xf0]  ;;  %v2650_v22 = vor.u32 %v3602_v13, %v2649_v12  ;;  %v2514_v34 = vor.u32 %v3568_v18, %v2513_v16 }
  0x15   :  { %1762 = vmatpush.bf16.msra.mxu1 %v2602_v57  ;;  %v2641_v23 = vld [vmem:[%s5753_s1 + $0x100] sm:$0xf]  ;;  %v3600_v24 = vld [vmem:[%s5753_s1 + $0x104] sm:$0xf0]  ;;  %v2714_v26 = vor.u32 %v3618_v15, %v2713_v14  ;;  %v3535_v30 = vld [vmem:[%s5754_s0 + $0x4] sm:$0xf]  ;;  %v2578_v38 = vor.u32 %v3584_v20, %v2577_v19 }
  0x16   :  { %1781 = vmatpush.bf16.msra.mxu2 %v2666_v58  ;;  %v2705_v25 = vld [vmem:[%s5753_s1 + $0x180] sm:$0xf]  ;;  %v3616_v27 = vld [vmem:[%s5753_s1 + $0x184] sm:$0xf0]  ;;  %v2387_v31 = vld [vmem:[%s5754_s0 + $0x40] sm:$0xf0]  ;;  %v2642_v39 = vor.u32 %v3600_v24, %v2641_v23 }
  0x17   :  { %1800 = vmatpush.bf16.msra.mxu3 %v2730_v62  ;;  %v2385_v28 = vld [vmem:[%s5754_s0] sm:$0xf]  ;;  %v2953_v32 = vld [vmem:[%s5753_s1 + $0x370] sm:$0xf]  ;;  %v3678_v33 = vld [vmem:[%s5753_s1 + $0x374] sm:$0xf0]  ;;  %v2706_v43 = vor.u32 %v3616_v27, %v2705_v25  ;;  %v4086_v53 = vor.u32 %v3535_v30, %v2387_v31 }
  0x18   :  { %1744 = vmatpush.bf16.msra.mxu0 %v2530_v4  ;;  %v3543_v29 = vld [vmem:[%s5754_s0 + $0x3c] sm:$0xf0]  ;;  %v2393_v35 = vld [vmem:[%s5754_s0 + $0x8] sm:$0xf]  ;;  %v2889_v36 = vld [vmem:[%s5753_s1 + $0x2f0] sm:$0xf]  ;;  %v2954_v44 = vor.u32 %v3678_v33, %v2953_v32 }
  0x19   :  { %1763 = vmatpush.bf16.msra.mxu1 %v2594_v5  ;;  %v3662_v37 = vld [vmem:[%s5753_s1 + $0x2f4] sm:$0xf0]  ;;  %v3544_v40 = vld [vmem:[%s5754_s0 + $0x44] sm:$0xf0]  ;;  %v3536_v41 = vld [vmem:[%s5754_s0 + $0xc] sm:$0xf]  ;;  %v4075_v48 = vor.u32 %v3543_v29, %v2385_v28 }
  0x1a   :  { %1782 = vmatpush.bf16.msra.mxu2 %v2658_v6  ;;  %v2395_v42 = vld [vmem:[%s5754_s0 + $0x48] sm:$0xf0]  ;;  %v2825_v45 = vld [vmem:[%s5753_s1 + $0x270] sm:$0xf]  ;;  %v3646_v46 = vld [vmem:[%s5753_s1 + $0x274] sm:$0xf0]  ;;  %v2890_v49 = vor.u32 %v3662_v37, %v2889_v36  ;;  %v4088_v54 = vor.u32 %v3544_v40, %v2393_v35 }
  0x1b   :  { %1801 = vmatpush.bf16.msra.mxu3 %v2722_v10  ;;  %v3017_v47 = vld [vmem:[%s5753_s1 + $0x3f0] sm:$0xf]  ;;  %v3694_v50 = vld [vmem:[%s5753_s1 + $0x3f4] sm:$0xf0]  ;;  %v2945_v51 = vld [vmem:[%s5753_s1 + $0x360] sm:$0xf]  ;;  %v4096_v57 = vor.u32 %v3536_v41, %v2395_v42  ;;  %v2826_v58 = vor.u32 %v3646_v46, %v2825_v45 }
  0x1c   :  { %1745 = vmatpush.bf16.msra.mxu0 %v2522_v17  ;;  %v3676_v52 = vld [vmem:[%s5753_s1 + $0x364] sm:$0xf0]  ;;  %v2881_v55 = vld [vmem:[%s5753_s1 + $0x2e0] sm:$0xf]  ;;  %v3018_v59 = vor.u32 %v3694_v50, %v3017_v47  ;;  %v2937_v2 = vld [vmem:[%s5753_s1 + $0x350] sm:$0xf] }
  0x1d   :  { %1764 = vmatpush.bf16.msra.mxu1 %v2586_v21  ;;  %v3660_v56 = vld [vmem:[%s5753_s1 + $0x2e4] sm:$0xf0]  ;;  %v2946_v60 = vor.u32 %v3676_v52, %v2945_v51  ;;  %v2817_v61 = vld [vmem:[%s5753_s1 + $0x260] sm:$0xf]  ;;  %v3674_v3 = vld [vmem:[%s5753_s1 + $0x354] sm:$0xf0] }
  0x1e   :  { %1783 = vmatpush.bf16.msra.mxu2 %v2650_v22  ;;  %v3644_v62 = vld [vmem:[%s5753_s1 + $0x264] sm:$0xf0]  ;;  %v3009_v63 = vld [vmem:[%s5753_s1 + $0x3e0] sm:$0xf]  ;;  %v2882_v0 = vor.u32 %v3660_v56, %v2881_v55  ;;  %v2873_v4 = vld [vmem:[%s5753_s1 + $0x2d0] sm:$0xf]  ;;  %v2938_v8 = vor.u32 %v3674_v3, %v2937_v2 }
  0x1f   :  { %1802 = vmatpush.bf16.msra.mxu3 %v2714_v26  ;;  %v3692_v1 = vld [vmem:[%s5753_s1 + $0x3e4] sm:$0xf0]  ;;  %v3658_v5 = vld [vmem:[%s5753_s1 + $0x2d4] sm:$0xf0]  ;;  %v2818_v6 = vor.u32 %v3644_v62, %v2817_v61  ;;  %v2809_v9 = vld [vmem:[%s5753_s1 + $0x250] sm:$0xf] }
  0x20   :  { %1746 = vmatpush.bf16.msra.mxu0 %v2514_v34  ;;  %v3010_v7 = vor.u32 %v3692_v1, %v3009_v63  ;;  %v3642_v10 = vld [vmem:[%s5753_s1 + $0x254] sm:$0xf0]  ;;  %v3001_v11 = vld [vmem:[%s5753_s1 + $0x3d0] sm:$0xf]  ;;  %v2874_v12 = vor.u32 %v3658_v5, %v2873_v4  ;;  %v2929_v14 = vld [vmem:[%s5753_s1 + $0x340] sm:$0xf] }
  0x21   :  { %1765 = vmatpush.bf16.msra.mxu1 %v2578_v38  ;;  %v3690_v13 = vld [vmem:[%s5753_s1 + $0x3d4] sm:$0xf0]  ;;  %v3672_v15 = vld [vmem:[%s5753_s1 + $0x344] sm:$0xf0]  ;;  %v2865_v16 = vld [vmem:[%s5753_s1 + $0x2c0] sm:$0xf]  ;;  %v2810_v18 = vor.u32 %v3642_v10, %v2809_v9 }
  0x22   :  { %1784 = vmatpush.bf16.msra.mxu2 %v2642_v39  ;;  %v3656_v17 = vld [vmem:[%s5753_s1 + $0x2c4] sm:$0xf0]  ;;  %v2801_v19 = vld [vmem:[%s5753_s1 + $0x240] sm:$0xf]  ;;  %v3002_v22 = vor.u32 %v3690_v13, %v3001_v11  ;;  %v2930_v23 = vor.u32 %v3672_v15, %v2929_v14  ;;  %v3551_v28 = vld [vmem:[%s5754_s0 + $0x84] sm:$0xf] }
  0x23   :  { %1803 = vmatpush.bf16.msra.mxu3 %v2706_v43  ;;  %1747 = vmatmul.bf16.vlgmr.msra.gmra.mxu0 %v4075_v48  ;;  %v3640_v20 = vld [vmem:[%s5753_s1 + $0x244] sm:$0xf0]  ;;  %v2993_v21 = vld [vmem:[%s5753_s1 + $0x3c0] sm:$0xf]  ;;  %v2866_v27 = vor.u32 %v3656_v17, %v2865_v16  ;;  %v2451_v29 = vld [vmem:[%s5754_s0 + $0xc0] sm:$0xf0] }
  0x24   :  { %1766 = vmatmul.bf16.vlgmr.msra.gmra.mxu1 %v4086_v53  ;;  %1815 = vmatpush.bf16.msrb.mxu0 %v2826_v58  ;;  %v3688_v24 = vld [vmem:[%s5753_s1 + $0x3c4] sm:$0xf0]  ;;  %v2449_v25 = vld [vmem:[%s5754_s0 + $0x80] sm:$0xf]  ;;  %v2921_v30 = vld [vmem:[%s5753_s1 + $0x330] sm:$0xf]  ;;  %v2802_v35 = vor.u32 %v3640_v20, %v2801_v19  ;;  %v4218_v50 = vor.u32 %v3551_v28, %v2451_v29 }
  0x25   :  { %1834 = vmatpush.bf16.msrb.mxu1 %v2890_v49  ;;  %1785 = vmatmul.bf16.vlgmr.msra.gmra.mxu2 %v4088_v54  ;;  %v3559_v26 = vld [vmem:[%s5754_s0 + $0xbc] sm:$0xf0]  ;;  %v3670_v31 = vld [vmem:[%s5753_s1 + $0x334] sm:$0xf0]  ;;  %v2457_v32 = vld [vmem:[%s5754_s0 + $0x88] sm:$0xf]  ;;  %v2994_v39 = vor.u32 %v3688_v24, %v2993_v21 }
  0x26   :  { %1853 = vmatpush.bf16.msrb.mxu2 %v2954_v44  ;;  %1804 = vmatmul.bf16.vlgmr.msra.gmra.mxu3 %v4096_v57  ;;  %v2857_v33 = vld [vmem:[%s5753_s1 + $0x2b0] sm:$0xf]  ;;  %v3654_v34 = vld [vmem:[%s5753_s1 + $0x2b4] sm:$0xf0]  ;;  %v3560_v36 = vld [vmem:[%s5754_s0 + $0xc4] sm:$0xf0]  ;;  %v2922_v40 = vor.u32 %v3670_v31, %v2921_v30  ;;  %v4207_v44 = vor.u32 %v3559_v26, %v2449_v25 }
  0x27   :  { %1872 = vmatpush.bf16.msrb.mxu3 %v3018_v59  ;;  %v3552_v37 = vld [vmem:[%s5754_s0 + $0x8c] sm:$0xf]  ;;  %v2793_v41 = vld [vmem:[%s5753_s1 + $0x230] sm:$0xf]  ;;  %v3638_v42 = vld [vmem:[%s5753_s1 + $0x234] sm:$0xf0]  ;;  %v2858_v45 = vor.u32 %v3654_v34, %v2857_v33  ;;  %v4220_v51 = vor.u32 %v3560_v36, %v2457_v32 }
  0x28   :  { %1816 = vmatpush.bf16.msrb.mxu0 %v2818_v6  ;;  %v2459_v38 = vld [vmem:[%s5754_s0 + $0xc8] sm:$0xf0]  ;;  %v2985_v43 = vld [vmem:[%s5753_s1 + $0x3b0] sm:$0xf]  ;;  %v3686_v46 = vld [vmem:[%s5753_s1 + $0x3b4] sm:$0xf0]  ;;  %v2794_v58 = vor.u32 %v3638_v42, %v2793_v41 }
  0x29   :  { %1835 = vmatpush.bf16.msrb.mxu1 %v2882_v0  ;;  %v2913_v47 = vld [vmem:[%s5753_s1 + $0x320] sm:$0xf]  ;;  %v3668_v49 = vld [vmem:[%s5753_s1 + $0x324] sm:$0xf0]  ;;  %v4228_v56 = vor.u32 %v3552_v37, %v2459_v38  ;;  %v2986_v59 = vor.u32 %v3686_v46, %v2985_v43  ;;  %v2905_v2 = vld [vmem:[%s5753_s1 + $0x310] sm:$0xf] }
  0x2a   :  { %1854 = vmatpush.bf16.msrb.mxu2 %v2946_v60  ;;  %v2849_v52 = vld [vmem:[%s5753_s1 + $0x2a0] sm:$0xf]  ;;  %v3652_v55 = vld [vmem:[%s5753_s1 + $0x2a4] sm:$0xf0]  ;;  %v2914_v60 = vor.u32 %v3668_v49, %v2913_v47  ;;  %v3666_v3 = vld [vmem:[%s5753_s1 + $0x314] sm:$0xf0] }
  0x2b   :  { %1873 = vmatpush.bf16.msrb.mxu3 %v3010_v7  ;;  %v2785_v61 = vld [vmem:[%s5753_s1 + $0x220] sm:$0xf]  ;;  %v3636_v62 = vld [vmem:[%s5753_s1 + $0x224] sm:$0xf0]  ;;  %v2850_v0 = vor.u32 %v3652_v55, %v2849_v52  ;;  %v2841_v4 = vld [vmem:[%s5753_s1 + $0x290] sm:$0xf]  ;;  %v2906_v9 = vor.u32 %v3666_v3, %v2905_v2 }
  0x2c   :  { %1817 = vmatpush.bf16.msrb.mxu0 %v2810_v18  ;;  %v2977_v63 = vld [vmem:[%s5753_s1 + $0x3a0] sm:$0xf]  ;;  %v3684_v1 = vld [vmem:[%s5753_s1 + $0x3a4] sm:$0xf0]  ;;  %v3650_v5 = vld [vmem:[%s5753_s1 + $0x294] sm:$0xf0]  ;;  %v2786_v6 = vor.u32 %v3636_v62, %v2785_v61 }
  0x2d   :  { %1836 = vmatpush.bf16.msrb.mxu1 %v2874_v12  ;;  %v2777_v7 = vld [vmem:[%s5753_s1 + $0x210] sm:$0xf]  ;;  %v3634_v10 = vld [vmem:[%s5753_s1 + $0x214] sm:$0xf0]  ;;  %v2842_v13 = vor.u32 %v3650_v5, %v2841_v4  ;;  %v2897_v14 = vld [vmem:[%s5753_s1 + $0x300] sm:$0xf] }
  0x2e   :  { %1855 = vmatpush.bf16.msrb.mxu2 %v2938_v8  ;;  %v2978_v8 = vor.u32 %v3684_v1, %v2977_v63  ;;  %v2969_v11 = vld [vmem:[%s5753_s1 + $0x390] sm:$0xf]  ;;  %v3682_v12 = vld [vmem:[%s5753_s1 + $0x394] sm:$0xf0]  ;;  %v3664_v15 = vld [vmem:[%s5753_s1 + $0x304] sm:$0xf0]  ;;  %v2778_v20 = vor.u32 %v3634_v10, %v2777_v7 }
  0x2f   :  { %1874 = vmatpush.bf16.msrb.mxu3 %v3002_v22  ;;  %v2833_v16 = vld [vmem:[%s5753_s1 + $0x280] sm:$0xf]  ;;  %v3648_v17 = vld [vmem:[%s5753_s1 + $0x284] sm:$0xf0]  ;;  %v3209_v18 = vld [vmem:[%s5753_s1 + $0x570] sm:$0xf]  ;;  %v2970_v24 = vor.u32 %v3682_v12, %v2969_v11  ;;  %v2898_v25 = vor.u32 %v3664_v15, %v2897_v14 }
  0x30   :  { %1818 = vmatpush.bf16.msrb.mxu0 %v2802_v35  ;;  %v3742_v19 = vld [vmem:[%s5753_s1 + $0x574] sm:$0xf0]  ;;  %v2769_v21 = vld [vmem:[%s5753_s1 + $0x200] sm:$0xf]  ;;  %v3145_v22 = vld [vmem:[%s5753_s1 + $0x4f0] sm:$0xf]  ;;  %v2834_v29 = vor.u32 %v3648_v17, %v2833_v16 }
  0x31   :  { %1837 = vmatpush.bf16.msrb.mxu1 %v2866_v27  ;;  %v3632_v26 = vld [vmem:[%s5753_s1 + $0x204] sm:$0xf0]  ;;  %v2961_v27 = vld [vmem:[%s5753_s1 + $0x380] sm:$0xf]  ;;  %v2401_v30 = vld [vmem:[%s5754_s0 + $0x10] sm:$0xf]  ;;  %v3210_v34 = vor.u32 %v3742_v19, %v3209_v18 }
  0x32   :  { %1856 = vmatpush.bf16.msrb.mxu2 %v2930_v23  ;;  %v3726_v23 = vld [vmem:[%s5753_s1 + $0x4f4] sm:$0xf0]  ;;  %v3680_v28 = vld [vmem:[%s5753_s1 + $0x384] sm:$0xf0]  ;;  %v3545_v31 = vld [vmem:[%s5754_s0 + $0x4c] sm:$0xf0]  ;;  %v2770_v42 = vor.u32 %v3632_v26, %v2769_v21 }
  0x33   :  { %1875 = vmatpush.bf16.msrb.mxu3 %v2994_v39  ;;  %1752 = vmatmul.bf16.gmra.mxu0 %v4207_v44  ;;  %v3537_v32 = vld [vmem:[%s5754_s0 + $0x14] sm:$0xf]  ;;  %v3081_v35 = vld [vmem:[%s5753_s1 + $0x470] sm:$0xf]  ;;  %v3710_v36 = vld [vmem:[%s5753_s1 + $0x474] sm:$0xf0]  ;;  %v3146_v38 = vor.u32 %v3726_v23, %v3145_v22  ;;  %v2962_v47 = vor.u32 %v3680_v28, %v2961_v27 }
  0x34   :  { %1771 = vmatmul.bf16.gmra.mxu1 %v4218_v50  ;;  %1819 = vmatpush.bf16.msrb.mxu0 %v2794_v58  ;;  %v2403_v33 = vld [vmem:[%s5754_s0 + $0x50] sm:$0xf0]  ;;  %v3273_v37 = vld [vmem:[%s5753_s1 + $0x5f0] sm:$0xf]  ;;  %v3758_v39 = vld [vmem:[%s5753_s1 + $0x5f4] sm:$0xf0]  ;;  %v3082_v52 = vor.u32 %v3710_v36, %v3081_v35 }
  0x35   :  { %1838 = vmatpush.bf16.msrb.mxu1 %v2858_v45  ;;  %1790 = vmatmul.bf16.gmra.mxu2 %v4220_v51  ;;  %v3740_v41 = vld [vmem:[%s5753_s1 + $0x564] sm:$0xf0]  ;;  %v2409_v43 = vld [vmem:[%s5754_s0 + $0x18] sm:$0xf]  ;;  %v3538_v46 = vld [vmem:[%s5754_s0 + $0x1c] sm:$0xf]  ;;  %v4365_v1 = vor.u32 %v3537_v32, %v2403_v33 }
  0x36   :  { %1857 = vmatpush.bf16.msrb.mxu2 %v2922_v40  ;;  %1809 = vmatmul.bf16.gmra.mxu3 %v4228_v56  ;;  %v3201_v40 = vld [vmem:[%s5753_s1 + $0x560] sm:$0xf]  ;;  %v3546_v45 = vld [vmem:[%s5754_s0 + $0x54] sm:$0xf0]  ;;  %v2411_v49 = vld [vmem:[%s5754_s0 + $0x58] sm:$0xf0] }
  0x37   :  { %1876 = vmatpush.bf16.msrb.mxu3 %v2986_v59  ;;  %v3073_v55 = vld [vmem:[%s5753_s1 + $0x460] sm:$0xf]  ;;  %v3708_v58 = vld [vmem:[%s5753_s1 + $0x464] sm:$0xf0]  ;;  %v3274_v59 = vor.u32 %v3758_v39, %v3273_v37  ;;  %v3193_v3 = vld [vmem:[%s5753_s1 + $0x550] sm:$0xf]  ;;  %v4376_v5 = vor.u32 %v3546_v45, %v2409_v43 }
  0x38   :  { %1820 = vmatpush.bf16.msrb.mxu0 %v2786_v6  ;;  %v3137_v61 = vld [vmem:[%s5753_s1 + $0x4e0] sm:$0xf]  ;;  %v3724_v62 = vld [vmem:[%s5753_s1 + $0x4e4] sm:$0xf0]  ;;  %v3738_v4 = vld [vmem:[%s5753_s1 + $0x554] sm:$0xf0]  ;;  %v4378_v6 = vor.u32 %v3538_v46, %v2411_v49  ;;  %v3074_v7 = vor.u32 %v3708_v58, %v3073_v55 }
  0x39   :  { %1839 = vmatpush.bf16.msrb.mxu1 %v2850_v0  ;;  %v3265_v63 = vld [vmem:[%s5753_s1 + $0x5e0] sm:$0xf]  ;;  %v4363_v0 = vor.u32 %v3545_v31, %v2401_v30  ;;  %v3756_v2 = vld [vmem:[%s5753_s1 + $0x5e4] sm:$0xf0]  ;;  %v3706_v10 = vld [vmem:[%s5753_s1 + $0x454] sm:$0xf0]  ;;  %v3194_v12 = vor.u32 %v3738_v4, %v3193_v3 }
  0x3a   :  { %1858 = vmatpush.bf16.msrb.mxu2 %v2914_v60  ;;  %v3202_v60 = vor.u32 %v3740_v41, %v3201_v40  ;;  %v3266_v11 = vor.u32 %v3756_v2, %v3265_v63  ;;  %v3722_v14 = vld [vmem:[%s5753_s1 + $0x4d4] sm:$0xf0]  ;;  %v3257_v15 = vld [vmem:[%s5753_s1 + $0x5d0] sm:$0xf]  ;;  %v3185_v17 = vld [vmem:[%s5753_s1 + $0x540] sm:$0xf] }
  0x3b   :  { %1877 = vmatpush.bf16.msrb.mxu3 %v2978_v8  ;;  %v3138_v8 = vor.u32 %v3724_v62, %v3137_v61  ;;  %v3754_v16 = vld [vmem:[%s5753_s1 + $0x5d4] sm:$0xf0]  ;;  %v3736_v18 = vld [vmem:[%s5753_s1 + $0x544] sm:$0xf0]  ;;  %v3057_v21 = vld [vmem:[%s5753_s1 + $0x440] sm:$0xf] }
  0x3c   :  { %1821 = vmatpush.bf16.msrb.mxu0 %v2778_v20  ;;  %v3704_v22 = vld [vmem:[%s5753_s1 + $0x444] sm:$0xf0]  ;;  %v3258_v23 = vor.u32 %v3754_v16, %v3257_v15  ;;  %v3249_v27 = vld [vmem:[%s5753_s1 + $0x5c0] sm:$0xf]  ;;  %v3734_v30 = vld [vmem:[%s5753_s1 + $0x534] sm:$0xf0] }
  0x3d   :  { %1840 = vmatpush.bf16.msrb.mxu1 %v2842_v13  ;;  %v3129_v13 = vld [vmem:[%s5753_s1 + $0x4d0] sm:$0xf]  ;;  %v3720_v26 = vld [vmem:[%s5753_s1 + $0x4c4] sm:$0xf0]  ;;  %v3058_v31 = vor.u32 %v3704_v22, %v3057_v21  ;;  %v2467_v39 = vld [vmem:[%s5754_s0 + $0xd0] sm:$0xf0] }
  0x3e   :  { %1859 = vmatpush.bf16.msrb.mxu2 %v2906_v9  ;;  %v3065_v9 = vld [vmem:[%s5753_s1 + $0x450] sm:$0xf]  ;;  %v3130_v20 = vor.u32 %v3722_v14, %v3129_v13  ;;  %v3752_v28 = vld [vmem:[%s5753_s1 + $0x5c4] sm:$0xf0]  ;;  %v3750_v45 = vld [vmem:[%s5753_s1 + $0x5b4] sm:$0xf0] }
  0x3f   :  { %1878 = vmatpush.bf16.msrb.mxu3 %v2970_v24  ;;  %v3066_v19 = vor.u32 %v3706_v10, %v3065_v9  ;;  %v3186_v24 = vor.u32 %v3736_v18, %v3185_v17  ;;  %v3049_v33 = vld [vmem:[%s5753_s1 + $0x430] sm:$0xf]  ;;  %v3250_v35 = vor.u32 %v3752_v28, %v3249_v27  ;;  %v3169_v46 = vld [vmem:[%s5753_s1 + $0x520] sm:$0xf]  ;;  %v2473_v49 = vld [vmem:[%s5754_s0 + $0x98] sm:$0xf] }
  0x40   :  { %1822 = vmatpush.bf16.msrb.mxu0 %v2770_v42  ;;  %v2465_v36 = vld [vmem:[%s5754_s0 + $0x90] sm:$0xf]  ;;  %v3718_v42 = vld [vmem:[%s5753_s1 + $0x4b4] sm:$0xf0]  ;;  %v3554_v55 = vld [vmem:[%s5754_s0 + $0x9c] sm:$0xf] }
  0x41   :  { %1841 = vmatpush.bf16.msrb.mxu1 %v2834_v29  ;;  %v3177_v29 = vld [vmem:[%s5753_s1 + $0x530] sm:$0xf]  ;;  %v2475_v58 = vld [vmem:[%s5754_s0 + $0xd8] sm:$0xf0]  ;;  %v3041_v61 = vld [vmem:[%s5753_s1 + $0x420] sm:$0xf] }
  0x42   :  { %1860 = vmatpush.bf16.msrb.mxu2 %v2898_v25  ;;  %v3121_v25 = vld [vmem:[%s5753_s1 + $0x4c0] sm:$0xf]  ;;  %v3561_v37 = vld [vmem:[%s5754_s0 + $0xcc] sm:$0xf0]  ;;  %v3178_v40 = vor.u32 %v3734_v30, %v3177_v29  ;;  %v3700_v62 = vld [vmem:[%s5753_s1 + $0x424] sm:$0xf0]  ;;  %v4510_v14 = vor.u32 %v3554_v55, %v2475_v58 }
  0x43   :  { %1879 = vmatpush.bf16.msrb.mxu3 %v2962_v47  ;;  %1823 = vmatmul.bf16.vlgmr.msrb.gmra.mxu0 %v4363_v0  ;;  %v3122_v32 = vor.u32 %v3720_v26, %v3121_v25  ;;  %v3113_v41 = vld [vmem:[%s5753_s1 + $0x4b0] sm:$0xf]  ;;  %v3732_v47 = vld [vmem:[%s5753_s1 + $0x524] sm:$0xf0]  ;;  %v3105_v3 = vld [vmem:[%s5753_s1 + $0x4a0] sm:$0xf]  ;;  %v3042_v15 = vor.u32 %v3700_v62, %v3041_v61 }
  0x44   :  { %1891 = vmatpush.bf16.msra.mxu0 %v3082_v52  ;;  %1842 = vmatmul.bf16.vlgmr.msrb.gmra.mxu1 %v4365_v1  ;;  %v3241_v43 = vld [vmem:[%s5753_s1 + $0x5b0] sm:$0xf]  ;;  %v3562_v52 = vld [vmem:[%s5754_s0 + $0xd4] sm:$0xf0]  ;;  %v3170_v2 = vor.u32 %v3732_v47, %v3169_v46  ;;  %v3716_v4 = vld [vmem:[%s5753_s1 + $0x4a4] sm:$0xf0] }
  0x45   :  { %1910 = vmatpush.bf16.msra.mxu1 %v3146_v38  ;;  %1861 = vmatmul.bf16.vlgmr.msrb.gmra.mxu2 %v4376_v5  ;;  %v3553_v38 = vld [vmem:[%s5754_s0 + $0x94] sm:$0xf]  ;;  %v3242_v63 = vor.u32 %v3750_v45, %v3241_v43  ;;  %v3748_v10 = vld [vmem:[%s5753_s1 + $0x5a4] sm:$0xf0]  ;;  %v4508_v13 = vor.u32 %v3562_v52, %v2473_v49  ;;  %v3106_v16 = vor.u32 %v3716_v4, %v3105_v3  ;;  %v3033_v17 = vld [vmem:[%s5753_s1 + $0x410] sm:$0xf] }
  0x46   :  { %1929 = vmatpush.bf16.msra.mxu2 %v3210_v34  ;;  %1880 = vmatmul.bf16.vlgmr.msrb.gmra.mxu3 %v4378_v6  ;;  %v3702_v34 = vld [vmem:[%s5753_s1 + $0x434] sm:$0xf0]  ;;  %v4497_v9 = vor.u32 %v3553_v38, %v2467_v39  ;;  %v3097_v21 = vld [vmem:[%s5753_s1 + $0x490] sm:$0xf]  ;;  %v3153_v25 = vld [vmem:[%s5753_s1 + $0x500] sm:$0xf] }
  0x47   :  { %1948 = vmatpush.bf16.msra.mxu3 %v3274_v59  ;;  %v3050_v59 = vor.u32 %v3702_v34, %v3049_v33  ;;  %v3698_v18 = vld [vmem:[%s5753_s1 + $0x414] sm:$0xf0]  ;;  %v3728_v26 = vld [vmem:[%s5753_s1 + $0x504] sm:$0xf0]  ;;  %v3465_v27 = vld [vmem:[%s5753_s1 + $0x770] sm:$0xf] }
  0x48   :  { %1892 = vmatpush.bf16.msra.mxu0 %v3074_v7  ;;  %v3233_v7 = vld [vmem:[%s5753_s1 + $0x5a0] sm:$0xf]  ;;  %v3714_v22 = vld [vmem:[%s5753_s1 + $0x494] sm:$0xf0]  ;;  %v3034_v29 = vor.u32 %v3698_v18, %v3033_v17  ;;  %v3744_v38 = vld [vmem:[%s5753_s1 + $0x584] sm:$0xf0] }
  0x49   :  { %1911 = vmatpush.bf16.msra.mxu1 %v3138_v8  ;;  %v4495_v8 = vor.u32 %v3561_v37, %v2465_v36  ;;  %v3806_v28 = vld [vmem:[%s5753_s1 + $0x774] sm:$0xf0]  ;;  %v3098_v30 = vor.u32 %v3714_v22, %v3097_v21  ;;  %v3089_v33 = vld [vmem:[%s5753_s1 + $0x480] sm:$0xf]  ;;  %v3712_v36 = vld [vmem:[%s5753_s1 + $0x484] sm:$0xf0] }
  0x4a   :  { %1930 = vmatpush.bf16.msra.mxu2 %v3202_v60  ;;  %v3114_v60 = vor.u32 %v3718_v42, %v3113_v41  ;;  %v3217_v37 = vld [vmem:[%s5753_s1 + $0x580] sm:$0xf]  ;;  %v3466_v39 = vor.u32 %v3806_v28, %v3465_v27  ;;  %v3774_v41 = vld [vmem:[%s5753_s1 + $0x674] sm:$0xf0]  ;;  %v3401_v42 = vld [vmem:[%s5753_s1 + $0x6f0] sm:$0xf]  ;;  %v3090_v49 = vor.u32 %v3712_v36, %v3089_v33 }
  0x4b   :  { %1949 = vmatpush.bf16.msra.mxu3 %v3266_v11  ;;  %v3161_v11 = vld [vmem:[%s5753_s1 + $0x510] sm:$0xf]  ;;  %v3790_v43 = vld [vmem:[%s5753_s1 + $0x6f4] sm:$0xf0]  ;;  %v3457_v52 = vld [vmem:[%s5753_s1 + $0x760] sm:$0xf]  ;;  %v3218_v58 = vor.u32 %v3744_v38, %v3217_v37 }
  0x4c   :  { %1893 = vmatpush.bf16.msra.mxu0 %v3066_v19  ;;  %v3234_v19 = vor.u32 %v3748_v10, %v3233_v7  ;;  %v3529_v45 = vld [vmem:[%s5753_s1 + $0x7f0] sm:$0xf]  ;;  %v3822_v46 = vld [vmem:[%s5753_s1 + $0x7f4] sm:$0xf0]  ;;  %v3804_v55 = vld [vmem:[%s5753_s1 + $0x764] sm:$0xf0] }
  0x4d   :  { %1912 = vmatpush.bf16.msra.mxu1 %v3130_v20  ;;  %v3539_v61 = vld [vmem:[%s5754_s0 + $0x24] sm:$0xf]  ;;  %v3530_v3 = vor.u32 %v3822_v46, %v3529_v45  ;;  %v3329_v4 = vld [vmem:[%s5753_s1 + $0x660] sm:$0xf]  ;;  %v3772_v7 = vld [vmem:[%s5753_s1 + $0x664] sm:$0xf0] }
  0x4e   :  { %1931 = vmatpush.bf16.msra.mxu2 %v3194_v12  ;;  %v3730_v12 = vld [vmem:[%s5753_s1 + $0x514] sm:$0xf0]  ;;  %v2425_v10 = vld [vmem:[%s5754_s0 + $0x28] sm:$0xf]  ;;  %v3393_v17 = vld [vmem:[%s5753_s1 + $0x6e0] sm:$0xf] }
  0x4f   :  { %1950 = vmatpush.bf16.msra.mxu3 %v3258_v23  ;;  %v3162_v20 = vor.u32 %v3730_v12, %v3161_v11  ;;  %v3225_v23 = vld [vmem:[%s5753_s1 + $0x590] sm:$0xf]  ;;  %v3548_v11 = vld [vmem:[%s5754_s0 + $0x64] sm:$0xf0]  ;;  %v3540_v12 = vld [vmem:[%s5754_s0 + $0x2c] sm:$0xf] }
  0x50   :  { %1894 = vmatpush.bf16.msra.mxu0 %v3058_v31  ;;  %v3025_v31 = vld [vmem:[%s5753_s1 + $0x400] sm:$0xf]  ;;  %v3788_v18 = vld [vmem:[%s5753_s1 + $0x6e4] sm:$0xf0]  ;;  %v3449_v22 = vld [vmem:[%s5753_s1 + $0x750] sm:$0xf]  ;;  %v4646_v28 = vor.u32 %v3548_v11, %v2425_v10 }
  0x51   :  { %1913 = vmatpush.bf16.msra.mxu1 %v3122_v32  ;;  %v3696_v32 = vld [vmem:[%s5753_s1 + $0x404] sm:$0xf0]  ;;  %v3770_v27 = vld [vmem:[%s5753_s1 + $0x654] sm:$0xf0]  ;;  %v3513_v36 = vld [vmem:[%s5753_s1 + $0x7d0] sm:$0xf] }
  0x52   :  { %1932 = vmatpush.bf16.msra.mxu2 %v3186_v24  ;;  %v3746_v24 = vld [vmem:[%s5753_s1 + $0x594] sm:$0xf0]  ;;  %v3026_v47 = vor.u32 %v3696_v32, %v3025_v31  ;;  %v3820_v21 = vld [vmem:[%s5753_s1 + $0x7e4] sm:$0xf0]  ;;  %v3385_v32 = vld [vmem:[%s5753_s1 + $0x6d0] sm:$0xf] }
  0x53   :  { %1951 = vmatpush.bf16.msra.mxu3 %v3250_v35  ;;  %1828 = vmatmul.bf16.gmra.mxu0 %v4495_v8  ;;  %v3226_v34 = vor.u32 %v3746_v24, %v3225_v23  ;;  %v3154_v35 = vor.u32 %v3728_v26, %v3153_v25  ;;  %v3802_v25 = vld [vmem:[%s5753_s1 + $0x754] sm:$0xf0]  ;;  %v3321_v26 = vld [vmem:[%s5753_s1 + $0x650] sm:$0xf]  ;;  %v3441_v38 = vld [vmem:[%s5753_s1 + $0x740] sm:$0xf] }
  0x54   :  { %1895 = vmatpush.bf16.msra.mxu0 %v3050_v59  ;;  %1847 = vmatmul.bf16.gmra.mxu1 %v4497_v9  ;;  %v2417_v59 = vld [vmem:[%s5754_s0 + $0x20] sm:$0xf]  ;;  %v3786_v33 = vld [vmem:[%s5753_s1 + $0x6d4] sm:$0xf0]  ;;  %v3784_v46 = vld [vmem:[%s5753_s1 + $0x6c4] sm:$0xf0] }
  0x55   :  { %1914 = vmatpush.bf16.msra.mxu1 %v3114_v60  ;;  %1866 = vmatmul.bf16.gmra.mxu2 %v4508_v13  ;;  %v3547_v60 = vld [vmem:[%s5754_s0 + $0x5c] sm:$0xf0]  ;;  %v3818_v37 = vld [vmem:[%s5753_s1 + $0x7d4] sm:$0xf0]  ;;  %v3555_v10 = vld [vmem:[%s5754_s0 + $0xa4] sm:$0xf] }
  0x56   :  { %1933 = vmatpush.bf16.msra.mxu2 %v3178_v40  ;;  %1885 = vmatmul.bf16.gmra.mxu3 %v4510_v14  ;;  %v3337_v40 = vld [vmem:[%s5753_s1 + $0x670] sm:$0xf]  ;;  %v4633_v23 = vor.u32 %v3547_v60, %v2417_v59  ;;  %v3377_v45 = vld [vmem:[%s5753_s1 + $0x6c0] sm:$0xf]  ;;  %v3798_v59 = vld [vmem:[%s5753_s1 + $0x734] sm:$0xf0] }
  0x57   :  { %1952 = vmatpush.bf16.msra.mxu3 %v3242_v63  ;;  %v3338_v62 = vor.u32 %v3774_v41, %v3337_v40  ;;  %v2419_v63 = vld [vmem:[%s5754_s0 + $0x60] sm:$0xf0]  ;;  %v3313_v40 = vld [vmem:[%s5753_s1 + $0x640] sm:$0xf]  ;;  %v3768_v41 = vld [vmem:[%s5753_s1 + $0x644] sm:$0xf0] }
  0x58   :  { %1896 = vmatpush.bf16.msra.mxu0 %v3042_v15  ;;  %v3458_v15 = vor.u32 %v3804_v55, %v3457_v52  ;;  %v4635_v24 = vor.u32 %v3539_v61, %v2419_v63  ;;  %v3505_v52 = vld [vmem:[%s5753_s1 + $0x7c0] sm:$0xf]  ;;  %v3816_v55 = vld [vmem:[%s5753_s1 + $0x7c4] sm:$0xf0]  ;;  %v3305_v60 = vld [vmem:[%s5753_s1 + $0x630] sm:$0xf] }
  0x59   :  { %1915 = vmatpush.bf16.msra.mxu1 %v3106_v16  ;;  %v2427_v16 = vld [vmem:[%s5754_s0 + $0x68] sm:$0xf0]  ;;  %v3766_v61 = vld [vmem:[%s5753_s1 + $0x634] sm:$0xf0]  ;;  %v3506_v63 = vor.u32 %v3816_v55, %v3505_v52  ;;  %v2483_v11 = vld [vmem:[%s5754_s0 + $0xe0] sm:$0xf0] }
  0x5a   :  { %1934 = vmatpush.bf16.msra.mxu2 %v3170_v2  ;;  %v3402_v2 = vor.u32 %v3790_v43, %v3401_v42  ;;  %v3386_v42 = vor.u32 %v3786_v33, %v3385_v32  ;;  %v3514_v43 = vor.u32 %v3818_v37, %v3513_v36  ;;  %v3361_v32 = vld [vmem:[%s5753_s1 + $0x6a0] sm:$0xf]  ;;  %v3780_v33 = vld [vmem:[%s5753_s1 + $0x6a4] sm:$0xf0]  ;;  %v3353_v52 = vld [vmem:[%s5753_s1 + $0x690] sm:$0xf] }
  0x5b   :  { %1953 = vmatpush.bf16.msra.mxu3 %v3234_v19  ;;  %v3330_v19 = vor.u32 %v3772_v7, %v3329_v4  ;;  %v2481_v4 = vld [vmem:[%s5754_s0 + $0xa0] sm:$0xf]  ;;  %v3812_v37 = vld [vmem:[%s5753_s1 + $0x7a4] sm:$0xf0]  ;;  %v3778_v55 = vld [vmem:[%s5753_s1 + $0x694] sm:$0xf0] }
  0x5c   :  { %1897 = vmatpush.bf16.msra.mxu0 %v3034_v29  ;;  %v4648_v29 = vor.u32 %v3540_v12, %v2427_v16  ;;  %v3563_v7 = vld [vmem:[%s5754_s0 + $0xdc] sm:$0xf0]  ;;  %v3497_v16 = vld [vmem:[%s5753_s1 + $0x7b0] sm:$0xf] }
  0x5d   :  { %1916 = vmatpush.bf16.msra.mxu1 %v3098_v30  ;;  %v3394_v30 = vor.u32 %v3788_v18, %v3393_v17  ;;  %v3814_v17 = vld [vmem:[%s5753_s1 + $0x7b4] sm:$0xf0]  ;;  %v3425_v18 = vld [vmem:[%s5753_s1 + $0x720] sm:$0xf] }
  0x5e   :  { %1935 = vmatpush.bf16.msra.mxu2 %v3162_v20  ;;  %v3521_v20 = vld [vmem:[%s5753_s1 + $0x7e0] sm:$0xf] }
  0x5f   :  { %1954 = vmatpush.bf16.msra.mxu3 %v3226_v34  ;;  %v3522_v31 = vor.u32 %v3820_v21, %v3521_v20  ;;  %v3450_v34 = vor.u32 %v3802_v25, %v3449_v22  ;;  %v3297_v20 = vld [vmem:[%s5753_s1 + $0x620] sm:$0xf]  ;;  %v3764_v21 = vld [vmem:[%s5753_s1 + $0x624] sm:$0xf0] }
  0x60   :  { %1898 = vmatpush.bf16.msra.mxu0 %v3026_v47  ;;  %v2489_v22 = vld [vmem:[%s5754_s0 + $0xa8] sm:$0xf]  ;;  %v3489_v36 = vld [vmem:[%s5753_s1 + $0x7a0] sm:$0xf] }
  0x61   :  { %1917 = vmatpush.bf16.msra.mxu1 %v3090_v49  ;;  %v3314_v49 = vor.u32 %v3768_v41, %v3313_v40  ;;  %v3564_v25 = vld [vmem:[%s5754_s0 + $0xe4] sm:$0xf0]  ;;  %v4767_v40 = vor.u32 %v3555_v10, %v2483_v11  ;;  %v3794_v41 = vld [vmem:[%s5753_s1 + $0x714] sm:$0xf0]  ;;  %v3581_v10 = vld [vmem:[%s5753_s1 + $0x74] sm:$0xf] }
  0x62   :  { %1936 = vmatpush.bf16.msra.mxu2 %v3154_v35  ;;  %v3322_v35 = vor.u32 %v3770_v27, %v3321_v26  ;;  %v3556_v26 = vld [vmem:[%s5754_s0 + $0xac] sm:$0xf]  ;;  %v2571_v11 = vld [vmem:[%s5753_s1 + $0x78] sm:$0xf0] }
  0x63   :  { %1955 = vmatpush.bf16.msra.mxu3 %v3218_v58  ;;  %1899 = vmatmul.bf16.vlgmr.msra.gmra.mxu0 %v4633_v23  ;;  %v3433_v58 = vld [vmem:[%s5753_s1 + $0x730] sm:$0xf]  ;;  %v2491_v27 = vld [vmem:[%s5754_s0 + $0xe8] sm:$0xf0] }
  0x64   :  { %1967 = vmatpush.bf16.msrb.mxu0 %v3338_v62  ;;  %1918 = vmatmul.bf16.vlgmr.msra.gmra.mxu1 %v4635_v24  ;;  %v3378_v62 = vor.u32 %v3784_v46, %v3377_v45  ;;  %v3434_v12 = vor.u32 %v3798_v59, %v3433_v58  ;;  %v4778_v45 = vor.u32 %v3564_v25, %v2489_v22  ;;  %v3481_v58 = vld [vmem:[%s5753_s1 + $0x790] sm:$0xf]  ;;  %v3597_v22 = vld [vmem:[%s5753_s1 + $0xf4] sm:$0xf]  ;;  %v2635_v25 = vld [vmem:[%s5753_s1 + $0xf8] sm:$0xf0] }
  0x65   :  { %1986 = vmatpush.bf16.msrb.mxu1 %v3402_v2  ;;  %1937 = vmatmul.bf16.vlgmr.msra.gmra.mxu2 %v4646_v28  ;;  %v3369_v2 = vld [vmem:[%s5753_s1 + $0x6b0] sm:$0xf]  ;;  %v4780_v46 = vor.u32 %v3556_v26, %v2491_v27  ;;  %v2574_v27 = vor.u32 %v3581_v10, %v2571_v11 }
  0x66   :  { %2005 = vmatpush.bf16.msrb.mxu2 %v3466_v39  ;;  %v3800_v39 = vld [vmem:[%s5753_s1 + $0x744] sm:$0xf0]  ;;  %1956 = vmatmul.bf16.vlgmr.msra.gmra.mxu3 %v4648_v29 }
  0x67   :  { %2024 = vmatpush.bf16.msrb.mxu3 %v3530_v3  ;;  %v3442_v47 = vor.u32 %v3800_v39, %v3441_v38  ;;  %v3782_v3 = vld [vmem:[%s5753_s1 + $0x6b4] sm:$0xf0]  ;;  %v3417_v38 = vld [vmem:[%s5753_s1 + $0x710] sm:$0xf]  ;;  %v4765_v39 = vor.u32 %v3563_v7, %v2481_v4  ;;  %v3613_v4 = vld [vmem:[%s5753_s1 + $0x174] sm:$0xf] }
  0x68   :  { %1968 = vmatpush.bf16.msrb.mxu0 %v3330_v19  ;;  %v3796_v19 = vld [vmem:[%s5753_s1 + $0x724] sm:$0xf0]  ;;  %v3418_v59 = vor.u32 %v3794_v41, %v3417_v38  ;;  %v2699_v7 = vld [vmem:[%s5753_s1 + $0x178] sm:$0xf0]  ;;  %v2433_v38 = vld [vmem:[%s5754_s0 + $0x30] sm:$0xf] }
  0x69   :  { %1987 = vmatpush.bf16.msrb.mxu1 %v3394_v30  ;;  %v3370_v30 = vor.u32 %v3782_v3, %v3369_v2  ;;  %v3281_v2 = vld [vmem:[%s5753_s1 + $0x600] sm:$0xf]  ;;  %v3760_v3 = vld [vmem:[%s5753_s1 + $0x604] sm:$0xf0]  ;;  %v2702_v26 = vor.u32 %v3613_v4, %v2699_v7  ;;  %v3549_v41 = vld [vmem:[%s5754_s0 + $0x6c] sm:$0xf0] }
  0x6a   :  { %2006 = vmatpush.bf16.msrb.mxu2 %v3458_v15  ;;  %v3306_v15 = vor.u32 %v3766_v61, %v3305_v60  ;;  %v3810_v61 = vld [vmem:[%s5753_s1 + $0x794] sm:$0xf0]  ;;  %v3609_v4 = vld [vmem:[%s5753_s1 + $0x154] sm:$0xf]  ;;  %v2683_v7 = vld [vmem:[%s5753_s1 + $0x158] sm:$0xf0] }
  0x6b   :  { %2025 = vmatpush.bf16.msrb.mxu3 %v3522_v31  ;;  %v3498_v31 = vor.u32 %v3814_v17, %v3497_v16  ;;  %v3345_v16 = vld [vmem:[%s5753_s1 + $0x680] sm:$0xf]  ;;  %v3776_v17 = vld [vmem:[%s5753_s1 + $0x684] sm:$0xf0] }
  0x6c   :  { %1969 = vmatpush.bf16.msrb.mxu0 %v3322_v35  ;;  %v3298_v35 = vor.u32 %v3764_v21, %v3297_v20  ;;  %v3282_v20 = vor.u32 %v3760_v3, %v3281_v2  ;;  %v3808_v21 = vld [vmem:[%s5753_s1 + $0x784] sm:$0xf0]  ;;  %v3542_v2 = vld [vmem:[%s5754_s0 + $0x3c] sm:$0xf] }
  0x6d   :  { %1988 = vmatpush.bf16.msrb.mxu1 %v3386_v42  ;;  %v3289_v42 = vld [vmem:[%s5753_s1 + $0x610] sm:$0xf]  ;;  %v2443_v3 = vld [vmem:[%s5754_s0 + $0x78] sm:$0xf0] }
  0x6e   :  { %2007 = vmatpush.bf16.msrb.mxu2 %v3450_v34  ;;  %v3426_v34 = vor.u32 %v3796_v19, %v3425_v18  ;;  %v3473_v18 = vld [vmem:[%s5753_s1 + $0x780] sm:$0xf] }
  0x6f   :  { %2026 = vmatpush.bf16.msrb.mxu3 %v3514_v43  ;;  %v3762_v43 = vld [vmem:[%s5753_s1 + $0x614] sm:$0xf0] }
  0x70   :  { %1970 = vmatpush.bf16.msrb.mxu0 %v3314_v49  ;;  %v3490_v49 = vor.u32 %v3812_v37, %v3489_v36  ;;  %v3290_v60 = vor.u32 %v3762_v43, %v3289_v42  ;;  %v3346_v36 = vor.u32 %v3776_v17, %v3345_v16  ;;  %v3474_v37 = vor.u32 %v3808_v21, %v3473_v18  ;;  %v3541_v42 = vld [vmem:[%s5754_s0 + $0x34] sm:$0xf]  ;;  %v2747_v21 = vld [vmem:[%s5753_s1 + $0x1d8] sm:$0xf0] }
  0x71   :  { %1989 = vmatpush.bf16.msrb.mxu1 %v3378_v62  ;;  %v3409_v62 = vld [vmem:[%s5753_s1 + $0x700] sm:$0xf]  ;;  %v2435_v43 = vld [vmem:[%s5754_s0 + $0x70] sm:$0xf0]  ;;  %v4909_v17 = vor.u32 %v3549_v41, %v2433_v38  ;;  %v3623_v38 = vld [vmem:[%s5753_s1 + $0x1c4] sm:$0xf] }
  0x72   :  { %2008 = vmatpush.bf16.msrb.mxu2 %v3442_v47  ;;  %v3362_v47 = vor.u32 %v3780_v33, %v3361_v32  ;;  %v3611_v32 = vld [vmem:[%s5753_s1 + $0x164] sm:$0xf]  ;;  %v2691_v33 = vld [vmem:[%s5753_s1 + $0x168] sm:$0xf0]  ;;  %v3593_v16 = vld [vmem:[%s5753_s1 + $0xd4] sm:$0xf]  ;;  %v4911_v18 = vor.u32 %v3541_v42, %v2435_v43 }
  0x73   :  { %2027 = vmatpush.bf16.msrb.mxu3 %v3506_v63  ;;  %v3792_v63 = vld [vmem:[%s5753_s1 + $0x704] sm:$0xf0]  ;;  %1904 = vmatmul.bf16.gmra.mxu0 %v4765_v39  ;;  %v2739_v41 = vld [vmem:[%s5753_s1 + $0x1c8] sm:$0xf0] }
  0x74   :  { %1971 = vmatpush.bf16.msrb.mxu0 %v3306_v15  ;;  %1923 = vmatmul.bf16.gmra.mxu1 %v4767_v40  ;;  %v3482_v15 = vor.u32 %v3810_v61, %v3481_v58  ;;  %v3410_v19 = vor.u32 %v3792_v63, %v3409_v62  ;;  %v2755_v61 = vld [vmem:[%s5753_s1 + $0x1e8] sm:$0xf0]  ;;  %v2441_v62 = vld [vmem:[%s5754_s0 + $0x38] sm:$0xf] }
  0x75   :  { %1990 = vmatpush.bf16.msrb.mxu1 %v3370_v30  ;;  %1942 = vmatmul.bf16.gmra.mxu2 %v4778_v45  ;;  %v3629_v30 = vld [vmem:[%s5753_s1 + $0x1f4] sm:$0xf]  ;;  %v3550_v63 = vld [vmem:[%s5754_s0 + $0x74] sm:$0xf0] }
  0x76   :  { %2009 = vmatpush.bf16.msrb.mxu2 %v3434_v12  ;;  %1961 = vmatmul.bf16.gmra.mxu3 %v4780_v46  ;;  %v3354_v12 = vor.u32 %v3778_v55, %v3353_v52  ;;  %v3595_v52 = vld [vmem:[%s5753_s1 + $0xe4] sm:$0xf]  ;;  %v2694_v55 = vor.u32 %v3611_v32, %v2691_v33 }
  0x77   :  { %2028 = vmatpush.bf16.msrb.mxu3 %v3498_v31  ;;  %v2763_v31 = vld [vmem:[%s5753_s1 + $0x1f8] sm:$0xf0] }
  0x78   :  { %1972 = vmatpush.bf16.msrb.mxu0 %v3298_v35  ;;  %v2563_v35 = vld [vmem:[%s5753_s1 + $0x68] sm:$0xf0] }
  0x79   :  { %1991 = vmatpush.bf16.msrb.mxu1 %v3362_v47  ;;  %v2638_v47 = vor.u32 %v3597_v22, %v2635_v25  ;;  %v4922_v22 = vor.u32 %v3550_v63, %v2441_v62  ;;  %v4924_v25 = vor.u32 %v3542_v2, %v2443_v3  ;;  %v3621_v62 = vld [vmem:[%s5753_s1 + $0x1b4] sm:$0xf]  ;;  %v2731_v63 = vld [vmem:[%s5753_s1 + $0x1b8] sm:$0xf0] }
  0x7a   :  { %2010 = vmatpush.bf16.msrb.mxu2 %v3426_v34  ;;  %v3579_v34 = vld [vmem:[%s5753_s1 + $0x64] sm:$0xf] }
  0x7b   :  { %2029 = vmatpush.bf16.msrb.mxu3 %v3490_v49  ;;  %v2766_v49 = vor.u32 %v3629_v30, %v2763_v31  ;;  %v2566_v58 = vor.u32 %v3579_v34, %v2563_v35  ;;  %v3607_v30 = vld [vmem:[%s5753_s1 + $0x144] sm:$0xf]  ;;  %v2675_v31 = vld [vmem:[%s5753_s1 + $0x148] sm:$0xf0] }
  0x7c   :  { %1973 = vmatpush.bf16.msrb.mxu0 %v3290_v60  ;;  %v3627_v60 = vld [vmem:[%s5753_s1 + $0x1e4] sm:$0xf]  ;;  %v2547_v35 = vld [vmem:[%s5753_s1 + $0x48] sm:$0xf0]  ;;  %v2678_v42 = vor.u32 %v3607_v30, %v2675_v31 }
  0x7d   :  { %1992 = vmatpush.bf16.msrb.mxu1 %v3354_v12  ;;  %v2758_v11 = vor.u32 %v3627_v60, %v2755_v61  ;;  %v3577_v12 = vld [vmem:[%s5753_s1 + $0x54] sm:$0xf]  ;;  %v3575_v34 = vld [vmem:[%s5753_s1 + $0x44] sm:$0xf]  ;;  %v2603_v61 = vld [vmem:[%s5753_s1 + $0xb8] sm:$0xf0] }
  0x7e   :  { %2011 = vmatpush.bf16.msrb.mxu2 %v3418_v59  ;;  %v2627_v59 = vld [vmem:[%s5753_s1 + $0xe8] sm:$0xf0]  ;;  %v2550_v43 = vor.u32 %v3575_v34, %v2547_v35  ;;  %v3589_v60 = vld [vmem:[%s5753_s1 + $0xb4] sm:$0xf]  ;;  %v3619_v30 = vld [vmem:[%s5753_s1 + $0x1a4] sm:$0xf] }
  0x7f   :  { %2030 = vmatpush.bf16.msrb.mxu3 %v3482_v15  ;;  %v2630_v10 = vor.u32 %v3595_v52, %v2627_v59  ;;  %v2555_v15 = vld [vmem:[%s5753_s1 + $0x58] sm:$0xf0]  ;;  %v2723_v31 = vld [vmem:[%s5753_s1 + $0x1a8] sm:$0xf0] }
  0x80   :  { %1974 = vmatpush.bf16.msrb.mxu0 %v3282_v20  ;;  %v3625_v20 = vld [vmem:[%s5753_s1 + $0x1d4] sm:$0xf]  ;;  %v2539_v59 = vld [vmem:[%s5753_s1 + $0x38] sm:$0xf0] }
  0x81   :  { %1993 = vmatpush.bf16.msrb.mxu1 %v3346_v36  ;;  %v2750_v33 = vor.u32 %v3625_v20, %v2747_v21  ;;  %v3591_v36 = vld [vmem:[%s5753_s1 + $0xc4] sm:$0xf]  ;;  %v2531_v21 = vld [vmem:[%s5753_s1 + $0x28] sm:$0xf0]  ;;  %v3558_v34 = vld [vmem:[%s5754_s0 + $0xbc] sm:$0xf] }
  0x82   :  { %2012 = vmatpush.bf16.msrb.mxu2 %v3410_v19  ;;  %v2619_v19 = vld [vmem:[%s5753_s1 + $0xd8] sm:$0xf0]  ;;  %v3571_v20 = vld [vmem:[%s5753_s1 + $0x24] sm:$0xf] }
  0x83   :  { %2031 = vmatpush.bf16.msrb.mxu3 %v3474_v37  ;;  %v2622_v32 = vor.u32 %v3593_v16, %v2619_v19  ;;  %1975 = vmatmul.bf16.vlgmr.msrb.gmra.mxu0 %v4909_v17  ;;  %v2611_v37 = vld [vmem:[%s5753_s1 + $0xc8] sm:$0xf0]  ;;  %v2606_v16 = vor.u32 %v3589_v60, %v2603_v61  ;;  %v2734_v19 = vor.u32 %v3621_v62, %v2731_v63  ;;  %v2507_v35 = vld [vmem:[%s5754_s0 + $0xf8] sm:$0xf0]  ;;  %v3617_v60 = vld [vmem:[%s5753_s1 + $0x194] sm:$0xf] }
  0x84   :  { %2043 = vmatpush.bf16.msra.mxu0 %v2574_v27  ;;  %v2558_v27 = vor.u32 %v3577_v12, %v2555_v15  ;;  %1994 = vmatmul.bf16.vlgmr.msrb.gmra.mxu1 %v4911_v18  ;;  %v2614_v52 = vor.u32 %v3591_v36, %v2611_v37  ;;  %v3557_v12 = vld [vmem:[%s5754_s0 + $0xb4] sm:$0xf]  ;;  %v2534_v37 = vor.u32 %v3571_v20, %v2531_v21  ;;  %v2715_v61 = vld [vmem:[%s5753_s1 + $0x198] sm:$0xf0]  ;;  %v3615_v20 = vld [vmem:[%s5753_s1 + $0x184] sm:$0xf] }
  0x85   :  { %2062 = vmatpush.bf16.msra.mxu1 %v2638_v47  ;;  %2013 = vmatmul.bf16.vlgmr.msrb.gmra.mxu2 %v4922_v22  ;;  %v3605_v47 = vld [vmem:[%s5753_s1 + $0x134] sm:$0xf]  ;;  %v5056_v63 = vor.u32 %v3558_v34, %v2507_v35  ;;  %v2707_v21 = vld [vmem:[%s5753_s1 + $0x188] sm:$0xf0]  ;;  %v2891_v35 = vld [vmem:[%s5753_s1 + $0x2f8] sm:$0xf0] }
  0x86   :  { %2081 = vmatpush.bf16.msra.mxu2 %v2702_v26  ;;  %v2686_v26 = vor.u32 %v3609_v4, %v2683_v7  ;;  %2032 = vmatmul.bf16.vlgmr.msrb.gmra.mxu3 %v4924_v25  ;;  %v3603_v4 = vld [vmem:[%s5753_s1 + $0x124] sm:$0xf]  ;;  %v2659_v7 = vld [vmem:[%s5753_s1 + $0x128] sm:$0xf0]  ;;  %v2499_v15 = vld [vmem:[%s5754_s0 + $0xf0] sm:$0xf0] }
  0x87   :  { %2100 = vmatpush.bf16.msra.mxu3 %v2766_v49  ;;  %v2667_v49 = vld [vmem:[%s5753_s1 + $0x138] sm:$0xf0]  ;;  %v2662_v36 = vor.u32 %v3603_v4, %v2659_v7  ;;  %v2643_v7 = vld [vmem:[%s5753_s1 + $0x108] sm:$0xf0] }
  0x88   :  { %2044 = vmatpush.bf16.msra.mxu0 %v2566_v58  ;;  %v3573_v58 = vld [vmem:[%s5753_s1 + $0x34] sm:$0xf]  ;;  %v2670_v2 = vor.u32 %v3605_v47, %v2667_v49  ;;  %v2523_v49 = vld [vmem:[%s5753_s1 + $0x18] sm:$0xf0] }
  0x89   :  { %2063 = vmatpush.bf16.msra.mxu1 %v2630_v10  ;;  %v2542_v3 = vor.u32 %v3573_v58, %v2539_v59  ;;  %v2497_v10 = vld [vmem:[%s5754_s0 + $0xb0] sm:$0xf]  ;;  %v3569_v47 = vld [vmem:[%s5753_s1 + $0x14] sm:$0xf]  ;;  %v5043_v58 = vor.u32 %v3557_v12, %v2499_v15  ;;  %v2587_v59 = vld [vmem:[%s5753_s1 + $0x98] sm:$0xf0]  ;;  %v2718_v15 = vor.u32 %v3617_v60, %v2715_v61 }
  0x8a   :  { %2082 = vmatpush.bf16.msra.mxu2 %v2694_v55  ;;  %v2742_v55 = vor.u32 %v3623_v38, %v2739_v41  ;;  %v3601_v38 = vld [vmem:[%s5753_s1 + $0x114] sm:$0xf]  ;;  %v2651_v41 = vld [vmem:[%s5753_s1 + $0x118] sm:$0xf0]  ;;  %v2526_v4 = vor.u32 %v3569_v47, %v2523_v49  ;;  %v3675_v47 = vld [vmem:[%s5753_s1 + $0x364] sm:$0xf] }
  0x8b   :  { %2101 = vmatpush.bf16.msra.mxu3 %v2758_v11  ;;  %v3565_v11 = vld [vmem:[%s5754_s0 + $0xec] sm:$0xf0]  ;;  %v2947_v49 = vld [vmem:[%s5753_s1 + $0x368] sm:$0xf0]  ;;  %v3643_v60 = vld [vmem:[%s5753_s1 + $0x264] sm:$0xf] }
  0x8c   :  { %2045 = vmatpush.bf16.msra.mxu0 %v2558_v27  ;;  %v2595_v27 = vld [vmem:[%s5753_s1 + $0xa8] sm:$0xf0] }
  0x8d   :  { %2064 = vmatpush.bf16.msra.mxu1 %v2622_v32  ;;  %v2505_v32 = vld [vmem:[%s5754_s0 + $0xb8] sm:$0xf]  ;;  %v2819_v61 = vld [vmem:[%s5753_s1 + $0x268] sm:$0xf0] }
  0x8e   :  { %2083 = vmatpush.bf16.msra.mxu2 %v2686_v26  ;;  %v3587_v26 = vld [vmem:[%s5753_s1 + $0xa4] sm:$0xf] }
  0x8f   :  { %2102 = vmatpush.bf16.msra.mxu3 %v2750_v33  ;;  %v3566_v33 = vld [vmem:[%s5754_s0 + $0xf4] sm:$0xf0] }
  0x90   :  { %2046 = vmatpush.bf16.msra.mxu0 %v2550_v43  ;;  %v2726_v43 = vor.u32 %v3619_v30, %v2723_v31  ;;  %v5054_v62 = vor.u32 %v3566_v33, %v2505_v32  ;;  %v3645_v30 = vld [vmem:[%s5753_s1 + $0x274] sm:$0xf]  ;;  %v2827_v31 = vld [vmem:[%s5753_s1 + $0x278] sm:$0xf0] }
  0x91   :  { %2065 = vmatpush.bf16.msra.mxu1 %v2614_v52  ;;  %v3585_v52 = vld [vmem:[%s5753_s1 + $0x94] sm:$0xf] }
  0x92   :  { %2084 = vmatpush.bf16.msra.mxu2 %v2678_v42  ;;  %v2598_v42 = vor.u32 %v3587_v26, %v2595_v27  ;;  %v2590_v12 = vor.u32 %v3585_v52, %v2587_v59  ;;  %v3677_v26 = vld [vmem:[%s5753_s1 + $0x374] sm:$0xf]  ;;  %v2955_v27 = vld [vmem:[%s5753_s1 + $0x378] sm:$0xf0] }
  0x93   :  { %2103 = vmatpush.bf16.msra.mxu3 %v2742_v55  ;;  %v5041_v55 = vor.u32 %v3565_v11, %v2497_v10  ;;  %v3567_v10 = vld [vmem:[%s5753_s1 + $0x4] sm:$0xf]  ;;  %v2515_v11 = vld [vmem:[%s5753_s1 + $0x8] sm:$0xf0]  ;;  %v3661_v32 = vld [vmem:[%s5753_s1 + $0x2f4] sm:$0xf] }
  0x94   :  { %2047 = vmatpush.bf16.msra.mxu0 %v2542_v3  ;;  %v2654_v3 = vor.u32 %v3601_v38, %v2651_v41  ;;  %1999 = vmatmul.bf16.gmra.mxu1 %v5043_v58  ;;  %v2518_v34 = vor.u32 %v3567_v10, %v2515_v11  ;;  %v2710_v41 = vor.u32 %v3615_v20, %v2707_v21  ;;  %v3641_v20 = vld [vmem:[%s5753_s1 + $0x254] sm:$0xf]  ;;  %v2811_v21 = vld [vmem:[%s5753_s1 + $0x258] sm:$0xf0] }
  0x95   :  { %2066 = vmatpush.bf16.msra.mxu1 %v2606_v16  ;;  %v3583_v16 = vld [vmem:[%s5753_s1 + $0x84] sm:$0xf]  ;;  %1980 = vmatmul.bf16.gmra.mxu0 %v5041_v55  ;;  %v2894_v52 = vor.u32 %v3661_v32, %v2891_v35  ;;  %v2950_v10 = vor.u32 %v3675_v47, %v2947_v49  ;;  %v2822_v11 = vor.u32 %v3643_v60, %v2819_v61  ;;  %v3003_v32 = vld [vmem:[%s5753_s1 + $0x3d8] sm:$0xf0]  ;;  %v2803_v47 = vld [vmem:[%s5753_s1 + $0x248] sm:$0xf0] }
  0x96   :  { %2085 = vmatpush.bf16.msra.mxu2 %v2670_v2  ;;  %v3599_v2 = vld [vmem:[%s5753_s1 + $0x104] sm:$0xf]  ;;  %2037 = vmatmul.bf16.gmra.mxu3 %v5056_v63  ;;  %v2995_v60 = vld [vmem:[%s5753_s1 + $0x3c8] sm:$0xf0]  ;;  %v3669_v61 = vld [vmem:[%s5753_s1 + $0x334] sm:$0xf] }
  0x97   :  { %2104 = vmatpush.bf16.msra.mxu3 %v2734_v19  ;;  %v2579_v19 = vld [vmem:[%s5753_s1 + $0x88] sm:$0xf0]  ;;  %2018 = vmatmul.bf16.gmra.mxu2 %v5054_v62  ;;  %v2646_v33 = vor.u32 %v3599_v2, %v2643_v7  ;;  %v3659_v2 = vld [vmem:[%s5753_s1 + $0x2e4] sm:$0xf] }
  0x98   :  { %2048 = vmatpush.bf16.msra.mxu0 %v2534_v37  ;;  %v3019_v37 = vld [vmem:[%s5753_s1 + $0x3f8] sm:$0xf0]  ;;  %v2582_v38 = vor.u32 %v3583_v16, %v2579_v19  ;;  %v3011_v7 = vld [vmem:[%s5753_s1 + $0x3e8] sm:$0xf0]  ;;  %v3673_v16 = vld [vmem:[%s5753_s1 + $0x354] sm:$0xf] }
  0x99   :  { %2067 = vmatpush.bf16.msra.mxu1 %v2598_v42  ;;  %v2958_v42 = vor.u32 %v3677_v26, %v2955_v27  ;;  %v2939_v19 = vld [vmem:[%s5753_s1 + $0x358] sm:$0xf0]  ;;  %v3657_v26 = vld [vmem:[%s5753_s1 + $0x2d4] sm:$0xf]  ;;  %v3655_v49 = vld [vmem:[%s5753_s1 + $0x2c4] sm:$0xf] }
  0x9a   :  { %2086 = vmatpush.bf16.msra.mxu2 %v2662_v36  ;;  %v3693_v36 = vld [vmem:[%s5753_s1 + $0x3f4] sm:$0xf]  ;;  %v2942_v35 = vor.u32 %v3673_v16, %v2939_v19  ;;  %v2859_v16 = vld [vmem:[%s5753_s1 + $0x2b8] sm:$0xf0] }
  0x9b   :  { %2105 = vmatpush.bf16.msra.mxu3 %v2726_v43  ;;  %v2830_v43 = vor.u32 %v3645_v30, %v2827_v31  ;;  %v3022_v59 = vor.u32 %v3693_v36, %v3019_v37  ;;  %v2875_v30 = vld [vmem:[%s5753_s1 + $0x2d8] sm:$0xf0]  ;;  %v3689_v31 = vld [vmem:[%s5753_s1 + $0x3d4] sm:$0xf]  ;;  %v2814_v36 = vor.u32 %v3641_v20, %v2811_v21  ;;  %v3671_v37 = vld [vmem:[%s5753_s1 + $0x344] sm:$0xf] }
  0x9c   :  { %2049 = vmatpush.bf16.msra.mxu0 %v2526_v4  ;;  %v3691_v4 = vld [vmem:[%s5753_s1 + $0x3e4] sm:$0xf]  ;;  %v3685_v19 = vld [vmem:[%s5753_s1 + $0x3b4] sm:$0xf]  ;;  %v2987_v20 = vld [vmem:[%s5753_s1 + $0x3b8] sm:$0xf0] }
  0x9d   :  { %2068 = vmatpush.bf16.msra.mxu1 %v2590_v12 }
  0x9e   :  { %2087 = vmatpush.bf16.msra.mxu2 %v2654_v3  ;;  %v2883_v3 = vld [vmem:[%s5753_s1 + $0x2e8] sm:$0xf0] }
  0x9f   :  { %2106 = vmatpush.bf16.msra.mxu3 %v2718_v15  ;;  %v2886_v12 = vor.u32 %v3659_v2, %v2883_v3  ;;  %v3014_v15 = vor.u32 %v3691_v4, %v3011_v7  ;;  %v2923_v2 = vld [vmem:[%s5753_s1 + $0x338] sm:$0xf0] }
  0xa0   :  { %2050 = vmatpush.bf16.msra.mxu0 %v2518_v34  ;;  %v1748_v27 = vpop.f32.mrf.mxu0 }
  0xa1   :  { %2069 = vmatpush.bf16.msra.mxu1 %v2582_v38  ;;  %v2931_v38 = vld [vmem:[%s5753_s1 + $0x348] sm:$0xf0] }
  0xa2   :  { %2088 = vmatpush.bf16.msra.mxu2 %v2646_v33  ;;  %v1767_v33 = vpop.f32.mrf.mxu1 }
  0xa3   :  { %2107 = vmatpush.bf16.msra.mxu3 %v2710_v41  ;;  %v1768_v34 = vadd.f32 %v1767_v33, %v1748_v27  ;;  %v2878_v41 = vor.u32 %v3657_v26, %v2875_v30  ;;  %v2926_v26 = vor.u32 %v3669_v61, %v2923_v2  ;;  %v2915_v33 = vld [vmem:[%s5753_s1 + $0x328] sm:$0xf0]  ;;  %v3633_v61 = vld [vmem:[%s5753_s1 + $0x214] sm:$0xf]  ;;  %v2779_v2 = vld [vmem:[%s5753_s1 + $0x218] sm:$0xf0] }
  0xa4   :  { %2119 = vmatpush.bf16.msrb.mxu0 %v2830_v43  ;;  %v3639_v43 = vld [vmem:[%s5753_s1 + $0x244] sm:$0xf]  ;;  %2070 = vmatmul.bf16.vlgmr.msra.gmra.mxu1 %v4086_v53 }
  0xa5   :  { %2138 = vmatpush.bf16.msrb.mxu1 %v2894_v52  ;;  %2051 = vmatmul.bf16.vlgmr.msra.gmra.mxu0 %v4075_v48  ;;  %v2867_v52 = vld [vmem:[%s5753_s1 + $0x2c8] sm:$0xf0]  ;;  %v2934_v48 = vor.u32 %v3671_v37, %v2931_v38  ;;  %v2806_v53 = vor.u32 %v3639_v43, %v2803_v47  ;;  %v3651_v38 = vld [vmem:[%s5753_s1 + $0x2a4] sm:$0xf] }
  0xa6   :  { %2157 = vmatpush.bf16.msrb.mxu2 %v2958_v42  ;;  %v3006_v42 = vor.u32 %v3689_v31, %v3003_v32  ;;  %2108 = vmatmul.bf16.vlgmr.msra.gmra.mxu3 %v4096_v57  ;;  %v2870_v4 = vor.u32 %v3655_v49, %v2867_v52  ;;  %v2795_v57 = vld [vmem:[%s5753_s1 + $0x238] sm:$0xf0]  ;;  %v3667_v32 = vld [vmem:[%s5753_s1 + $0x324] sm:$0xf]  ;;  %v2787_v37 = vld [vmem:[%s5753_s1 + $0x228] sm:$0xf0] }
  0xa7   :  { %2176 = vmatpush.bf16.msrb.mxu3 %v3022_v59  ;;  %v3687_v59 = vld [vmem:[%s5753_s1 + $0x3c4] sm:$0xf]  ;;  %2089 = vmatmul.bf16.vlgmr.msra.gmra.mxu2 %v4088_v54  ;;  %v3637_v54 = vld [vmem:[%s5753_s1 + $0x234] sm:$0xf]  ;;  %v2979_v43 = vld [vmem:[%s5753_s1 + $0x3a8] sm:$0xf0]  ;;  %v2918_v47 = vor.u32 %v3667_v32, %v2915_v33 }
  0xa8   :  { %2120 = vmatpush.bf16.msrb.mxu0 %v2822_v11  ;;  %v1786_v3 = vpop.f32.mrf.mxu2  ;;  %v2998_v7 = vor.u32 %v3687_v59, %v2995_v60  ;;  %v2798_v31 = vor.u32 %v3637_v54, %v2795_v57  ;;  %v3665_v52 = vld [vmem:[%s5753_s1 + $0x314] sm:$0xf]  ;;  %v2907_v59 = vld [vmem:[%s5753_s1 + $0x318] sm:$0xf0] }
  0xa9   :  { %2139 = vmatpush.bf16.msrb.mxu1 %v2886_v12  ;;  %v1787_v11 = vadd.f32 %v1786_v3, %v1768_v34  ;;  %v1805_v12 = vpop.f32.mrf.mxu3  ;;  %v3649_v3 = vld [vmem:[%s5753_s1 + $0x294] sm:$0xf]  ;;  %v2843_v57 = vld [vmem:[%s5753_s1 + $0x298] sm:$0xf0] }
  0xaa   :  { %2158 = vmatpush.bf16.msrb.mxu2 %v2950_v10  ;;  %v3653_v10 = vld [vmem:[%s5753_s1 + $0x2b4] sm:$0xf]  ;;  %v1769_v21 = vpop.f32.mrf.mxu1  ;;  %v2846_v32 = vor.u32 %v3649_v3, %v2843_v57 }
  0xab   :  { %2177 = vmatpush.bf16.msrb.mxu3 %v3014_v15  ;;  %v1750_v15 = vpop.f32.mrf.mxu0  ;;  %v5210_v27 = vadd.f32 %v1805_v12, %v1787_v11  ;;  %v2862_v34 = vor.u32 %v3653_v10, %v2859_v16  ;;  %v3681_v10 = vld [vmem:[%s5753_s1 + $0x394] sm:$0xf]  ;;  %v2971_v11 = vld [vmem:[%s5753_s1 + $0x398] sm:$0xf0]  ;;  %v3663_v16 = vld [vmem:[%s5753_s1 + $0x304] sm:$0xf] }
  0xac   :  { %2121 = vmatpush.bf16.msrb.mxu0 %v2814_v36  ;;  %v1770_v30 = vadd.f32 %v1769_v21, %v1750_v15  ;;  %v3635_v36 = vld [vmem:[%s5753_s1 + $0x224] sm:$0xf]  ;;  %v2910_v15 = vor.u32 %v3665_v52, %v2907_v59  ;;  %v2782_v21 = vor.u32 %v3633_v61, %v2779_v2  ;;  %v2974_v33 = vor.u32 %v3681_v10, %v2971_v11 }
  0xad   :  { %2140 = vmatpush.bf16.msrb.mxu1 %v2878_v41  ;;  %v2851_v41 = vld [vmem:[%s5753_s1 + $0x2a8] sm:$0xf0]  ;;  %v2790_v49 = vor.u32 %v3635_v36, %v2787_v37  ;;  %v3679_v36 = vld [vmem:[%s5753_s1 + $0x384] sm:$0xf] }
  0xae   :  { %2159 = vmatpush.bf16.msrb.mxu2 %v2942_v35  ;;  %v2990_v35 = vor.u32 %v3685_v19, %v2987_v20  ;;  %v2963_v37 = vld [vmem:[%s5753_s1 + $0x388] sm:$0xf0]  ;;  %v3707_v11 = vld [vmem:[%s5753_s1 + $0x464] sm:$0xf] }
  0xaf   :  { %2178 = vmatpush.bf16.msrb.mxu3 %v3006_v42  ;;  %v3683_v42 = vld [vmem:[%s5753_s1 + $0x3a4] sm:$0xf] }
  0xb0   :  { %2122 = vmatpush.bf16.msrb.mxu0 %v2806_v53  ;;  %v1788_v60 = vpop.f32.mrf.mxu2  ;;  %v2982_v53 = vor.u32 %v3683_v42, %v2979_v43  ;;  %v3725_v42 = vld [vmem:[%s5753_s1 + $0x4f4] sm:$0xf] }
  0xb1   :  { %2141 = vmatpush.bf16.msrb.mxu1 %v2870_v4  ;;  %v1789_v4 = vadd.f32 %v1788_v60, %v1770_v30  ;;  %v3631_v30 = vld [vmem:[%s5753_s1 + $0x204] sm:$0xf]  ;;  %v2966_v60 = vor.u32 %v3679_v36, %v2963_v37  ;;  %v3195_v36 = vld [vmem:[%s5753_s1 + $0x558] sm:$0xf0] }
  0xb2   :  { %2160 = vmatpush.bf16.msrb.mxu2 %v2934_v48  ;;  %v2854_v48 = vor.u32 %v3651_v38, %v2851_v41  ;;  %v1772_v12 = vpop.f32.mrf.mxu1  ;;  %v3741_v38 = vld [vmem:[%s5753_s1 + $0x574] sm:$0xf]  ;;  %v3211_v41 = vld [vmem:[%s5753_s1 + $0x578] sm:$0xf0] }
  0xb3   :  { %2179 = vmatpush.bf16.msrb.mxu3 %v2998_v7  ;;  %v1807_v7 = vpop.f32.mrf.mxu3  ;;  %v1753_v54 = vpop.f32.mrf.mxu0  ;;  %v3214_v2 = vor.u32 %v3741_v38, %v3211_v41  ;;  %v3705_v38 = vld [vmem:[%s5753_s1 + $0x454] sm:$0xf]  ;;  %v3067_v41 = vld [vmem:[%s5753_s1 + $0x458] sm:$0xf0] }
  0xb4   :  { %2123 = vmatpush.bf16.msrb.mxu0 %v2798_v31  ;;  %v5263_v19 = vadd.f32 %v1807_v7, %v1789_v4  ;;  %v1773_v20 = vadd.f32 %v1772_v12, %v1753_v54  ;;  %v2771_v31 = vld [vmem:[%s5753_s1 + $0x208] sm:$0xf0]  ;;  %2075 = vmatmul.bf16.gmra.mxu1 %v4218_v50  ;;  %v3083_v50 = vld [vmem:[%s5753_s1 + $0x478] sm:$0xf0]  ;;  %v3739_v4 = vld [vmem:[%s5753_s1 + $0x564] sm:$0xf] }
  0xb5   :  { %2142 = vmatpush.bf16.msrb.mxu1 %v2862_v34  ;;  %v3647_v34 = vld [vmem:[%s5753_s1 + $0x284] sm:$0xf]  ;;  %2056 = vmatmul.bf16.gmra.mxu0 %v4207_v44  ;;  %v3709_v44 = vld [vmem:[%s5753_s1 + $0x474] sm:$0xf]  ;;  %v3203_v7 = vld [vmem:[%s5753_s1 + $0x568] sm:$0xf0] }
  0xb6   :  { %2161 = vmatpush.bf16.msrb.mxu2 %v2926_v26  ;;  %v2899_v26 = vld [vmem:[%s5753_s1 + $0x308] sm:$0xf0]  ;;  %2113 = vmatmul.bf16.gmra.mxu3 %v4228_v56  ;;  %v3757_v56 = vld [vmem:[%s5753_s1 + $0x5f4] sm:$0xf]  ;;  %v3086_v3 = vor.u32 %v3709_v44, %v3083_v50 }
  0xb7   :  { %2180 = vmatpush.bf16.msrb.mxu3 %v2990_v35  ;;  %v2835_v35 = vld [vmem:[%s5753_s1 + $0x288] sm:$0xf0]  ;;  %2094 = vmatmul.bf16.gmra.mxu2 %v4220_v51  ;;  %v2902_v43 = vor.u32 %v3663_v16, %v2899_v26  ;;  %v3147_v51 = vld [vmem:[%s5753_s1 + $0x4f8] sm:$0xf0]  ;;  %v3755_v26 = vld [vmem:[%s5753_s1 + $0x5e4] sm:$0xf] }
  0xb8   :  { %2124 = vmatpush.bf16.msrb.mxu0 %v2790_v49  ;;  %v3275_v49 = vld [vmem:[%s5753_s1 + $0x5f8] sm:$0xf0]  ;;  %v1791_v52 = vpop.f32.mrf.mxu2  ;;  %v2838_v59 = vor.u32 %v3647_v34, %v2835_v35  ;;  %v3150_v57 = vor.u32 %v3725_v42, %v3147_v51  ;;  %v3075_v12 = vld [vmem:[%s5753_s1 + $0x468] sm:$0xf0]  ;;  %v3737_v35 = vld [vmem:[%s5753_s1 + $0x554] sm:$0xf] }
  0xb9   :  { %2143 = vmatpush.bf16.msrb.mxu1 %v2854_v48  ;;  %v1792_v48 = vadd.f32 %v1791_v52, %v1773_v20  ;;  %v3278_v10 = vor.u32 %v3757_v56, %v3275_v49  ;;  %v3721_v44 = vld [vmem:[%s5753_s1 + $0x4d4] sm:$0xf]  ;;  %v3259_v51 = vld [vmem:[%s5753_s1 + $0x5d8] sm:$0xf0] }
  0xba   :  { %2162 = vmatpush.bf16.msrb.mxu2 %v2918_v47  ;;  %v2774_v47 = vor.u32 %v3631_v30, %v2771_v31  ;;  %v1774_v54 = vpop.f32.mrf.mxu1  ;;  %v3267_v30 = vld [vmem:[%s5753_s1 + $0x5e8] sm:$0xf0]  ;;  %v3206_v31 = vor.u32 %v3739_v4, %v3203_v7  ;;  %v3703_v4 = vld [vmem:[%s5753_s1 + $0x444] sm:$0xf] }
  0xbb   :  { %2181 = vmatpush.bf16.msrb.mxu3 %v2982_v53  ;;  %v1810_v53 = vpop.f32.mrf.mxu3  ;;  %v1755_v61 = vpop.f32.mrf.mxu0  ;;  %v3270_v34 = vor.u32 %v3755_v26, %v3267_v30  ;;  %v3719_v7 = vld [vmem:[%s5753_s1 + $0x4c4] sm:$0xf]  ;;  %v3717_v26 = vld [vmem:[%s5753_s1 + $0x4b4] sm:$0xf] }
  0xbc   :  { %2125 = vmatpush.bf16.msrb.mxu0 %v2782_v21  ;;  %v5329_v16 = vadd.f32 %v1810_v53, %v1792_v48  ;;  %v1775_v20 = vadd.f32 %v1774_v54, %v1755_v61  ;;  %v3139_v21 = vld [vmem:[%s5753_s1 + $0x4e8] sm:$0xf0]  ;;  %v3070_v48 = vor.u32 %v3705_v38, %v3067_v41  ;;  %v3735_v53 = vld [vmem:[%s5753_s1 + $0x544] sm:$0xf] }
  0xbd   :  { %2144 = vmatpush.bf16.msrb.mxu1 %v2846_v32  ;;  %v3078_v32 = vor.u32 %v3707_v11, %v3075_v12  ;;  %v3187_v61 = vld [vmem:[%s5753_s1 + $0x548] sm:$0xf0]  ;;  %v3733_v12 = vld [vmem:[%s5753_s1 + $0x534] sm:$0xf] }
  0xbe   :  { %2163 = vmatpush.bf16.msrb.mxu2 %v2910_v15  ;;  %v3723_v15 = vld [vmem:[%s5753_s1 + $0x4e4] sm:$0xf]  ;;  %v3251_v11 = vld [vmem:[%s5753_s1 + $0x5c8] sm:$0xf0] }
  0xbf   :  { %2182 = vmatpush.bf16.msrb.mxu3 %v2974_v33  ;;  %v3142_v33 = vor.u32 %v3723_v15, %v3139_v21  ;;  %v3179_v15 = vld [vmem:[%s5753_s1 + $0x538] sm:$0xf0] }
  0xc0   :  { %2126 = vmatpush.bf16.msrb.mxu0 %v2774_v47  ;;  %v1793_v37 = vpop.f32.mrf.mxu2  ;;  %v3753_v47 = vld [vmem:[%s5753_s1 + $0x5d4] sm:$0xf]  ;;  %v3182_v41 = vor.u32 %v3733_v12, %v3179_v15  ;;  %v3227_v15 = vld [vmem:[%s5753_s1 + $0x598] sm:$0xf0] }
  0xc1   :  { %2145 = vmatpush.bf16.msrb.mxu1 %v2838_v59  ;;  %v1794_v50 = vadd.f32 %v1793_v37, %v1775_v20  ;;  %v3745_v12 = vld [vmem:[%s5753_s1 + $0x594] sm:$0xf] }
  0xc2   :  { %2164 = vmatpush.bf16.msrb.mxu2 %v2902_v43  ;;  %v3131_v43 = vld [vmem:[%s5753_s1 + $0x4d8] sm:$0xf0]  ;;  %v1843_v49 = vpop.f32.mrf.mxu1 }
  0xc3   :  { %2183 = vmatpush.bf16.msrb.mxu3 %v2966_v60  ;;  %v1812_v42 = vpop.f32.mrf.mxu3  ;;  %v1824_v56 = vpop.f32.mrf.mxu0  ;;  %v3198_v60 = vor.u32 %v3737_v35, %v3195_v36 }
  0xc4   :  { %2195 = vmatpush.bf16.msra.mxu0 %v3086_v3  ;;  %v5364_v52 = vadd.f32 %v1812_v42, %v1794_v50  ;;  %v1825_v59 = vadd.f32 %v1824_v56, %v5210_v27  ;;  %v3262_v3 = vor.u32 %v3753_v47, %v3259_v51  ;;  %v3059_v27 = vld [vmem:[%s5753_s1 + $0x448] sm:$0xf0]  ;;  %2146 = vmatmul.bf16.vlgmr.msrb.gmra.mxu1 %v4365_v1  ;;  %v3731_v50 = vld [vmem:[%s5753_s1 + $0x524] sm:$0xf] }
  0xc5   :  { %2214 = vmatpush.bf16.msra.mxu1 %v3150_v57  ;;  %2127 = vmatmul.bf16.vlgmr.msrb.gmra.mxu0 %v4363_v0  ;;  %v3123_v57 = vld [vmem:[%s5753_s1 + $0x4c8] sm:$0xf0]  ;;  %v3190_v0 = vor.u32 %v3735_v53, %v3187_v61  ;;  %v3062_v1 = vor.u32 %v3703_v4, %v3059_v27  ;;  %v3163_v4 = vld [vmem:[%s5753_s1 + $0x518] sm:$0xf0] }
  0xc6   :  { %2233 = vmatpush.bf16.msra.mxu2 %v3214_v2  ;;  %v3134_v2 = vor.u32 %v3721_v44, %v3131_v43  ;;  %v1844_v54 = vadd.f32 %v1843_v49, %v1825_v59  ;;  %2184 = vmatmul.bf16.vlgmr.msrb.gmra.mxu3 %v4378_v6  ;;  %v3126_v20 = vor.u32 %v3719_v7, %v3123_v57  ;;  %v3051_v6 = vld [vmem:[%s5753_s1 + $0x438] sm:$0xf0]  ;;  %v3171_v42 = vld [vmem:[%s5753_s1 + $0x528] sm:$0xf0]  ;;  %v3715_v49 = vld [vmem:[%s5753_s1 + $0x4a4] sm:$0xf] }
  0xc7   :  { %2252 = vmatpush.bf16.msra.mxu3 %v3278_v10  ;;  %v3751_v10 = vld [vmem:[%s5753_s1 + $0x5c4] sm:$0xf]  ;;  %2165 = vmatmul.bf16.vlgmr.msrb.gmra.mxu2 %v4376_v5  ;;  %v3701_v5 = vld [vmem:[%s5753_s1 + $0x434] sm:$0xf]  ;;  %v3043_v56 = vld [vmem:[%s5753_s1 + $0x428] sm:$0xf0]  ;;  %v3174_v61 = vor.u32 %v3731_v50, %v3171_v42 }
  0xc8   :  { %2196 = vmatpush.bf16.msra.mxu0 %v3078_v32  ;;  %v3254_v21 = vor.u32 %v3751_v10, %v3251_v11  ;;  %v1862_v30 = vpop.f32.mrf.mxu2  ;;  %v3115_v32 = vld [vmem:[%s5753_s1 + $0x4b8] sm:$0xf0]  ;;  %v3054_v44 = vor.u32 %v3701_v5, %v3051_v6  ;;  %v3235_v53 = vld [vmem:[%s5753_s1 + $0x5a8] sm:$0xf0]  ;;  %v3713_v10 = vld [vmem:[%s5753_s1 + $0x494] sm:$0xf] }
  0xc9   :  { %2215 = vmatpush.bf16.msra.mxu1 %v3142_v33  ;;  %v3749_v33 = vld [vmem:[%s5753_s1 + $0x5b4] sm:$0xf]  ;;  %v1863_v35 = vadd.f32 %v1862_v30, %v1844_v54  ;;  %v3118_v47 = vor.u32 %v3717_v26, %v3115_v32  ;;  %v3035_v57 = vld [vmem:[%s5753_s1 + $0x418] sm:$0xf0]  ;;  %v3727_v6 = vld [vmem:[%s5753_s1 + $0x504] sm:$0xf] }
  0xca   :  { %2234 = vmatpush.bf16.msra.mxu2 %v3206_v31  ;;  %v1845_v37 = vpop.f32.mrf.mxu1  ;;  %v3697_v54 = vld [vmem:[%s5753_s1 + $0x414] sm:$0xf]  ;;  %v3155_v32 = vld [vmem:[%s5753_s1 + $0x508] sm:$0xf0] }
  0xcb   :  { %2253 = vmatpush.bf16.msra.mxu3 %v3270_v34  ;;  %v1881_v31 = vpop.f32.mrf.mxu3  ;;  %v3243_v34 = vld [vmem:[%s5753_s1 + $0x5b8] sm:$0xf0]  ;;  %v1826_v36 = vpop.f32.mrf.mxu0  ;;  %v3219_v50 = vld [vmem:[%s5753_s1 + $0x588] sm:$0xf0]  ;;  %v3805_v42 = vld [vmem:[%s5753_s1 + $0x774] sm:$0xf] }
  0xcc   :  { %2197 = vmatpush.bf16.msra.mxu0 %v3070_v48  ;;  %v1827_v38 = vadd.f32 %v1826_v36, %v5263_v19  ;;  %v5426_v43 = vadd.f32 %v1881_v31, %v1863_v35  ;;  %v3246_v51 = vor.u32 %v3749_v33, %v3243_v34  ;;  %v3699_v19 = vld [vmem:[%s5753_s1 + $0x424] sm:$0xf]  ;;  %v3038_v31 = vor.u32 %v3697_v54, %v3035_v57  ;;  %v3027_v34 = vld [vmem:[%s5753_s1 + $0x408] sm:$0xf0] }
  0xcd   :  { %2216 = vmatpush.bf16.msra.mxu1 %v3134_v2  ;;  %v3747_v48 = vld [vmem:[%s5753_s1 + $0x5a4] sm:$0xf]  ;;  %v3046_v2 = vor.u32 %v3699_v19, %v3043_v56  ;;  %v3230_v36 = vor.u32 %v3745_v12, %v3227_v15  ;;  %v3158_v19 = vor.u32 %v3727_v6, %v3155_v32  ;;  %v3395_v15 = vld [vmem:[%s5753_s1 + $0x6e8] sm:$0xf0]  ;;  %v3801_v32 = vld [vmem:[%s5753_s1 + $0x754] sm:$0xf] }
  0xce   :  { %2235 = vmatpush.bf16.msra.mxu2 %v3198_v60  ;;  %v1846_v59 = vadd.f32 %v1845_v37, %v1827_v38  ;;  %v3107_v60 = vld [vmem:[%s5753_s1 + $0x4a8] sm:$0xf0]  ;;  %v3238_v7 = vor.u32 %v3747_v48, %v3235_v53  ;;  %v3695_v33 = vld [vmem:[%s5753_s1 + $0x404] sm:$0xf] }
  0xcf   :  { %2254 = vmatpush.bf16.msra.mxu3 %v3262_v3  ;;  %v3729_v3 = vld [vmem:[%s5753_s1 + $0x514] sm:$0xf]  ;;  %v3110_v27 = vor.u32 %v3715_v49, %v3107_v60  ;;  %v3711_v37 = vld [vmem:[%s5753_s1 + $0x484] sm:$0xf]  ;;  %v3091_v38 = vld [vmem:[%s5753_s1 + $0x488] sm:$0xf0]  ;;  %v3030_v56 = vor.u32 %v3695_v33, %v3027_v34 }
  0xd0   :  { %2198 = vmatpush.bf16.msra.mxu0 %v3062_v1  ;;  %v1864_v11 = vpop.f32.mrf.mxu2  ;;  %v3099_v1 = vld [vmem:[%s5753_s1 + $0x498] sm:$0xf0]  ;;  %v3166_v30 = vor.u32 %v3729_v3, %v3163_v4  ;;  %v3803_v3 = vld [vmem:[%s5753_s1 + $0x764] sm:$0xf]  ;;  %v3459_v4 = vld [vmem:[%s5753_s1 + $0x768] sm:$0xf0] }
  0xd1   :  { %2217 = vmatpush.bf16.msra.mxu1 %v3126_v20  ;;  %v1865_v20 = vadd.f32 %v1864_v11, %v1846_v59  ;;  %v3531_v49 = vld [vmem:[%s5753_s1 + $0x7f8] sm:$0xf0]  ;;  %v3094_v59 = vor.u32 %v3711_v37, %v3091_v38  ;;  %v3771_v11 = vld [vmem:[%s5753_s1 + $0x664] sm:$0xf]  ;;  %v3769_v34 = vld [vmem:[%s5753_s1 + $0x654] sm:$0xf] }
  0xd2   :  { %2236 = vmatpush.bf16.msra.mxu2 %v3190_v0  ;;  %v1848_v5 = vpop.f32.mrf.mxu1  ;;  %v3451_v33 = vld [vmem:[%s5753_s1 + $0x758] sm:$0xf0] }
  0xd3   :  { %2255 = vmatpush.bf16.msra.mxu3 %v3254_v21  ;;  %v1883_v0 = vpop.f32.mrf.mxu3  ;;  %v1829_v21 = vpop.f32.mrf.mxu0 }
  0xd4   :  { %2199 = vmatpush.bf16.msra.mxu0 %v3054_v44  ;;  %v1830_v26 = vadd.f32 %v1829_v21, %v5329_v16  ;;  %v5483_v35 = vadd.f32 %v1883_v0, %v1865_v20  ;;  %v3102_v16 = vor.u32 %v3713_v10, %v3099_v1  ;;  %2151 = vmatmul.bf16.gmra.mxu1 %v4497_v9  ;;  %v3339_v9 = vld [vmem:[%s5753_s1 + $0x678] sm:$0xf0]  ;;  %v3331_v0 = vld [vmem:[%s5753_s1 + $0x668] sm:$0xf0]  ;;  %v3787_v1 = vld [vmem:[%s5753_s1 + $0x6e4] sm:$0xf] }
  0xd5   :  { %2218 = vmatpush.bf16.msra.mxu1 %v3118_v47  ;;  %2132 = vmatmul.bf16.gmra.mxu0 %v4495_v8  ;;  %v3467_v47 = vld [vmem:[%s5753_s1 + $0x778] sm:$0xf0]  ;;  %v3773_v8 = vld [vmem:[%s5753_s1 + $0x674] sm:$0xf]  ;;  %v3819_v20 = vld [vmem:[%s5753_s1 + $0x7e4] sm:$0xf] }
  0xd6   :  { %2237 = vmatpush.bf16.msra.mxu2 %v3182_v41  ;;  %v3743_v41 = vld [vmem:[%s5753_s1 + $0x584] sm:$0xf]  ;;  %v1849_v44 = vadd.f32 %v1848_v5, %v1830_v26  ;;  %2189 = vmatmul.bf16.gmra.mxu3 %v4510_v14  ;;  %v3821_v14 = vld [vmem:[%s5753_s1 + $0x7f4] sm:$0xf]  ;;  %v3523_v21 = vld [vmem:[%s5753_s1 + $0x7e8] sm:$0xf0]  ;;  %v3334_v26 = vor.u32 %v3771_v11, %v3331_v0 }
  0xd7   :  { %2256 = vmatpush.bf16.msra.mxu3 %v3246_v51  ;;  %2170 = vmatmul.bf16.gmra.mxu2 %v4508_v13  ;;  %v3789_v51 = vld [vmem:[%s5753_s1 + $0x6f4] sm:$0xf]  ;;  %v3403_v13 = vld [vmem:[%s5753_s1 + $0x6f8] sm:$0xf0]  ;;  %v3222_v60 = vor.u32 %v3743_v41, %v3219_v50  ;;  %v3534_v10 = vor.u32 %v3821_v14, %v3531_v49 }
  0xd8   :  { %2200 = vmatpush.bf16.msra.mxu0 %v3046_v2  ;;  %v1867_v48 = vpop.f32.mrf.mxu2  ;;  %v3342_v2 = vor.u32 %v3773_v8, %v3339_v9  ;;  %v3406_v57 = vor.u32 %v3789_v51, %v3403_v13  ;;  %v3387_v41 = vld [vmem:[%s5753_s1 + $0x6d8] sm:$0xf0]  ;;  %v3454_v51 = vor.u32 %v3801_v32, %v3451_v33  ;;  %v3443_v13 = vld [vmem:[%s5753_s1 + $0x748] sm:$0xf0] }
  0xd9   :  { %2219 = vmatpush.bf16.msra.mxu1 %v3110_v27  ;;  %v1868_v27 = vadd.f32 %v1867_v48, %v1849_v44  ;;  %v3817_v44 = vld [vmem:[%s5753_s1 + $0x7d4] sm:$0xf]  ;;  %v3515_v50 = vld [vmem:[%s5753_s1 + $0x7d8] sm:$0xf0]  ;;  %v3783_v48 = vld [vmem:[%s5753_s1 + $0x6c4] sm:$0xf] }
  0xda   :  { %2238 = vmatpush.bf16.msra.mxu2 %v3174_v61  ;;  %v3470_v61 = vor.u32 %v3805_v42, %v3467_v47  ;;  %v1850_v54 = vpop.f32.mrf.mxu1  ;;  %v3371_v0 = vld [vmem:[%s5753_s1 + $0x6b8] sm:$0xf0] }
  0xdb   :  { %2257 = vmatpush.bf16.msra.mxu3 %v3238_v7  ;;  %v1886_v53 = vpop.f32.mrf.mxu3  ;;  %v1831_v7 = vpop.f32.mrf.mxu0 }
  0xdc   :  { %2201 = vmatpush.bf16.msra.mxu0 %v3038_v31  ;;  %v1832_v12 = vadd.f32 %v1831_v7, %v5364_v52  ;;  %v5550_v5 = vadd.f32 %v1886_v53, %v1868_v27  ;;  %v3462_v52 = vor.u32 %v3803_v3, %v3459_v4  ;;  %v3526_v31 = vor.u32 %v3819_v20, %v3523_v21  ;;  %v3507_v3 = vld [vmem:[%s5753_s1 + $0x7c8] sm:$0xf0]  ;;  %v3797_v4 = vld [vmem:[%s5753_s1 + $0x734] sm:$0xf]  ;;  %v3435_v27 = vld [vmem:[%s5753_s1 + $0x738] sm:$0xf0] }
  0xdd   :  { %2220 = vmatpush.bf16.msra.mxu1 %v3102_v16  ;;  %v3323_v16 = vld [vmem:[%s5753_s1 + $0x658] sm:$0xf0] }
  0xde   :  { %2239 = vmatpush.bf16.msra.mxu2 %v3166_v30  ;;  %v1851_v6 = vadd.f32 %v1850_v54, %v1832_v12  ;;  %v3398_v30 = vor.u32 %v3787_v1, %v3395_v15  ;;  %v3813_v1 = vld [vmem:[%s5753_s1 + $0x7b4] sm:$0xf]  ;;  %v3499_v12 = vld [vmem:[%s5753_s1 + $0x7b8] sm:$0xf0] }
  0xdf   :  { %2258 = vmatpush.bf16.msra.mxu3 %v3230_v36  ;;  %v3785_v36 = vld [vmem:[%s5753_s1 + $0x6d4] sm:$0xf] }
  0xe0   :  { %2202 = vmatpush.bf16.msra.mxu0 %v3030_v56  ;;  %v1869_v37 = vpop.f32.mrf.mxu2  ;;  %v3799_v56 = vld [vmem:[%s5753_s1 + $0x744] sm:$0xf]  ;;  %v3390_v49 = vor.u32 %v3785_v36, %v3387_v41 }
  0xe1   :  { %2221 = vmatpush.bf16.msra.mxu1 %v3094_v59  ;;  %v1870_v42 = vadd.f32 %v1869_v37, %v1851_v6  ;;  %v3518_v59 = vor.u32 %v3817_v44, %v3515_v50  ;;  %v3779_v36 = vld [vmem:[%s5753_s1 + $0x6a4] sm:$0xf]  ;;  %v3491_v44 = vld [vmem:[%s5753_s1 + $0x7a8] sm:$0xf0] }
  0xe2   :  { %2240 = vmatpush.bf16.msra.mxu2 %v3158_v19  ;;  %v1919_v8 = vpop.f32.mrf.mxu1  ;;  %v3326_v19 = vor.u32 %v3769_v34, %v3323_v16  ;;  %v3502_v34 = vor.u32 %v3813_v1, %v3499_v12  ;;  %v3299_v16 = vld [vmem:[%s5753_s1 + $0x628] sm:$0xf0]  ;;  %v3811_v41 = vld [vmem:[%s5753_s1 + $0x7a4] sm:$0xf] }
  0xe3   :  { %2259 = vmatpush.bf16.msra.mxu3 %v3222_v60  ;;  %v1888_v38 = vpop.f32.mrf.mxu3  ;;  %v1900_v47 = vpop.f32.mrf.mxu0  ;;  %v3767_v60 = vld [vmem:[%s5753_s1 + $0x644] sm:$0xf]  ;;  %v3475_v1 = vld [vmem:[%s5753_s1 + $0x788] sm:$0xf0] }
  0xe4   :  { %2271 = vmatpush.bf16.msrb.mxu0 %v3342_v2  ;;  %v1901_v9 = vadd.f32 %v1900_v47, %v5426_v43  ;;  %v5583_v14 = vadd.f32 %v1888_v38, %v1870_v42  ;;  %v3315_v43 = vld [vmem:[%s5753_s1 + $0x648] sm:$0xf0]  ;;  %2222 = vmatmul.bf16.vlgmr.msra.gmra.mxu1 %v4635_v24  ;;  %v3815_v2 = vld [vmem:[%s5753_s1 + $0x7c4] sm:$0xf]  ;;  %v3793_v47 = vld [vmem:[%s5753_s1 + $0x714] sm:$0xf] }
  0xe5   :  { %2290 = vmatpush.bf16.msrb.mxu1 %v3406_v57  ;;  %2203 = vmatmul.bf16.vlgmr.msra.gmra.mxu0 %v4633_v23  ;;  %v3446_v23 = vor.u32 %v3799_v56, %v3443_v13  ;;  %v3318_v24 = vor.u32 %v3767_v60, %v3315_v43  ;;  %v3510_v54 = vor.u32 %v3815_v2, %v3507_v3  ;;  %v3781_v57 = vld [vmem:[%s5753_s1 + $0x6b4] sm:$0xf]  ;;  %v3363_v38 = vld [vmem:[%s5753_s1 + $0x6a8] sm:$0xf0]  ;;  %v3291_v56 = vld [vmem:[%s5753_s1 + $0x618] sm:$0xf0] }
  0xe6   :  { %2309 = vmatpush.bf16.msrb.mxu2 %v3470_v61  ;;  %v1920_v53 = vadd.f32 %v1919_v8, %v1901_v9  ;;  %v3379_v61 = vld [vmem:[%s5753_s1 + $0x6c8] sm:$0xf0]  ;;  %2260 = vmatmul.bf16.vlgmr.msra.gmra.mxu3 %v4648_v29  ;;  %v3307_v29 = vld [vmem:[%s5753_s1 + $0x638] sm:$0xf0]  ;;  %v3374_v33 = vor.u32 %v3781_v57, %v3371_v0  ;;  %v3366_v9 = vor.u32 %v3779_v36, %v3363_v38  ;;  %v3777_v13 = vld [vmem:[%s5753_s1 + $0x694] sm:$0xf] }
  0xe7   :  { %2328 = vmatpush.bf16.msrb.mxu3 %v3534_v10  ;;  %2241 = vmatmul.bf16.vlgmr.msra.gmra.mxu2 %v4646_v28  ;;  %v3382_v7 = vor.u32 %v3783_v48, %v3379_v61  ;;  %v3765_v28 = vld [vmem:[%s5753_s1 + $0x634] sm:$0xf]  ;;  %v3419_v8 = vld [vmem:[%s5753_s1 + $0x718] sm:$0xf0]  ;;  %v3775_v57 = vld [vmem:[%s5753_s1 + $0x684] sm:$0xf] }
  0xe8   :  { %2272 = vmatpush.bf16.msrb.mxu0 %v3334_v26  ;;  %v1938_v10 = vpop.f32.mrf.mxu2  ;;  %v3310_v26 = vor.u32 %v3765_v28, %v3307_v29  ;;  %v3355_v60 = vld [vmem:[%s5753_s1 + $0x698] sm:$0xf0]  ;;  %v3809_v43 = vld [vmem:[%s5753_s1 + $0x794] sm:$0xf]  ;;  %v3283_v29 = vld [vmem:[%s5753_s1 + $0x608] sm:$0xf0] }
  0xe9   :  { %2291 = vmatpush.bf16.msrb.mxu1 %v3398_v30  ;;  %v1939_v15 = vadd.f32 %v1938_v10, %v1920_v53  ;;  %v3795_v30 = vld [vmem:[%s5753_s1 + $0x724] sm:$0xf]  ;;  %v3483_v48 = vld [vmem:[%s5753_s1 + $0x798] sm:$0xf0] }
  0xea   :  { %2310 = vmatpush.bf16.msrb.mxu2 %v3462_v52  ;;  %v1921_v21 = vpop.f32.mrf.mxu1  ;;  %v3438_v52 = vor.u32 %v3797_v4, %v3435_v27  ;;  %v3791_v4 = vld [vmem:[%s5753_s1 + $0x704] sm:$0xf]  ;;  %v3411_v27 = vld [vmem:[%s5753_s1 + $0x708] sm:$0xf0]  ;;  %v3486_v28 = vor.u32 %v3809_v43, %v3483_v48 }
  0xeb   :  { %2329 = vmatpush.bf16.msrb.mxu3 %v3526_v31  ;;  %v1957_v11 = vpop.f32.mrf.mxu3  ;;  %v1902_v20 = vpop.f32.mrf.mxu0  ;;  %v3427_v31 = vld [vmem:[%s5753_s1 + $0x728] sm:$0xf0]  ;;  %v3807_v0 = vld [vmem:[%s5753_s1 + $0x784] sm:$0xf] }
  0xec   :  { %2273 = vmatpush.bf16.msrb.mxu0 %v3326_v19  ;;  %v1903_v6 = vadd.f32 %v1902_v20, %v5483_v35  ;;  %v5638_v32 = vadd.f32 %v1957_v11, %v1939_v15  ;;  %v3763_v35 = vld [vmem:[%s5753_s1 + $0x624] sm:$0xf]  ;;  %v3430_v50 = vor.u32 %v3795_v30, %v3427_v31  ;;  %v3761_v19 = vld [vmem:[%s5753_s1 + $0x614] sm:$0xf]  ;;  %v3347_v11 = vld [vmem:[%s5753_s1 + $0x688] sm:$0xf0]  ;;  %v3478_v15 = vor.u32 %v3807_v0, %v3475_v1 }
  0xed   :  { %2292 = vmatpush.bf16.msrb.mxu1 %v3390_v49  ;;  %v3302_v42 = vor.u32 %v3763_v35, %v3299_v16  ;;  %v3350_v12 = vor.u32 %v3775_v57, %v3347_v11 }
  0xee   :  { %2311 = vmatpush.bf16.msrb.mxu2 %v3454_v51  ;;  %v1922_v37 = vadd.f32 %v1921_v21, %v1903_v6  ;;  %v3494_v51 = vor.u32 %v3811_v41, %v3491_v44 }
  0xef   :  { %2330 = vmatpush.bf16.msrb.mxu3 %v3518_v59 }
  0xf0   :  { %2274 = vmatpush.bf16.msrb.mxu0 %v3318_v24  ;;  %v1940_v49 = vpop.f32.mrf.mxu2  ;;  %v3294_v24 = vor.u32 %v3761_v19, %v3291_v56 }
  0xf1   :  { %2293 = vmatpush.bf16.msrb.mxu1 %v3382_v7  ;;  %v1941_v53 = vadd.f32 %v1940_v49, %v1922_v37 }
  0xf2   :  { %2312 = vmatpush.bf16.msrb.mxu2 %v3446_v23  ;;  %v1924_v2 = vpop.f32.mrf.mxu1  ;;  %v3422_v23 = vor.u32 %v3793_v47, %v3419_v8 }
  0xf3   :  { %2331 = vmatpush.bf16.msrb.mxu3 %v3510_v54  ;;  %v1959_v59 = vpop.f32.mrf.mxu3  ;;  %v1905_v61 = vpop.f32.mrf.mxu0  ;;  %v3358_v54 = vor.u32 %v3777_v13, %v3355_v60 }
  0xf4   :  { %2275 = vmatpush.bf16.msrb.mxu0 %v3310_v26  ;;  %v1906_v3 = vadd.f32 %v1905_v61, %v5550_v5  ;;  %v1960_v7 = vadd.f32 %v1959_v59, %v1941_v53  ;;  %v3759_v5 = vld [vmem:[%s5753_s1 + $0x604] sm:$0xf]  ;;  %2227 = vmatmul.bf16.gmra.mxu1 %v4767_v40 }
  0xf5   :  { %2294 = vmatpush.bf16.msrb.mxu1 %v3374_v33  ;;  %2208 = vmatmul.bf16.gmra.mxu0 %v4765_v39  ;;  %v3414_v39 = vor.u32 %v3791_v4, %v3411_v27  ;;  %v3286_v40 = vor.u32 %v3759_v5, %v3283_v29 }
  0xf6   :  { %2313 = vmatpush.bf16.msrb.mxu2 %v3438_v52  ;;  %v1925_v10 = vadd.f32 %v1924_v2, %v1906_v3  ;;  %2265 = vmatmul.bf16.gmra.mxu3 %v4780_v46 }
  0xf7   :  { %2332 = vmatpush.bf16.msrb.mxu3 %v3502_v34  ;;  %2246 = vmatmul.bf16.gmra.mxu2 %v4778_v45 }
  0xf8   :  { %2276 = vmatpush.bf16.msrb.mxu0 %v3302_v42  ;;  %v1943_v20 = vpop.f32.mrf.mxu2 }
  0xf9   :  { %2295 = vmatpush.bf16.msrb.mxu1 %v3366_v9  ;;  %v1944_v6 = vadd.f32 %v1943_v20, %v1925_v10 }
  0xfa   :  { %2314 = vmatpush.bf16.msrb.mxu2 %v3430_v50  ;;  %v1926_v26 = vpop.f32.mrf.mxu1 }
  0xfb   :  { %2333 = vmatpush.bf16.msrb.mxu3 %v3494_v51  ;;  %v1962_v21 = vpop.f32.mrf.mxu3  ;;  %v1907_v52 = vpop.f32.mrf.mxu0 }
  0xfc   :  { %2277 = vmatpush.bf16.msrb.mxu0 %v3294_v24  ;;  %v1908_v30 = vadd.f32 %v1907_v52, %v5583_v14  ;;  %v1963_v45 = vadd.f32 %v1962_v21, %v1944_v6 }
  0xfd   :  { %2296 = vmatpush.bf16.msrb.mxu1 %v3358_v54 }
  0xfe   :  { %2315 = vmatpush.bf16.msrb.mxu2 %v3422_v23  ;;  %v1927_v46 = vadd.f32 %v1926_v26, %v1908_v30 }
  0xff   :  { %2334 = vmatpush.bf16.msrb.mxu3 %v3486_v28 }
 0x100   :  { %2278 = vmatpush.bf16.msrb.mxu0 %v3286_v40  ;;  %v1945_v31 = vpop.f32.mrf.mxu2 }
 0x101   :  { %2297 = vmatpush.bf16.msrb.mxu1 %v3350_v12  ;;  %v1946_v34 = vadd.f32 %v1945_v31, %v1927_v46 }
 0x102   :  { %2316 = vmatpush.bf16.msrb.mxu2 %v3414_v39  ;;  %v1995_v16 = vpop.f32.mrf.mxu1 }
 0x103   :  { %2335 = vmatpush.bf16.msrb.mxu3 %v3478_v15  ;;  %v1964_v33 = vpop.f32.mrf.mxu3  ;;  %v1976_v35 = vpop.f32.mrf.mxu0 }
 0x104   :  { %v1977_v36 = vadd.f32 %v1976_v35, %v5638_v32  ;;  %v1965_v37 = vadd.f32 %v1964_v33, %v1946_v34  ;;  %2298 = vmatmul.bf16.vlgmr.msrb.gmra.mxu1 %v4911_v18 }
 0x105   :  { %2279 = vmatmul.bf16.vlgmr.msrb.gmra.mxu0 %v4909_v17 }
 0x106   :  { %v1996_v38 = vadd.f32 %v1995_v16, %v1977_v36  ;;  %2336 = vmatmul.bf16.vlgmr.msrb.gmra.mxu3 %v4924_v25 }
 0x107   :  { %2317 = vmatmul.bf16.vlgmr.msrb.gmra.mxu2 %v4922_v22 }
 0x108   :  { %v2014_v14 = vpop.f32.mrf.mxu2 }
 0x109   :  { %v2015_v44 = vadd.f32 %v2014_v14, %v1996_v38 }
 0x10a   :  { %v1997_v42 = vpop.f32.mrf.mxu1 }
 0x10b   :  { %v2033_v41 = vpop.f32.mrf.mxu3  ;;  %v1978_v50 = vpop.f32.mrf.mxu0 }
 0x10c   :  { %v1979_v47 = vadd.f32 %v1978_v50, %v1960_v7  ;;  %v5717_v8 = vadd.f32 %v2033_v41, %v2015_v44 }
 0x10e   :  { %v1998_v9 = vadd.f32 %v1997_v42, %v1979_v47  ;;  %vm2347_vm0 = vcmp.gt.f32.partialorder %v5717_v8, 0.0 }
 0x110   :  { %v2016_v32 = vpop.f32.mrf.mxu2 }
 0x111   :  { %v2017_v19 = vadd.f32 %v2016_v32, %v1998_v9 }
 0x112   :  { %v2000_v17 = vpop.f32.mrf.mxu1 }
 0x113   :  { %v2035_v51 = vpop.f32.mrf.mxu3  ;;  %v1981_v56 = vpop.f32.mrf.mxu0 }
 0x114   :  { %v1982_v13 = vadd.f32 %v1981_v56, %v1963_v45  ;;  %v5719_v18 = vadd.f32 %v2035_v51, %v2017_v19  ;;  %2303 = vmatmul.bf16.gmra.mxu1 %v5043_v58 }
 0x115   :  { %2284 = vmatmul.bf16.gmra.mxu0 %v5041_v55 }
 0x116   :  { %v2001_v22 = vadd.f32 %v2000_v17, %v1982_v13  ;;  %2341 = vmatmul.bf16.gmra.mxu3 %v5056_v63  ;;  %vm2349_vm2 = vcmp.gt.f32.partialorder %v5719_v18, 0.0 }
 0x117   :  { %2322 = vmatmul.bf16.gmra.mxu2 %v5054_v62 }
 0x11a   :  { %v2019_v25 = vpop.f32.mrf.mxu2  ;;  %v2002_v43 = vpop.f32.mrf.mxu1 }
 0x11b   :  { %v2038_v49 = vpop.f32.mrf.mxu3  ;;  %v2020_v59 = vadd.f32 %v2019_v25, %v2001_v22  ;;  %v1983_v60 = vpop.f32.mrf.mxu0 }
 0x11c   :  { %v1984_v48 = vadd.f32 %v1983_v60, %v1965_v37 }
 0x11d   :  { %v5725_v53 = vadd.f32 %v2038_v49, %v2020_v59 }
 0x11e   :  { %v2003_v61 = vadd.f32 %v2002_v43, %v1984_v48 }
 0x11f   :  { %vm2351_vm4 = vcmp.gt.f32.partialorder %v5725_v53, 0.0 }
 0x122   :  { %v2021_v2 = vpop.f32.mrf.mxu2  ;;  %v2071_v55 = vpop.f32.mrf.mxu1 }
 0x123   :  { %v2040_v3 = vpop.f32.mrf.mxu3  ;;  %v2022_v23 = vadd.f32 %v2021_v2, %v2003_v61  ;;  %v2052_v24 = vpop.f32.mrf.mxu0 }
 0x124   :  { %v2072_v4 = vadd.f32 %v2071_v55, %v2052_v24 }
 0x125   :  { %v5727_v58 = vadd.f32 %v2040_v3, %v2022_v23 }
 0x127   :  { %vm2353_vm6 = vcmp.gt.f32.partialorder %v5727_v58, 0.0 }
 0x12a   :  { %v2090_v62 = vpop.f32.mrf.mxu2  ;;  %v2073_v54 = vpop.f32.mrf.mxu1 }
 0x12b   :  { %v2109_v27 = vpop.f32.mrf.mxu3  ;;  %v2091_v63 = vadd.f32 %v2090_v62, %v2072_v4  ;;  %v2054_v7 = vpop.f32.mrf.mxu0 }
 0x12c   :  { %v2074_v28 = vadd.f32 %v2073_v54, %v2054_v7 }
 0x12d   :  { %v2110_v5 = vadd.f32 %v2109_v27, %v2091_v63 }
 0x132   :  { %v2092_v29 = vpop.f32.mrf.mxu2  ;;  %v2076_v0 = vpop.f32.mrf.mxu1 }
 0x133   :  { %v2111_v57 = vpop.f32.mrf.mxu3  ;;  %v2093_v10 = vadd.f32 %v2092_v29, %v2074_v28  ;;  %v2057_v11 = vpop.f32.mrf.mxu0 }
 0x134   :  { %v2077_v1 = vadd.f32 %v2076_v0, %v2057_v11 }
 0x135   :  { %v2112_v39 = vadd.f32 %v2111_v57, %v2093_v10 }
 0x13a   :  { %v2095_v40 = vpop.f32.mrf.mxu2  ;;  %v2078_v21 = vpop.f32.mrf.mxu1 }
 0x13b   :  { %v2114_v12 = vpop.f32.mrf.mxu3  ;;  %v2096_v15 = vadd.f32 %v2095_v40, %v2077_v1  ;;  %v2059_v20 = vpop.f32.mrf.mxu0 }
 0x13c   :  { %v2079_v6 = vadd.f32 %v2078_v21, %v2059_v20 }
 0x13d   :  { %v2115_v52 = vadd.f32 %v2114_v12, %v2096_v15 }
 0x142   :  { %v2097_v26 = vpop.f32.mrf.mxu2  ;;  %v2147_v31 = vpop.f32.mrf.mxu1 }
 0x143   :  { %v2116_v30 = vpop.f32.mrf.mxu3  ;;  %v2098_v45 = vadd.f32 %v2097_v26, %v2079_v6  ;;  %v2128_v46 = vpop.f32.mrf.mxu0 }
 0x144   :  { %v2129_v25 = vadd.f32 %v2128_v46, %v2110_v5 }
 0x145   :  { %v2117_v33 = vadd.f32 %v2116_v30, %v2098_v45 }
 0x146   :  { %v2148_v49 = vadd.f32 %v2147_v31, %v2129_v25 }
 0x14a   :  { %v2166_v34 = vpop.f32.mrf.mxu2  ;;  %v2149_v36 = vpop.f32.mrf.mxu1 }
 0x14b   :  { %v2185_v35 = vpop.f32.mrf.mxu3  ;;  %v2130_v16 = vpop.f32.mrf.mxu0  ;;  %v2167_v43 = vadd.f32 %v2166_v34, %v2148_v49 }
 0x14c   :  { %v2131_v2 = vadd.f32 %v2130_v16, %v2112_v39 }
 0x14d   :  { %v2186_v3 = vadd.f32 %v2185_v35, %v2167_v43 }
 0x14e   :  { %v2150_v23 = vadd.f32 %v2149_v36, %v2131_v2 }
 0x152   :  { %v2168_v37 = vpop.f32.mrf.mxu2  ;;  %v2152_v41 = vpop.f32.mrf.mxu1 }
 0x153   :  { %v2187_v38 = vpop.f32.mrf.mxu3  ;;  %v2133_v14 = vpop.f32.mrf.mxu0  ;;  %v2169_v62 = vadd.f32 %v2168_v37, %v2150_v23  ;;  %v2355_v37 = vmul.f32 0.2, %v5717_v8 }
 0x154   :  { %v2134_v7 = vadd.f32 %v2133_v14, %v2115_v52 }
 0x155   :  { %v2188_v28 = vadd.f32 %v2187_v38, %v2169_v62 }
 0x156   :  { %v2153_v5 = vadd.f32 %v2152_v41, %v2134_v7 }
 0x15a   :  { %v2171_v44 = vpop.f32.mrf.mxu2  ;;  %v2154_v47 = vpop.f32.mrf.mxu1 }
 0x15b   :  { %v2190_v50 = vpop.f32.mrf.mxu3  ;;  %v2135_v42 = vpop.f32.mrf.mxu0  ;;  %v2172_v0 = vadd.f32 %v2171_v44, %v2153_v5 }
 0x15c   :  { %v2136_v12 = vadd.f32 %v2135_v42, %v2117_v33  ;;  %v2363_v42 = vsel %vm2347_vm0, %v5717_v8, %v2355_v37 }
 0x15d   :  { %v2191_v21 = vadd.f32 %v2190_v50, %v2172_v0 }
 0x15e   :  { %v2155_v26 = vadd.f32 %v2154_v47, %v2136_v12 }
 0x162   :  { %v2173_v9 = vpop.f32.mrf.mxu2  ;;  %v2223_v19 = vpop.f32.mrf.mxu1 }
 0x163   :  { %v2192_v32 = vpop.f32.mrf.mxu3  ;;  %v2204_v51 = vpop.f32.mrf.mxu0  ;;  %v2174_v31 = vadd.f32 %v2173_v9, %v2155_v26 }
 0x164   :  { %v2205_v24 = vadd.f32 %v2204_v51, %v2186_v3 }
 0x165   :  { %v2193_v33 = vadd.f32 %v2192_v32, %v2174_v31  ;;  %v2357_v32 = vmul.f32 0.2, %v5719_v18 }
 0x166   :  { %v2224_v54 = vadd.f32 %v2223_v19, %v2205_v24 }
 0x16a   :  { %v2242_v56 = vpop.f32.mrf.mxu2  ;;  %v2225_v22 = vpop.f32.mrf.mxu1 }
 0x16b   :  { %v2261_v17 = vpop.f32.mrf.mxu3  ;;  %v2206_v13 = vpop.f32.mrf.mxu0  ;;  %v2243_v29 = vadd.f32 %v2242_v56, %v2224_v54 }
 0x16c   :  { %v2207_v57 = vadd.f32 %v2206_v13, %v2188_v28 }
 0x16d   :  { %v2262_v1 = vadd.f32 %v2261_v17, %v2243_v29 }
 0x16e   :  { %v2226_v15 = vadd.f32 %v2225_v22, %v2207_v57 }
 0x172   :  { %v2244_v59 = vpop.f32.mrf.mxu2  ;;  %v2228_v61 = vpop.f32.mrf.mxu1 }
 0x173   :  { %v2263_v60 = vpop.f32.mrf.mxu3  ;;  %v2209_v48 = vpop.f32.mrf.mxu0  ;;  %v2245_v6 = vadd.f32 %v2244_v59, %v2226_v15 }
 0x174   :  { %v2210_v30 = vadd.f32 %v2209_v48, %v2191_v21 }
 0x175   :  { %v2264_v34 = vadd.f32 %v2263_v60, %v2245_v6 }
 0x176   :  { %v2229_v38 = vadd.f32 %v2228_v61, %v2210_v30  ;;  %v2365_v61 = vsel %vm2349_vm2, %v5719_v18, %v2357_v32 }
 0x17a   :  { %v2247_v55 = vpop.f32.mrf.mxu2  ;;  %v2230_v63 = vpop.f32.mrf.mxu1 }
 0x17b   :  { %v2266_v4 = vpop.f32.mrf.mxu3  ;;  %v2211_v27 = vpop.f32.mrf.mxu0  ;;  %v2248_v44 = vadd.f32 %v2247_v55, %v2229_v38 }
 0x17c   :  { %v2212_v47 = vadd.f32 %v2211_v27, %v2193_v33 }
 0x17d   :  { %v2267_v13 = vadd.f32 %v2266_v4, %v2248_v44 }
 0x17e   :  { %v2231_v49 = vadd.f32 %v2230_v63, %v2212_v47  ;;  %v2359_v63 = vmul.f32 0.2, %v5725_v53 }
 0x180   :  { %v2367_v29 = vsel %vm2351_vm4, %v5725_v53, %v2359_v63 }
 0x182   :  { %v2249_v10 = vpop.f32.mrf.mxu2  ;;  %v2299_v39 = vpop.f32.mrf.mxu1 }
 0x183   :  { %v2268_v11 = vpop.f32.mrf.mxu3  ;;  %v2280_v40 = vpop.f32.mrf.mxu0  ;;  %v2250_v43 = vadd.f32 %v2249_v10, %v2231_v49 }
 0x184   :  { %v2281_v20 = vadd.f32 %v2280_v40, %v2262_v1  ;;  %v2361_v40 = vmul.f32 0.2, %v5727_v58 }
 0x185   :  { %v2269_v4 = vadd.f32 %v2268_v11, %v2250_v43 }
 0x186   :  { %v2300_v45 = vadd.f32 %v2299_v39, %v2281_v20  ;;  %v2369_v15 = vsel %vm2353_vm6, %v5727_v58, %v2361_v40 }
 0x18a   :  { %v2318_v52 = vpop.f32.mrf.mxu2  ;;  %v2301_v36 = vpop.f32.mrf.mxu1 }
 0x18b   :  { %v2337_v46 = vpop.f32.mrf.mxu3  ;;  %v2319_v35 = vadd.f32 %v2318_v52, %v2300_v45  ;;  %v2282_v16 = vpop.f32.mrf.mxu0 }
 0x18c   :  { %v2283_v41 = vadd.f32 %v2282_v16, %v2264_v34 }
 0x18d   :  { %v2338_v14 = vadd.f32 %v2337_v46, %v2319_v35 }
 0x18e   :  { %v2302_v9 = vadd.f32 %v2301_v36, %v2283_v41 }
 0x18f   :  { %vm2348_vm1 = vcmp.gt.f32.partialorder %v2338_v14, 0.0  ;;  %v2356_v50 = vmul.f32 0.2, %v2338_v14 }
 0x191   :  { %v2364_v51 = vsel %vm2348_vm1, %v2338_v14, %v2356_v50 }
 0x192   :  { %v2371_v19 = vpack.c.bf16 %v2364_v51, %v2363_v42  ;;  %v2320_v56 = vpop.f32.mrf.mxu2  ;;  %v2304_v8 = vpop.f32.mrf.mxu1 }
 0x193   :  { %v2339_v17 = vpop.f32.mrf.mxu3  ;;  %v2321_v22 = vadd.f32 %v2320_v56, %v2302_v9  ;;  %v2285_v25 = vpop.f32.mrf.mxu0 }
 0x194   :  { %2375 = vst [vmem:[%s5755_s2] sm:$0xff] %v2371_v19  ;;  %v2286_v60 = vadd.f32 %v2285_v25, %v2267_v13 }
 0x195   :  { %v2340_v59 = vadd.f32 %v2339_v17, %v2321_v22 }
 0x196   :  { %v2305_v3 = vadd.f32 %v2304_v8, %v2286_v60 }
 0x197   :  { %vm2350_vm3 = vcmp.gt.f32.partialorder %v2340_v59, 0.0  ;;  %v2358_v48 = vmul.f32 0.2, %v2340_v59 }
 0x199   :  { %v2366_v2 = vsel %vm2350_vm3, %v2340_v59, %v2358_v48 }
 0x19a   :  { %v2372_v23 = vpack.c.bf16 %v2366_v2, %v2365_v61  ;;  %v2323_v24 = vpop.f32.mrf.mxu2  ;;  %v2306_v28 = vpop.f32.mrf.mxu1 }
 0x19b   :  { %v2342_v55 = vpop.f32.mrf.mxu3  ;;  %v2324_v62 = vadd.f32 %v2323_v24, %v2305_v3  ;;  %v2287_v27 = vpop.f32.mrf.mxu0 }
 0x19c   :  { %2376 = vst [vmem:[%s5755_s2 + $0x8] sm:$0xff] %v2372_v23  ;;  %v2288_v54 = vadd.f32 %v2287_v27, %v2269_v4 }
 0x19d   :  { %v2343_v7 = vadd.f32 %v2342_v55, %v2324_v62 }
 0x19e   :  { %v2307_v57 = vadd.f32 %v2306_v28, %v2288_v54 }
 0x19f   :  { %vm2352_vm5 = vcmp.gt.f32.partialorder %v2343_v7, 0.0  ;;  %v2360_v18 = vmul.f32 0.2, %v2343_v7 }
 0x1a1   :  { %v2368_v5 = vsel %vm2352_vm5, %v2343_v7, %v2360_v18 }
 0x1a2   :  { %v2373_v10 = vpack.c.bf16 %v2368_v5, %v2367_v29  ;;  %v2325_v11 = vpop.f32.mrf.mxu2 }
 0x1a3   :  { %v2326_v0 = vadd.f32 %v2325_v11, %v2307_v57  ;;  %v2344_v1 = vpop.f32.mrf.mxu3 }
 0x1a4   :  { %2377 = vst [vmem:[%s5755_s2 + $0x10] sm:$0xff] %v2373_v10 }
 0x1a5   :  { %v2345_v39 = vadd.f32 %v2344_v1, %v2326_v0 }
 0x1a7   :  { %vm2354_vm7 = vcmp.gt.f32.partialorder %v2345_v39, 0.0  ;;  %v2362_v12 = vmul.f32 0.2, %v2345_v39 }
 0x1a9   :  { %v2370_v53 = vsel %vm2354_vm7, %v2345_v39, %v2362_v12 }
 0x1aa   :  { %v2374_v20 = vpack.c.bf16 %v2370_v53, %v2369_v15 }
 0x1ac   :  { %2378 = vst [vmem:[%s5755_s2 + $0x18] sm:$0xff] %v2374_v20 }

// kernel: discriminator_forward.7
= control target key start
LH: loop header
LB: loop body
LE: loop exit
PB: predicated region body
PF: predicated region fallthrough
CT: control target
= control target key end

     0   :  { %s10095_s0 = inlined_call_operand.vmem [shape: bf16[18,4096], index: 0, kind: input, shape index: {}]   ;;  %s10096_s1 = inlined_call_operand.vmem [shape: bf16[4096,512], index: 1, kind: input, shape index: {}]   ;;  %s10097_s2 = inlined_call_operand.vmem [shape: f32[1,512], index: 2, kind: input, shape index: {}]   ;;  %s10098_s3 = inlined_call_operand.vmem [shape: f32[1,512], index: 3, kind: input, shape index: {}]   ;;  %s10099_s4 = inlined_call_operand.vmem [shape: f32[4,18,512], index: 4, kind: input, shape index: {}]   ;;  %s10100_s5 = inlined_call_operand.<no memory space> [shape: f32[1,1], index: 5, kind: input, shape index: {}]   ;;  %s10101_s6 = inlined_call_operand.vmem [shape: f32[2,4], index: 6, kind: output, shape index: {}]  }
   0x1   :  { %11 = sst [smem:[#allocation3]] %s10100_s5 }
   0x2   :  { %s8115_s23 = smov 0   ;;  %s8117_s24 = smov 0  }
   0x3   :  { %s8119_s25 = smov 0  }
   0x4 LB: > { %s8131_s5 = sadd.s32 4294967295, %s8074_s25   ;;  %s8134_s26 = sadd.s32 1, %s8074_s25   ;;  %s8074_s25 = sphi %s8119_s25, %s10178_s25   ;;  %s8070_s24 = sphi %s8117_s24, %s10177_s24   ;;  %s8066_s23 = sphi %s8115_s23, %s10176_s23  }
   0x5   : > { %s21_s27 = ssub.s32 %s8074_s25, %s8134_s26  ;;  %s24_s28 = sadd.s32 1, %s8070_s24 }
   0x6   : > { %p22_p0 = scmp.eq.s32.totalorder %s21_s27, 0  ;;  %p31_p1 = scmp.ne.s32.totalorder %s8070_s24, %s8066_s23 }
   0x7   : > { %p32_p2 = scmp.eq.s32.totalorder %s8074_s25, 0  ;;  %p5328_p4 = scmp.ge.s32.totalorder %s8074_s25, 2 }
   0x8   : > { %s8143_s29 = scalar_select %p22_p0, %s8070_s24, %s24_s28  }
   0x9   : > { %p33_p3 = por %p32_p2, %p31_p1  ;;  %200 = sbr.rel (%p5328_p4) target bundleno = 42 (0x2a), region = 32 }
   0xe   : > { %203 = sbr.rel (!%p33_p3) target bundleno = 42 (0x2a), region = 36  ;;  %s205_s30 = sand.u32 (%p33_p3), 1, %s8070_s24  }
   0xf   : > { %s7487_s7 = sshll.u32 (%p33_p3), %s8074_s25, 6  ;;  %s8017_s8 = smul.u32 (%p33_p3), 192, %s205_s30 }
  0x10   : > { %s8151_s11 = scalar_lea.vmem (%p33_p3), %s10095_s0, %s7487_s7 }
  0x11   : > { %v223_v0 = vld [vmem:[%s8151_s11] sm:$0xff] (%p33_p3)  ;;  %v225_v1 = vld [vmem:[%s8151_s11 + $0x8] sm:$0xff] (%p33_p3)  ;;  %v227_v2 = vld [vmem:[%s8151_s11 + $0x10] sm:$0xff] (%p33_p3)  ;;  %s8156_s12 = scalar_lea.vmem (%p33_p3), [#allocation4], %s8017_s8 }
  0x12   : > { %224 = vst [vmem:[%s8156_s12] sm:$0xff] (%p33_p3), %v223_v0  ;;  %v229_v3 = vld [vmem:[%s8151_s11 + $0x18] sm:$0xff] (%p33_p3)  ;;  %v231_v4 = vld [vmem:[%s8151_s11 + $0x20] sm:$0xff] (%p33_p3)  ;;  %v233_v5 = vld [vmem:[%s8151_s11 + $0x28] sm:$0xff] (%p33_p3) }
  0x13   : > { %226 = vst [vmem:[%s8156_s12 + $0x8] sm:$0xff] %v225_v1  ;;  %v235_v6 = vld [vmem:[%s8151_s11 + $0x30] sm:$0xff]  ;;  %v237_v7 = vld [vmem:[%s8151_s11 + $0x38] sm:$0xff]  ;;  %v239_v8 = vld [vmem:[%s8151_s11 + $0x80] sm:$0xff] }
  0x14   : > { %228 = vst [vmem:[%s8156_s12 + $0x10] sm:$0xff] %v227_v2  ;;  %v241_v9 = vld [vmem:[%s8151_s11 + $0x88] sm:$0xff]  ;;  %v243_v10 = vld [vmem:[%s8151_s11 + $0x90] sm:$0xff]  ;;  %v245_v11 = vld [vmem:[%s8151_s11 + $0x98] sm:$0xff] }
  0x15   : > { %230 = vst [vmem:[%s8156_s12 + $0x18] sm:$0xff] %v229_v3  ;;  %v247_v12 = vld [vmem:[%s8151_s11 + $0xa0] sm:$0xff]  ;;  %v249_v13 = vld [vmem:[%s8151_s11 + $0xa8] sm:$0xff]  ;;  %v251_v14 = vld [vmem:[%s8151_s11 + $0xb0] sm:$0xff] }
  0x16   : > { %232 = vst [vmem:[%s8156_s12 + $0x20] sm:$0xff] %v231_v4  ;;  %v253_v15 = vld [vmem:[%s8151_s11 + $0xb8] sm:$0xff]  ;;  %v255_v16 = vld [vmem:[%s8151_s11 + $0x100] sm:$0xff]  ;;  %v257_v17 = vld [vmem:[%s8151_s11 + $0x108] sm:$0xff] }
  0x17   : > { %234 = vst [vmem:[%s8156_s12 + $0x28] sm:$0xff] %v233_v5  ;;  %v259_v18 = vld [vmem:[%s8151_s11 + $0x110] sm:$0xff]  ;;  %v261_v19 = vld [vmem:[%s8151_s11 + $0x118] sm:$0xff]  ;;  %v263_v20 = vld [vmem:[%s8151_s11 + $0x120] sm:$0xff] }
  0x18   : > { %236 = vst [vmem:[%s8156_s12 + $0x30] sm:$0xff] %v235_v6  ;;  %v265_v21 = vld [vmem:[%s8151_s11 + $0x128] sm:$0xff]  ;;  %v267_v22 = vld [vmem:[%s8151_s11 + $0x130] sm:$0xff]  ;;  %v269_v23 = vld [vmem:[%s8151_s11 + $0x138] sm:$0xff] }
  0x19   : > { %238 = vst [vmem:[%s8156_s12 + $0x38] sm:$0xff] %v237_v7 }
  0x1a   : > { %240 = vst [vmem:[%s8156_s12 + $0x40] sm:$0xff] %v239_v8 }
  0x1b   : > { %242 = vst [vmem:[%s8156_s12 + $0x48] sm:$0xff] %v241_v9 }
  0x1c   : > { %244 = vst [vmem:[%s8156_s12 + $0x50] sm:$0xff] %v243_v10 }
  0x1d   : > { %246 = vst [vmem:[%s8156_s12 + $0x58] sm:$0xff] %v245_v11 }
  0x1e   : > { %248 = vst [vmem:[%s8156_s12 + $0x60] sm:$0xff] %v247_v12 }
  0x1f   : > { %250 = vst [vmem:[%s8156_s12 + $0x68] sm:$0xff] %v249_v13 }
  0x20   : > { %252 = vst [vmem:[%s8156_s12 + $0x70] sm:$0xff] %v251_v14 }
  0x21   : > { %254 = vst [vmem:[%s8156_s12 + $0x78] sm:$0xff] %v253_v15 }
  0x22   : > { %256 = vst [vmem:[%s8156_s12 + $0x80] sm:$0xff] %v255_v16 }
  0x23   : > { %258 = vst [vmem:[%s8156_s12 + $0x88] sm:$0xff] %v257_v17 }
  0x24   : > { %260 = vst [vmem:[%s8156_s12 + $0x90] sm:$0xff] %v259_v18 }
  0x25   : > { %262 = vst [vmem:[%s8156_s12 + $0x98] sm:$0xff] %v261_v19 }
  0x26   : > { %264 = vst [vmem:[%s8156_s12 + $0xa0] sm:$0xff] %v263_v20 }
  0x27   : > { %266 = vst [vmem:[%s8156_s12 + $0xa8] sm:$0xff] %v265_v21 }
  0x28   : > { %268 = vst [vmem:[%s8156_s12 + $0xb0] sm:$0xff] %v267_v22 }
  0x29   : > { %270 = vst [vmem:[%s8156_s12 + $0xb8] sm:$0xff] %v269_v23 }
  0x2a PF: > { %p5331_p5 = scmp.ge.s32.totalorder %s8074_s25, 1  ;;  %p285_p6 = scmp.lt.s32.totalorder %s8074_s25, 3 }
  0x2c   : > { %p286_p7 = pnand %p5331_p5, %p285_p6 }
  0x2e   : > { %289 = sbr.rel (%p286_p7) target bundleno = 1013 (0x3f5), region = 63 }
  0x33   : > { %s292_s13 = sand.u32 1, %s8066_s23   ;;  %s5332_s14 = sshll.u32 %s8131_s5, 8 }
  0x34   : > { %s8018_s15 = smul.u32 192, %s292_s13  ;;  %p324_p8 = scmp.lt.s32.totalorder %s5332_s14, 511 }
  0x35   : > { %p5335_p9 = scmp.ne.s32.totalorder %s8131_s5, 0 }
  0x36   : > { %s10180_s14 = smov (!%p324_p8, %s5332_s14), 511  ;;  %s8212_s20 = scalar_lea.vmem [#allocation4], %s8018_s15 }
  0x37   : > { %s7488_s16 = sshll.u32 %s10180_s14, 4  ;;  %333 = sbr.rel (%p5335_p9) target bundleno = 73 (0x49), region = 71 }
  0x38   : > { %s8210_s19 = scalar_lea.vmem %s10096_s1, %s7488_s16 }
  0x3c   : > { %v8076_v24 = vmov 0.0  }
  0x3d   : > { %334 = vst [vmem:[#allocation2 + $0x30] sm:$0xff] %v8076_v24 }
  0x3e   : > { %335 = vst [vmem:[#allocation2] sm:$0xff] %v8076_v24 }
  0x3f   : > { %336 = vst [vmem:[#allocation2 + $0x58] sm:$0xff] %v8076_v24 }
  0x40   : > { %337 = vst [vmem:[#allocation2 + $0x18] sm:$0xff] %v8076_v24 }
  0x41   : > { %338 = vst [vmem:[#allocation2 + $0x50] sm:$0xff] %v8076_v24 }
  0x42   : > { %339 = vst [vmem:[#allocation2 + $0x20] sm:$0xff] %v8076_v24 }
  0x43   : > { %340 = vst [vmem:[#allocation2 + $0x8] sm:$0xff] %v8076_v24 }
  0x44   : > { %341 = vst [vmem:[#allocation2 + $0x38] sm:$0xff] %v8076_v24 }
  0x45   : > { %342 = vst [vmem:[#allocation2 + $0x28] sm:$0x3] %v8076_v24 }
  0x46   : > { %343 = vst [vmem:[#allocation2 + $0x48] sm:$0x3] %v8076_v24 }
  0x47   : > { %344 = vst [vmem:[#allocation2 + $0x10] sm:$0x3] %v8076_v24 }
  0x48   : > { %345 = vst [vmem:[#allocation2 + $0x40] sm:$0x3] %v8076_v24 }
  0x49 PF: > { %v5514_v25 = vld [vmem:[%s8210_s19 + $0xe0] sm:$0xf]  ;;  %v7535_v26 = vld [vmem:[%s8210_s19 + $0xec] sm:$0xf0]  ;;  %p7448_p10 = scmp.ne.s32.totalorder %s8131_s5, 1 }
  0x4a   : > { %v5642_v27 = vld [vmem:[%s8210_s19 + $0x1e0] sm:$0xf]  ;;  %v5515_v28 = vor.u32 %v7535_v26, %v5514_v25  ;;  %v7567_v29 = vld [vmem:[%s8210_s19 + $0x1ec] sm:$0xf0]  ;;  %s5274_s11 = sld [smem:[#allocation3]] (!%p7448_p10) }
  0x4b   : > { %v5770_v30 = vld [vmem:[%s8210_s19 + $0x2e0] sm:$0xf]  ;;  %v7599_v31 = vld [vmem:[%s8210_s19 + $0x2ec] sm:$0xf0]  ;;  %v5643_v32 = vor.u32 %v7567_v29, %v5642_v27 }
  0x4c   : > { %v5771_v33 = vor.u32 %v7599_v31, %v5770_v30  ;;  %v5898_v34 = vld [vmem:[%s8210_s19 + $0x3e0] sm:$0xf]  ;;  %v7631_v35 = vld [vmem:[%s8210_s19 + $0x3ec] sm:$0xf0]  ;;  %3590 = vmatpush.bf16.msra.mxu0 %v5515_v28 }
  0x4d   : > { %v5498_v36 = vld [vmem:[%s8210_s19 + $0xc0] sm:$0xf]  ;;  %v5899_v37 = vor.u32 %v7631_v35, %v5898_v34  ;;  %v7531_v38 = vld [vmem:[%s8210_s19 + $0xcc] sm:$0xf0]  ;;  %3608 = vmatpush.bf16.msra.mxu1 %v5643_v32 }
  0x4e   : > { %v5626_v39 = vld [vmem:[%s8210_s19 + $0x1c0] sm:$0xf]  ;;  %v7563_v40 = vld [vmem:[%s8210_s19 + $0x1cc] sm:$0xf0]  ;;  %3626 = vmatpush.bf16.msra.mxu2 %v5771_v33  ;;  %v5499_v41 = vor.u32 %v7531_v38, %v5498_v36 }
  0x4f   : > { %v5627_v42 = vor.u32 %v7563_v40, %v5626_v39  ;;  %v5754_v43 = vld [vmem:[%s8210_s19 + $0x2c0] sm:$0xf]  ;;  %v7595_v44 = vld [vmem:[%s8210_s19 + $0x2cc] sm:$0xf0]  ;;  %3644 = vmatpush.bf16.msra.mxu3 %v5899_v37 }
  0x50   : > { %v5882_v45 = vld [vmem:[%s8210_s19 + $0x3c0] sm:$0xf]  ;;  %v5755_v46 = vor.u32 %v7595_v44, %v5754_v43  ;;  %v7627_v47 = vld [vmem:[%s8210_s19 + $0x3cc] sm:$0xf0]  ;;  %3591 = vmatpush.bf16.msra.mxu0 %v5499_v41 }
  0x51   : > { %v5482_v48 = vld [vmem:[%s8210_s19 + $0xa0] sm:$0xf]  ;;  %v7527_v49 = vld [vmem:[%s8210_s19 + $0xac] sm:$0xf0]  ;;  %v5883_v50 = vor.u32 %v7627_v47, %v5882_v45  ;;  %3609 = vmatpush.bf16.msra.mxu1 %v5627_v42 }
  0x52   : > { %v5610_v51 = vld [vmem:[%s8210_s19 + $0x1a0] sm:$0xf]  ;;  %v7559_v52 = vld [vmem:[%s8210_s19 + $0x1ac] sm:$0xf0]  ;;  %v5483_v54 = vor.u32 %v7527_v49, %v5482_v48  ;;  %3627 = vmatpush.bf16.msra.mxu2 %v5755_v46 }
  0x53   : > { %v5738_v53 = vld [vmem:[%s8210_s19 + $0x2a0] sm:$0xf]  ;;  %v7591_v55 = vld [vmem:[%s8210_s19 + $0x2ac] sm:$0xf0]  ;;  %v5611_v58 = vor.u32 %v7559_v52, %v5610_v51  ;;  %3645 = vmatpush.bf16.msra.mxu3 %v5883_v50 }
  0x54   : > { %v5866_v56 = vld [vmem:[%s8210_s19 + $0x3a0] sm:$0xf]  ;;  %v7623_v57 = vld [vmem:[%s8210_s19 + $0x3ac] sm:$0xf0]  ;;  %v5739_v59 = vor.u32 %v7591_v55, %v5738_v53  ;;  %3592 = vmatpush.bf16.msra.mxu0 %v5483_v54  ;;  %v7489_v55 = vld [vmem:[%s8212_s20 + $0x4] sm:$0xf] }
  0x55   : > { %v5466_v60 = vld [vmem:[%s8210_s19 + $0x80] sm:$0xf]  ;;  %v7523_v61 = vld [vmem:[%s8210_s19 + $0x8c] sm:$0xf0]  ;;  %v5867_v63 = vor.u32 %v7623_v57, %v5866_v56  ;;  %3610 = vmatpush.bf16.msra.mxu1 %v5611_v58  ;;  %v5340_v56 = vld [vmem:[%s8212_s20 + $0x40] sm:$0xf0] }
  0x56   : > { %v5594_v62 = vld [vmem:[%s8210_s19 + $0x180] sm:$0xf]  ;;  %v7555_v0 = vld [vmem:[%s8210_s19 + $0x18c] sm:$0xf0]  ;;  %v5467_v5 = vor.u32 %v7523_v61, %v5466_v60  ;;  %3628 = vmatpush.bf16.msra.mxu2 %v5739_v59  ;;  %v5346_v60 = vld [vmem:[%s8212_s20 + $0x8] sm:$0xf] }
  0x57   : > { %v5722_v1 = vld [vmem:[%s8210_s19 + $0x280] sm:$0xf]  ;;  %v7587_v2 = vld [vmem:[%s8210_s19 + $0x28c] sm:$0xf0]  ;;  %v5595_v6 = vor.u32 %v7555_v0, %v5594_v62  ;;  %3646 = vmatpush.bf16.msra.mxu3 %v5867_v63 }
  0x58   : > { %v5850_v3 = vld [vmem:[%s8210_s19 + $0x380] sm:$0xf]  ;;  %v7619_v4 = vld [vmem:[%s8210_s19 + $0x38c] sm:$0xf0]  ;;  %v5723_v7 = vor.u32 %v7587_v2, %v5722_v1  ;;  %3593 = vmatpush.bf16.msra.mxu0 %v5467_v5  ;;  %v7498_v1 = vld [vmem:[%s8212_s20 + $0x44] sm:$0xf0] }
  0x59   : > { %v5450_v8 = vld [vmem:[%s8210_s19 + $0x60] sm:$0xf]  ;;  %v7519_v9 = vld [vmem:[%s8210_s19 + $0x6c] sm:$0xf0]  ;;  %v5851_v11 = vor.u32 %v7619_v4, %v5850_v3  ;;  %3611 = vmatpush.bf16.msra.mxu1 %v5595_v6  ;;  %v7490_v2 = vld [vmem:[%s8212_s20 + $0xc] sm:$0xf] }
  0x5a   : > { %v5578_v10 = vld [vmem:[%s8210_s19 + $0x160] sm:$0xf]  ;;  %v7551_v12 = vld [vmem:[%s8210_s19 + $0x16c] sm:$0xf0]  ;;  %v5451_v17 = vor.u32 %v7519_v9, %v5450_v8  ;;  %3629 = vmatpush.bf16.msra.mxu2 %v5723_v7  ;;  %v5348_v3 = vld [vmem:[%s8212_s20 + $0x48] sm:$0xf0] }
  0x5b   : > { %v5706_v13 = vld [vmem:[%s8210_s19 + $0x260] sm:$0xf]  ;;  %v7583_v14 = vld [vmem:[%s8210_s19 + $0x26c] sm:$0xf0]  ;;  %v5579_v18 = vor.u32 %v7551_v12, %v5578_v10  ;;  %3647 = vmatpush.bf16.msra.mxu3 %v5851_v11 }
  0x5c   : > { %v5834_v15 = vld [vmem:[%s8210_s19 + $0x360] sm:$0xf]  ;;  %v7615_v16 = vld [vmem:[%s8210_s19 + $0x36c] sm:$0xf0]  ;;  %v5707_v19 = vor.u32 %v7583_v14, %v5706_v13  ;;  %3594 = vmatpush.bf16.msra.mxu0 %v5451_v17  ;;  %v8299_v14 = vor.u32 %v7489_v55, %v5340_v56 }
  0x5d   : > { %v5434_v20 = vld [vmem:[%s8210_s19 + $0x40] sm:$0xf]  ;;  %v7515_v21 = vld [vmem:[%s8210_s19 + $0x4c] sm:$0xf0]  ;;  %v5835_v23 = vor.u32 %v7615_v16, %v5834_v15  ;;  %3612 = vmatpush.bf16.msra.mxu1 %v5579_v18  ;;  %v8301_v15 = vor.u32 %v7498_v1, %v5346_v60  ;;  %v8305_v18 = vor.u32 %v7490_v2, %v5348_v3 }
  0x5e   : > { %v5562_v22 = vld [vmem:[%s8210_s19 + $0x140] sm:$0xf]  ;;  %v7547_v24 = vld [vmem:[%s8210_s19 + $0x14c] sm:$0xf0]  ;;  %v5435_v29 = vor.u32 %v7515_v21, %v5434_v20  ;;  %3630 = vmatpush.bf16.msra.mxu2 %v5707_v19 }
  0x5f   : > { %v5690_v25 = vld [vmem:[%s8210_s19 + $0x240] sm:$0xf]  ;;  %v7579_v26 = vld [vmem:[%s8210_s19 + $0x24c] sm:$0xf0]  ;;  %v5563_v30 = vor.u32 %v7547_v24, %v5562_v22  ;;  %3648 = vmatpush.bf16.msra.mxu3 %v5835_v23 }
  0x60   : > { %v5818_v27 = vld [vmem:[%s8210_s19 + $0x340] sm:$0xf]  ;;  %v7611_v28 = vld [vmem:[%s8210_s19 + $0x34c] sm:$0xf0]  ;;  %v5691_v31 = vor.u32 %v7579_v26, %v5690_v25  ;;  %3595 = vmatpush.bf16.msra.mxu0 %v5435_v29 }
  0x61   : > { %v5418_v32 = vld [vmem:[%s8210_s19 + $0x20] sm:$0xf]  ;;  %v7511_v33 = vld [vmem:[%s8210_s19 + $0x2c] sm:$0xf0]  ;;  %v5819_v35 = vor.u32 %v7611_v28, %v5818_v27  ;;  %3613 = vmatpush.bf16.msra.mxu1 %v5563_v30 }
  0x62   : > { %v5546_v34 = vld [vmem:[%s8210_s19 + $0x120] sm:$0xf]  ;;  %v7543_v36 = vld [vmem:[%s8210_s19 + $0x12c] sm:$0xf0]  ;;  %v5419_v42 = vor.u32 %v7511_v33, %v5418_v32  ;;  %3631 = vmatpush.bf16.msra.mxu2 %v5691_v31 }
  0x63   : > { %v5674_v37 = vld [vmem:[%s8210_s19 + $0x220] sm:$0xf]  ;;  %v7575_v38 = vld [vmem:[%s8210_s19 + $0x22c] sm:$0xf0]  ;;  %v5547_v46 = vor.u32 %v7543_v36, %v5546_v34  ;;  %3649 = vmatpush.bf16.msra.mxu3 %v5819_v35 }
  0x64   : > { %v5802_v39 = vld [vmem:[%s8210_s19 + $0x320] sm:$0xf]  ;;  %v7607_v40 = vld [vmem:[%s8210_s19 + $0x32c] sm:$0xf0]  ;;  %v5675_v47 = vor.u32 %v7575_v38, %v5674_v37  ;;  %3596 = vmatpush.bf16.msra.mxu0 %v5419_v42 }
  0x65   : > { %v5402_v41 = vld [vmem:[%s8210_s19] sm:$0xf]  ;;  %v7507_v43 = vld [vmem:[%s8210_s19 + $0xc] sm:$0xf0]  ;;  %v5803_v51 = vor.u32 %v7607_v40, %v5802_v39  ;;  %3614 = vmatpush.bf16.msra.mxu1 %v5547_v46 }
  0x66   : > { %v5530_v44 = vld [vmem:[%s8210_s19 + $0x100] sm:$0xf]  ;;  %v7539_v45 = vld [vmem:[%s8210_s19 + $0x10c] sm:$0xf0]  ;;  %v5403_v59 = vor.u32 %v7507_v43, %v5402_v41  ;;  %3632 = vmatpush.bf16.msra.mxu2 %v5675_v47 }
  0x67   : > { %v5658_v48 = vld [vmem:[%s8210_s19 + $0x200] sm:$0xf]  ;;  %v7571_v49 = vld [vmem:[%s8210_s19 + $0x20c] sm:$0xf0]  ;;  %v5531_v63 = vor.u32 %v7539_v45, %v5530_v44  ;;  %3650 = vmatpush.bf16.msra.mxu3 %v5803_v51  ;;  %v375_v45 = vld [vmem:[%s8212_s20 + $0x88] sm:$0x11] }
  0x68   : > { %v5786_v50 = vld [vmem:[%s8210_s19 + $0x300] sm:$0xf]  ;;  %v7603_v52 = vld [vmem:[%s8210_s19 + $0x30c] sm:$0xf0]  ;;  %v5659_v0 = vor.u32 %v7571_v49, %v5658_v48  ;;  %3597 = vmatpush.bf16.msra.mxu0 %v5403_v59 }
  0x69   : > { %v5338_v53 = vld [vmem:[%s8212_s20] sm:$0xf]  ;;  %v7727_v58 = vld [vmem:[%s8210_s19 + $0x6ec] sm:$0xf0]  ;;  %v5787_v4 = vor.u32 %v7603_v52, %v5786_v50  ;;  %3615 = vmatpush.bf16.msra.mxu1 %v5531_v63 }
  0x6a   : > { %v7497_v54 = vld [vmem:[%s8212_s20 + $0x3c] sm:$0xf0]  ;;  %v7759_v62 = vld [vmem:[%s8210_s19 + $0x7ec] sm:$0xf0]  ;;  %3633 = vmatpush.bf16.msra.mxu2 %v5659_v0 }
  0x6b   : > { %v6282_v57 = vld [vmem:[%s8210_s19 + $0x6e0] sm:$0xf]  ;;  %v7663_v7 = vld [vmem:[%s8210_s19 + $0x4ec] sm:$0xf0]  ;;  %v8294_v9 = vor.u32 %v7497_v54, %v5338_v53  ;;  %3651 = vmatpush.bf16.msra.mxu3 %v5787_v4 }
  0x6c   : > { %v6410_v61 = vld [vmem:[%s8210_s19 + $0x7e0] sm:$0xf]  ;;  %v6283_v5 = vor.u32 %v7727_v58, %v6282_v57  ;;  %v7695_v11 = vld [vmem:[%s8210_s19 + $0x5ec] sm:$0xf0]  ;;  %3616 = vmatmul.bf16.vlgmr.msra.gmra.mxu1 %v8299_v14  ;;  %v952_v57 = vunpack.c.l.b16 %v375_v45 }
  0x6d   : > { %v6026_v6 = vld [vmem:[%s8210_s19 + $0x4e0] sm:$0xf]  ;;  %v6411_v10 = vor.u32 %v7759_v62, %v6410_v61  ;;  %v7723_v13 = vld [vmem:[%s8210_s19 + $0x6cc] sm:$0xf0]  ;;  %3598 = vmatmul.bf16.vlgmr.msra.gmra.mxu0 %v8294_v9  ;;  %3634 = vmatmul.bf16.vlgmr.msra.gmra.mxu2 %v8301_v15  ;;  %v953_v61 = vunpack.c.h.b16 %v375_v45 }
  0x6e   : > { %v6154_v8 = vld [vmem:[%s8210_s19 + $0x5e0] sm:$0xf]  ;;  %v7755_v17 = vld [vmem:[%s8210_s19 + $0x7cc] sm:$0xf0]  ;;  %v6027_v19 = vor.u32 %v7663_v7, %v6026_v6  ;;  %3698 = vmatpush.bf16.msrb.mxu2 %v6283_v5  ;;  %3652 = vmatmul.bf16.vlgmr.msra.gmra.mxu3 %v8305_v18 }
  0x6f   : > { %v6266_v12 = vld [vmem:[%s8210_s19 + $0x6c0] sm:$0xf]  ;;  %v6155_v20 = vor.u32 %v7695_v11, %v6154_v8  ;;  %v7659_v23 = vld [vmem:[%s8210_s19 + $0x4cc] sm:$0xf0]  ;;  %3716 = vmatpush.bf16.msrb.mxu3 %v6411_v10  ;;  %v8347_v10 = vpack.c.b16 %v952_v57, %v952_v57 }
  0x70   : > { %v6394_v16 = vld [vmem:[%s8210_s19 + $0x7c0] sm:$0xf]  ;;  %v6267_v21 = vor.u32 %v7723_v13, %v6266_v12  ;;  %v7691_v26 = vld [vmem:[%s8210_s19 + $0x5cc] sm:$0xf0]  ;;  %3662 = vmatpush.bf16.msrb.mxu0 %v6027_v19  ;;  %v8351_v13 = vpack.c.b16 %v953_v61, %v953_v61 }
  0x71   : > { %v6010_v22 = vld [vmem:[%s8210_s19 + $0x4c0] sm:$0xf]  ;;  %v6395_v25 = vor.u32 %v7755_v17, %v6394_v16  ;;  %v7719_v28 = vld [vmem:[%s8210_s19 + $0x6ac] sm:$0xf0]  ;;  %3680 = vmatpush.bf16.msrb.mxu1 %v6155_v20  ;;  %10134 = vst [vmem:[#allocation7_spill] sm:$0xff] %v8347_v10 }
  0x72   : > { %v6138_v24 = vld [vmem:[%s8210_s19 + $0x5c0] sm:$0xf]  ;;  %v7751_v30 = vld [vmem:[%s8210_s19 + $0x7ac] sm:$0xf0]  ;;  %v6011_v31 = vor.u32 %v7659_v23, %v6010_v22  ;;  %3699 = vmatpush.bf16.msrb.mxu2 %v6267_v21  ;;  %10135 = vst [vmem:[#allocation8_spill] sm:$0xff] %v8351_v13 }
  0x73   : > { %v6250_v27 = vld [vmem:[%s8210_s19 + $0x6a0] sm:$0xf]  ;;  %v6139_v32 = vor.u32 %v7691_v26, %v6138_v24  ;;  %v7655_v35 = vld [vmem:[%s8210_s19 + $0x4ac] sm:$0xf0]  ;;  %3717 = vmatpush.bf16.msrb.mxu3 %v6395_v25 }
  0x74   : > { %v6378_v29 = vld [vmem:[%s8210_s19 + $0x7a0] sm:$0xf]  ;;  %v6251_v33 = vor.u32 %v7719_v28, %v6250_v27  ;;  %v7687_v38 = vld [vmem:[%s8210_s19 + $0x5ac] sm:$0xf0]  ;;  %3663 = vmatpush.bf16.msrb.mxu0 %v6011_v31 }
  0x75   : > { %v5994_v34 = vld [vmem:[%s8210_s19 + $0x4a0] sm:$0xf]  ;;  %v6379_v37 = vor.u32 %v7751_v30, %v6378_v29  ;;  %v7715_v40 = vld [vmem:[%s8210_s19 + $0x68c] sm:$0xf0]  ;;  %3681 = vmatpush.bf16.msrb.mxu1 %v6139_v32 }
  0x76   : > { %v6122_v36 = vld [vmem:[%s8210_s19 + $0x5a0] sm:$0xf]  ;;  %v7747_v42 = vld [vmem:[%s8210_s19 + $0x78c] sm:$0xf0]  ;;  %v5995_v44 = vor.u32 %v7655_v35, %v5994_v34  ;;  %3700 = vmatpush.bf16.msrb.mxu2 %v6251_v33 }
  0x77   : > { %v6234_v39 = vld [vmem:[%s8210_s19 + $0x680] sm:$0xf]  ;;  %v6123_v46 = vor.u32 %v7687_v38, %v6122_v36  ;;  %v7651_v49 = vld [vmem:[%s8210_s19 + $0x48c] sm:$0xf0]  ;;  %3718 = vmatpush.bf16.msrb.mxu3 %v6379_v37 }
  0x78   : > { %v6362_v41 = vld [vmem:[%s8210_s19 + $0x780] sm:$0xf]  ;;  %v6235_v47 = vor.u32 %v7715_v40, %v6234_v39  ;;  %v7683_v52 = vld [vmem:[%s8210_s19 + $0x58c] sm:$0xf0]  ;;  %3664 = vmatpush.bf16.msrb.mxu0 %v5995_v44 }
  0x79   : > { %v374_v43 = vld [vmem:[%s8212_s20 + $0x80] sm:$0x11]  ;;  %v6363_v51 = vor.u32 %v7747_v42, %v6362_v41  ;;  %v7711_v55 = vld [vmem:[%s8210_s19 + $0x66c] sm:$0xf0]  ;;  %3682 = vmatpush.bf16.msrb.mxu1 %v6123_v46 }
  0x7a   : > { %v5978_v48 = vld [vmem:[%s8210_s19 + $0x480] sm:$0xf]  ;;  %v950_v53 = vunpack.c.l.b16 %v374_v43  ;;  %v951_v56 = vunpack.c.h.b16 %v374_v43  ;;  %v7743_v59 = vld [vmem:[%s8210_s19 + $0x76c] sm:$0xf0]  ;;  %3701 = vmatpush.bf16.msrb.mxu2 %v6235_v47 }
  0x7b   : > { %v6106_v50 = vld [vmem:[%s8210_s19 + $0x580] sm:$0xf]  ;;  %v5979_v60 = vor.u32 %v7651_v49, %v5978_v48  ;;  %v7647_v1 = vld [vmem:[%s8210_s19 + $0x46c] sm:$0xf0]  ;;  %3719 = vmatpush.bf16.msrb.mxu3 %v6363_v51 }
  0x7c   : > { %v6218_v54 = vld [vmem:[%s8210_s19 + $0x660] sm:$0xf]  ;;  %v6107_v62 = vor.u32 %v7683_v52, %v6106_v50  ;;  %v8340_v3 = vpack.c.b16 %v950_v53, %v950_v53  ;;  %v7679_v5 = vld [vmem:[%s8210_s19 + $0x56c] sm:$0xf0]  ;;  %v8345_v8 = vpack.c.b16 %v951_v56, %v951_v56 }
  0x7d   : > { %v6346_v58 = vld [vmem:[%s8210_s19 + $0x760] sm:$0xf]  ;;  %v6219_v63 = vor.u32 %v7711_v55, %v6218_v54  ;;  %v7707_v7 = vld [vmem:[%s8210_s19 + $0x64c] sm:$0xf0]  ;;  %3665 = vmatpush.bf16.msrb.mxu0 %v5979_v60  ;;  %3639 = vmatmul.bf16.gmra.mxu2 %v8347_v10  ;;  %v5356_v60 = vld [vmem:[%s8212_s20 + $0x50] sm:$0xf0] }
  0x7e   : > { %v5962_v0 = vld [vmem:[%s8210_s19 + $0x460] sm:$0xf]  ;;  %10132 = vst [vmem:[#allocation5_spill] sm:$0xff] %v8340_v3  ;;  %v6347_v4 = vor.u32 %v7743_v59, %v6346_v58  ;;  %v7739_v12 = vld [vmem:[%s8210_s19 + $0x74c] sm:$0xf0]  ;;  %3683 = vmatpush.bf16.msrb.mxu1 %v6107_v62  ;;  %3603 = vmatmul.bf16.gmra.mxu0 %v8340_v3 }
  0x7f   : > { %v6090_v2 = vld [vmem:[%s8210_s19 + $0x560] sm:$0xf]  ;;  %10133 = vst [vmem:[#allocation6_spill] sm:$0xff] %v8345_v8  ;;  %v5963_v16 = vor.u32 %v7647_v1, %v5962_v0  ;;  %3702 = vmatpush.bf16.msrb.mxu2 %v6219_v63  ;;  %v7643_v21 = vld [vmem:[%s8210_s19 + $0x44c] sm:$0xf0]  ;;  %3621 = vmatmul.bf16.gmra.mxu1 %v8345_v8 }
  0x80   : > { %v6202_v6 = vld [vmem:[%s8210_s19 + $0x640] sm:$0xf]  ;;  %v6091_v17 = vor.u32 %v7679_v5, %v6090_v2  ;;  %3720 = vmatpush.bf16.msrb.mxu3 %v6347_v4  ;;  %v7675_v24 = vld [vmem:[%s8210_s19 + $0x54c] sm:$0xf0]  ;;  %v7491_v59 = vld [vmem:[%s8212_s20 + $0x14] sm:$0xf] }
  0x81   : > { %v6330_v11 = vld [vmem:[%s8210_s19 + $0x740] sm:$0xf]  ;;  %v6203_v19 = vor.u32 %v7707_v7, %v6202_v6  ;;  %v7703_v26 = vld [vmem:[%s8210_s19 + $0x62c] sm:$0xf0]  ;;  %3657 = vmatmul.bf16.gmra.mxu3 %v8351_v13  ;;  %3666 = vmatpush.bf16.msrb.mxu0 %v5963_v16  ;;  %v5362_v2 = vld [vmem:[%s8212_s20 + $0x18] sm:$0xf] }
  0x82   : > { %v5946_v20 = vld [vmem:[%s8210_s19 + $0x440] sm:$0xf]  ;;  %v6331_v23 = vor.u32 %v7739_v12, %v6330_v11  ;;  %v7735_v28 = vld [vmem:[%s8210_s19 + $0x72c] sm:$0xf0]  ;;  %3684 = vmatpush.bf16.msrb.mxu1 %v6091_v17  ;;  %v7500_v4 = vld [vmem:[%s8212_s20 + $0x54] sm:$0xf0] }
  0x83   : > { %v6074_v22 = vld [vmem:[%s8210_s19 + $0x540] sm:$0xf]  ;;  %v5947_v29 = vor.u32 %v7643_v21, %v5946_v20  ;;  %3703 = vmatpush.bf16.msrb.mxu2 %v6203_v19  ;;  %v7639_v33 = vld [vmem:[%s8210_s19 + $0x42c] sm:$0xf0]  ;;  %v7492_v5 = vld [vmem:[%s8212_s20 + $0x1c] sm:$0xf] }
  0x84   : > { %v6186_v25 = vld [vmem:[%s8210_s19 + $0x620] sm:$0xf]  ;;  %v6075_v31 = vor.u32 %v7675_v24, %v6074_v22  ;;  %v7671_v35 = vld [vmem:[%s8210_s19 + $0x52c] sm:$0xf0]  ;;  %3721 = vmatpush.bf16.msrb.mxu3 %v6331_v23  ;;  %v5364_v7 = vld [vmem:[%s8212_s20 + $0x58] sm:$0xf0]  ;;  %v8402_v24 = vor.u32 %v7500_v4, %v5362_v2 }
  0x85   : > { %v6314_v27 = vld [vmem:[%s8210_s19 + $0x720] sm:$0xf]  ;;  %v6187_v32 = vor.u32 %v7703_v26, %v6186_v25  ;;  %v7699_v38 = vld [vmem:[%s8210_s19 + $0x60c] sm:$0xf0]  ;;  %3667 = vmatpush.bf16.msrb.mxu0 %v5947_v29  ;;  %v8409_v29 = vor.u32 %v7492_v5, %v5364_v7 }
  0x86   : > { %v5930_v30 = vld [vmem:[%s8210_s19 + $0x420] sm:$0xf]  ;;  %v6315_v36 = vor.u32 %v7735_v28, %v6314_v27  ;;  %v7731_v40 = vld [vmem:[%s8210_s19 + $0x70c] sm:$0xf0]  ;;  %3685 = vmatpush.bf16.msrb.mxu1 %v6075_v31  ;;  %10137 = vst [vmem:[#allocation10_spill] sm:$0xff] %v8402_v24  ;;  %v8407_v28 = vor.u32 %v7491_v59, %v5356_v60 }
  0x87   : > { %v6058_v34 = vld [vmem:[%s8210_s19 + $0x520] sm:$0xf]  ;;  %v7855_v42 = vld [vmem:[%s8210_s19 + $0xaec] sm:$0xf0]  ;;  %v5931_v43 = vor.u32 %v7639_v33, %v5930_v30  ;;  %3704 = vmatpush.bf16.msrb.mxu2 %v6187_v32  ;;  %10139 = vst [vmem:[#allocation12_spill] sm:$0xff] %v8409_v29 }
  0x88   : > { %v6170_v37 = vld [vmem:[%s8210_s19 + $0x600] sm:$0xf]  ;;  %v7887_v46 = vld [vmem:[%s8210_s19 + $0xbec] sm:$0xf0]  ;;  %v6059_v47 = vor.u32 %v7671_v35, %v6058_v34  ;;  %3722 = vmatpush.bf16.msrb.mxu3 %v6315_v36  ;;  %10138 = vst [vmem:[#allocation11_spill] sm:$0xff] %v8407_v28 }
  0x89   : > { %v6298_v39 = vld [vmem:[%s8210_s19 + $0x700] sm:$0xf]  ;;  %v6171_v48 = vor.u32 %v7699_v38, %v6170_v37  ;;  %v7635_v49 = vld [vmem:[%s8210_s19 + $0x40c] sm:$0xf0]  ;;  %3668 = vmatpush.bf16.msrb.mxu0 %v5931_v43 }
  0x8a   : > { %v6794_v41 = vld [vmem:[%s8210_s19 + $0xae0] sm:$0xf]  ;;  %v7667_v51 = vld [vmem:[%s8210_s19 + $0x50c] sm:$0xf0]  ;;  %v6299_v52 = vor.u32 %v7731_v40, %v6298_v39  ;;  %3686 = vmatpush.bf16.msrb.mxu1 %v6059_v47 }
  0x8b   : > { %v5914_v44 = vld [vmem:[%s8210_s19 + $0x400] sm:$0xf]  ;;  %v5354_v53 = vld [vmem:[%s8212_s20 + $0x10] sm:$0xf]  ;;  %v6795_v55 = vor.u32 %v7855_v42, %v6794_v41  ;;  %3705 = vmatpush.bf16.msrb.mxu2 %v6171_v48 }
  0x8c   : > { %v6922_v45 = vld [vmem:[%s8210_s19 + $0xbe0] sm:$0xf]  ;;  %v7499_v54 = vld [vmem:[%s8212_s20 + $0x4c] sm:$0xf0]  ;;  %v5915_v1 = vor.u32 %v7635_v49, %v5914_v44  ;;  %3723 = vmatpush.bf16.msrb.mxu3 %v6299_v52 }
  0x8d   : > { %v6042_v50 = vld [vmem:[%s8210_s19 + $0x500] sm:$0xf]  ;;  %v7791_v57 = vld [vmem:[%s8210_s19 + $0x8ec] sm:$0xf0]  ;;  %v6923_v61 = vor.u32 %v7887_v46, %v6922_v45  ;;  %v8400_v23 = vor.u32 %v7499_v54, %v5354_v53 }
  0x8e   : > { %v6538_v56 = vld [vmem:[%s8210_s19 + $0x8e0] sm:$0xf]  ;;  %v7823_v62 = vld [vmem:[%s8210_s19 + $0x9ec] sm:$0xf0]  ;;  %v6043_v6 = vor.u32 %v7667_v51, %v6042_v50  ;;  %3669 = vmatpush.bf16.msrb.mxu0 %v5915_v1  ;;  %3706 = vmatmul.bf16.vlgmr.msrb.gmra.mxu2 %v8402_v24 }
  0x8f   : > { %v6666_v58 = vld [vmem:[%s8210_s19 + $0x9e0] sm:$0xf]  ;;  %v7851_v0 = vld [vmem:[%s8210_s19 + $0xacc] sm:$0xf0]  ;;  %v6539_v11 = vor.u32 %v7791_v57, %v6538_v56  ;;  %3770 = vmatpush.bf16.msra.mxu2 %v6795_v55  ;;  %10136 = vst [vmem:[#allocation9_spill] sm:$0xff] %v8400_v23 }
  0x90   : > { %v6778_v63 = vld [vmem:[%s8210_s19 + $0xac0] sm:$0xf]  ;;  %v7883_v16 = vld [vmem:[%s8210_s19 + $0xbcc] sm:$0xf0]  ;;  %v6667_v17 = vor.u32 %v7823_v62, %v6666_v58  ;;  %3788 = vmatpush.bf16.msra.mxu3 %v6923_v61  ;;  %3687 = vmatpush.bf16.msrb.mxu1 %v6043_v6  ;;  %v377_v55 = vld [vmem:[%s8212_s20 + $0x98] sm:$0x11] }
  0x91   : > { %v6906_v12 = vld [vmem:[%s8210_s19 + $0xbc0] sm:$0xf]  ;;  %v6779_v19 = vor.u32 %v7851_v0, %v6778_v63  ;;  %v7787_v21 = vld [vmem:[%s8210_s19 + $0x8cc] sm:$0xf0]  ;;  %3670 = vmatmul.bf16.vlgmr.msrb.gmra.mxu0 %v8400_v23  ;;  %3724 = vmatmul.bf16.vlgmr.msrb.gmra.mxu3 %v8409_v29  ;;  %v956_v2 = vunpack.c.l.b16 %v377_v55 }
  0x92   : > { %v6522_v20 = vld [vmem:[%s8210_s19 + $0x8c0] sm:$0xf]  ;;  %v7819_v25 = vld [vmem:[%s8210_s19 + $0x9cc] sm:$0xf0]  ;;  %3734 = vmatpush.bf16.msra.mxu0 %v6539_v11  ;;  %v6907_v30 = vor.u32 %v7883_v16, %v6906_v12  ;;  %v957_v11 = vunpack.c.h.b16 %v377_v55 }
  0x93   : > { %v6650_v22 = vld [vmem:[%s8210_s19 + $0x9c0] sm:$0xf]  ;;  %v7847_v27 = vld [vmem:[%s8210_s19 + $0xaac] sm:$0xf0]  ;;  %v6523_v31 = vor.u32 %v7787_v21, %v6522_v20  ;;  %3771 = vmatpush.bf16.msra.mxu2 %v6779_v19  ;;  %3688 = vmatmul.bf16.vlgmr.msrb.gmra.mxu1 %v8407_v28 }
  0x94   : > { %v6762_v26 = vld [vmem:[%s8210_s19 + $0xaa0] sm:$0xf]  ;;  %v7879_v33 = vld [vmem:[%s8210_s19 + $0xbac] sm:$0xf0]  ;;  %3752 = vmatpush.bf16.msra.mxu1 %v6667_v17  ;;  %v6651_v34 = vor.u32 %v7819_v25, %v6650_v22  ;;  %3789 = vmatpush.bf16.msra.mxu3 %v6907_v30  ;;  %v8448_v30 = vpack.c.b16 %v956_v2, %v956_v2 }
  0x95   : > { %v6890_v32 = vld [vmem:[%s8210_s19 + $0xba0] sm:$0xf]  ;;  %v6763_v35 = vor.u32 %v7847_v27, %v6762_v26  ;;  %v7783_v37 = vld [vmem:[%s8210_s19 + $0x8ac] sm:$0xf0] }
  0x96   : > { %v6506_v36 = vld [vmem:[%s8210_s19 + $0x8a0] sm:$0xf]  ;;  %v7815_v39 = vld [vmem:[%s8210_s19 + $0x9ac] sm:$0xf0]  ;;  %3735 = vmatpush.bf16.msra.mxu0 %v6523_v31  ;;  %v6891_v42 = vor.u32 %v7879_v33, %v6890_v32  ;;  %10141 = vst [vmem:[#allocation14_spill] sm:$0xff] %v8448_v30 }
  0x97   : > { %v6634_v38 = vld [vmem:[%s8210_s19 + $0x9a0] sm:$0xf]  ;;  %v7843_v41 = vld [vmem:[%s8210_s19 + $0xa8c] sm:$0xf0]  ;;  %v6507_v43 = vor.u32 %v7783_v37, %v6506_v36  ;;  %3772 = vmatpush.bf16.msra.mxu2 %v6763_v35  ;;  %v8455_v35 = vpack.c.b16 %v957_v11, %v957_v11 }
  0x98   : > { %v6746_v40 = vld [vmem:[%s8210_s19 + $0xa80] sm:$0xf]  ;;  %v7875_v45 = vld [vmem:[%s8210_s19 + $0xb8c] sm:$0xf0]  ;;  %3753 = vmatpush.bf16.msra.mxu1 %v6651_v34  ;;  %v6635_v46 = vor.u32 %v7815_v39, %v6634_v38  ;;  %3790 = vmatpush.bf16.msra.mxu3 %v6891_v42 }
  0x99   : > { %v6874_v44 = vld [vmem:[%s8210_s19 + $0xb80] sm:$0xf]  ;;  %v6747_v47 = vor.u32 %v7843_v41, %v6746_v40  ;;  %v7779_v49 = vld [vmem:[%s8210_s19 + $0x88c] sm:$0xf0]  ;;  %10143 = vst [vmem:[#allocation16_spill] sm:$0xff] %v8455_v35 }
  0x9a   : > { %v6490_v48 = vld [vmem:[%s8210_s19 + $0x880] sm:$0xf]  ;;  %v7811_v51 = vld [vmem:[%s8210_s19 + $0x98c] sm:$0xf0]  ;;  %3736 = vmatpush.bf16.msra.mxu0 %v6507_v43  ;;  %v6875_v56 = vor.u32 %v7875_v45, %v6874_v44 }
  0x9b   : > { %v6618_v50 = vld [vmem:[%s8210_s19 + $0x980] sm:$0xf]  ;;  %v7839_v53 = vld [vmem:[%s8210_s19 + $0xa6c] sm:$0xf0]  ;;  %v6491_v57 = vor.u32 %v7779_v49, %v6490_v48  ;;  %3773 = vmatpush.bf16.msra.mxu2 %v6747_v47 }
  0x9c   : > { %v6730_v52 = vld [vmem:[%s8210_s19 + $0xa60] sm:$0xf]  ;;  %v376_v54 = vld [vmem:[%s8212_s20 + $0x90] sm:$0x11]  ;;  %3754 = vmatpush.bf16.msra.mxu1 %v6635_v46  ;;  %v6619_v60 = vor.u32 %v7811_v51, %v6618_v50  ;;  %3791 = vmatpush.bf16.msra.mxu3 %v6875_v56 }
  0x9d   : > { %v6858_v58 = vld [vmem:[%s8210_s19 + $0xb60] sm:$0xf]  ;;  %v7871_v59 = vld [vmem:[%s8210_s19 + $0xb6c] sm:$0xf0]  ;;  %v6731_v61 = vor.u32 %v7839_v53, %v6730_v52  ;;  %v954_v1 = vunpack.c.l.b16 %v376_v54  ;;  %v955_v7 = vunpack.c.h.b16 %v376_v54 }
  0x9e   : > { %v6474_v62 = vld [vmem:[%s8210_s19 + $0x860] sm:$0xf]  ;;  %v7775_v63 = vld [vmem:[%s8210_s19 + $0x86c] sm:$0xf0]  ;;  %3737 = vmatpush.bf16.msra.mxu0 %v6491_v57  ;;  %v6859_v12 = vor.u32 %v7871_v59, %v6858_v58  ;;  %3711 = vmatmul.bf16.gmra.mxu2 %v8448_v30 }
  0x9f   : > { %v6602_v0 = vld [vmem:[%s8210_s19 + $0x960] sm:$0xf]  ;;  %v7807_v4 = vld [vmem:[%s8210_s19 + $0x96c] sm:$0xf0]  ;;  %v6475_v16 = vor.u32 %v7775_v63, %v6474_v62  ;;  %3774 = vmatpush.bf16.msra.mxu2 %v6731_v61  ;;  %v8446_v27 = vpack.c.b16 %v954_v1, %v954_v1  ;;  %v8453_v34 = vpack.c.b16 %v955_v7, %v955_v7 }
  0xa0   : > { %v6714_v5 = vld [vmem:[%s8210_s19 + $0xa40] sm:$0xf]  ;;  %v7835_v6 = vld [vmem:[%s8210_s19 + $0xa4c] sm:$0xf0]  ;;  %3755 = vmatpush.bf16.msra.mxu1 %v6619_v60  ;;  %v6603_v20 = vor.u32 %v7807_v4, %v6602_v0  ;;  %3792 = vmatpush.bf16.msra.mxu3 %v6859_v12 }
  0xa1   : > { %v6842_v17 = vld [vmem:[%s8210_s19 + $0xb40] sm:$0xf]  ;;  %v7867_v19 = vld [vmem:[%s8210_s19 + $0xb4c] sm:$0xf0]  ;;  %v6715_v21 = vor.u32 %v7835_v6, %v6714_v5  ;;  %10140 = vst [vmem:[#allocation13_spill] sm:$0xff] %v8446_v27  ;;  %3675 = vmatmul.bf16.gmra.mxu0 %v8446_v27  ;;  %3729 = vmatmul.bf16.gmra.mxu3 %v8455_v35 }
  0xa2   : > { %v6458_v22 = vld [vmem:[%s8210_s19 + $0x840] sm:$0xf]  ;;  %v7771_v25 = vld [vmem:[%s8210_s19 + $0x84c] sm:$0xf0]  ;;  %10142 = vst [vmem:[#allocation15_spill] sm:$0xff] %v8453_v34  ;;  %3738 = vmatpush.bf16.msra.mxu0 %v6475_v16  ;;  %v6843_v36 = vor.u32 %v7867_v19, %v6842_v17 }
  0xa3   : > { %v6586_v26 = vld [vmem:[%s8210_s19 + $0x940] sm:$0xf]  ;;  %v7803_v31 = vld [vmem:[%s8210_s19 + $0x94c] sm:$0xf0]  ;;  %v6459_v37 = vor.u32 %v7771_v25, %v6458_v22  ;;  %3775 = vmatpush.bf16.msra.mxu2 %v6715_v21  ;;  %3693 = vmatmul.bf16.gmra.mxu1 %v8453_v34  ;;  %v7493_v19 = vld [vmem:[%s8212_s20 + $0x24] sm:$0xf] }
  0xa4   : > { %v6698_v32 = vld [vmem:[%s8210_s19 + $0xa20] sm:$0xf]  ;;  %v7831_v33 = vld [vmem:[%s8210_s19 + $0xa2c] sm:$0xf0]  ;;  %3756 = vmatpush.bf16.msra.mxu1 %v6603_v20  ;;  %v6587_v40 = vor.u32 %v7803_v31, %v6586_v26  ;;  %3793 = vmatpush.bf16.msra.mxu3 %v6843_v36  ;;  %v5372_v20 = vld [vmem:[%s8212_s20 + $0x60] sm:$0xf0] }
  0xa5   : > { %v6826_v38 = vld [vmem:[%s8210_s19 + $0xb20] sm:$0xf]  ;;  %v7863_v39 = vld [vmem:[%s8210_s19 + $0xb2c] sm:$0xf0]  ;;  %v6699_v41 = vor.u32 %v7831_v33, %v6698_v32  ;;  %v5378_v31 = vld [vmem:[%s8212_s20 + $0x28] sm:$0xf] }
  0xa6   : > { %v6442_v42 = vld [vmem:[%s8210_s19 + $0x820] sm:$0xf]  ;;  %v7767_v43 = vld [vmem:[%s8210_s19 + $0x82c] sm:$0xf0]  ;;  %3739 = vmatpush.bf16.msra.mxu0 %v6459_v37  ;;  %v6827_v50 = vor.u32 %v7863_v39, %v6826_v38  ;;  %v7502_v32 = vld [vmem:[%s8212_s20 + $0x64] sm:$0xf0] }
  0xa7   : > { %v6570_v44 = vld [vmem:[%s8210_s19 + $0x920] sm:$0xf]  ;;  %v7799_v45 = vld [vmem:[%s8210_s19 + $0x92c] sm:$0xf0]  ;;  %v6443_v51 = vor.u32 %v7767_v43, %v6442_v42  ;;  %3776 = vmatpush.bf16.msra.mxu2 %v6699_v41  ;;  %v7494_v33 = vld [vmem:[%s8212_s20 + $0x2c] sm:$0xf] }
  0xa8   : > { %v6682_v46 = vld [vmem:[%s8210_s19 + $0xa00] sm:$0xf]  ;;  %v7827_v47 = vld [vmem:[%s8210_s19 + $0xa0c] sm:$0xf0]  ;;  %3757 = vmatpush.bf16.msra.mxu1 %v6587_v40  ;;  %v6571_v55 = vor.u32 %v7799_v45, %v6570_v44  ;;  %3794 = vmatpush.bf16.msra.mxu3 %v6827_v50  ;;  %v5380_v37 = vld [vmem:[%s8212_s20 + $0x68] sm:$0xf0]  ;;  %v8502_v45 = vor.u32 %v7502_v32, %v5378_v31 }
  0xa9   : > { %v7306_v48 = vld [vmem:[%s8210_s19 + $0xee0] sm:$0xf]  ;;  %v7983_v49 = vld [vmem:[%s8210_s19 + $0xeec] sm:$0xf0]  ;;  %v6683_v56 = vor.u32 %v7827_v47, %v6682_v46  ;;  %v8509_v50 = vor.u32 %v7494_v33, %v5380_v37 }
  0xaa   : > { %v6810_v52 = vld [vmem:[%s8210_s19 + $0xb00] sm:$0xf]  ;;  %v7859_v53 = vld [vmem:[%s8210_s19 + $0xb0c] sm:$0xf0]  ;;  %v7307_v60 = vor.u32 %v7983_v49, %v7306_v48  ;;  %3740 = vmatpush.bf16.msra.mxu0 %v6443_v51  ;;  %v8507_v49 = vor.u32 %v7493_v19, %v5372_v20  ;;  %v379_v20 = vld [vmem:[%s8212_s20 + $0xa8] sm:$0x11] }
  0xab   : > { %v6426_v54 = vld [vmem:[%s8210_s19 + $0x800] sm:$0xf]  ;;  %v7763_v57 = vld [vmem:[%s8210_s19 + $0x80c] sm:$0xf0]  ;;  %v6811_v4 = vor.u32 %v7859_v53, %v6810_v52  ;;  %3777 = vmatpush.bf16.msra.mxu2 %v6683_v56 }
  0xac   : > { %v6554_v58 = vld [vmem:[%s8210_s19 + $0x900] sm:$0xf]  ;;  %v7795_v59 = vld [vmem:[%s8210_s19 + $0x90c] sm:$0xf0]  ;;  %v6427_v5 = vor.u32 %v7763_v57, %v6426_v54  ;;  %3758 = vmatpush.bf16.msra.mxu1 %v6571_v55 }
  0xad   : > { %v7434_v61 = vld [vmem:[%s8210_s19 + $0xfe0] sm:$0xf]  ;;  %v8015_v62 = vld [vmem:[%s8210_s19 + $0xfec] sm:$0xf0]  ;;  %v6555_v11 = vor.u32 %v7795_v59, %v6554_v58  ;;  %3795 = vmatpush.bf16.msra.mxu3 %v6811_v4 }
  0xae   : > { %v7050_v63 = vld [vmem:[%s8210_s19 + $0xce0] sm:$0xf]  ;;  %v7919_v0 = vld [vmem:[%s8210_s19 + $0xcec] sm:$0xf0]  ;;  %v7435_v17 = vor.u32 %v8015_v62, %v7434_v61  ;;  %3741 = vmatpush.bf16.msra.mxu0 %v6427_v5  ;;  %3778 = vmatmul.bf16.vlgmr.msra.gmra.mxu2 %v8502_v45 }
  0xaf   : > { %v7178_v1 = vld [vmem:[%s8210_s19 + $0xde0] sm:$0xf]  ;;  %v7951_v2 = vld [vmem:[%s8210_s19 + $0xdec] sm:$0xf0]  ;;  %3842 = vmatpush.bf16.msrb.mxu2 %v7307_v60  ;;  %v7051_v21 = vor.u32 %v7919_v0, %v7050_v63 }
  0xb0   : > { %v7290_v6 = vld [vmem:[%s8210_s19 + $0xec0] sm:$0xf]  ;;  %v7979_v7 = vld [vmem:[%s8210_s19 + $0xecc] sm:$0xf0]  ;;  %v7179_v22 = vor.u32 %v7951_v2, %v7178_v1  ;;  %3759 = vmatpush.bf16.msra.mxu1 %v6555_v11 }
  0xb1   : > { %v5370_v12 = vld [vmem:[%s8212_s20 + $0x20] sm:$0xf]  ;;  %v8011_v26 = vld [vmem:[%s8210_s19 + $0xfcc] sm:$0xf0]  ;;  %v7291_v36 = vor.u32 %v7979_v7, %v7290_v6  ;;  %3860 = vmatpush.bf16.msrb.mxu3 %v7435_v17 }
  0xb2   : > { %v7501_v16 = vld [vmem:[%s8212_s20 + $0x5c] sm:$0xf0]  ;;  %v7915_v39 = vld [vmem:[%s8210_s19 + $0xccc] sm:$0xf0]  ;;  %3806 = vmatpush.bf16.msrb.mxu0 %v7051_v21  ;;  %3796 = vmatmul.bf16.vlgmr.msra.gmra.mxu3 %v8509_v50 }
  0xb3   : > { %v7418_v25 = vld [vmem:[%s8210_s19 + $0xfc0] sm:$0xf]  ;;  %v7947_v42 = vld [vmem:[%s8210_s19 + $0xdcc] sm:$0xf0]  ;;  %v8500_v44 = vor.u32 %v7501_v16, %v5370_v12  ;;  %3843 = vmatpush.bf16.msrb.mxu2 %v7291_v36  ;;  %3760 = vmatmul.bf16.vlgmr.msra.gmra.mxu1 %v8507_v49 }
  0xb4   : > { %v7034_v38 = vld [vmem:[%s8210_s19 + $0xcc0] sm:$0xf]  ;;  %v7419_v40 = vor.u32 %v8011_v26, %v7418_v25  ;;  %3824 = vmatpush.bf16.msrb.mxu1 %v7179_v22  ;;  %v7975_v46 = vld [vmem:[%s8210_s19 + $0xeac] sm:$0xf0] }
  0xb5   : > { %v7162_v41 = vld [vmem:[%s8210_s19 + $0xdc0] sm:$0xf]  ;;  %v8007_v48 = vld [vmem:[%s8210_s19 + $0xfac] sm:$0xf0]  ;;  %v7035_v51 = vor.u32 %v7915_v39, %v7034_v38  ;;  %3742 = vmatmul.bf16.vlgmr.msra.gmra.mxu0 %v8500_v44  ;;  %v960_v39 = vunpack.c.l.b16 %v379_v20 }
  0xb6   : > { %v7274_v43 = vld [vmem:[%s8210_s19 + $0xea0] sm:$0xf]  ;;  %v7163_v52 = vor.u32 %v7947_v42, %v7162_v41  ;;  %v7911_v54 = vld [vmem:[%s8210_s19 + $0xcac] sm:$0xf0]  ;;  %3861 = vmatpush.bf16.msrb.mxu3 %v7419_v40 }
  0xb7   : > { %v7402_v47 = vld [vmem:[%s8210_s19 + $0xfa0] sm:$0xf]  ;;  %v7275_v55 = vor.u32 %v7975_v46, %v7274_v43  ;;  %v7943_v58 = vld [vmem:[%s8210_s19 + $0xdac] sm:$0xf0]  ;;  %3807 = vmatpush.bf16.msrb.mxu0 %v7035_v51  ;;  %v961_v46 = vunpack.c.h.b16 %v379_v20 }
  0xb8   : > { %v7018_v53 = vld [vmem:[%s8210_s19 + $0xca0] sm:$0xf]  ;;  %v7403_v56 = vor.u32 %v8007_v48, %v7402_v47  ;;  %v7971_v60 = vld [vmem:[%s8210_s19 + $0xe8c] sm:$0xf0]  ;;  %3825 = vmatpush.bf16.msrb.mxu1 %v7163_v52 }
  0xb9   : > { %v7146_v57 = vld [vmem:[%s8210_s19 + $0xda0] sm:$0xf]  ;;  %v8003_v62 = vld [vmem:[%s8210_s19 + $0xf8c] sm:$0xf0]  ;;  %v7019_v63 = vor.u32 %v7911_v54, %v7018_v53  ;;  %3844 = vmatpush.bf16.msrb.mxu2 %v7275_v55 }
  0xba   : > { %v7258_v59 = vld [vmem:[%s8210_s19 + $0xe80] sm:$0xf]  ;;  %v7147_v0 = vor.u32 %v7943_v58, %v7146_v57  ;;  %v7907_v2 = vld [vmem:[%s8210_s19 + $0xc8c] sm:$0xf0]  ;;  %3862 = vmatpush.bf16.msrb.mxu3 %v7403_v56 }
  0xbb   : > { %v7386_v61 = vld [vmem:[%s8210_s19 + $0xf80] sm:$0xf]  ;;  %v7259_v4 = vor.u32 %v7971_v60, %v7258_v59  ;;  %v7939_v7 = vld [vmem:[%s8210_s19 + $0xd8c] sm:$0xf0]  ;;  %3808 = vmatpush.bf16.msrb.mxu0 %v7019_v63  ;;  %v8548_v59 = vpack.c.b16 %v960_v39, %v960_v39 }
  0xbc   : > { %v7002_v1 = vld [vmem:[%s8210_s19 + $0xc80] sm:$0xf]  ;;  %v7387_v5 = vor.u32 %v8003_v62, %v7386_v61  ;;  %v7967_v12 = vld [vmem:[%s8210_s19 + $0xe6c] sm:$0xf0]  ;;  %3826 = vmatpush.bf16.msrb.mxu1 %v7147_v0  ;;  %v8555_v0 = vpack.c.b16 %v961_v46, %v961_v46 }
  0xbd   : > { %v7130_v6 = vld [vmem:[%s8210_s19 + $0xd80] sm:$0xf]  ;;  %v7999_v17 = vld [vmem:[%s8210_s19 + $0xf6c] sm:$0xf0]  ;;  %v7003_v21 = vor.u32 %v7907_v2, %v7002_v1  ;;  %3845 = vmatpush.bf16.msrb.mxu2 %v7259_v4  ;;  %10145 = vst [vmem:[#allocation18_spill] sm:$0xff] %v8548_v59 }
  0xbe   : > { %v7242_v11 = vld [vmem:[%s8210_s19 + $0xe60] sm:$0xf]  ;;  %v7131_v22 = vor.u32 %v7939_v7, %v7130_v6  ;;  %v7903_v26 = vld [vmem:[%s8210_s19 + $0xc6c] sm:$0xf0]  ;;  %3863 = vmatpush.bf16.msrb.mxu3 %v7387_v5  ;;  %10147 = vst [vmem:[#allocation20_spill] sm:$0xff] %v8555_v0  ;;  %3783 = vmatmul.bf16.gmra.mxu2 %v8548_v59 }
  0xbf   : > { %v7370_v16 = vld [vmem:[%s8210_s19 + $0xf60] sm:$0xf]  ;;  %v7243_v31 = vor.u32 %v7967_v12, %v7242_v11  ;;  %v7935_v36 = vld [vmem:[%s8210_s19 + $0xd6c] sm:$0xf0]  ;;  %3809 = vmatpush.bf16.msrb.mxu0 %v7003_v21  ;;  %v7597_v21 = vld [vmem:[%s8210_s19 + $0x2e4] sm:$0xf] }
  0xc0   : > { %v378_v19 = vld [vmem:[%s8212_s20 + $0xa0] sm:$0x11]  ;;  %v7371_v32 = vor.u32 %v7999_v17, %v7370_v16  ;;  %v7963_v40 = vld [vmem:[%s8210_s19 + $0xe4c] sm:$0xf0]  ;;  %3827 = vmatpush.bf16.msrb.mxu1 %v7131_v22  ;;  %v5772_v22 = vld [vmem:[%s8210_s19 + $0x2f0] sm:$0xf0] }
  0xc1   : > { %v6986_v25 = vld [vmem:[%s8210_s19 + $0xc60] sm:$0xf]  ;;  %v958_v38 = vunpack.c.l.b16 %v378_v19  ;;  %v7995_v42 = vld [vmem:[%s8210_s19 + $0xf4c] sm:$0xf0]  ;;  %v959_v43 = vunpack.c.h.b16 %v378_v19  ;;  %3846 = vmatpush.bf16.msrb.mxu2 %v7243_v31 }
  0xc2   : > { %v7114_v33 = vld [vmem:[%s8210_s19 + $0xd60] sm:$0xf]  ;;  %v6987_v47 = vor.u32 %v7903_v26, %v6986_v25  ;;  %v7899_v52 = vld [vmem:[%s8210_s19 + $0xc4c] sm:$0xf0]  ;;  %3864 = vmatpush.bf16.msrb.mxu3 %v7371_v32  ;;  %v7629_v25 = vld [vmem:[%s8210_s19 + $0x3e4] sm:$0xf] }
  0xc3   : > { %v7226_v37 = vld [vmem:[%s8210_s19 + $0xe40] sm:$0xf]  ;;  %v7115_v48 = vor.u32 %v7935_v36, %v7114_v33  ;;  %v7931_v56 = vld [vmem:[%s8210_s19 + $0xd4c] sm:$0xf0]  ;;  %v8546_v58 = vpack.c.b16 %v958_v38, %v958_v38  ;;  %v8553_v63 = vpack.c.b16 %v959_v43, %v959_v43  ;;  %3801 = vmatmul.bf16.gmra.mxu3 %v8555_v0  ;;  %v5900_v26 = vld [vmem:[%s8210_s19 + $0x3f0] sm:$0xf0]  ;;  %v5775_v43 = vor.u32 %v7597_v21, %v5772_v22 }
  0xc4   : > { %v7354_v41 = vld [vmem:[%s8210_s19 + $0xf40] sm:$0xf]  ;;  %v7227_v53 = vor.u32 %v7963_v40, %v7226_v37  ;;  %v7959_v60 = vld [vmem:[%s8210_s19 + $0xe2c] sm:$0xf0]  ;;  %3810 = vmatpush.bf16.msrb.mxu0 %v6987_v47  ;;  %v5903_v46 = vor.u32 %v7629_v25, %v5900_v26  ;;  %v7565_v47 = vld [vmem:[%s8210_s19 + $0x1e4] sm:$0xf] }
  0xc5   : > { %v6970_v51 = vld [vmem:[%s8210_s19 + $0xc40] sm:$0xf]  ;;  %v7355_v54 = vor.u32 %v7995_v42, %v7354_v41  ;;  %10144 = vst [vmem:[#allocation17_spill] sm:$0xff] %v8546_v58  ;;  %v7991_v62 = vld [vmem:[%s8210_s19 + $0xf2c] sm:$0xf0]  ;;  %3828 = vmatpush.bf16.msrb.mxu1 %v7115_v48  ;;  %3747 = vmatmul.bf16.gmra.mxu0 %v8546_v58 }
  0xc6   : > { %v7098_v55 = vld [vmem:[%s8210_s19 + $0xd40] sm:$0xf]  ;;  %10146 = vst [vmem:[#allocation19_spill] sm:$0xff] %v8553_v63  ;;  %v6971_v1 = vor.u32 %v7899_v52, %v6970_v51  ;;  %v7895_v5 = vld [vmem:[%s8210_s19 + $0xc2c] sm:$0xf0]  ;;  %3847 = vmatpush.bf16.msrb.mxu2 %v7227_v53  ;;  %3765 = vmatmul.bf16.gmra.mxu1 %v8553_v63 }
  0xc7   : > { %v7210_v57 = vld [vmem:[%s8210_s19 + $0xe20] sm:$0xf]  ;;  %v7099_v2 = vor.u32 %v7931_v56, %v7098_v55  ;;  %3865 = vmatpush.bf16.msrb.mxu3 %v7355_v54  ;;  %v7927_v12 = vld [vmem:[%s8210_s19 + $0xd2c] sm:$0xf0]  ;;  %v7533_v41 = vld [vmem:[%s8210_s19 + $0xe4] sm:$0xf] }
  0xc8   : > { %v7338_v61 = vld [vmem:[%s8210_s19 + $0xf20] sm:$0xf]  ;;  %v7211_v7 = vor.u32 %v7959_v60, %v7210_v57  ;;  %v7955_v17 = vld [vmem:[%s8210_s19 + $0xe0c] sm:$0xf0]  ;;  %3811 = vmatpush.bf16.msrb.mxu0 %v6971_v1  ;;  %v5516_v42 = vld [vmem:[%s8210_s19 + $0xf0] sm:$0xf0] }
  0xc9   : > { %v6954_v4 = vld [vmem:[%s8210_s19 + $0xc20] sm:$0xf]  ;;  %v7339_v11 = vor.u32 %v7991_v62, %v7338_v61  ;;  %v7987_v20 = vld [vmem:[%s8210_s19 + $0xf0c] sm:$0xf0]  ;;  %3829 = vmatpush.bf16.msrb.mxu1 %v7099_v2  ;;  %v5644_v48 = vld [vmem:[%s8210_s19 + $0x1f0] sm:$0xf0]  ;;  %v5519_v61 = vor.u32 %v7533_v41, %v5516_v42 }
  0xca   : > { %v7082_v6 = vld [vmem:[%s8210_s19 + $0xd20] sm:$0xf]  ;;  %v6955_v31 = vor.u32 %v7895_v5, %v6954_v4  ;;  %v7891_v36 = vld [vmem:[%s8210_s19 + $0xc0c] sm:$0xf0]  ;;  %3848 = vmatpush.bf16.msrb.mxu2 %v7211_v7  ;;  %v7593_v51 = vld [vmem:[%s8210_s19 + $0x2c4] sm:$0xf]  ;;  %v5647_v62 = vor.u32 %v7565_v47, %v5644_v48 }
  0xcb   : > { %v7194_v16 = vld [vmem:[%s8210_s19 + $0xe00] sm:$0xf]  ;;  %v7083_v32 = vor.u32 %v7927_v12, %v7082_v6  ;;  %3866 = vmatpush.bf16.msrb.mxu3 %v7339_v11  ;;  %v7923_v40 = vld [vmem:[%s8210_s19 + $0xd0c] sm:$0xf0]  ;;  %v5756_v52 = vld [vmem:[%s8210_s19 + $0x2d0] sm:$0xf0] }
  0xcc   : > { %v7322_v19 = vld [vmem:[%s8210_s19 + $0xf00] sm:$0xf]  ;;  %v7195_v38 = vor.u32 %v7955_v17, %v7194_v16  ;;  %v7625_v53 = vld [vmem:[%s8210_s19 + $0x3c4] sm:$0xf]  ;;  %v5884_v54 = vld [vmem:[%s8210_s19 + $0x3d0] sm:$0xf0]  ;;  %3812 = vmatpush.bf16.msrb.mxu0 %v6955_v31  ;;  %v5759_v5 = vor.u32 %v7593_v51, %v5756_v52 }
  0xcd   : > { %v6938_v33 = vld [vmem:[%s8210_s19 + $0xc00] sm:$0xf]  ;;  %v7323_v39 = vor.u32 %v7987_v20, %v7322_v19  ;;  %3830 = vmatpush.bf16.msrb.mxu1 %v7083_v32  ;;  %v5386_v57 = vld [vmem:[%s8212_s20 + $0x30] sm:$0xf]  ;;  %v7529_v1 = vld [vmem:[%s8210_s19 + $0xc4] sm:$0xf]  ;;  %v5887_v6 = vor.u32 %v7625_v53, %v5884_v54 }
  0xce   : > { %v7066_v37 = vld [vmem:[%s8210_s19 + $0xd00] sm:$0xf]  ;;  %v6939_v55 = vor.u32 %v7891_v36, %v6938_v33  ;;  %3849 = vmatpush.bf16.msrb.mxu2 %v7195_v38  ;;  %v7503_v60 = vld [vmem:[%s8212_s20 + $0x6c] sm:$0xf0]  ;;  %v7495_v2 = vld [vmem:[%s8212_s20 + $0x34] sm:$0xf] }
  0xcf   : > { %v7067_v56 = vor.u32 %v7923_v40, %v7066_v37  ;;  %3867 = vmatpush.bf16.msrb.mxu3 %v7323_v39  ;;  %v5388_v4 = vld [vmem:[%s8212_s20 + $0x70] sm:$0xf0]  ;;  %v7561_v11 = vld [vmem:[%s8210_s19 + $0x1c4] sm:$0xf]  ;;  %v5394_v16 = vld [vmem:[%s8212_s20 + $0x38] sm:$0xf]  ;;  %v8602_v36 = vor.u32 %v7503_v60, %v5386_v57 }
  0xd0   : > { %v5500_v7 = vld [vmem:[%s8210_s19 + $0xd0] sm:$0xf0]  ;;  %v7504_v17 = vld [vmem:[%s8212_s20 + $0x74] sm:$0xf0]  ;;  %v7496_v19 = vld [vmem:[%s8212_s20 + $0x3c] sm:$0xf]  ;;  %3813 = vmatpush.bf16.msrb.mxu0 %v6939_v55  ;;  %v8609_v41 = vor.u32 %v7495_v2, %v5388_v4 }
  0xd1   : > { %v5628_v12 = vld [vmem:[%s8210_s19 + $0x1d0] sm:$0xf0]  ;;  %3831 = vmatpush.bf16.msrb.mxu1 %v7067_v56  ;;  %v5396_v20 = vld [vmem:[%s8212_s20 + $0x78] sm:$0xf0]  ;;  %v7589_v21 = vld [vmem:[%s8210_s19 + $0x2a4] sm:$0xf]  ;;  %v5503_v25 = vor.u32 %v7529_v1, %v5500_v7  ;;  %v8604_v37 = vor.u32 %v7504_v17, %v5394_v16 }
  0xd2   : > { %3914 = vmatpush.bf16.msra.mxu2 %v5775_v43  ;;  %v5740_v22 = vld [vmem:[%s8210_s19 + $0x2b0] sm:$0xf0]  ;;  %v5631_v26 = vor.u32 %v7561_v11, %v5628_v12  ;;  %v7621_v31 = vld [vmem:[%s8210_s19 + $0x3a4] sm:$0xf]  ;;  %v8611_v42 = vor.u32 %v7496_v19, %v5396_v20  ;;  %v381_v20 = vld [vmem:[%s8212_s20 + $0xb8] sm:$0x11] }
  0xd3   : > { %3932 = vmatpush.bf16.msra.mxu3 %v5903_v46  ;;  %v5868_v32 = vld [vmem:[%s8210_s19 + $0x3b0] sm:$0xf0]  ;;  %v7525_v33 = vld [vmem:[%s8210_s19 + $0xa4] sm:$0xf]  ;;  %v5743_v43 = vor.u32 %v7589_v21, %v5740_v22  ;;  %3850 = vmatmul.bf16.vlgmr.msrb.gmra.mxu2 %v8604_v37 }
  0xd4   : > { %3878 = vmatpush.bf16.msra.mxu0 %v5519_v61  ;;  %v5484_v38 = vld [vmem:[%s8210_s19 + $0xb0] sm:$0xf0]  ;;  %v7557_v39 = vld [vmem:[%s8210_s19 + $0x1a4] sm:$0xf]  ;;  %v5871_v46 = vor.u32 %v7621_v31, %v5868_v32  ;;  %3868 = vmatmul.bf16.vlgmr.msrb.gmra.mxu3 %v8611_v42 }
  0xd5   : > { %3896 = vmatpush.bf16.msra.mxu1 %v5647_v62  ;;  %v5612_v40 = vld [vmem:[%s8210_s19 + $0x1b0] sm:$0xf0]  ;;  %v7585_v47 = vld [vmem:[%s8210_s19 + $0x284] sm:$0xf]  ;;  %v5487_v51 = vor.u32 %v7525_v33, %v5484_v38  ;;  %3814 = vmatmul.bf16.vlgmr.msrb.gmra.mxu0 %v8602_v36 }
  0xd6   : > { %3915 = vmatpush.bf16.msra.mxu2 %v5759_v5  ;;  %v5724_v48 = vld [vmem:[%s8210_s19 + $0x290] sm:$0xf0]  ;;  %v5615_v52 = vor.u32 %v7557_v39, %v5612_v40  ;;  %v7617_v53 = vld [vmem:[%s8210_s19 + $0x384] sm:$0xf]  ;;  %3832 = vmatmul.bf16.vlgmr.msrb.gmra.mxu1 %v8609_v41 }
  0xd7   : > { %3933 = vmatpush.bf16.msra.mxu3 %v5887_v6  ;;  %v5852_v54 = vld [vmem:[%s8210_s19 + $0x390] sm:$0xf0]  ;;  %v7521_v55 = vld [vmem:[%s8210_s19 + $0x84] sm:$0xf]  ;;  %v5727_v61 = vor.u32 %v7585_v47, %v5724_v48 }
  0xd8   : > { %3879 = vmatpush.bf16.msra.mxu0 %v5503_v25  ;;  %v5468_v56 = vld [vmem:[%s8210_s19 + $0x90] sm:$0xf0]  ;;  %v7553_v57 = vld [vmem:[%s8210_s19 + $0x184] sm:$0xf]  ;;  %v5855_v62 = vor.u32 %v7617_v53, %v5852_v54 }
  0xd9   : > { %3897 = vmatpush.bf16.msra.mxu1 %v5631_v26  ;;  %v5596_v60 = vld [vmem:[%s8210_s19 + $0x190] sm:$0xf0]  ;;  %v7581_v1 = vld [vmem:[%s8210_s19 + $0x264] sm:$0xf]  ;;  %v5471_v4 = vor.u32 %v7521_v55, %v5468_v56 }
  0xda   : > { %3916 = vmatpush.bf16.msra.mxu2 %v5743_v43  ;;  %v5708_v2 = vld [vmem:[%s8210_s19 + $0x270] sm:$0xf0]  ;;  %v5599_v5 = vor.u32 %v7553_v57, %v5596_v60  ;;  %v7613_v6 = vld [vmem:[%s8210_s19 + $0x364] sm:$0xf]  ;;  %v964_v43 = vunpack.c.l.b16 %v381_v20 }
  0xdb   : > { %3934 = vmatpush.bf16.msra.mxu3 %v5871_v46  ;;  %v5836_v7 = vld [vmem:[%s8210_s19 + $0x370] sm:$0xf0]  ;;  %v7517_v11 = vld [vmem:[%s8210_s19 + $0x64] sm:$0xf]  ;;  %v5711_v21 = vor.u32 %v7581_v1, %v5708_v2 }
  0xdc   : > { %3880 = vmatpush.bf16.msra.mxu0 %v5487_v51  ;;  %v5452_v12 = vld [vmem:[%s8210_s19 + $0x70] sm:$0xf0]  ;;  %v7549_v16 = vld [vmem:[%s8210_s19 + $0x164] sm:$0xf]  ;;  %v5839_v22 = vor.u32 %v7613_v6, %v5836_v7 }
  0xdd   : > { %3898 = vmatpush.bf16.msra.mxu1 %v5615_v52  ;;  %v5580_v17 = vld [vmem:[%s8210_s19 + $0x170] sm:$0xf0]  ;;  %v7577_v25 = vld [vmem:[%s8210_s19 + $0x244] sm:$0xf]  ;;  %v5455_v31 = vor.u32 %v7517_v11, %v5452_v12  ;;  %v965_v52 = vunpack.c.h.b16 %v381_v20 }
  0xde   : > { %v380_v19 = vld [vmem:[%s8212_s20 + $0xb0] sm:$0x11]  ;;  %3917 = vmatpush.bf16.msra.mxu2 %v5727_v61  ;;  %v5583_v32 = vor.u32 %v7549_v16, %v5580_v17  ;;  %v7609_v33 = vld [vmem:[%s8210_s19 + $0x344] sm:$0xf] }
  0xdf   : > { %3935 = vmatpush.bf16.msra.mxu3 %v5855_v62  ;;  %v5692_v26 = vld [vmem:[%s8210_s19 + $0x250] sm:$0xf0]  ;;  %v7513_v39 = vld [vmem:[%s8210_s19 + $0x44] sm:$0xf]  ;;  %v962_v40 = vunpack.c.l.b16 %v380_v19  ;;  %v963_v51 = vunpack.c.h.b16 %v380_v19  ;;  %v8657_v12 = vpack.c.b16 %v965_v52, %v965_v52 }
  0xe0   : > { %3881 = vmatpush.bf16.msra.mxu0 %v5471_v4  ;;  %v5820_v38 = vld [vmem:[%s8210_s19 + $0x350] sm:$0xf0]  ;;  %v7545_v47 = vld [vmem:[%s8210_s19 + $0x144] sm:$0xf]  ;;  %v5695_v53 = vor.u32 %v7577_v25, %v5692_v26  ;;  %v8650_v4 = vpack.c.b16 %v964_v43, %v964_v43 }
  0xe1   : > { %3899 = vmatpush.bf16.msra.mxu1 %v5599_v5  ;;  %v5436_v46 = vld [vmem:[%s8210_s19 + $0x50] sm:$0xf0]  ;;  %v5823_v54 = vor.u32 %v7609_v33, %v5820_v38  ;;  %v7573_v55 = vld [vmem:[%s8210_s19 + $0x224] sm:$0xf]  ;;  %v8648_v2 = vpack.c.b16 %v962_v40, %v962_v40  ;;  %v8655_v11 = vpack.c.b16 %v963_v51, %v963_v51 }
  0xe2   : > { %v5564_v48 = vld [vmem:[%s8210_s19 + $0x150] sm:$0xf0]  ;;  %3918 = vmatpush.bf16.msra.mxu2 %v5711_v21  ;;  %v5439_v57 = vor.u32 %v7513_v39, %v5436_v46  ;;  %v7605_v61 = vld [vmem:[%s8210_s19 + $0x324] sm:$0xf] }
  0xe3   : > { %3936 = vmatpush.bf16.msra.mxu3 %v5839_v22  ;;  %v5676_v56 = vld [vmem:[%s8210_s19 + $0x230] sm:$0xf0]  ;;  %v5567_v60 = vor.u32 %v7545_v47, %v5564_v48  ;;  %v7509_v1 = vld [vmem:[%s8210_s19 + $0x24] sm:$0xf]  ;;  %3855 = vmatmul.bf16.gmra.mxu2 %v8650_v4 }
  0xe4   : > { %3882 = vmatpush.bf16.msra.mxu0 %v5455_v31  ;;  %v5804_v62 = vld [vmem:[%s8210_s19 + $0x330] sm:$0xf0]  ;;  %v7541_v6 = vld [vmem:[%s8210_s19 + $0x124] sm:$0xf]  ;;  %v5679_v17 = vor.u32 %v7573_v55, %v5676_v56  ;;  %3873 = vmatmul.bf16.gmra.mxu3 %v8657_v12 }
  0xe5   : > { %3900 = vmatpush.bf16.msra.mxu1 %v5583_v32  ;;  %v5420_v5 = vld [vmem:[%s8210_s19 + $0x30] sm:$0xf0]  ;;  %v7569_v16 = vld [vmem:[%s8210_s19 + $0x204] sm:$0xf]  ;;  %v5807_v19 = vor.u32 %v7605_v61, %v5804_v62  ;;  %3819 = vmatmul.bf16.gmra.mxu0 %v8648_v2 }
  0xe6   : > { %v5548_v7 = vld [vmem:[%s8210_s19 + $0x130] sm:$0xf0]  ;;  %3919 = vmatpush.bf16.msra.mxu2 %v5695_v53  ;;  %v7601_v21 = vld [vmem:[%s8210_s19 + $0x304] sm:$0xf]  ;;  %v5423_v25 = vor.u32 %v7509_v1, %v5420_v5  ;;  %3837 = vmatmul.bf16.gmra.mxu1 %v8655_v11 }
  0xe7   : > { %3937 = vmatpush.bf16.msra.mxu3 %v5823_v54  ;;  %v5660_v20 = vld [vmem:[%s8210_s19 + $0x210] sm:$0xf0]  ;;  %v5551_v26 = vor.u32 %v7541_v6, %v5548_v7  ;;  %v7505_v31 = vld [vmem:[%s8210_s19 + $0x4] sm:$0xf] }
  0xe8   : > { %v5788_v22 = vld [vmem:[%s8210_s19 + $0x310] sm:$0xf0]  ;;  %3883 = vmatpush.bf16.msra.mxu0 %v5439_v57  ;;  %v7537_v33 = vld [vmem:[%s8210_s19 + $0x104] sm:$0xf]  ;;  %v5663_v48 = vor.u32 %v7569_v16, %v5660_v20 }
  0xe9   : > { %3901 = vmatpush.bf16.msra.mxu1 %v5567_v60  ;;  %v5404_v32 = vld [vmem:[%s8210_s19 + $0x10] sm:$0xf0]  ;;  %v7725_v39 = vld [vmem:[%s8210_s19 + $0x6e4] sm:$0xf]  ;;  %v5791_v51 = vor.u32 %v7601_v21, %v5788_v22 }
  0xea   : > { %v5532_v38 = vld [vmem:[%s8210_s19 + $0x110] sm:$0xf0]  ;;  %v7757_v43 = vld [vmem:[%s8210_s19 + $0x7e4] sm:$0xf]  ;;  %3920 = vmatpush.bf16.msra.mxu2 %v5679_v17  ;;  %v5407_v55 = vor.u32 %v7505_v31, %v5404_v32 }
  0xeb   : > { %v6284_v40 = vld [vmem:[%s8210_s19 + $0x6f0] sm:$0xf0]  ;;  %v7661_v47 = vld [vmem:[%s8210_s19 + $0x4e4] sm:$0xf]  ;;  %3938 = vmatpush.bf16.msra.mxu3 %v5807_v19  ;;  %v5535_v56 = vor.u32 %v7537_v33, %v5532_v38 }
  0xec   : > { %v6412_v46 = vld [vmem:[%s8210_s19 + $0x7f0] sm:$0xf0]  ;;  %v7693_v53 = vld [vmem:[%s8210_s19 + $0x5e4] sm:$0xf]  ;;  %3884 = vmatpush.bf16.msra.mxu0 %v5423_v25  ;;  %v6287_v57 = vor.u32 %v7725_v39, %v6284_v40  ;;  %v3599_v40 = vpop.f32.mrf.mxu0 }
  0xed   : > { %v6028_v52 = vld [vmem:[%s8210_s19 + $0x4f0] sm:$0xf0]  ;;  %3902 = vmatpush.bf16.msra.mxu1 %v5551_v26  ;;  %v6415_v60 = vor.u32 %v7757_v43, %v6412_v46  ;;  %v7721_v61 = vld [vmem:[%s8210_s19 + $0x6c4] sm:$0xf] }
  0xee   : > { %v6156_v54 = vld [vmem:[%s8210_s19 + $0x5f0] sm:$0xf0]  ;;  %v6031_v1 = vor.u32 %v7661_v47, %v6028_v52  ;;  %v7753_v6 = vld [vmem:[%s8210_s19 + $0x7c4] sm:$0xf]  ;;  %3921 = vmatpush.bf16.msra.mxu2 %v5663_v48  ;;  %v3617_v48 = vpop.f32.mrf.mxu1 }
  0xef   : > { %v6268_v62 = vld [vmem:[%s8210_s19 + $0x6d0] sm:$0xf0]  ;;  %v6159_v5 = vor.u32 %v7693_v53, %v6156_v54  ;;  %v7657_v16 = vld [vmem:[%s8210_s19 + $0x4c4] sm:$0xf]  ;;  %3939 = vmatpush.bf16.msra.mxu3 %v5791_v51  ;;  %v3618_v51 = vadd.f32 %v3617_v48, %v3599_v40 }
  0xf0   : > { %v6396_v7 = vld [vmem:[%s8210_s19 + $0x7d0] sm:$0xf0]  ;;  %v7689_v19 = vld [vmem:[%s8210_s19 + $0x5c4] sm:$0xf]  ;;  %3885 = vmatpush.bf16.msra.mxu0 %v5407_v55  ;;  %v6271_v21 = vor.u32 %v7721_v61, %v6268_v62 }
  0xf1   : > { %v6012_v17 = vld [vmem:[%s8210_s19 + $0x4d0] sm:$0xf0]  ;;  %3903 = vmatpush.bf16.msra.mxu1 %v5535_v56  ;;  %v6399_v22 = vor.u32 %v7753_v6, %v6396_v7  ;;  %v7717_v31 = vld [vmem:[%s8210_s19 + $0x6a4] sm:$0xf] }
  0xf2   : > { %v6140_v20 = vld [vmem:[%s8210_s19 + $0x5d0] sm:$0xf0]  ;;  %3986 = vmatpush.bf16.msrb.mxu2 %v6287_v57  ;;  %v6015_v25 = vor.u32 %v7657_v16, %v6012_v17  ;;  %v7749_v33 = vld [vmem:[%s8210_s19 + $0x7a4] sm:$0xf] }
  0xf3   : > { %4004 = vmatpush.bf16.msrb.mxu3 %v6415_v60  ;;  %v6143_v26 = vor.u32 %v7689_v19, %v6140_v20  ;;  %v6252_v32 = vld [vmem:[%s8210_s19 + $0x6b0] sm:$0xf0]  ;;  %v7653_v39 = vld [vmem:[%s8210_s19 + $0x4a4] sm:$0xf]  ;;  %3922 = vmatmul.bf16.vlgmr.msra.gmra.mxu2 %v8301_v15  ;;  %v3635_v20 = vpop.f32.mrf.mxu2 }
  0xf4   : > { %3950 = vmatpush.bf16.msrb.mxu0 %v6031_v1  ;;  %v6380_v38 = vld [vmem:[%s8210_s19 + $0x7b0] sm:$0xf0]  ;;  %v7685_v46 = vld [vmem:[%s8210_s19 + $0x5a4] sm:$0xf]  ;;  %v6255_v52 = vor.u32 %v7717_v31, %v6252_v32  ;;  %3940 = vmatmul.bf16.vlgmr.msra.gmra.mxu3 %v8305_v18  ;;  %v3636_v32 = vadd.f32 %v3635_v20, %v3618_v51 }
  0xf5   : > { %3968 = vmatpush.bf16.msrb.mxu1 %v6159_v5  ;;  %v5996_v43 = vld [vmem:[%s8210_s19 + $0x4b0] sm:$0xf0]  ;;  %v6383_v53 = vor.u32 %v7749_v33, %v6380_v38  ;;  %v7713_v54 = vld [vmem:[%s8210_s19 + $0x684] sm:$0xf]  ;;  %3886 = vmatmul.bf16.vlgmr.msra.gmra.mxu0 %v8294_v9  ;;  %v3653_v33 = vpop.f32.mrf.mxu3  ;;  %v3601_v38 = vpop.f32.mrf.mxu0 }
  0xf6   : > { %3987 = vmatpush.bf16.msrb.mxu2 %v6271_v21  ;;  %v6124_v47 = vld [vmem:[%s8210_s19 + $0x5b0] sm:$0xf0]  ;;  %v5999_v56 = vor.u32 %v7653_v39, %v5996_v43  ;;  %v7745_v60 = vld [vmem:[%s8210_s19 + $0x784] sm:$0xf]  ;;  %3904 = vmatmul.bf16.vlgmr.msra.gmra.mxu1 %v8299_v14  ;;  %v8715_v48 = vadd.f32 %v3653_v33, %v3636_v32 }
  0xf7   : > { %4005 = vmatpush.bf16.msrb.mxu3 %v6399_v22  ;;  %v6236_v55 = vld [vmem:[%s8210_s19 + $0x690] sm:$0xf0]  ;;  %v6127_v57 = vor.u32 %v7685_v46, %v6124_v47  ;;  %v7649_v62 = vld [vmem:[%s8210_s19 + $0x484] sm:$0xf]  ;;  %v3619_v46 = vpop.f32.mrf.mxu1 }
  0xf8   : > { %3951 = vmatpush.bf16.msrb.mxu0 %v6015_v25  ;;  %v6364_v61 = vld [vmem:[%s8210_s19 + $0x790] sm:$0xf0]  ;;  %v7681_v5 = vld [vmem:[%s8210_s19 + $0x584] sm:$0xf]  ;;  %v6239_v7 = vor.u32 %v7713_v54, %v6236_v55 }
  0xf9   : > { %3969 = vmatpush.bf16.msrb.mxu1 %v6143_v26  ;;  %v5980_v1 = vld [vmem:[%s8210_s19 + $0x490] sm:$0xf0]  ;;  %v6367_v16 = vor.u32 %v7745_v60, %v6364_v61  ;;  %v7709_v17 = vld [vmem:[%s8210_s19 + $0x664] sm:$0xf] }
  0xfa   : > { %v6108_v6 = vld [vmem:[%s8210_s19 + $0x590] sm:$0xf0]  ;;  %3988 = vmatpush.bf16.msrb.mxu2 %v6255_v52  ;;  %v5983_v21 = vor.u32 %v7649_v62, %v5980_v1  ;;  %v7741_v25 = vld [vmem:[%s8210_s19 + $0x764] sm:$0xf]  ;;  %v3620_v52 = vadd.f32 %v3619_v46, %v3601_v38 }
  0xfb   : > { %4006 = vmatpush.bf16.msrb.mxu3 %v6383_v53  ;;  %v6220_v19 = vld [vmem:[%s8210_s19 + $0x670] sm:$0xf0]  ;;  %v6111_v22 = vor.u32 %v7681_v5, %v6108_v6  ;;  %v7645_v31 = vld [vmem:[%s8210_s19 + $0x464] sm:$0xf] }
  0xfc   : > { %3952 = vmatpush.bf16.msrb.mxu0 %v5999_v56  ;;  %v6348_v26 = vld [vmem:[%s8210_s19 + $0x770] sm:$0xf0]  ;;  %v7677_v40 = vld [vmem:[%s8210_s19 + $0x564] sm:$0xf]  ;;  %v6223_v47 = vor.u32 %v7709_v17, %v6220_v19  ;;  %v3637_v19 = vpop.f32.mrf.mxu2 }
  0xfd   : > { %3970 = vmatpush.bf16.msrb.mxu1 %v6127_v57  ;;  %v5964_v39 = vld [vmem:[%s8210_s19 + $0x470] sm:$0xf0]  ;;  %v6351_v53 = vor.u32 %v7741_v25, %v6348_v26  ;;  %v7705_v51 = vld [vmem:[%s8210_s19 + $0x644] sm:$0xf]  ;;  %v3655_v32 = vpop.f32.mrf.mxu3  ;;  %v3604_v33 = vpop.f32.mrf.mxu0 }
  0xfe   : > { %v6092_v43 = vld [vmem:[%s8210_s19 + $0x570] sm:$0xf0]  ;;  %3989 = vmatpush.bf16.msrb.mxu2 %v6239_v7  ;;  %v5967_v55 = vor.u32 %v7645_v31, %v5964_v39  ;;  %v7737_v57 = vld [vmem:[%s8210_s19 + $0x744] sm:$0xf]  ;;  %v3638_v31 = vadd.f32 %v3637_v19, %v3620_v52 }
  0xff   : > { %4007 = vmatpush.bf16.msrb.mxu3 %v6367_v16  ;;  %v6204_v54 = vld [vmem:[%s8210_s19 + $0x650] sm:$0xf0]  ;;  %v6095_v56 = vor.u32 %v7677_v40, %v6092_v43  ;;  %v7641_v61 = vld [vmem:[%s8210_s19 + $0x444] sm:$0xf]  ;;  %v3622_v43 = vpop.f32.mrf.mxu1 }
 0x100   : > { %3953 = vmatpush.bf16.msrb.mxu0 %v5983_v21  ;;  %v6332_v60 = vld [vmem:[%s8210_s19 + $0x750] sm:$0xf0]  ;;  %v7673_v1 = vld [vmem:[%s8210_s19 + $0x544] sm:$0xf]  ;;  %v6207_v6 = vor.u32 %v7705_v51, %v6204_v54  ;;  %v3623_v51 = vadd.f32 %v3622_v43, %v3604_v33 }
 0x101   : > { %3971 = vmatpush.bf16.msrb.mxu1 %v6111_v22  ;;  %v5948_v62 = vld [vmem:[%s8210_s19 + $0x450] sm:$0xf0]  ;;  %v6335_v7 = vor.u32 %v7737_v57, %v6332_v60  ;;  %v7701_v16 = vld [vmem:[%s8210_s19 + $0x624] sm:$0xf] }
 0x102   : > { %v6076_v5 = vld [vmem:[%s8210_s19 + $0x550] sm:$0xf0]  ;;  %3990 = vmatpush.bf16.msrb.mxu2 %v6223_v47  ;;  %v5951_v20 = vor.u32 %v7641_v61, %v5948_v62  ;;  %v7733_v22 = vld [vmem:[%s8210_s19 + $0x724] sm:$0xf] }
 0x103   : > { %4008 = vmatpush.bf16.msrb.mxu3 %v6351_v53  ;;  %v6188_v17 = vld [vmem:[%s8210_s19 + $0x630] sm:$0xf0]  ;;  %v6079_v21 = vor.u32 %v7673_v1, %v6076_v5  ;;  %v7637_v26 = vld [vmem:[%s8210_s19 + $0x424] sm:$0xf]  ;;  %v8734_v53 = vadd.f32 %v3655_v32, %v3638_v31  ;;  %3927 = vmatmul.bf16.gmra.mxu2 %v8347_v10 }
 0x104   : > { %3954 = vmatpush.bf16.msrb.mxu0 %v5967_v55  ;;  %v6316_v25 = vld [vmem:[%s8210_s19 + $0x730] sm:$0xf0]  ;;  %v7669_v39 = vld [vmem:[%s8210_s19 + $0x524] sm:$0xf]  ;;  %v6191_v46 = vor.u32 %v7701_v16, %v6188_v17  ;;  %3945 = vmatmul.bf16.gmra.mxu3 %v8351_v13  ;;  %v3640_v31 = vpop.f32.mrf.mxu2 }
 0x105   : > { %3972 = vmatpush.bf16.msrb.mxu1 %v6095_v56  ;;  %v5932_v38 = vld [vmem:[%s8210_s19 + $0x430] sm:$0xf0]  ;;  %v7697_v47 = vld [vmem:[%s8210_s19 + $0x604] sm:$0xf]  ;;  %v6319_v52 = vor.u32 %v7733_v22, %v6316_v25  ;;  %3891 = vmatmul.bf16.gmra.mxu0 %v8340_v3 }
 0x106   : > { %v6060_v40 = vld [vmem:[%s8210_s19 + $0x530] sm:$0xf0]  ;;  %3991 = vmatpush.bf16.msrb.mxu2 %v6207_v6  ;;  %v7729_v55 = vld [vmem:[%s8210_s19 + $0x704] sm:$0xf]  ;;  %v5935_v57 = vor.u32 %v7637_v26, %v5932_v38  ;;  %3909 = vmatmul.bf16.gmra.mxu1 %v8345_v8  ;;  %v3641_v38 = vadd.f32 %v3640_v31, %v3623_v51 }
 0x107   : > { %4009 = vmatpush.bf16.msrb.mxu3 %v6335_v7  ;;  %v6172_v54 = vld [vmem:[%s8210_s19 + $0x610] sm:$0xf0]  ;;  %v6063_v60 = vor.u32 %v7669_v39, %v6060_v40  ;;  %v7633_v61 = vld [vmem:[%s8210_s19 + $0x404] sm:$0xf]  ;;  %v3658_v39 = vpop.f32.mrf.mxu3  ;;  %v3606_v40 = vpop.f32.mrf.mxu0 }
 0x108   : > { %v6300_v56 = vld [vmem:[%s8210_s19 + $0x710] sm:$0xf0]  ;;  %3955 = vmatpush.bf16.msrb.mxu0 %v5951_v20  ;;  %v7665_v1 = vld [vmem:[%s8210_s19 + $0x504] sm:$0xf]  ;;  %v6175_v20 = vor.u32 %v7697_v47, %v6172_v54  ;;  %v3624_v54 = vpop.f32.mrf.mxu1  ;;  %v8760_v10 = vadd.f32 %v3658_v39, %v3641_v38 }
 0x109   : > { %3973 = vmatpush.bf16.msrb.mxu1 %v6079_v21  ;;  %v5916_v62 = vld [vmem:[%s8210_s19 + $0x410] sm:$0xf0]  ;;  %v7853_v6 = vld [vmem:[%s8210_s19 + $0xae4] sm:$0xf]  ;;  %v6303_v21 = vor.u32 %v7729_v55, %v6300_v56 }
 0x10a   : > { %v6044_v5 = vld [vmem:[%s8210_s19 + $0x510] sm:$0xf0]  ;;  %v7885_v16 = vld [vmem:[%s8210_s19 + $0xbe4] sm:$0xf]  ;;  %3992 = vmatpush.bf16.msrb.mxu2 %v6191_v46  ;;  %v5919_v32 = vor.u32 %v7633_v61, %v5916_v62 }
 0x10b   : > { %v6796_v7 = vld [vmem:[%s8210_s19 + $0xaf0] sm:$0xf0]  ;;  %v7789_v19 = vld [vmem:[%s8210_s19 + $0x8e4] sm:$0xf]  ;;  %4010 = vmatpush.bf16.msrb.mxu3 %v6319_v52  ;;  %v6047_v33 = vor.u32 %v7665_v1, %v6044_v5 }
 0x10c   : > { %v6924_v17 = vld [vmem:[%s8210_s19 + $0xbf0] sm:$0xf0]  ;;  %v7821_v25 = vld [vmem:[%s8210_s19 + $0x9e4] sm:$0xf]  ;;  %3956 = vmatpush.bf16.msrb.mxu0 %v5935_v57  ;;  %v6799_v43 = vor.u32 %v7853_v6, %v6796_v7 }
 0x10d   : > { %v6540_v22 = vld [vmem:[%s8210_s19 + $0x8f0] sm:$0xf0]  ;;  %3974 = vmatpush.bf16.msrb.mxu1 %v6063_v60  ;;  %v6927_v46 = vor.u32 %v7885_v16, %v6924_v17  ;;  %v7849_v47 = vld [vmem:[%s8210_s19 + $0xac4] sm:$0xf]  ;;  %v3642_v17 = vpop.f32.mrf.mxu2 }
 0x10e   : > { %v6668_v26 = vld [vmem:[%s8210_s19 + $0x9f0] sm:$0xf0]  ;;  %v6543_v55 = vor.u32 %v7789_v19, %v6540_v22  ;;  %v7881_v13 = vld [vmem:[%s8210_s19 + $0xbc4] sm:$0xf]  ;;  %3993 = vmatpush.bf16.msrb.mxu2 %v6175_v20 }
 0x10f   : > { %v6780_v52 = vld [vmem:[%s8210_s19 + $0xad0] sm:$0xf0]  ;;  %v6671_v56 = vor.u32 %v7821_v25, %v6668_v26  ;;  %v7785_v57 = vld [vmem:[%s8210_s19 + $0x8c4] sm:$0xf]  ;;  %4011 = vmatpush.bf16.msrb.mxu3 %v6303_v21  ;;  %v3660_v22 = vpop.f32.mrf.mxu3  ;;  %v8773_v26 = vpop.f32.mrf.mxu0 }
 0x110   : > { %v6908_v8 = vld [vmem:[%s8210_s19 + $0xbd0] sm:$0xf0]  ;;  %v7817_v60 = vld [vmem:[%s8210_s19 + $0x9c4] sm:$0xf]  ;;  %3957 = vmatpush.bf16.msrb.mxu0 %v5919_v32  ;;  %v6783_v62 = vor.u32 %v7849_v47, %v6780_v52  ;;  %v8775_v31 = vpop.f32.mrf.mxu1 }
 0x111   : > { %v6524_v51 = vld [vmem:[%s8210_s19 + $0x8d0] sm:$0xf0]  ;;  %3975 = vmatpush.bf16.msrb.mxu1 %v6047_v33  ;;  %v6911_v1 = vor.u32 %v7881_v13, %v6908_v8  ;;  %v7845_v7 = vld [vmem:[%s8210_s19 + $0xaa4] sm:$0xf] }
 0x112   : > { %v6652_v61 = vld [vmem:[%s8210_s19 + $0x9d0] sm:$0xf0]  ;;  %4058 = vmatpush.bf16.msra.mxu2 %v6799_v43  ;;  %v6527_v5 = vor.u32 %v7785_v57, %v6524_v51  ;;  %v7877_v19 = vld [vmem:[%s8210_s19 + $0xba4] sm:$0xf] }
 0x113   : > { %4076 = vmatpush.bf16.msra.mxu3 %v6927_v46  ;;  %v6655_v6 = vor.u32 %v7817_v60, %v6652_v61  ;;  %v6764_v16 = vld [vmem:[%s8210_s19 + $0xab0] sm:$0xf0]  ;;  %v7781_v21 = vld [vmem:[%s8210_s19 + $0x8a4] sm:$0xf]  ;;  %3994 = vmatmul.bf16.vlgmr.msrb.gmra.mxu2 %v8402_v24 }
 0x114   : > { %4022 = vmatpush.bf16.msra.mxu0 %v6543_v55  ;;  %v6892_v20 = vld [vmem:[%s8210_s19 + $0xbb0] sm:$0xf0]  ;;  %v7813_v13 = vld [vmem:[%s8210_s19 + $0x9a4] sm:$0xf]  ;;  %v6767_v32 = vor.u32 %v7845_v7, %v6764_v16  ;;  %4012 = vmatmul.bf16.vlgmr.msrb.gmra.mxu3 %v8409_v29 }
 0x115   : > { %4040 = vmatpush.bf16.msra.mxu1 %v6671_v56  ;;  %v6508_v8 = vld [vmem:[%s8210_s19 + $0x8b0] sm:$0xf0]  ;;  %v6895_v33 = vor.u32 %v7877_v19, %v6892_v20  ;;  %v7841_v38 = vld [vmem:[%s8210_s19 + $0xa84] sm:$0xf]  ;;  %3958 = vmatmul.bf16.vlgmr.msrb.gmra.mxu0 %v8400_v23 }
 0x116   : > { %4059 = vmatpush.bf16.msra.mxu2 %v6783_v62  ;;  %v6636_v25 = vld [vmem:[%s8210_s19 + $0x9b0] sm:$0xf0]  ;;  %v6511_v40 = vor.u32 %v7781_v21, %v6508_v8  ;;  %v7873_v46 = vld [vmem:[%s8210_s19 + $0xb84] sm:$0xf]  ;;  %3976 = vmatmul.bf16.vlgmr.msrb.gmra.mxu1 %v8407_v28  ;;  %v8791_v62 = vpop.f32.mrf.mxu2 }
 0x117   : > { %4077 = vmatpush.bf16.msra.mxu3 %v6911_v1  ;;  %v6748_v39 = vld [vmem:[%s8210_s19 + $0xa90] sm:$0xf0]  ;;  %v6639_v43 = vor.u32 %v7813_v13, %v6636_v25  ;;  %v7777_v52 = vld [vmem:[%s8210_s19 + $0x884] sm:$0xf]  ;;  %v8796_v17 = vpop.f32.mrf.mxu3  ;;  %v8801_v22 = vpop.f32.mrf.mxu0 }
 0x118   : > { %4023 = vmatpush.bf16.msra.mxu0 %v6527_v5  ;;  %v6876_v47 = vld [vmem:[%s8210_s19 + $0xb90] sm:$0xf0]  ;;  %v7809_v55 = vld [vmem:[%s8210_s19 + $0x984] sm:$0xf]  ;;  %v6751_v57 = vor.u32 %v7841_v38, %v6748_v39  ;;  %v8803_v8 = vpop.f32.mrf.mxu1 }
 0x119   : > { %4041 = vmatpush.bf16.msra.mxu1 %v6655_v6  ;;  %v6492_v54 = vld [vmem:[%s8210_s19 + $0x890] sm:$0xf0]  ;;  %v6879_v51 = vor.u32 %v7873_v46, %v6876_v47  ;;  %v7837_v60 = vld [vmem:[%s8210_s19 + $0xa64] sm:$0xf] }
 0x11a   : > { %v6620_v56 = vld [vmem:[%s8210_s19 + $0x990] sm:$0xf0]  ;;  %4060 = vmatpush.bf16.msra.mxu2 %v6767_v32  ;;  %v6495_v1 = vor.u32 %v7777_v52, %v6492_v54  ;;  %v7869_v6 = vld [vmem:[%s8210_s19 + $0xb64] sm:$0xf] }
 0x11b   : > { %4078 = vmatpush.bf16.msra.mxu3 %v6895_v33  ;;  %v6732_v61 = vld [vmem:[%s8210_s19 + $0xa70] sm:$0xf0]  ;;  %v6623_v5 = vor.u32 %v7809_v55, %v6620_v56  ;;  %v7773_v16 = vld [vmem:[%s8210_s19 + $0x864] sm:$0xf] }
 0x11c   : > { %4024 = vmatpush.bf16.msra.mxu0 %v6511_v40  ;;  %v6860_v7 = vld [vmem:[%s8210_s19 + $0xb70] sm:$0xf0]  ;;  %v7805_v20 = vld [vmem:[%s8210_s19 + $0x964] sm:$0xf]  ;;  %v6735_v13 = vor.u32 %v7837_v60, %v6732_v61 }
 0x11d   : > { %4042 = vmatpush.bf16.msra.mxu1 %v6639_v43  ;;  %v6476_v19 = vld [vmem:[%s8210_s19 + $0x870] sm:$0xf0]  ;;  %v6863_v25 = vor.u32 %v7869_v6, %v6860_v7  ;;  %v7833_v32 = vld [vmem:[%s8210_s19 + $0xa44] sm:$0xf] }
 0x11e   : > { %v6604_v21 = vld [vmem:[%s8210_s19 + $0x970] sm:$0xf0]  ;;  %4061 = vmatpush.bf16.msra.mxu2 %v6751_v57  ;;  %v6479_v38 = vor.u32 %v7773_v16, %v6476_v19  ;;  %v7865_v40 = vld [vmem:[%s8210_s19 + $0xb44] sm:$0xf]  ;;  %v8815_v60 = vpop.f32.mrf.mxu2 }
 0x11f   : > { %4079 = vmatpush.bf16.msra.mxu3 %v6879_v51  ;;  %v6716_v33 = vld [vmem:[%s8210_s19 + $0xa50] sm:$0xf0]  ;;  %v6607_v39 = vor.u32 %v7805_v20, %v6604_v21  ;;  %v7769_v46 = vld [vmem:[%s8210_s19 + $0x844] sm:$0xf]  ;;  %v8820_v16 = vpop.f32.mrf.mxu3 }
 0x120   : > { %4025 = vmatpush.bf16.msra.mxu0 %v6495_v1  ;;  %v6844_v43 = vld [vmem:[%s8210_s19 + $0xb50] sm:$0xf0]  ;;  %v7801_v52 = vld [vmem:[%s8210_s19 + $0x944] sm:$0xf]  ;;  %v6719_v55 = vor.u32 %v7833_v32, %v6716_v33  ;;  %v8828_v32 = vpop.f32.mrf.mxu1 }
 0x121   : > { %4043 = vmatpush.bf16.msra.mxu1 %v6623_v5  ;;  %v6460_v47 = vld [vmem:[%s8210_s19 + $0x850] sm:$0xf0]  ;;  %v6847_v56 = vor.u32 %v7865_v40, %v6844_v43  ;;  %v7829_v57 = vld [vmem:[%s8210_s19 + $0xa24] sm:$0xf] }
 0x122   : > { %v6588_v54 = vld [vmem:[%s8210_s19 + $0x950] sm:$0xf0]  ;;  %4062 = vmatpush.bf16.msra.mxu2 %v6735_v13  ;;  %v6463_v61 = vor.u32 %v7769_v46, %v6460_v47  ;;  %v7861_v5 = vld [vmem:[%s8210_s19 + $0xb24] sm:$0xf]  ;;  %v8825_v13 = vpop.f32.mrf.mxu0 }
 0x123   : > { %4080 = vmatpush.bf16.msra.mxu3 %v6863_v25  ;;  %v6700_v51 = vld [vmem:[%s8210_s19 + $0xa30] sm:$0xf0]  ;;  %v6591_v1 = vor.u32 %v7801_v52, %v6588_v54  ;;  %v7765_v7 = vld [vmem:[%s8210_s19 + $0x824] sm:$0xf]  ;;  %3999 = vmatmul.bf16.gmra.mxu2 %v8448_v30 }
 0x124   : > { %4026 = vmatpush.bf16.msra.mxu0 %v6479_v38  ;;  %v6828_v6 = vld [vmem:[%s8210_s19 + $0xb30] sm:$0xf0]  ;;  %v7797_v20 = vld [vmem:[%s8210_s19 + $0x924] sm:$0xf]  ;;  %v6703_v33 = vor.u32 %v7829_v57, %v6700_v51  ;;  %4017 = vmatmul.bf16.gmra.mxu3 %v8455_v35 }
 0x125   : > { %4044 = vmatpush.bf16.msra.mxu1 %v6607_v39  ;;  %v6444_v19 = vld [vmem:[%s8210_s19 + $0x830] sm:$0xf0]  ;;  %v7825_v25 = vld [vmem:[%s8210_s19 + $0xa04] sm:$0xf]  ;;  %v6831_v38 = vor.u32 %v7861_v5, %v6828_v6  ;;  %3963 = vmatmul.bf16.gmra.mxu0 %v8446_v27 }
 0x126   : > { %v6572_v21 = vld [vmem:[%s8210_s19 + $0x930] sm:$0xf0]  ;;  %4063 = vmatpush.bf16.msra.mxu2 %v6719_v55  ;;  %v7857_v40 = vld [vmem:[%s8210_s19 + $0xb04] sm:$0xf]  ;;  %v6447_v46 = vor.u32 %v7765_v7, %v6444_v19  ;;  %3981 = vmatmul.bf16.gmra.mxu1 %v8453_v34  ;;  %v8849_v30 = vpop.f32.mrf.mxu2 }
 0x127   : > { %4081 = vmatpush.bf16.msra.mxu3 %v6847_v56  ;;  %v6684_v39 = vld [vmem:[%s8210_s19 + $0xa10] sm:$0xf0]  ;;  %v6575_v47 = vor.u32 %v7797_v20, %v6572_v21  ;;  %v7761_v52 = vld [vmem:[%s8210_s19 + $0x804] sm:$0xf]  ;;  %v8851_v27 = vpop.f32.mrf.mxu3 }
 0x128   : > { %v6812_v43 = vld [vmem:[%s8210_s19 + $0xb10] sm:$0xf0]  ;;  %4027 = vmatpush.bf16.msra.mxu0 %v6463_v61  ;;  %v7793_v55 = vld [vmem:[%s8210_s19 + $0x904] sm:$0xf]  ;;  %v6687_v6 = vor.u32 %v7825_v25, %v6684_v39  ;;  %v3696_v3 = vpop.f32.mrf.mxu1 }
 0x129   : > { %4045 = vmatpush.bf16.msra.mxu1 %v6591_v1  ;;  %v6428_v54 = vld [vmem:[%s8210_s19 + $0x810] sm:$0xf0]  ;;  %v7981_v57 = vld [vmem:[%s8210_s19 + $0xee4] sm:$0xf]  ;;  %v6815_v7 = vor.u32 %v7857_v40, %v6812_v43 }
 0x12a   : > { %v6556_v56 = vld [vmem:[%s8210_s19 + $0x910] sm:$0xf0]  ;;  %v8013_v61 = vld [vmem:[%s8210_s19 + $0xfe4] sm:$0xf]  ;;  %4064 = vmatpush.bf16.msra.mxu2 %v6703_v33  ;;  %v6431_v35 = vor.u32 %v7761_v52, %v6428_v54  ;;  %v3678_v40 = vpop.f32.mrf.mxu0 }
 0x12b   : > { %v7308_v51 = vld [vmem:[%s8210_s19 + $0xef0] sm:$0xf0]  ;;  %v7917_v5 = vld [vmem:[%s8210_s19 + $0xce4] sm:$0xf]  ;;  %4082 = vmatpush.bf16.msra.mxu3 %v6831_v38  ;;  %v6559_v34 = vor.u32 %v7793_v55, %v6556_v56 }
 0x12c   : > { %v7436_v1 = vld [vmem:[%s8210_s19 + $0xff0] sm:$0xf0]  ;;  %v7949_v20 = vld [vmem:[%s8210_s19 + $0xde4] sm:$0xf]  ;;  %4028 = vmatpush.bf16.msra.mxu0 %v6447_v46  ;;  %v7311_v33 = vor.u32 %v7981_v57, %v7308_v51 }
 0x12d   : > { %v7052_v19 = vld [vmem:[%s8210_s19 + $0xcf0] sm:$0xf0]  ;;  %4046 = vmatpush.bf16.msra.mxu1 %v6575_v47  ;;  %v7439_v25 = vor.u32 %v8013_v61, %v7436_v1  ;;  %v7977_v38 = vld [vmem:[%s8210_s19 + $0xec4] sm:$0xf] }
 0x12e   : > { %v7180_v21 = vld [vmem:[%s8210_s19 + $0xdf0] sm:$0xf0]  ;;  %v7055_v43 = vor.u32 %v7917_v5, %v7052_v19  ;;  %v8009_v28 = vld [vmem:[%s8210_s19 + $0xfc4] sm:$0xf]  ;;  %4065 = vmatpush.bf16.msra.mxu2 %v6687_v6  ;;  %v3714_v61 = vpop.f32.mrf.mxu2 }
 0x12f   : > { %v7292_v39 = vld [vmem:[%s8210_s19 + $0xed0] sm:$0xf0]  ;;  %v7183_v29 = vor.u32 %v7949_v20, %v7180_v21  ;;  %v7913_v23 = vld [vmem:[%s8210_s19 + $0xcc4] sm:$0xf]  ;;  %4083 = vmatpush.bf16.msra.mxu3 %v6815_v7 }
 0x130   : > { %v7420_v24 = vld [vmem:[%s8210_s19 + $0xfd0] sm:$0xf0]  ;;  %v7945_v47 = vld [vmem:[%s8210_s19 + $0xdc4] sm:$0xf]  ;;  %4029 = vmatpush.bf16.msra.mxu0 %v6431_v35  ;;  %v7295_v54 = vor.u32 %v7977_v38, %v7292_v39 }
 0x131   : > { %v7036_v46 = vld [vmem:[%s8210_s19 + $0xcd0] sm:$0xf0]  ;;  %4047 = vmatpush.bf16.msra.mxu1 %v6559_v34  ;;  %v7423_v55 = vor.u32 %v8009_v28, %v7420_v24  ;;  %v7973_v57 = vld [vmem:[%s8210_s19 + $0xea4] sm:$0xf]  ;;  %v3732_v34 = vpop.f32.mrf.mxu3 }
 0x132   : > { %v7164_v52 = vld [vmem:[%s8210_s19 + $0xdd0] sm:$0xf0]  ;;  %4130 = vmatpush.bf16.msrb.mxu2 %v7311_v33  ;;  %v7039_v3 = vor.u32 %v7913_v23, %v7036_v46  ;;  %v8005_v1 = vld [vmem:[%s8210_s19 + $0xfa4] sm:$0xf]  ;;  %v8869_v23 = vpop.f32.mrf.mxu0 }
 0x133   : > { %4148 = vmatpush.bf16.msrb.mxu3 %v7439_v25  ;;  %v7167_v56 = vor.u32 %v7945_v47, %v7164_v52  ;;  %v7276_v51 = vld [vmem:[%s8210_s19 + $0xeb0] sm:$0xf0]  ;;  %v7909_v35 = vld [vmem:[%s8210_s19 + $0xca4] sm:$0xf]  ;;  %4066 = vmatmul.bf16.vlgmr.msra.gmra.mxu2 %v8502_v45 }
 0x134   : > { %4094 = vmatpush.bf16.msrb.mxu0 %v7055_v43  ;;  %v7404_v5 = vld [vmem:[%s8210_s19 + $0xfb0] sm:$0xf0]  ;;  %v7941_v28 = vld [vmem:[%s8210_s19 + $0xda4] sm:$0xf]  ;;  %v7279_v7 = vor.u32 %v7973_v57, %v7276_v51  ;;  %4084 = vmatmul.bf16.vlgmr.msra.gmra.mxu3 %v8509_v50 }
 0x135   : > { %4112 = vmatpush.bf16.msrb.mxu1 %v7183_v29  ;;  %v7020_v24 = vld [vmem:[%s8210_s19 + $0xcb0] sm:$0xf0]  ;;  %v8871_v29 = vpop.f32.mrf.mxu1  ;;  %v7407_v19 = vor.u32 %v8005_v1, %v7404_v5  ;;  %v7969_v20 = vld [vmem:[%s8210_s19 + $0xe84] sm:$0xf]  ;;  %4030 = vmatmul.bf16.vlgmr.msra.gmra.mxu0 %v8500_v44 }
 0x136   : > { %4131 = vmatpush.bf16.msrb.mxu2 %v7295_v54  ;;  %v7148_v6 = vld [vmem:[%s8210_s19 + $0xdb0] sm:$0xf0]  ;;  %v7023_v33 = vor.u32 %v7909_v35, %v7020_v24  ;;  %v8001_v38 = vld [vmem:[%s8210_s19 + $0xf84] sm:$0xf]  ;;  %4048 = vmatmul.bf16.vlgmr.msra.gmra.mxu1 %v8507_v49 }
 0x137   : > { %4149 = vmatpush.bf16.msrb.mxu3 %v7423_v55  ;;  %v7260_v21 = vld [vmem:[%s8210_s19 + $0xe90] sm:$0xf0]  ;;  %v7151_v25 = vor.u32 %v7941_v28, %v7148_v6  ;;  %v7905_v40 = vld [vmem:[%s8210_s19 + $0xc84] sm:$0xf] }
 0x138   : > { %4095 = vmatpush.bf16.msrb.mxu0 %v7039_v3  ;;  %v7388_v39 = vld [vmem:[%s8210_s19 + $0xf90] sm:$0xf0]  ;;  %v7937_v46 = vld [vmem:[%s8210_s19 + $0xd84] sm:$0xf]  ;;  %v7263_v52 = vor.u32 %v7969_v20, %v7260_v21 }
 0x139   : > { %4113 = vmatpush.bf16.msrb.mxu1 %v7167_v56  ;;  %v7004_v43 = vld [vmem:[%s8210_s19 + $0xc90] sm:$0xf0]  ;;  %v7391_v54 = vor.u32 %v8001_v38, %v7388_v39  ;;  %v7965_v55 = vld [vmem:[%s8210_s19 + $0xe64] sm:$0xf]  ;;  %v8887_v56 = vpop.f32.mrf.mxu2  ;;  %v8892_v35 = vpop.f32.mrf.mxu3 }
 0x13a   : > { %v7132_v47 = vld [vmem:[%s8210_s19 + $0xd90] sm:$0xf0]  ;;  %4132 = vmatpush.bf16.msrb.mxu2 %v7279_v7  ;;  %v7007_v57 = vor.u32 %v7905_v40, %v7004_v43  ;;  %v7997_v61 = vld [vmem:[%s8210_s19 + $0xf64] sm:$0xf]  ;;  %v8897_v6 = vpop.f32.mrf.mxu0  ;;  %v3672_v7 = vadd.f32 %v8773_v26, %v8715_v48 }
 0x13b   : > { %4150 = vmatpush.bf16.msrb.mxu3 %v7407_v19  ;;  %v7244_v3 = vld [vmem:[%s8210_s19 + $0xe70] sm:$0xf0]  ;;  %v7135_v51 = vor.u32 %v7937_v46, %v7132_v47  ;;  %v7901_v5 = vld [vmem:[%s8210_s19 + $0xc64] sm:$0xf] }
 0x13c   : > { %4096 = vmatpush.bf16.msrb.mxu0 %v7023_v33  ;;  %v7372_v1 = vld [vmem:[%s8210_s19 + $0xf70] sm:$0xf0]  ;;  %v7933_v24 = vld [vmem:[%s8210_s19 + $0xd64] sm:$0xf]  ;;  %v7247_v20 = vor.u32 %v7965_v55, %v7244_v3 }
 0x13d   : > { %4114 = vmatpush.bf16.msrb.mxu1 %v7151_v25  ;;  %v6988_v34 = vld [vmem:[%s8210_s19 + $0xc70] sm:$0xf0]  ;;  %v8901_v19 = vpop.f32.mrf.mxu1  ;;  %v7375_v21 = vor.u32 %v7997_v61, %v7372_v1  ;;  %v7961_v33 = vld [vmem:[%s8210_s19 + $0xe44] sm:$0xf] }
 0x13e   : > { %v7116_v28 = vld [vmem:[%s8210_s19 + $0xd70] sm:$0xf0]  ;;  %4133 = vmatpush.bf16.msrb.mxu2 %v7263_v52  ;;  %v6991_v38 = vor.u32 %v7901_v5, %v6988_v34  ;;  %v7993_v40 = vld [vmem:[%s8210_s19 + $0xf44] sm:$0xf]  ;;  %v3690_v52 = vadd.f32 %v8775_v31, %v3672_v7 }
 0x13f   : > { %4151 = vmatpush.bf16.msrb.mxu3 %v7391_v54  ;;  %v7228_v25 = vld [vmem:[%s8210_s19 + $0xe50] sm:$0xf0]  ;;  %v7119_v39 = vor.u32 %v7933_v24, %v7116_v28  ;;  %v7897_v46 = vld [vmem:[%s8210_s19 + $0xc44] sm:$0xf] }
 0x140   : > { %4097 = vmatpush.bf16.msrb.mxu0 %v7007_v57  ;;  %v7356_v43 = vld [vmem:[%s8210_s19 + $0xf50] sm:$0xf0]  ;;  %v7929_v26 = vld [vmem:[%s8210_s19 + $0xd44] sm:$0xf]  ;;  %v7231_v54 = vor.u32 %v7961_v33, %v7228_v25  ;;  %v3708_v24 = vadd.f32 %v8791_v62, %v3690_v52  ;;  %v3674_v33 = vadd.f32 %v8801_v22, %v8734_v53 }
 0x141   : > { %4115 = vmatpush.bf16.msrb.mxu1 %v7135_v51  ;;  %v6972_v48 = vld [vmem:[%s8210_s19 + $0xc50] sm:$0xf0]  ;;  %v7359_v55 = vor.u32 %v7993_v40, %v7356_v43  ;;  %v7957_v3 = vld [vmem:[%s8210_s19 + $0xe24] sm:$0xf]  ;;  %v8914_v51 = vpop.f32.mrf.mxu2  ;;  %v8920_v28 = vpop.f32.mrf.mxu3 }
 0x142   : > { %v7100_v47 = vld [vmem:[%s8210_s19 + $0xd50] sm:$0xf0]  ;;  %4134 = vmatpush.bf16.msrb.mxu2 %v7247_v20  ;;  %v6975_v61 = vor.u32 %v7897_v46, %v6972_v48  ;;  %v7989_v5 = vld [vmem:[%s8210_s19 + $0xf24] sm:$0xf]  ;;  %v8927_v25 = vpop.f32.mrf.mxu0 }
 0x143   : > { %4152 = vmatpush.bf16.msrb.mxu3 %v7375_v21  ;;  %v7212_v57 = vld [vmem:[%s8210_s19 + $0xe30] sm:$0xf0]  ;;  %v7103_v1 = vor.u32 %v7929_v26, %v7100_v47  ;;  %v7893_v31 = vld [vmem:[%s8210_s19 + $0xc24] sm:$0xf]  ;;  %4071 = vmatmul.bf16.gmra.mxu2 %v8548_v59 }
 0x144   : > { %4098 = vmatpush.bf16.msrb.mxu0 %v6991_v38  ;;  %v7340_v34 = vld [vmem:[%s8210_s19 + $0xf30] sm:$0xf0]  ;;  %v7925_v20 = vld [vmem:[%s8210_s19 + $0xd24] sm:$0xf]  ;;  %v7215_v62 = vor.u32 %v7957_v3, %v7212_v57  ;;  %v5778_v3 = vld [vmem:[%s8210_s19 + $0x2e8] sm:$0xf]  ;;  %4089 = vmatmul.bf16.gmra.mxu3 %v8555_v0 }
 0x145   : > { %4116 = vmatpush.bf16.msrb.mxu1 %v7119_v39  ;;  %v6956_v7 = vld [vmem:[%s8210_s19 + $0xc30] sm:$0xf0]  ;;  %v7953_v38 = vld [vmem:[%s8210_s19 + $0xe04] sm:$0xf]  ;;  %v8930_v39 = vpop.f32.mrf.mxu1  ;;  %v7343_v40 = vor.u32 %v7989_v5, %v7340_v34  ;;  %4035 = vmatmul.bf16.gmra.mxu0 %v8546_v58  ;;  %v7600_v57 = vld [vmem:[%s8210_s19 + $0x2f4] sm:$0xf0] }
 0x146   : > { %v7084_v21 = vld [vmem:[%s8210_s19 + $0xd30] sm:$0xf0]  ;;  %4135 = vmatpush.bf16.msrb.mxu2 %v7231_v54  ;;  %v7985_v46 = vld [vmem:[%s8210_s19 + $0xf04] sm:$0xf]  ;;  %v6959_v53 = vor.u32 %v7893_v31, %v6956_v7  ;;  %v3726_v54 = vadd.f32 %v8796_v17, %v3708_v24  ;;  %4053 = vmatmul.bf16.gmra.mxu1 %v8553_v63  ;;  %v7632_v5 = vld [vmem:[%s8210_s19 + $0x3f4] sm:$0xf0] }
 0x147   : > { %4153 = vmatpush.bf16.msrb.mxu3 %v7359_v55  ;;  %v7196_v43 = vld [vmem:[%s8210_s19 + $0xe10] sm:$0xf0]  ;;  %v7087_v22 = vor.u32 %v7925_v20, %v7084_v21  ;;  %v7889_v26 = vld [vmem:[%s8210_s19 + $0xc04] sm:$0xf]  ;;  %v5522_v34 = vld [vmem:[%s8210_s19 + $0xe8] sm:$0xf] }
 0x148   : > { %v7324_v48 = vld [vmem:[%s8210_s19 + $0xf10] sm:$0xf0]  ;;  %4099 = vmatpush.bf16.msrb.mxu0 %v6975_v61  ;;  %v7921_v52 = vld [vmem:[%s8210_s19 + $0xd04] sm:$0xf]  ;;  %v3692_v61 = vadd.f32 %v8803_v8, %v3674_v33  ;;  %v3744_v17 = vadd.f32 %v8869_v23, %v3726_v54  ;;  %v7199_v31 = vor.u32 %v7953_v38, %v7196_v43  ;;  %v7536_v7 = vld [vmem:[%s8210_s19 + $0xf4] sm:$0xf0] }
 0x149   : > { %4117 = vmatpush.bf16.msrb.mxu1 %v7103_v1  ;;  %v6940_v47 = vld [vmem:[%s8210_s19 + $0xc10] sm:$0xf0]  ;;  %v5906_v1 = vld [vmem:[%s8210_s19 + $0x3e8] sm:$0xf]  ;;  %v7327_v24 = vor.u32 %v7985_v46, %v7324_v48  ;;  %v7568_v21 = vld [vmem:[%s8210_s19 + $0x1f4] sm:$0xf0]  ;;  %v8955_v33 = vpop.f32.mrf.mxu2  ;;  %v5523_v54 = vor.u32 %v7536_v7, %v5522_v34 }
 0x14a   : > { %v7068_v55 = vld [vmem:[%s8210_s19 + $0xd10] sm:$0xf0]  ;;  %4136 = vmatpush.bf16.msrb.mxu2 %v7215_v62  ;;  %v5650_v20 = vld [vmem:[%s8210_s19 + $0x1e8] sm:$0xf]  ;;  %v3710_v8 = vadd.f32 %v8815_v60, %v3692_v61  ;;  %v6943_v0 = vor.u32 %v7889_v26, %v6940_v47  ;;  %v8957_v62 = vpop.f32.mrf.mxu3  ;;  %v5907_v38 = vor.u32 %v7632_v5, %v5906_v1  ;;  %v7596_v46 = vld [vmem:[%s8210_s19 + $0x2d4] sm:$0xf0]  ;;  %v3677_v60 = vadd.f32 %v8825_v13, %v8760_v10  ;;  %v3750_v48 = vpop.f32.mrf.mxu0 }
 0x14b   : > { %4154 = vmatpush.bf16.msrb.mxu3 %v7343_v40  ;;  %v7071_v23 = vor.u32 %v7921_v52, %v7068_v55  ;;  %v5779_v40 = vor.u32 %v7600_v57, %v5778_v3  ;;  %v5762_v43 = vld [vmem:[%s8210_s19 + $0x2c8] sm:$0xf]  ;;  %v5651_v61 = vor.u32 %v7568_v21, %v5650_v20  ;;  %v3762_v26 = vadd.f32 %v8871_v29, %v3744_v17  ;;  %v7532_v52 = vld [vmem:[%s8210_s19 + $0xd4] sm:$0xf0] }
 0x14c   : > { %4100 = vmatpush.bf16.msrb.mxu0 %v6959_v53  ;;  %v5890_v63 = vld [vmem:[%s8210_s19 + $0x3c8] sm:$0xf]  ;;  %v7628_v53 = vld [vmem:[%s8210_s19 + $0x3d4] sm:$0xf0]  ;;  %v3728_v57 = vadd.f32 %v8820_v16, %v3710_v8  ;;  %v5763_v13 = vor.u32 %v7596_v46, %v5762_v43  ;;  %v3695_v1 = vadd.f32 %v8828_v32, %v3677_v60 }
 0x14d   : > { %4118 = vmatpush.bf16.msrb.mxu1 %v7087_v22  ;;  %v5506_v22 = vld [vmem:[%s8210_s19 + $0xc8] sm:$0xf]  ;;  %v3768_v47 = vpop.f32.mrf.mxu1  ;;  %v7564_v3 = vld [vmem:[%s8210_s19 + $0x1d4] sm:$0xf0]  ;;  %v3780_v10 = vadd.f32 %v8887_v56, %v3762_v26  ;;  %v5891_v29 = vor.u32 %v7628_v53, %v5890_v63 }
 0x14e   : > { %4137 = vmatpush.bf16.msrb.mxu2 %v7199_v31  ;;  %v5634_v55 = vld [vmem:[%s8210_s19 + $0x1c8] sm:$0xf]  ;;  %v5507_v5 = vor.u32 %v7532_v52, %v5506_v22  ;;  %v7592_v17 = vld [vmem:[%s8210_s19 + $0x2b4] sm:$0xf0]  ;;  %v3713_v56 = vadd.f32 %v8849_v30, %v3695_v1 }
 0x14f   : > { %4155 = vmatpush.bf16.msrb.mxu3 %v7327_v24  ;;  %v5635_v16 = vor.u32 %v7564_v3, %v5634_v55  ;;  %v5746_v34 = vld [vmem:[%s8210_s19 + $0x2a8] sm:$0xf]  ;;  %v7624_v7 = vld [vmem:[%s8210_s19 + $0x3b4] sm:$0xf0]  ;;  %v3798_v63 = vadd.f32 %v8892_v35, %v3780_v10 }
 0x150   : > { %4101 = vmatpush.bf16.msrb.mxu0 %v6943_v0  ;;  %v3746_v0 = vadd.f32 %v8897_v6, %v3728_v57  ;;  %v5874_v24 = vld [vmem:[%s8210_s19 + $0x3a8] sm:$0xf]  ;;  %v7528_v21 = vld [vmem:[%s8210_s19 + $0xb4] sm:$0xf0]  ;;  %v5747_v35 = vor.u32 %v7592_v17, %v5746_v34  ;;  %v3731_v48 = vadd.f32 %v8851_v27, %v3713_v56 }
 0x151   : > { %4119 = vmatpush.bf16.msrb.mxu1 %v7071_v23  ;;  %v3786_v31 = vpop.f32.mrf.mxu2  ;;  %v5490_v20 = vld [vmem:[%s8210_s19 + $0xa8] sm:$0xf]  ;;  %v7560_v6 = vld [vmem:[%s8210_s19 + $0x1b4] sm:$0xf0]  ;;  %v5875_v43 = vor.u32 %v7624_v7, %v5874_v24 }
 0x152   : > { %4202 = vmatpush.bf16.msra.mxu2 %v5779_v40  ;;  %v3804_v32 = vpop.f32.mrf.mxu3  ;;  %v5618_v8 = vld [vmem:[%s8210_s19 + $0x1a8] sm:$0xf]  ;;  %v3815_v23 = vpop.f32.mrf.mxu0  ;;  %v3764_v30 = vadd.f32 %v8901_v19, %v3746_v0  ;;  %v7588_v60 = vld [vmem:[%s8210_s19 + $0x294] sm:$0xf0]  ;;  %v3749_v3 = vadd.f32 %v8927_v25, %v3731_v48 }
 0x153   : > { %4220 = vmatpush.bf16.msra.mxu3 %v5907_v38  ;;  %v3816_v40 = vadd.f32 %v3815_v23, %v3798_v63  ;;  %v5730_v46 = vld [vmem:[%s8210_s19 + $0x288] sm:$0xf]  ;;  %v7620_v22 = vld [vmem:[%s8210_s19 + $0x394] sm:$0xf0]  ;;  %4138 = vmatmul.bf16.vlgmr.msrb.gmra.mxu2 %v8604_v37  ;;  %v346_v63 = vld [vmem:[#allocation2 + $0x30] sm:$0xff] }
 0x154   : > { %4166 = vmatpush.bf16.msra.mxu0 %v5523_v54  ;;  %v5491_v54 = vor.u32 %v7528_v21, %v5490_v20  ;;  %v5858_v53 = vld [vmem:[%s8210_s19 + $0x388] sm:$0xf]  ;;  %v3782_v19 = vadd.f32 %v8914_v51, %v3764_v30  ;;  %v7524_v47 = vld [vmem:[%s8210_s19 + $0x94] sm:$0xf0]  ;;  %4156 = vmatmul.bf16.vlgmr.msrb.gmra.mxu3 %v8611_v42  ;;  %v5731_v51 = vor.u32 %v7588_v60, %v5730_v46 }
 0x155   : > { %4184 = vmatpush.bf16.msra.mxu1 %v5651_v61  ;;  %v3833_v38 = vpop.f32.mrf.mxu1  ;;  %v5619_v61 = vor.u32 %v7560_v6, %v5618_v8  ;;  %v5474_v26 = vld [vmem:[%s8210_s19 + $0x88] sm:$0xf]  ;;  %4102 = vmatmul.bf16.vlgmr.msrb.gmra.mxu0 %v8602_v36  ;;  %v7556_v55 = vld [vmem:[%s8210_s19 + $0x194] sm:$0xf0]  ;;  %v5859_v57 = vor.u32 %v7620_v22, %v5858_v53  ;;  %v3767_v20 = vadd.f32 %v8930_v39, %v3749_v3 }
 0x156   : > { %4203 = vmatpush.bf16.msra.mxu2 %v5763_v13  ;;  %v5602_v52 = vld [vmem:[%s8210_s19 + $0x188] sm:$0xf]  ;;  %4120 = vmatmul.bf16.vlgmr.msrb.gmra.mxu1 %v8609_v41  ;;  %v3834_v27 = vadd.f32 %v3833_v38, %v3816_v40  ;;  %v7584_v13 = vld [vmem:[%s8210_s19 + $0x274] sm:$0xf0]  ;;  %v5475_v25 = vor.u32 %v7524_v47, %v5474_v26  ;;  %v3800_v34 = vadd.f32 %v8920_v28, %v3782_v19 }
 0x157   : > { %4221 = vmatpush.bf16.msra.mxu3 %v5891_v29  ;;  %v5714_v10 = vld [vmem:[%s8210_s19 + $0x268] sm:$0xf]  ;;  %v5603_v1 = vor.u32 %v7556_v55, %v5602_v52  ;;  %v7520_v31 = vld [vmem:[%s8210_s19 + $0x74] sm:$0xf0]  ;;  %v3785_v60 = vadd.f32 %v8955_v33, %v3767_v20 }
 0x158   : > { %4167 = vmatpush.bf16.msra.mxu0 %v5507_v5  ;;  %v5842_v5 = vld [vmem:[%s8210_s19 + $0x368] sm:$0xf]  ;;  %v7552_v7 = vld [vmem:[%s8210_s19 + $0x174] sm:$0xf0]  ;;  %v5715_v21 = vor.u32 %v7584_v13, %v5714_v10 }
 0x159   : > { %4185 = vmatpush.bf16.msra.mxu1 %v5635_v16  ;;  %v3851_v29 = vpop.f32.mrf.mxu2  ;;  %v7616_v16 = vld [vmem:[%s8210_s19 + $0x374] sm:$0xf0]  ;;  %v5458_v0 = vld [vmem:[%s8210_s19 + $0x68] sm:$0xf]  ;;  %v3803_v10 = vadd.f32 %v8957_v62, %v3785_v60 }
 0x15a   : > { %4204 = vmatpush.bf16.msra.mxu2 %v5747_v35  ;;  %v3852_v17 = vadd.f32 %v3851_v29, %v3834_v27  ;;  %v3869_v56 = vpop.f32.mrf.mxu3  ;;  %v5586_v24 = vld [vmem:[%s8210_s19 + $0x168] sm:$0xf]  ;;  %v3817_v32 = vpop.f32.mrf.mxu0  ;;  %v5843_v28 = vor.u32 %v7616_v16, %v5842_v5  ;;  %v7580_v40 = vld [vmem:[%s8210_s19 + $0x254] sm:$0xf0]  ;;  %v5459_v39 = vor.u32 %v7520_v31, %v5458_v0  ;;  %v350_v16 = vld [vmem:[#allocation2 + $0x50] sm:$0xff] }
 0x15b   : > { %4222 = vmatpush.bf16.msra.mxu3 %v5875_v43  ;;  %v3818_v6 = vadd.f32 %v3817_v32, %v3800_v34  ;;  %v5698_v30 = vld [vmem:[%s8210_s19 + $0x248] sm:$0xf]  ;;  %v5587_v38 = vor.u32 %v7552_v7, %v5586_v24  ;;  %v7612_v43 = vld [vmem:[%s8210_s19 + $0x354] sm:$0xf0] }
 0x15c   : > { %4168 = vmatpush.bf16.msra.mxu0 %v5491_v54  ;;  %v3870_v8 = vadd.f32 %v3869_v56, %v3852_v17  ;;  %v5826_v35 = vld [vmem:[%s8210_s19 + $0x348] sm:$0xf]  ;;  %v7516_v54 = vld [vmem:[%s8210_s19 + $0x54] sm:$0xf0]  ;;  %v5699_v26 = vor.u32 %v7580_v40, %v5698_v30 }
 0x15d   : > { %4186 = vmatpush.bf16.msra.mxu1 %v5619_v61  ;;  %v3835_v23 = vpop.f32.mrf.mxu1  ;;  %v5442_v46 = vld [vmem:[%s8210_s19 + $0x48] sm:$0xf]  ;;  %v7548_v53 = vld [vmem:[%s8210_s19 + $0x154] sm:$0xf0]  ;;  %v5827_v19 = vor.u32 %v7612_v43, %v5826_v35 }
 0x15e   : > { %4205 = vmatpush.bf16.msra.mxu2 %v5731_v51  ;;  %v4742_v48 = vadd.f32 %v3870_v8, %v346_v63  ;;  %v5570_v61 = vld [vmem:[%s8210_s19 + $0x148] sm:$0xf]  ;;  %v3836_v22 = vadd.f32 %v3835_v23, %v3818_v6  ;;  %v7576_v52 = vld [vmem:[%s8210_s19 + $0x234] sm:$0xf0]  ;;  %v5443_v33 = vor.u32 %v7516_v54, %v5442_v46 }
 0x15f   : > { %4223 = vmatpush.bf16.msra.mxu3 %v5859_v57  ;;  %v5682_v47 = vld [vmem:[%s8210_s19 + $0x228] sm:$0xf]  ;;  %v5571_v3 = vor.u32 %v7548_v53, %v5570_v61  ;;  %v7608_v51 = vld [vmem:[%s8210_s19 + $0x334] sm:$0xf0] }
 0x160   : > { %4169 = vmatpush.bf16.msra.mxu0 %v5475_v25  ;;  %4754 = vst [vmem:[#allocation2 + $0x30] sm:$0xff] %v4742_v48  ;;  %v5810_v27 = vld [vmem:[%s8210_s19 + $0x328] sm:$0xf]  ;;  %v7512_v25 = vld [vmem:[%s8210_s19 + $0x34] sm:$0xf0]  ;;  %v5683_v34 = vor.u32 %v7576_v52, %v5682_v47 }
 0x161   : > { %4187 = vmatpush.bf16.msra.mxu1 %v5603_v1  ;;  %v3853_v55 = vpop.f32.mrf.mxu2  ;;  %v5426_v57 = vld [vmem:[%s8210_s19 + $0x28] sm:$0xf]  ;;  %v7544_v5 = vld [vmem:[%s8210_s19 + $0x134] sm:$0xf0]  ;;  %v5811_v62 = vor.u32 %v7608_v51, %v5810_v27 }
 0x162   : > { %4206 = vmatpush.bf16.msra.mxu2 %v5715_v21  ;;  %v3854_v13 = vadd.f32 %v3853_v55, %v3836_v22  ;;  %v3871_v29 = vpop.f32.mrf.mxu3  ;;  %v5554_v1 = vld [vmem:[%s8210_s19 + $0x128] sm:$0xf]  ;;  %v3820_v0 = vpop.f32.mrf.mxu0  ;;  %v7572_v56 = vld [vmem:[%s8210_s19 + $0x214] sm:$0xf0]  ;;  %v5427_v21 = vor.u32 %v7512_v25, %v5426_v57 }
 0x163   : > { %4224 = vmatpush.bf16.msra.mxu3 %v5843_v28  ;;  %v5666_v17 = vld [vmem:[%s8210_s19 + $0x208] sm:$0xf]  ;;  %v3821_v24 = vadd.f32 %v3820_v0, %v3803_v10  ;;  %v7604_v63 = vld [vmem:[%s8210_s19 + $0x314] sm:$0xf0]  ;;  %v5555_v8 = vor.u32 %v7544_v5, %v5554_v1  ;;  %4143 = vmatmul.bf16.gmra.mxu2 %v8650_v4 }
 0x164   : > { %4170 = vmatpush.bf16.msra.mxu0 %v5459_v39  ;;  %v3872_v31 = vadd.f32 %v3871_v29, %v3854_v13  ;;  %v5794_v20 = vld [vmem:[%s8210_s19 + $0x308] sm:$0xf]  ;;  %v7508_v6 = vld [vmem:[%s8210_s19 + $0x14] sm:$0xf0]  ;;  %4161 = vmatmul.bf16.gmra.mxu3 %v8657_v12  ;;  %v5667_v48 = vor.u32 %v7572_v56, %v5666_v17 }
 0x165   : > { %4188 = vmatpush.bf16.msra.mxu1 %v5587_v38  ;;  %v3838_v7 = vpop.f32.mrf.mxu1  ;;  %v5410_v32 = vld [vmem:[%s8210_s19 + $0x8] sm:$0xf]  ;;  %v7540_v28 = vld [vmem:[%s8210_s19 + $0x114] sm:$0xf0]  ;;  %4107 = vmatmul.bf16.gmra.mxu0 %v8648_v2  ;;  %v5795_v54 = vor.u32 %v7604_v63, %v5794_v20 }
 0x166   : > { %4207 = vmatpush.bf16.msra.mxu2 %v5699_v26  ;;  %v5538_v23 = vld [vmem:[%s8210_s19 + $0x108] sm:$0xf]  ;;  %v4746_v30 = vadd.f32 %v3872_v31, %v350_v16  ;;  %v7728_v39 = vld [vmem:[%s8210_s19 + $0x6f4] sm:$0xf0]  ;;  %4125 = vmatmul.bf16.gmra.mxu1 %v8655_v11  ;;  %v3839_v60 = vadd.f32 %v3838_v7, %v3821_v24  ;;  %v5411_v26 = vor.u32 %v7508_v6, %v5410_v32 }
 0x167   : > { %4225 = vmatpush.bf16.msra.mxu3 %v5827_v19  ;;  %v6290_v40 = vld [vmem:[%s8210_s19 + $0x6e8] sm:$0xf]  ;;  %v7760_v35 = vld [vmem:[%s8210_s19 + $0x7f4] sm:$0xf0]  ;;  %v5539_v19 = vor.u32 %v7540_v28, %v5538_v23 }
 0x168   : > { %4171 = vmatpush.bf16.msra.mxu0 %v5443_v33  ;;  %v6418_v38 = vld [vmem:[%s8210_s19 + $0x7e8] sm:$0xf]  ;;  %v7664_v46 = vld [vmem:[%s8210_s19 + $0x4f4] sm:$0xf0]  ;;  %4758 = vst [vmem:[#allocation2 + $0x50] sm:$0xff] %v4746_v30  ;;  %v6291_v33 = vor.u32 %v7728_v39, %v6290_v40 }
 0x169   : > { %4189 = vmatpush.bf16.msra.mxu1 %v5571_v3  ;;  %v6034_v43 = vld [vmem:[%s8210_s19 + $0x4e8] sm:$0xf]  ;;  %v7696_v53 = vld [vmem:[%s8210_s19 + $0x5f4] sm:$0xf0]  ;;  %v3856_v22 = vpop.f32.mrf.mxu2  ;;  %v6419_v3 = vor.u32 %v7760_v35, %v6418_v38 }
 0x16a   : > { %4208 = vmatpush.bf16.msra.mxu2 %v5683_v34  ;;  %v6162_v61 = vld [vmem:[%s8210_s19 + $0x5e8] sm:$0xf]  ;;  %v3857_v47 = vadd.f32 %v3856_v22, %v3839_v60  ;;  %v3874_v55 = vpop.f32.mrf.mxu3  ;;  %v7724_v51 = vld [vmem:[%s8210_s19 + $0x6d4] sm:$0xf0]  ;;  %v3822_v57 = vpop.f32.mrf.mxu0  ;;  %v6035_v10 = vor.u32 %v7664_v46, %v6034_v43 }
 0x16b   : > { %4226 = vmatpush.bf16.msra.mxu3 %v5811_v62  ;;  %v354_v52 = vld [vmem:[#allocation2 + $0x28] sm:$0x3]  ;;  %v6163_v13 = vor.u32 %v7696_v53, %v6162_v61  ;;  %v7756_v25 = vld [vmem:[%s8210_s19 + $0x7d4] sm:$0xf0] }
 0x16c   : > { %4172 = vmatpush.bf16.msra.mxu0 %v5427_v21  ;;  %v6274_v27 = vld [vmem:[%s8210_s19 + $0x6c8] sm:$0xf]  ;;  %v3875_v5 = vadd.f32 %v3874_v55, %v3857_v47  ;;  %v7660_v0 = vld [vmem:[%s8210_s19 + $0x4d4] sm:$0xf0] }
 0x16d   : > { %4190 = vmatpush.bf16.msra.mxu1 %v5555_v8  ;;  %v6402_v29 = vld [vmem:[%s8210_s19 + $0x7c8] sm:$0xf]  ;;  %v3840_v16 = vpop.f32.mrf.mxu1  ;;  %v7692_v17 = vld [vmem:[%s8210_s19 + $0x5d4] sm:$0xf0]  ;;  %v6275_v31 = vor.u32 %v7724_v51, %v6274_v27 }
 0x16e   : > { %v6018_v1 = vld [vmem:[%s8210_s19 + $0x4c8] sm:$0xf]  ;;  %4209 = vmatpush.bf16.msra.mxu2 %v5667_v48  ;;  %v4750_v56 = vadd.f32 %v3875_v5, %v354_v52  ;;  %v6403_v24 = vor.u32 %v7756_v25, %v6402_v29  ;;  %v7720_v63 = vld [vmem:[%s8210_s19 + $0x6b4] sm:$0xf0] }
 0x16f   : > { %4227 = vmatpush.bf16.msra.mxu3 %v5795_v54  ;;  %v6146_v34 = vld [vmem:[%s8210_s19 + $0x5c8] sm:$0xf]  ;;  %v6019_v7 = vor.u32 %v7660_v0, %v6018_v1  ;;  %v7752_v8 = vld [vmem:[%s8210_s19 + $0x7b4] sm:$0xf0] }
 0x170   : > { %4173 = vmatpush.bf16.msra.mxu0 %v5411_v26  ;;  %v6147_v62 = vor.u32 %v7692_v17, %v6146_v34  ;;  %4762 = vst [vmem:[#allocation2 + $0x28] sm:$0x3] %v4750_v56  ;;  %v6258_v20 = vld [vmem:[%s8210_s19 + $0x6a8] sm:$0xf]  ;;  %v7656_v28 = vld [vmem:[%s8210_s19 + $0x4b4] sm:$0xf0] }
 0x171   : > { %4191 = vmatpush.bf16.msra.mxu1 %v5539_v19  ;;  %v3858_v32 = vpop.f32.mrf.mxu2  ;;  %v6386_v21 = vld [vmem:[%s8210_s19 + $0x7a8] sm:$0xf]  ;;  %v7688_v40 = vld [vmem:[%s8210_s19 + $0x5b4] sm:$0xf0]  ;;  %v6259_v35 = vor.u32 %v7720_v63, %v6258_v20 }
 0x172   : > { %4274 = vmatpush.bf16.msrb.mxu2 %v6291_v33  ;;  %v6002_v6 = vld [vmem:[%s8210_s19 + $0x4a8] sm:$0xf]  ;;  %v3876_v23 = vpop.f32.mrf.mxu3  ;;  %v3887_v39 = vpop.f32.mrf.mxu0  ;;  %v6387_v43 = vor.u32 %v7752_v8, %v6386_v21  ;;  %v7716_v60 = vld [vmem:[%s8210_s19 + $0x694] sm:$0xf0] }
 0x173   : > { %4292 = vmatpush.bf16.msrb.mxu3 %v6419_v3  ;;  %v6130_v30 = vld [vmem:[%s8210_s19 + $0x5a8] sm:$0xf]  ;;  %v6003_v54 = vor.u32 %v7656_v28, %v6002_v6  ;;  %v7748_v22 = vld [vmem:[%s8210_s19 + $0x794] sm:$0xf0]  ;;  %4210 = vmatmul.bf16.vlgmr.msra.gmra.mxu2 %v8301_v15 }
 0x174   : > { %4238 = vmatpush.bf16.msrb.mxu0 %v6035_v10  ;;  %v6242_v46 = vld [vmem:[%s8210_s19 + $0x688] sm:$0xf]  ;;  %v6131_v61 = vor.u32 %v7688_v40, %v6130_v30  ;;  %v7652_v19 = vld [vmem:[%s8210_s19 + $0x494] sm:$0xf0]  ;;  %4228 = vmatmul.bf16.vlgmr.msra.gmra.mxu3 %v8305_v18 }
 0x175   : > { %4256 = vmatpush.bf16.msrb.mxu1 %v6163_v13  ;;  %v3905_v38 = vpop.f32.mrf.mxu1  ;;  %v6370_v53 = vld [vmem:[%s8210_s19 + $0x788] sm:$0xf]  ;;  %4174 = vmatmul.bf16.vlgmr.msra.gmra.mxu0 %v8294_v9  ;;  %v7684_v52 = vld [vmem:[%s8210_s19 + $0x594] sm:$0xf0]  ;;  %v6243_v55 = vor.u32 %v7716_v60, %v6242_v46 }
 0x176   : > { %4275 = vmatpush.bf16.msrb.mxu2 %v6275_v31  ;;  %v3906_v48 = vadd.f32 %v3905_v38, %v3887_v39  ;;  %v5986_v26 = vld [vmem:[%s8210_s19 + $0x488] sm:$0xf]  ;;  %4192 = vmatmul.bf16.vlgmr.msra.gmra.mxu1 %v8299_v14  ;;  %v6371_v33 = vor.u32 %v7748_v22, %v6370_v53  ;;  %v7712_v27 = vld [vmem:[%s8210_s19 + $0x674] sm:$0xf0] }
 0x177   : > { %4293 = vmatpush.bf16.msrb.mxu3 %v6403_v24  ;;  %v6114_v47 = vld [vmem:[%s8210_s19 + $0x588] sm:$0xf]  ;;  %v5987_v57 = vor.u32 %v7652_v19, %v5986_v26  ;;  %v7744_v29 = vld [vmem:[%s8210_s19 + $0x774] sm:$0xf0] }
 0x178   : > { %4239 = vmatpush.bf16.msrb.mxu0 %v6019_v7  ;;  %v6226_v3 = vld [vmem:[%s8210_s19 + $0x668] sm:$0xf]  ;;  %v6115_v10 = vor.u32 %v7684_v52, %v6114_v47  ;;  %v7648_v16 = vld [vmem:[%s8210_s19 + $0x474] sm:$0xf0] }
 0x179   : > { %4257 = vmatpush.bf16.msrb.mxu1 %v6147_v62  ;;  %v3923_v51 = vpop.f32.mrf.mxu2  ;;  %v6354_v13 = vld [vmem:[%s8210_s19 + $0x768] sm:$0xf]  ;;  %v7680_v34 = vld [vmem:[%s8210_s19 + $0x574] sm:$0xf0]  ;;  %v6227_v24 = vor.u32 %v7712_v27, %v6226_v3 }
 0x17a   : > { %4276 = vmatpush.bf16.msrb.mxu2 %v6259_v35  ;;  %v5970_v25 = vld [vmem:[%s8210_s19 + $0x468] sm:$0xf]  ;;  %v3924_v1 = vadd.f32 %v3923_v51, %v3906_v48  ;;  %v3941_v5 = vpop.f32.mrf.mxu3  ;;  %v3889_v17 = vpop.f32.mrf.mxu0  ;;  %v6355_v7 = vor.u32 %v7744_v29, %v6354_v13  ;;  %v7708_v20 = vld [vmem:[%s8210_s19 + $0x654] sm:$0xf0] }
 0x17b   : > { %4294 = vmatpush.bf16.msrb.mxu3 %v6387_v43  ;;  %v6098_v0 = vld [vmem:[%s8210_s19 + $0x568] sm:$0xf]  ;;  %v5971_v32 = vor.u32 %v7648_v16, %v5970_v25  ;;  %v7740_v6 = vld [vmem:[%s8210_s19 + $0x754] sm:$0xf0] }
 0x17c   : > { %4240 = vmatpush.bf16.msrb.mxu0 %v6003_v54  ;;  %v9084_v56 = vadd.f32 %v3941_v5, %v3924_v1  ;;  %v6210_v62 = vld [vmem:[%s8210_s19 + $0x648] sm:$0xf]  ;;  %v6099_v21 = vor.u32 %v7680_v34, %v6098_v0  ;;  %v7644_v28 = vld [vmem:[%s8210_s19 + $0x454] sm:$0xf0] }
 0x17d   : > { %4258 = vmatpush.bf16.msrb.mxu1 %v6131_v61  ;;  %v3907_v31 = vpop.f32.mrf.mxu1  ;;  %v6338_v8 = vld [vmem:[%s8210_s19 + $0x748] sm:$0xf]  ;;  %v7676_v40 = vld [vmem:[%s8210_s19 + $0x554] sm:$0xf0]  ;;  %v6211_v39 = vor.u32 %v7708_v20, %v6210_v62 }
 0x17e   : > { %4277 = vmatpush.bf16.msrb.mxu2 %v6243_v55  ;;  %v3908_v63 = vadd.f32 %v3907_v31, %v3889_v17  ;;  %v5954_v23 = vld [vmem:[%s8210_s19 + $0x448] sm:$0xf]  ;;  %v6339_v38 = vor.u32 %v7740_v6, %v6338_v8  ;;  %v7704_v43 = vld [vmem:[%s8210_s19 + $0x634] sm:$0xf0]  ;;  %v10148_v17 = vld [vmem:[#allocation5_spill] sm:$0xff] }
 0x17f   : > { %4295 = vmatpush.bf16.msrb.mxu3 %v6371_v33  ;;  %v6082_v30 = vld [vmem:[%s8210_s19 + $0x548] sm:$0xf]  ;;  %v5955_v60 = vor.u32 %v7644_v28, %v5954_v23  ;;  %v7736_v61 = vld [vmem:[%s8210_s19 + $0x734] sm:$0xf0]  ;;  %v10149_v31 = vld [vmem:[#allocation7_spill] sm:$0xff] }
 0x180   : > { %4241 = vmatpush.bf16.msrb.mxu0 %v5987_v57  ;;  %v6194_v35 = vld [vmem:[%s8210_s19 + $0x628] sm:$0xf]  ;;  %v6083_v48 = vor.u32 %v7676_v40, %v6082_v30  ;;  %v7640_v19 = vld [vmem:[%s8210_s19 + $0x434] sm:$0xf0] }
 0x181   : > { %4259 = vmatpush.bf16.msrb.mxu1 %v6115_v10  ;;  %v3925_v46 = vpop.f32.mrf.mxu2  ;;  %v6322_v54 = vld [vmem:[%s8210_s19 + $0x728] sm:$0xf]  ;;  %v7672_v52 = vld [vmem:[%s8210_s19 + $0x534] sm:$0xf0]  ;;  %v6195_v51 = vor.u32 %v7704_v43, %v6194_v35 }
 0x182   : > { %4278 = vmatpush.bf16.msrb.mxu2 %v6227_v24  ;;  %v5938_v53 = vld [vmem:[%s8210_s19 + $0x428] sm:$0xf]  ;;  %v3926_v22 = vadd.f32 %v3925_v46, %v3908_v63  ;;  %v3943_v26 = vpop.f32.mrf.mxu3  ;;  %v3892_v55 = vpop.f32.mrf.mxu0  ;;  %v6323_v57 = vor.u32 %v7736_v61, %v6322_v54  ;;  %v7700_v10 = vld [vmem:[%s8210_s19 + $0x614] sm:$0xf0] }
 0x183   : > { %4296 = vmatpush.bf16.msrb.mxu3 %v6355_v7  ;;  %v6066_v47 = vld [vmem:[%s8210_s19 + $0x528] sm:$0xf]  ;;  %v7732_v29 = vld [vmem:[%s8210_s19 + $0x714] sm:$0xf0]  ;;  %v5939_v1 = vor.u32 %v7640_v19, %v5938_v53  ;;  %4215 = vmatmul.bf16.gmra.mxu2 %v10149_v31 }
 0x184   : > { %4242 = vmatpush.bf16.msrb.mxu0 %v5971_v32  ;;  %v6178_v33 = vld [vmem:[%s8210_s19 + $0x608] sm:$0xf]  ;;  %v9103_v3 = vadd.f32 %v3943_v26, %v3926_v22  ;;  %v6067_v5 = vor.u32 %v7672_v52, %v6066_v47  ;;  %v7636_v0 = vld [vmem:[%s8210_s19 + $0x414] sm:$0xf0] }
 0x185   : > { %4260 = vmatpush.bf16.msrb.mxu1 %v6099_v21  ;;  %v3910_v27 = vpop.f32.mrf.mxu1  ;;  %v6306_v13 = vld [vmem:[%s8210_s19 + $0x708] sm:$0xf]  ;;  %4179 = vmatmul.bf16.gmra.mxu0 %v10148_v17  ;;  %v7668_v24 = vld [vmem:[%s8210_s19 + $0x514] sm:$0xf0]  ;;  %v6179_v6 = vor.u32 %v7700_v10, %v6178_v33 }
 0x186   : > { %4279 = vmatpush.bf16.msrb.mxu2 %v6211_v39  ;;  %v3911_v25 = vadd.f32 %v3910_v27, %v3892_v55  ;;  %v5922_v16 = vld [vmem:[%s8210_s19 + $0x408] sm:$0xf]  ;;  %v7856_v62 = vld [vmem:[%s8210_s19 + $0xaf4] sm:$0xf0]  ;;  %v6307_v23 = vor.u32 %v7732_v29, %v6306_v13 }
 0x187   : > { %4297 = vmatpush.bf16.msrb.mxu3 %v6339_v38  ;;  %v6050_v34 = vld [vmem:[%s8210_s19 + $0x508] sm:$0xf]  ;;  %v10151_v63 = vld [vmem:[#allocation8_spill] sm:$0xff]  ;;  %v5923_v38 = vor.u32 %v7636_v0, %v5922_v16 }
 0x188   : > { %4243 = vmatpush.bf16.msrb.mxu0 %v5955_v60  ;;  %v6802_v7 = vld [vmem:[%s8210_s19 + $0xae8] sm:$0xf]  ;;  %4233 = vmatmul.bf16.gmra.mxu3 %v10151_v63  ;;  %v7888_v21 = vld [vmem:[%s8210_s19 + $0xbf4] sm:$0xf0]  ;;  %v6051_v35 = vor.u32 %v7668_v24, %v6050_v34 }
 0x189   : > { %4261 = vmatpush.bf16.msrb.mxu1 %v6083_v48  ;;  %v10150_v20 = vld [vmem:[#allocation6_spill] sm:$0xff]  ;;  %v7792_v28 = vld [vmem:[%s8210_s19 + $0x8f4] sm:$0xf0]  ;;  %v3928_v39 = vpop.f32.mrf.mxu2  ;;  %v6803_v60 = vor.u32 %v7856_v62, %v6802_v7 }
 0x18a   : > { %4197 = vmatmul.bf16.gmra.mxu1 %v10150_v20  ;;  %v6930_v32 = vld [vmem:[%s8210_s19 + $0xbe8] sm:$0xf]  ;;  %4280 = vmatpush.bf16.msrb.mxu2 %v6195_v51  ;;  %v7824_v40 = vld [vmem:[%s8210_s19 + $0x9f4] sm:$0xf0]  ;;  %v3929_v43 = vadd.f32 %v3928_v39, %v3911_v25  ;;  %v3946_v46 = vpop.f32.mrf.mxu3  ;;  %v3894_v53 = vpop.f32.mrf.mxu0 }
 0x18b   : > { %v6546_v8 = vld [vmem:[%s8210_s19 + $0x8e8] sm:$0xf]  ;;  %4298 = vmatpush.bf16.msrb.mxu3 %v6323_v57  ;;  %v6931_v48 = vor.u32 %v7888_v21, %v6930_v32  ;;  %v7852_v61 = vld [vmem:[%s8210_s19 + $0xad4] sm:$0xf0] }
 0x18c   : > { %v6674_v30 = vld [vmem:[%s8210_s19 + $0x9e8] sm:$0xf]  ;;  %4244 = vmatpush.bf16.msrb.mxu0 %v5939_v1  ;;  %v6547_v22 = vor.u32 %v7792_v28, %v6546_v8  ;;  %v7884_v47 = vld [vmem:[%s8210_s19 + $0xbd4] sm:$0xf0]  ;;  %v9129_v55 = vadd.f32 %v3946_v46, %v3929_v43 }
 0x18d   : > { %4262 = vmatpush.bf16.msrb.mxu1 %v6067_v5  ;;  %v6786_v54 = vld [vmem:[%s8210_s19 + $0xac8] sm:$0xf]  ;;  %v6675_v26 = vor.u32 %v7824_v40, %v6674_v30  ;;  %v3912_v33 = vpop.f32.mrf.mxu1  ;;  %v7788_v27 = vld [vmem:[%s8210_s19 + $0x8d4] sm:$0xf0] }
 0x18e   : > { %v6914_v19 = vld [vmem:[%s8210_s19 + $0xbc8] sm:$0xf]  ;;  %4281 = vmatpush.bf16.msrb.mxu2 %v6179_v6  ;;  %v7820_v57 = vld [vmem:[%s8210_s19 + $0x9d4] sm:$0xf0]  ;;  %v6787_v10 = vor.u32 %v7852_v61, %v6786_v54 }
 0x18f   : > { %v6530_v52 = vld [vmem:[%s8210_s19 + $0x8c8] sm:$0xf]  ;;  %4299 = vmatpush.bf16.msrb.mxu3 %v6307_v23  ;;  %v6915_v13 = vor.u32 %v7884_v47, %v6914_v19  ;;  %v7848_v5 = vld [vmem:[%s8210_s19 + $0xab4] sm:$0xf0] }
 0x190   : > { %v6658_v51 = vld [vmem:[%s8210_s19 + $0x9c8] sm:$0xf]  ;;  %4245 = vmatpush.bf16.msrb.mxu0 %v5923_v38  ;;  %v6531_v29 = vor.u32 %v7788_v27, %v6530_v52  ;;  %v7880_v34 = vld [vmem:[%s8210_s19 + $0xbb4] sm:$0xf0] }
 0x191   : > { %4263 = vmatpush.bf16.msrb.mxu1 %v6051_v35  ;;  %v6659_v25 = vor.u32 %v7820_v57, %v6658_v51  ;;  %v6770_v1 = vld [vmem:[%s8210_s19 + $0xaa8] sm:$0xf]  ;;  %v3930_v16 = vpop.f32.mrf.mxu2  ;;  %v7784_v62 = vld [vmem:[%s8210_s19 + $0x8b4] sm:$0xf0] }
 0x192   : > { %4346 = vmatpush.bf16.msra.mxu2 %v6803_v60  ;;  %v6898_v0 = vld [vmem:[%s8210_s19 + $0xba8] sm:$0xf]  ;;  %v3948_v7 = vpop.f32.mrf.mxu3  ;;  %v7816_v21 = vld [vmem:[%s8210_s19 + $0x9b4] sm:$0xf0]  ;;  %v9142_v8 = vpop.f32.mrf.mxu0  ;;  %v6771_v23 = vor.u32 %v7848_v5, %v6770_v1  ;;  %v10152_v60 = vld [vmem:[#allocation9_spill] sm:$0xff] }
 0x193   : > { %4364 = vmatpush.bf16.msra.mxu3 %v6931_v48  ;;  %v6514_v24 = vld [vmem:[%s8210_s19 + $0x8a8] sm:$0xf]  ;;  %v6899_v28 = vor.u32 %v7880_v34, %v6898_v0  ;;  %v7844_v40 = vld [vmem:[%s8210_s19 + $0xa94] sm:$0xf0] }
 0x194   : > { %4310 = vmatpush.bf16.msra.mxu0 %v6547_v22  ;;  %v6642_v32 = vld [vmem:[%s8210_s19 + $0x9a8] sm:$0xf]  ;;  %v6515_v39 = vor.u32 %v7784_v62, %v6514_v24  ;;  %v7876_v43 = vld [vmem:[%s8210_s19 + $0xb94] sm:$0xf0]  ;;  %v10154_v22 = vld [vmem:[#allocation11_spill] sm:$0xff] }
 0x195   : > { %4328 = vmatpush.bf16.msra.mxu1 %v6675_v26  ;;  %v9144_v6 = vpop.f32.mrf.mxu1  ;;  %v6754_v30 = vld [vmem:[%s8210_s19 + $0xa88] sm:$0xf]  ;;  %v6643_v38 = vor.u32 %v7816_v21, %v6642_v32  ;;  %4246 = vmatmul.bf16.vlgmr.msrb.gmra.mxu0 %v10152_v60  ;;  %v7780_v54 = vld [vmem:[%s8210_s19 + $0x894] sm:$0xf0] }
 0x196   : > { %4347 = vmatpush.bf16.msra.mxu2 %v6787_v10  ;;  %v6882_v35 = vld [vmem:[%s8210_s19 + $0xb88] sm:$0xf]  ;;  %v7812_v53 = vld [vmem:[%s8210_s19 + $0x994] sm:$0xf0]  ;;  %v6755_v19 = vor.u32 %v7844_v40, %v6754_v30 }
 0x197   : > { %4365 = vmatpush.bf16.msra.mxu3 %v6915_v13  ;;  %v6498_v46 = vld [vmem:[%s8210_s19 + $0x888] sm:$0xf]  ;;  %v10155_v26 = vld [vmem:[#allocation12_spill] sm:$0xff]  ;;  %v6883_v47 = vor.u32 %v7876_v43, %v6882_v35 }
 0x198   : > { %4311 = vmatpush.bf16.msra.mxu0 %v6531_v29  ;;  %v10153_v48 = vld [vmem:[#allocation10_spill] sm:$0xff]  ;;  %4300 = vmatmul.bf16.vlgmr.msrb.gmra.mxu3 %v10155_v26  ;;  %v7840_v33 = vld [vmem:[%s8210_s19 + $0xa74] sm:$0xf0]  ;;  %v6499_v51 = vor.u32 %v7780_v54, %v6498_v46 }
 0x199   : > { %4329 = vmatpush.bf16.msra.mxu1 %v6659_v25  ;;  %4282 = vmatmul.bf16.vlgmr.msrb.gmra.mxu2 %v10153_v48  ;;  %v6626_v61 = vld [vmem:[%s8210_s19 + $0x988] sm:$0xf]  ;;  %v9160_v27 = vpop.f32.mrf.mxu2  ;;  %v7872_v13 = vld [vmem:[%s8210_s19 + $0xb74] sm:$0xf0] }
 0x19a   : > { %4264 = vmatmul.bf16.vlgmr.msrb.gmra.mxu1 %v10154_v22  ;;  %4348 = vmatpush.bf16.msra.mxu2 %v6771_v23  ;;  %v6738_v52 = vld [vmem:[%s8210_s19 + $0xa68] sm:$0xf]  ;;  %v6627_v57 = vor.u32 %v7812_v53, %v6626_v61  ;;  %v9165_v25 = vpop.f32.mrf.mxu3  ;;  %v7776_v1 = vld [vmem:[%s8210_s19 + $0x874] sm:$0xf0]  ;;  %v9170_v0 = vpop.f32.mrf.mxu0 }
 0x19b   : > { %4366 = vmatpush.bf16.msra.mxu3 %v6899_v28  ;;  %v6866_v10 = vld [vmem:[%s8210_s19 + $0xb68] sm:$0xf]  ;;  %v7808_v16 = vld [vmem:[%s8210_s19 + $0x974] sm:$0xf0]  ;;  %v6739_v24 = vor.u32 %v7840_v33, %v6738_v52 }
 0x19c   : > { %4312 = vmatpush.bf16.msra.mxu0 %v6515_v39  ;;  %v6482_v29 = vld [vmem:[%s8210_s19 + $0x868] sm:$0xf]  ;;  %v6867_v7 = vor.u32 %v7872_v13, %v6866_v10  ;;  %v7836_v32 = vld [vmem:[%s8210_s19 + $0xa54] sm:$0xf0] }
 0x19d   : > { %4330 = vmatpush.bf16.msra.mxu1 %v6643_v38  ;;  %v6610_v5 = vld [vmem:[%s8210_s19 + $0x968] sm:$0xf]  ;;  %v9172_v34 = vpop.f32.mrf.mxu1  ;;  %v6483_v21 = vor.u32 %v7776_v1, %v6482_v29  ;;  %v7868_v30 = vld [vmem:[%s8210_s19 + $0xb54] sm:$0xf0] }
 0x19e   : > { %4349 = vmatpush.bf16.msra.mxu2 %v6755_v19  ;;  %v6722_v62 = vld [vmem:[%s8210_s19 + $0xa48] sm:$0xf]  ;;  %v6611_v23 = vor.u32 %v7808_v16, %v6610_v5  ;;  %v7772_v39 = vld [vmem:[%s8210_s19 + $0x854] sm:$0xf0] }
 0x19f   : > { %4367 = vmatpush.bf16.msra.mxu3 %v6883_v47  ;;  %v6850_v28 = vld [vmem:[%s8210_s19 + $0xb48] sm:$0xf]  ;;  %v7804_v35 = vld [vmem:[%s8210_s19 + $0x954] sm:$0xf0]  ;;  %v6723_v43 = vor.u32 %v7836_v32, %v6722_v62 }
 0x1a0   : > { %4313 = vmatpush.bf16.msra.mxu0 %v6499_v51  ;;  %v6466_v40 = vld [vmem:[%s8210_s19 + $0x848] sm:$0xf]  ;;  %v6851_v46 = vor.u32 %v7868_v30, %v6850_v28  ;;  %v7832_v61 = vld [vmem:[%s8210_s19 + $0xa34] sm:$0xf0] }
 0x1a1   : > { %4331 = vmatpush.bf16.msra.mxu1 %v6627_v57  ;;  %v6594_v38 = vld [vmem:[%s8210_s19 + $0x948] sm:$0xf]  ;;  %v9184_v53 = vpop.f32.mrf.mxu2  ;;  %v6467_v19 = vor.u32 %v7772_v39, %v6466_v40  ;;  %v7864_v33 = vld [vmem:[%s8210_s19 + $0xb34] sm:$0xf0] }
 0x1a2   : > { %4350 = vmatpush.bf16.msra.mxu2 %v6739_v24  ;;  %v6706_v54 = vld [vmem:[%s8210_s19 + $0xa28] sm:$0xf]  ;;  %v6595_v47 = vor.u32 %v7804_v35, %v6594_v38  ;;  %v9189_v57 = vpop.f32.mrf.mxu3  ;;  %v7768_v10 = vld [vmem:[%s8210_s19 + $0x834] sm:$0xf0]  ;;  %v9194_v1 = vpop.f32.mrf.mxu0  ;;  %v10156_v38 = vld [vmem:[#allocation13_spill] sm:$0xff] }
 0x1a3   : > { %4368 = vmatpush.bf16.msra.mxu3 %v6867_v7  ;;  %v6834_v52 = vld [vmem:[%s8210_s19 + $0xb28] sm:$0xf]  ;;  %v7800_v29 = vld [vmem:[%s8210_s19 + $0x934] sm:$0xf0]  ;;  %v6707_v24 = vor.u32 %v7832_v61, %v6706_v54  ;;  %v10158_v61 = vld [vmem:[#allocation15_spill] sm:$0xff] }
 0x1a4   : > { %4314 = vmatpush.bf16.msra.mxu0 %v6483_v21  ;;  %v6450_v51 = vld [vmem:[%s8210_s19 + $0x828] sm:$0xf]  ;;  %v6835_v7 = vor.u32 %v7864_v33, %v6834_v52  ;;  %v7828_v62 = vld [vmem:[%s8210_s19 + $0xa14] sm:$0xf0] }
 0x1a5   : > { %4332 = vmatpush.bf16.msra.mxu1 %v6611_v23  ;;  %v6578_v13 = vld [vmem:[%s8210_s19 + $0x928] sm:$0xf]  ;;  %v9197_v16 = vpop.f32.mrf.mxu1  ;;  %v7860_v21 = vld [vmem:[%s8210_s19 + $0xb14] sm:$0xf0]  ;;  %v6451_v23 = vor.u32 %v7768_v10, %v6450_v51  ;;  %4251 = vmatmul.bf16.gmra.mxu0 %v10156_v38 }
 0x1a6   : > { %v6690_v5 = vld [vmem:[%s8210_s19 + $0xa08] sm:$0xf]  ;;  %4351 = vmatpush.bf16.msra.mxu2 %v6723_v43  ;;  %v6579_v28 = vor.u32 %v7800_v29, %v6578_v13  ;;  %v7764_v40 = vld [vmem:[%s8210_s19 + $0x814] sm:$0xf0] }
 0x1a7   : > { %4369 = vmatpush.bf16.msra.mxu3 %v6851_v46  ;;  %v6818_v32 = vld [vmem:[%s8210_s19 + $0xb08] sm:$0xf]  ;;  %v7796_v43 = vld [vmem:[%s8210_s19 + $0x914] sm:$0xf0]  ;;  %v6691_v51 = vor.u32 %v7828_v62, %v6690_v5 }
 0x1a8   : > { %4315 = vmatpush.bf16.msra.mxu0 %v6467_v19  ;;  %v6434_v30 = vld [vmem:[%s8210_s19 + $0x808] sm:$0xf]  ;;  %v7984_v54 = vld [vmem:[%s8210_s19 + $0xef4] sm:$0xf0]  ;;  %v6819_v10 = vor.u32 %v7860_v21, %v6818_v32 }
 0x1a9   : > { %4333 = vmatpush.bf16.msra.mxu1 %v6595_v47  ;;  %v6562_v39 = vld [vmem:[%s8210_s19 + $0x908] sm:$0xf]  ;;  %v10159_v19 = vld [vmem:[#allocation16_spill] sm:$0xff]  ;;  %v9218_v38 = vpop.f32.mrf.mxu2 }
 0x1aa   : > { %v10157_v35 = vld [vmem:[#allocation14_spill] sm:$0xff]  ;;  %4269 = vmatmul.bf16.gmra.mxu1 %v10158_v61  ;;  %4305 = vmatmul.bf16.gmra.mxu3 %v10159_v19  ;;  %v8016_v52 = vld [vmem:[%s8210_s19 + $0xff4] sm:$0xf0]  ;;  %v6435_v19 = vor.u32 %v7764_v40, %v6434_v30  ;;  %v6563_v61 = vor.u32 %v7796_v43, %v6562_v39  ;;  %v9220_v26 = vpop.f32.mrf.mxu3  ;;  %v3966_v32 = vpop.f32.mrf.mxu0 }
 0x1ab   : > { %4287 = vmatmul.bf16.gmra.mxu2 %v10157_v35  ;;  %v7314_v46 = vld [vmem:[%s8210_s19 + $0xee8] sm:$0xf]  ;;  %4370 = vmatpush.bf16.msra.mxu3 %v6835_v7  ;;  %v7920_v13 = vld [vmem:[%s8210_s19 + $0xcf4] sm:$0xf0] }
 0x1ac   : > { %v7442_v47 = vld [vmem:[%s8210_s19 + $0xfe8] sm:$0xf]  ;;  %4352 = vmatpush.bf16.msra.mxu2 %v6707_v24  ;;  %v7952_v35 = vld [vmem:[%s8210_s19 + $0xdf4] sm:$0xf0]  ;;  %4316 = vmatpush.bf16.msra.mxu0 %v6451_v23  ;;  %v7315_v24 = vor.u32 %v7984_v54, %v7314_v46 }
 0x1ad   : > { %v7058_v33 = vld [vmem:[%s8210_s19 + $0xce8] sm:$0xf]  ;;  %4334 = vmatpush.bf16.msra.mxu1 %v6579_v28  ;;  %v7443_v5 = vor.u32 %v8016_v52, %v7442_v47  ;;  %v7980_v62 = vld [vmem:[%s8210_s19 + $0xed4] sm:$0xf0]  ;;  %v3984_v20 = vpop.f32.mrf.mxu1 }
 0x1ae   : > { %v7186_v29 = vld [vmem:[%s8210_s19 + $0xde8] sm:$0xf]  ;;  %v7059_v21 = vor.u32 %v7920_v13, %v7058_v33  ;;  %v8012_v60 = vld [vmem:[%s8210_s19 + $0xfd4] sm:$0xf0] }
 0x1af   : > { %v7298_v7 = vld [vmem:[%s8210_s19 + $0xec8] sm:$0xf]  ;;  %v7187_v22 = vor.u32 %v7952_v35, %v7186_v29  ;;  %4371 = vmatpush.bf16.msra.mxu3 %v6819_v10  ;;  %v7916_v23 = vld [vmem:[%s8210_s19 + $0xcd4] sm:$0xf0] }
 0x1b0   : > { %v7426_v48 = vld [vmem:[%s8210_s19 + $0xfc8] sm:$0xf]  ;;  %4353 = vmatpush.bf16.msra.mxu2 %v6691_v51  ;;  %v7948_v30 = vld [vmem:[%s8210_s19 + $0xdd4] sm:$0xf0]  ;;  %4317 = vmatpush.bf16.msra.mxu0 %v6435_v19  ;;  %v7299_v40 = vor.u32 %v7980_v62, %v7298_v7 }
 0x1b1   : > { %v7042_v63 = vld [vmem:[%s8210_s19 + $0xcc8] sm:$0xf]  ;;  %4335 = vmatpush.bf16.msra.mxu1 %v6563_v61  ;;  %v7427_v39 = vor.u32 %v8012_v60, %v7426_v48  ;;  %v7976_v46 = vld [vmem:[%s8210_s19 + $0xeb4] sm:$0xf0]  ;;  %v4002_v54 = vpop.f32.mrf.mxu2 }
 0x1b2   : > { %v7170_v28 = vld [vmem:[%s8210_s19 + $0xdc8] sm:$0xf]  ;;  %v7043_v20 = vor.u32 %v7916_v23, %v7042_v63  ;;  %v8008_v52 = vld [vmem:[%s8210_s19 + $0xfb4] sm:$0xf0]  ;;  %v4020_v61 = vpop.f32.mrf.mxu3  ;;  %v9238_v63 = vpop.f32.mrf.mxu0 }
 0x1b3   : > { %4436 = vmatpush.bf16.msrb.mxu3 %v7443_v5  ;;  %v7171_v35 = vor.u32 %v7948_v30, %v7170_v28  ;;  %v7282_v43 = vld [vmem:[%s8210_s19 + $0xea8] sm:$0xf]  ;;  %v7912_v60 = vld [vmem:[%s8210_s19 + $0xcb4] sm:$0xf0] }
 0x1b4   : > { %4418 = vmatpush.bf16.msrb.mxu2 %v7315_v24  ;;  %4382 = vmatpush.bf16.msrb.mxu0 %v7059_v21  ;;  %v7410_v47 = vld [vmem:[%s8210_s19 + $0xfa8] sm:$0xf]  ;;  %v7944_v33 = vld [vmem:[%s8210_s19 + $0xdb4] sm:$0xf0]  ;;  %v7283_v51 = vor.u32 %v7976_v46, %v7282_v43 }
 0x1b5   : > { %4400 = vmatpush.bf16.msrb.mxu1 %v7187_v22  ;;  %v7026_v19 = vld [vmem:[%s8210_s19 + $0xca8] sm:$0xf]  ;;  %v9240_v22 = vpop.f32.mrf.mxu1  ;;  %v7411_v10 = vor.u32 %v8008_v52, %v7410_v47  ;;  %v7972_v29 = vld [vmem:[%s8210_s19 + $0xe94] sm:$0xf0]  ;;  %4318 = vmatmul.bf16.vlgmr.msra.gmra.mxu0 %v8500_v44 }
 0x1b6   : > { %v7154_v48 = vld [vmem:[%s8210_s19 + $0xda8] sm:$0xf]  ;;  %v7027_v24 = vor.u32 %v7912_v60, %v7026_v19  ;;  %v8004_v62 = vld [vmem:[%s8210_s19 + $0xf94] sm:$0xf0] }
 0x1b7   : > { %4437 = vmatpush.bf16.msrb.mxu3 %v7427_v39  ;;  %v7266_v13 = vld [vmem:[%s8210_s19 + $0xe88] sm:$0xf]  ;;  %v7155_v5 = vor.u32 %v7944_v33, %v7154_v48  ;;  %v7908_v21 = vld [vmem:[%s8210_s19 + $0xc94] sm:$0xf0] }
 0x1b8   : > { %4419 = vmatpush.bf16.msrb.mxu2 %v7299_v40  ;;  %4383 = vmatpush.bf16.msrb.mxu0 %v7043_v20  ;;  %v7394_v7 = vld [vmem:[%s8210_s19 + $0xf88] sm:$0xf]  ;;  %v7940_v28 = vld [vmem:[%s8210_s19 + $0xd94] sm:$0xf0]  ;;  %v7267_v30 = vor.u32 %v7972_v29, %v7266_v13 }
 0x1b9   : > { %4401 = vmatpush.bf16.msrb.mxu1 %v7171_v35  ;;  %v7010_v32 = vld [vmem:[%s8210_s19 + $0xc88] sm:$0xf]  ;;  %v7395_v40 = vor.u32 %v8004_v62, %v7394_v7  ;;  %v7968_v20 = vld [vmem:[%s8210_s19 + $0xe74] sm:$0xf0]  ;;  %v9256_v35 = vpop.f32.mrf.mxu2 }
 0x1ba   : > { %v7138_v23 = vld [vmem:[%s8210_s19 + $0xd88] sm:$0xf]  ;;  %4336 = vmatmul.bf16.vlgmr.msra.gmra.mxu1 %v8507_v49  ;;  %4372 = vmatmul.bf16.vlgmr.msra.gmra.mxu3 %v8509_v50  ;;  %v7011_v43 = vor.u32 %v7908_v21, %v7010_v32  ;;  %v8000_v47 = vld [vmem:[%s8210_s19 + $0xf74] sm:$0xf0]  ;;  %v9261_v19 = vpop.f32.mrf.mxu3  ;;  %v9266_v33 = vpop.f32.mrf.mxu0 }
 0x1bb   : > { %4354 = vmatmul.bf16.vlgmr.msra.gmra.mxu2 %v8502_v45  ;;  %4438 = vmatpush.bf16.msrb.mxu3 %v7411_v10  ;;  %v7250_v39 = vld [vmem:[%s8210_s19 + $0xe68] sm:$0xf]  ;;  %v7139_v46 = vor.u32 %v7940_v28, %v7138_v23  ;;  %v7904_v61 = vld [vmem:[%s8210_s19 + $0xc74] sm:$0xf0] }
 0x1bc   : > { %4420 = vmatpush.bf16.msrb.mxu2 %v7283_v51  ;;  %4384 = vmatpush.bf16.msrb.mxu0 %v7027_v24  ;;  %v7378_v54 = vld [vmem:[%s8210_s19 + $0xf68] sm:$0xf]  ;;  %v7936_v48 = vld [vmem:[%s8210_s19 + $0xd74] sm:$0xf0]  ;;  %v3960_v51 = vadd.f32 %v9142_v8, %v9084_v56  ;;  %v7251_v13 = vor.u32 %v7968_v20, %v7250_v39 }
 0x1bd   : > { %4402 = vmatpush.bf16.msrb.mxu1 %v7155_v5  ;;  %v6994_v52 = vld [vmem:[%s8210_s19 + $0xc68] sm:$0xf]  ;;  %v9270_v10 = vpop.f32.mrf.mxu1  ;;  %v7379_v29 = vor.u32 %v8000_v47, %v7378_v54  ;;  %v7964_v5 = vld [vmem:[%s8210_s19 + $0xe54] sm:$0xf0] }
 0x1be   : > { %v7122_v60 = vld [vmem:[%s8210_s19 + $0xd68] sm:$0xf]  ;;  %v6995_v7 = vor.u32 %v7904_v61, %v6994_v52  ;;  %v7996_v21 = vld [vmem:[%s8210_s19 + $0xf54] sm:$0xf0] }
 0x1bf   : > { %4439 = vmatpush.bf16.msrb.mxu3 %v7395_v40  ;;  %v7234_v24 = vld [vmem:[%s8210_s19 + $0xe48] sm:$0xf]  ;;  %v7123_v62 = vor.u32 %v7936_v48, %v7122_v60  ;;  %v7900_v56 = vld [vmem:[%s8210_s19 + $0xc54] sm:$0xf0] }
 0x1c0   : > { %4421 = vmatpush.bf16.msrb.mxu2 %v7267_v30  ;;  %4385 = vmatpush.bf16.msrb.mxu0 %v7011_v43  ;;  %v7362_v32 = vld [vmem:[%s8210_s19 + $0xf48] sm:$0xf]  ;;  %v7932_v28 = vld [vmem:[%s8210_s19 + $0xd54] sm:$0xf0]  ;;  %v3978_v30 = vadd.f32 %v9144_v6, %v3960_v51  ;;  %v7235_v40 = vor.u32 %v7964_v5, %v7234_v24  ;;  %v3962_v24 = vadd.f32 %v9170_v0, %v9103_v3 }
 0x1c1   : > { %4403 = vmatpush.bf16.msrb.mxu1 %v7139_v46  ;;  %v6978_v23 = vld [vmem:[%s8210_s19 + $0xc48] sm:$0xf]  ;;  %v7363_v39 = vor.u32 %v7996_v21, %v7362_v32  ;;  %v7960_v43 = vld [vmem:[%s8210_s19 + $0xe34] sm:$0xf0]  ;;  %v9283_v46 = vpop.f32.mrf.mxu2 }
 0x1c2   : > { %v7106_v8 = vld [vmem:[%s8210_s19 + $0xd48] sm:$0xf]  ;;  %v6979_v54 = vor.u32 %v7900_v56, %v6978_v23  ;;  %v7992_v61 = vld [vmem:[%s8210_s19 + $0xf34] sm:$0xf0]  ;;  %v3996_v60 = vadd.f32 %v9160_v27, %v3978_v30  ;;  %v9289_v48 = vpop.f32.mrf.mxu3  ;;  %v9296_v5 = vpop.f32.mrf.mxu0 }
 0x1c3   : > { %4440 = vmatpush.bf16.msrb.mxu3 %v7379_v29  ;;  %v7218_v20 = vld [vmem:[%s8210_s19 + $0xe28] sm:$0xf]  ;;  %v7107_v47 = vor.u32 %v7932_v28, %v7106_v8  ;;  %v7896_v51 = vld [vmem:[%s8210_s19 + $0xc34] sm:$0xf0] }
 0x1c4   : > { %4422 = vmatpush.bf16.msrb.mxu2 %v7251_v13  ;;  %4386 = vmatpush.bf16.msrb.mxu0 %v6995_v7  ;;  %v7346_v52 = vld [vmem:[%s8210_s19 + $0xf28] sm:$0xf]  ;;  %v7928_v29 = vld [vmem:[%s8210_s19 + $0xd34] sm:$0xf0]  ;;  %v7219_v27 = vor.u32 %v7960_v43, %v7218_v20  ;;  %v7598_v20 = vld [vmem:[%s8210_s19 + $0x2ec] sm:$0xf] }
 0x1c5   : > { %4404 = vmatpush.bf16.msrb.mxu1 %v7123_v62  ;;  %v6962_v6 = vld [vmem:[%s8210_s19 + $0xc28] sm:$0xf]  ;;  %v9299_v62 = vpop.f32.mrf.mxu1  ;;  %v7347_v32 = vor.u32 %v7992_v61, %v7346_v52  ;;  %v7956_v21 = vld [vmem:[%s8210_s19 + $0xe14] sm:$0xf0]  ;;  %4323 = vmatmul.bf16.gmra.mxu0 %v8546_v58  ;;  %v5780_v43 = vld [vmem:[%s8210_s19 + $0x2f8] sm:$0xf0] }
 0x1c6   : > { %v7090_v13 = vld [vmem:[%s8210_s19 + $0xd28] sm:$0xf]  ;;  %v7988_v56 = vld [vmem:[%s8210_s19 + $0xf14] sm:$0xf0]  ;;  %v6963_v3 = vor.u32 %v7896_v51, %v6962_v6  ;;  %v7630_v61 = vld [vmem:[%s8210_s19 + $0x3ec] sm:$0xf] }
 0x1c7   : > { %v7202_v7 = vld [vmem:[%s8210_s19 + $0xe08] sm:$0xf]  ;;  %4441 = vmatpush.bf16.msrb.mxu3 %v7363_v39  ;;  %v7091_v0 = vor.u32 %v7928_v29, %v7090_v13  ;;  %v7892_v28 = vld [vmem:[%s8210_s19 + $0xc14] sm:$0xf0]  ;;  %v5908_v6 = vld [vmem:[%s8210_s19 + $0x3f8] sm:$0xf0] }
 0x1c8   : > { %4423 = vmatpush.bf16.msrb.mxu2 %v7235_v40  ;;  %v7330_v23 = vld [vmem:[%s8210_s19 + $0xf08] sm:$0xf]  ;;  %4387 = vmatpush.bf16.msrb.mxu0 %v6979_v54  ;;  %v4014_v40 = vadd.f32 %v9165_v25, %v3996_v60  ;;  %v7924_v39 = vld [vmem:[%s8210_s19 + $0xd14] sm:$0xf0]  ;;  %v3980_v54 = vadd.f32 %v9172_v34, %v3962_v24  ;;  %v7534_v51 = vld [vmem:[%s8210_s19 + $0xec] sm:$0xf]  ;;  %v7203_v60 = vor.u32 %v7956_v21, %v7202_v7 }
 0x1c9   : > { %4405 = vmatpush.bf16.msrb.mxu1 %v7107_v47  ;;  %v6946_v8 = vld [vmem:[%s8210_s19 + $0xc08] sm:$0xf]  ;;  %v10160_v47 = vld [vmem:[#allocation19_spill] sm:$0xff]  ;;  %v10161_v52 = vld [vmem:[#allocation20_spill] sm:$0xff]  ;;  %v7331_v13 = vor.u32 %v7988_v56, %v7330_v23  ;;  %v9324_v24 = vpop.f32.mrf.mxu2  ;;  %v5911_v7 = vor.u32 %v7630_v61, %v5908_v6 }
 0x1ca   : > { %v7074_v30 = vld [vmem:[%s8210_s19 + $0xd08] sm:$0xf]  ;;  %4341 = vmatmul.bf16.gmra.mxu1 %v10160_v47  ;;  %4377 = vmatmul.bf16.gmra.mxu3 %v10161_v52  ;;  %v4032_v25 = vadd.f32 %v9238_v63, %v4014_v40  ;;  %v5524_v29 = vld [vmem:[%s8210_s19 + $0xf8] sm:$0xf0]  ;;  %v3998_v34 = vadd.f32 %v9184_v53, %v3980_v54  ;;  %v6947_v52 = vor.u32 %v7892_v28, %v6946_v8  ;;  %v7594_v21 = vld [vmem:[%s8210_s19 + $0x2cc] sm:$0xf]  ;;  %v4038_v56 = vpop.f32.mrf.mxu0 }
 0x1cb   : > { %4359 = vmatmul.bf16.gmra.mxu2 %v8548_v59  ;;  %4442 = vmatpush.bf16.msrb.mxu3 %v7347_v32  ;;  %v7566_v59 = vld [vmem:[%s8210_s19 + $0x1ec] sm:$0xf]  ;;  %v5652_v58 = vld [vmem:[%s8210_s19 + $0x1f8] sm:$0xf0]  ;;  %v7075_v63 = vor.u32 %v7924_v39, %v7074_v30  ;;  %v5783_v32 = vor.u32 %v7598_v20, %v5780_v43  ;;  %v3965_v53 = vadd.f32 %v9194_v1, %v9129_v55 }
 0x1cc   : > { %4424 = vmatpush.bf16.msrb.mxu2 %v7219_v27  ;;  %4388 = vmatpush.bf16.msrb.mxu0 %v6963_v3  ;;  %v9326_v27 = vpop.f32.mrf.mxu3  ;;  %v5764_v23 = vld [vmem:[%s8210_s19 + $0x2d8] sm:$0xf0]  ;;  %v5527_v40 = vor.u32 %v7534_v51, %v5524_v29  ;;  %v5655_v54 = vor.u32 %v7566_v59, %v5652_v58  ;;  %v7626_v47 = vld [vmem:[%s8210_s19 + $0x3cc] sm:$0xf]  ;;  %v4050_v8 = vadd.f32 %v9240_v22, %v4032_v25 }
 0x1cd   : > { %4406 = vmatpush.bf16.msrb.mxu1 %v7091_v0  ;;  %v5892_v3 = vld [vmem:[%s8210_s19 + $0x3d8] sm:$0xf0]  ;;  %v7530_v0 = vld [vmem:[%s8210_s19 + $0xcc] sm:$0xf]  ;;  %v4056_v28 = vpop.f32.mrf.mxu1  ;;  %v4016_v43 = vadd.f32 %v9189_v57, %v3998_v34  ;;  %v5767_v59 = vor.u32 %v7594_v21, %v5764_v23  ;;  %v3983_v1 = vadd.f32 %v9197_v16, %v3965_v53 }
 0x1ce   : > { %v5508_v30 = vld [vmem:[%s8210_s19 + $0xd8] sm:$0xf0]  ;;  %v7562_v39 = vld [vmem:[%s8210_s19 + $0x1cc] sm:$0xf]  ;;  %v4068_v58 = vadd.f32 %v9256_v35, %v4050_v8  ;;  %v5895_v55 = vor.u32 %v7626_v47, %v5892_v3 }
 0x1cf   : > { %4443 = vmatpush.bf16.msrb.mxu3 %v7331_v13  ;;  %v5636_v20 = vld [vmem:[%s8210_s19 + $0x1d8] sm:$0xf0]  ;;  %v5511_v22 = vor.u32 %v7530_v0, %v5508_v30  ;;  %v7590_v61 = vld [vmem:[%s8210_s19 + $0x2ac] sm:$0xf]  ;;  %v4001_v35 = vadd.f32 %v9218_v38, %v3983_v1 }
 0x1d0   : > { %4425 = vmatpush.bf16.msrb.mxu2 %v7203_v60  ;;  %4389 = vmatpush.bf16.msrb.mxu0 %v6947_v52  ;;  %v5639_v57 = vor.u32 %v7562_v39, %v5636_v20  ;;  %v4034_v52 = vadd.f32 %v9266_v33, %v4016_v43  ;;  %v5748_v6 = vld [vmem:[%s8210_s19 + $0x2b8] sm:$0xf0]  ;;  %v7622_v25 = vld [vmem:[%s8210_s19 + $0x3ac] sm:$0xf]  ;;  %v4086_v16 = vadd.f32 %v9261_v19, %v4068_v58 }
 0x1d1   : > { %4407 = vmatpush.bf16.msrb.mxu1 %v7075_v63  ;;  %v4074_v51 = vpop.f32.mrf.mxu2  ;;  %v5876_v60 = vld [vmem:[%s8210_s19 + $0x3b8] sm:$0xf0]  ;;  %v7526_v13 = vld [vmem:[%s8210_s19 + $0xac] sm:$0xf]  ;;  %v5751_v19 = vor.u32 %v7590_v61, %v5748_v6  ;;  %v4019_v56 = vadd.f32 %v9220_v26, %v4001_v35 }
 0x1d2   : > { %v5492_v29 = vld [vmem:[%s8210_s19 + $0xb8] sm:$0xf0]  ;;  %v7558_v34 = vld [vmem:[%s8210_s19 + $0x1ac] sm:$0xf]  ;;  %v4103_v63 = vpop.f32.mrf.mxu0  ;;  %v4052_v38 = vadd.f32 %v9270_v10, %v4034_v52  ;;  %v5879_v21 = vor.u32 %v7622_v25, %v5876_v60 }
 0x1d3   : > { %4508 = vmatpush.bf16.msra.mxu3 %v5911_v7  ;;  %v5620_v33 = vld [vmem:[%s8210_s19 + $0x1b8] sm:$0xf0]  ;;  %v7586_v23 = vld [vmem:[%s8210_s19 + $0x28c] sm:$0xf]  ;;  %v4037_v20 = vadd.f32 %v9296_v5, %v4019_v56 }
 0x1d4   : > { %4490 = vmatpush.bf16.msra.mxu2 %v5783_v32  ;;  %4454 = vmatpush.bf16.msra.mxu0 %v5527_v40  ;;  %v4092_v47 = vpop.f32.mrf.mxu3  ;;  %v4104_v32 = vadd.f32 %v4103_v63, %v4086_v16  ;;  %v5732_v53 = vld [vmem:[%s8210_s19 + $0x298] sm:$0xf0]  ;;  %v5495_v40 = vor.u32 %v7526_v13, %v5492_v29  ;;  %v7618_v3 = vld [vmem:[%s8210_s19 + $0x38c] sm:$0xf]  ;;  %v4070_v10 = vadd.f32 %v9283_v46, %v4052_v38  ;;  %v347_v16 = vld [vmem:[#allocation2] sm:$0xff] }
 0x1d5   : > { %4472 = vmatpush.bf16.msra.mxu1 %v5655_v54  ;;  %v4121_v7 = vpop.f32.mrf.mxu1  ;;  %v5623_v54 = vor.u32 %v7558_v34, %v5620_v33  ;;  %v5860_v0 = vld [vmem:[%s8210_s19 + $0x398] sm:$0xf0]  ;;  %v7522_v8 = vld [vmem:[%s8210_s19 + $0x8c] sm:$0xf]  ;;  %4390 = vmatmul.bf16.vlgmr.msrb.gmra.mxu0 %v8602_v36  ;;  %v5735_v46 = vor.u32 %v7586_v23, %v5732_v53  ;;  %v4055_v13 = vadd.f32 %v9299_v62, %v4037_v20 }
 0x1d6   : > { %v5476_v28 = vld [vmem:[%s8210_s19 + $0x98] sm:$0xf0]  ;;  %v7554_v30 = vld [vmem:[%s8210_s19 + $0x18c] sm:$0xf]  ;;  %v4122_v26 = vadd.f32 %v4121_v7, %v4104_v32  ;;  %v5863_v43 = vor.u32 %v7618_v3, %v5860_v0  ;;  %v4088_v61 = vadd.f32 %v9289_v48, %v4070_v10 }
 0x1d7   : > { %4509 = vmatpush.bf16.msra.mxu3 %v5895_v55  ;;  %v5604_v39 = vld [vmem:[%s8210_s19 + $0x198] sm:$0xf0]  ;;  %v7582_v58 = vld [vmem:[%s8210_s19 + $0x26c] sm:$0xf]  ;;  %v5479_v5 = vor.u32 %v7522_v8, %v5476_v28  ;;  %v4073_v53 = vadd.f32 %v9324_v24, %v4055_v13 }
 0x1d8   : > { %4491 = vmatpush.bf16.msra.mxu2 %v5767_v59  ;;  %4455 = vmatpush.bf16.msra.mxu0 %v5511_v22  ;;  %v5716_v59 = vld [vmem:[%s8210_s19 + $0x278] sm:$0xf0]  ;;  %v5607_v1 = vor.u32 %v7554_v30, %v5604_v39  ;;  %v7614_v22 = vld [vmem:[%s8210_s19 + $0x36c] sm:$0xf] }
 0x1d9   : > { %4473 = vmatpush.bf16.msra.mxu1 %v5639_v57  ;;  %v4139_v55 = vpop.f32.mrf.mxu2  ;;  %v5844_v57 = vld [vmem:[%s8210_s19 + $0x378] sm:$0xf0]  ;;  %v7518_v52 = vld [vmem:[%s8210_s19 + $0x6c] sm:$0xf]  ;;  %v5719_v29 = vor.u32 %v7582_v58, %v5716_v59  ;;  %v4091_v58 = vadd.f32 %v9326_v27, %v4073_v53 }
 0x1da   : > { %4408 = vmatmul.bf16.vlgmr.msrb.gmra.mxu1 %v8609_v41  ;;  %4444 = vmatmul.bf16.vlgmr.msrb.gmra.mxu3 %v8611_v42  ;;  %v4140_v6 = vadd.f32 %v4139_v55, %v4122_v26  ;;  %v5460_v51 = vld [vmem:[%s8210_s19 + $0x78] sm:$0xf0]  ;;  %v7550_v25 = vld [vmem:[%s8210_s19 + $0x16c] sm:$0xf]  ;;  %v4105_v47 = vpop.f32.mrf.mxu0  ;;  %v5847_v48 = vor.u32 %v7614_v22, %v5844_v57  ;;  %v351_v57 = vld [vmem:[#allocation2 + $0x20] sm:$0xff] }
 0x1db   : > { %4426 = vmatmul.bf16.vlgmr.msrb.gmra.mxu2 %v8604_v37  ;;  %4510 = vmatpush.bf16.msra.mxu3 %v5879_v21  ;;  %v5588_v60 = vld [vmem:[%s8210_s19 + $0x178] sm:$0xf0]  ;;  %v4106_v33 = vadd.f32 %v4105_v47, %v4088_v61  ;;  %v7578_v38 = vld [vmem:[%s8210_s19 + $0x24c] sm:$0xf]  ;;  %v5463_v62 = vor.u32 %v7518_v52, %v5460_v51 }
 0x1dc   : > { %4492 = vmatpush.bf16.msra.mxu2 %v5751_v19  ;;  %4456 = vmatpush.bf16.msra.mxu0 %v5495_v40  ;;  %v4157_v35 = vpop.f32.mrf.mxu3  ;;  %v5700_v32 = vld [vmem:[%s8210_s19 + $0x258] sm:$0xf0]  ;;  %v5591_v7 = vor.u32 %v7550_v25, %v5588_v60  ;;  %v7610_v19 = vld [vmem:[%s8210_s19 + $0x34c] sm:$0xf] }
 0x1dd   : > { %4474 = vmatpush.bf16.msra.mxu1 %v5623_v54  ;;  %v4158_v34 = vadd.f32 %v4157_v35, %v4140_v6  ;;  %v4123_v63 = vpop.f32.mrf.mxu1  ;;  %v5828_v21 = vld [vmem:[%s8210_s19 + $0x358] sm:$0xf0]  ;;  %v7514_v23 = vld [vmem:[%s8210_s19 + $0x4c] sm:$0xf]  ;;  %v5703_v8 = vor.u32 %v7578_v38, %v5700_v32 }
 0x1de   : > { %v5444_v40 = vld [vmem:[%s8210_s19 + $0x58] sm:$0xf0]  ;;  %v7546_v54 = vld [vmem:[%s8210_s19 + $0x14c] sm:$0xf]  ;;  %v4124_v0 = vadd.f32 %v4123_v63, %v4106_v33  ;;  %v5831_v10 = vor.u32 %v7610_v19, %v5828_v21 }
 0x1df   : > { %4511 = vmatpush.bf16.msra.mxu3 %v5863_v43  ;;  %v4743_v56 = vadd.f32 %v4158_v34, %v347_v16  ;;  %v5572_v3 = vld [vmem:[%s8210_s19 + $0x158] sm:$0xf0]  ;;  %v7574_v28 = vld [vmem:[%s8210_s19 + $0x22c] sm:$0xf]  ;;  %v5447_v24 = vor.u32 %v7514_v23, %v5444_v40 }
 0x1e0   : > { %4493 = vmatpush.bf16.msra.mxu2 %v5735_v46  ;;  %4457 = vmatpush.bf16.msra.mxu0 %v5479_v5  ;;  %v5684_v30 = vld [vmem:[%s8210_s19 + $0x238] sm:$0xf0]  ;;  %v5575_v20 = vor.u32 %v7546_v54, %v5572_v3  ;;  %v7606_v26 = vld [vmem:[%s8210_s19 + $0x32c] sm:$0xf] }
 0x1e1   : > { %4475 = vmatpush.bf16.msra.mxu1 %v5607_v1  ;;  %4755 = vst [vmem:[#allocation2] sm:$0xff] %v4743_v56  ;;  %v4141_v39 = vpop.f32.mrf.mxu2  ;;  %v5812_v46 = vld [vmem:[%s8210_s19 + $0x338] sm:$0xf0]  ;;  %v7510_v43 = vld [vmem:[%s8210_s19 + $0x2c] sm:$0xf]  ;;  %v5687_v61 = vor.u32 %v7574_v28, %v5684_v30 }
 0x1e2   : > { %v4142_v59 = vadd.f32 %v4141_v39, %v4124_v0  ;;  %v5428_v5 = vld [vmem:[%s8210_s19 + $0x38] sm:$0xf0]  ;;  %v7542_v1 = vld [vmem:[%s8210_s19 + $0x12c] sm:$0xf]  ;;  %v4108_v52 = vpop.f32.mrf.mxu0  ;;  %v5815_v27 = vor.u32 %v7606_v26, %v5812_v46  ;;  %v355_v30 = vld [vmem:[#allocation2 + $0x48] sm:$0x3] }
 0x1e3   : > { %4512 = vmatpush.bf16.msra.mxu3 %v5847_v48  ;;  %v5556_v22 = vld [vmem:[%s8210_s19 + $0x138] sm:$0xf0]  ;;  %v7570_v6 = vld [vmem:[%s8210_s19 + $0x20c] sm:$0xf]  ;;  %v4109_v25 = vadd.f32 %v4108_v52, %v4091_v58 }
 0x1e4   : > { %4494 = vmatpush.bf16.msra.mxu2 %v5719_v29  ;;  %4458 = vmatpush.bf16.msra.mxu0 %v5463_v62  ;;  %v4159_v55 = vpop.f32.mrf.mxu3  ;;  %v5668_v35 = vld [vmem:[%s8210_s19 + $0x218] sm:$0xf0]  ;;  %v7602_v13 = vld [vmem:[%s8210_s19 + $0x30c] sm:$0xf]  ;;  %v5431_v29 = vor.u32 %v7510_v43, %v5428_v5  ;;  %v5559_v34 = vor.u32 %v7542_v1, %v5556_v22 }
 0x1e5   : > { %4476 = vmatpush.bf16.msra.mxu1 %v5591_v7  ;;  %v4160_v51 = vadd.f32 %v4159_v55, %v4142_v59  ;;  %v4126_v60 = vpop.f32.mrf.mxu1  ;;  %v5796_v16 = vld [vmem:[%s8210_s19 + $0x318] sm:$0xf0]  ;;  %v7506_v47 = vld [vmem:[%s8210_s19 + $0xc] sm:$0xf]  ;;  %4395 = vmatmul.bf16.gmra.mxu0 %v8648_v2  ;;  %v5671_v56 = vor.u32 %v7570_v6, %v5668_v35 }
 0x1e6   : > { %v5412_v33 = vld [vmem:[%s8210_s19 + $0x18] sm:$0xf0]  ;;  %v7538_v63 = vld [vmem:[%s8210_s19 + $0x10c] sm:$0xf]  ;;  %v4127_v53 = vadd.f32 %v4126_v60, %v4109_v25  ;;  %v5799_v40 = vor.u32 %v7602_v13, %v5796_v16 }
 0x1e7   : > { %4513 = vmatpush.bf16.msra.mxu3 %v5831_v10  ;;  %v5540_v48 = vld [vmem:[%s8210_s19 + $0x118] sm:$0xf0]  ;;  %v4747_v38 = vadd.f32 %v4160_v51, %v351_v57  ;;  %v7726_v32 = vld [vmem:[%s8210_s19 + $0x6ec] sm:$0xf] }
 0x1e8   : > { %4495 = vmatpush.bf16.msra.mxu2 %v5703_v8  ;;  %4459 = vmatpush.bf16.msra.mxu0 %v5447_v24  ;;  %v6292_v62 = vld [vmem:[%s8210_s19 + $0x6f8] sm:$0xf0]  ;;  %v7758_v7 = vld [vmem:[%s8210_s19 + $0x7ec] sm:$0xf]  ;;  %v5415_v8 = vor.u32 %v7506_v47, %v5412_v33  ;;  %v5543_v10 = vor.u32 %v7538_v63, %v5540_v48 }
 0x1e9   : > { %4477 = vmatpush.bf16.msra.mxu1 %v5575_v20  ;;  %v6420_v19 = vld [vmem:[%s8210_s19 + $0x7f8] sm:$0xf0]  ;;  %v7662_v21 = vld [vmem:[%s8210_s19 + $0x4ec] sm:$0xf]  ;;  %4759 = vst [vmem:[#allocation2 + $0x20] sm:$0xff] %v4747_v38  ;;  %v4144_v0 = vpop.f32.mrf.mxu2  ;;  %v6295_v24 = vor.u32 %v7726_v32, %v6292_v62 }
 0x1ea   : > { %4413 = vmatmul.bf16.gmra.mxu1 %v8655_v11  ;;  %4449 = vmatmul.bf16.gmra.mxu3 %v8657_v12  ;;  %v6036_v23 = vld [vmem:[%s8210_s19 + $0x4f8] sm:$0xf0]  ;;  %v7694_v54 = vld [vmem:[%s8210_s19 + $0x5ec] sm:$0xf]  ;;  %v4145_v28 = vadd.f32 %v4144_v0, %v4127_v53  ;;  %v6423_v20 = vor.u32 %v7758_v7, %v6420_v19  ;;  %v4110_v43 = vpop.f32.mrf.mxu0 }
 0x1eb   : > { %4431 = vmatmul.bf16.gmra.mxu2 %v8650_v4  ;;  %4514 = vmatpush.bf16.msra.mxu3 %v5815_v27  ;;  %v6164_v3 = vld [vmem:[%s8210_s19 + $0x5f8] sm:$0xf0]  ;;  %v7722_v26 = vld [vmem:[%s8210_s19 + $0x6cc] sm:$0xf]  ;;  %v6039_v58 = vor.u32 %v7662_v21, %v6036_v23 }
 0x1ec   : > { %4496 = vmatpush.bf16.msra.mxu2 %v5687_v61  ;;  %4460 = vmatpush.bf16.msra.mxu0 %v5431_v29  ;;  %v4162_v39 = vpop.f32.mrf.mxu3  ;;  %v6276_v46 = vld [vmem:[%s8210_s19 + $0x6d8] sm:$0xf0]  ;;  %v6167_v59 = vor.u32 %v7694_v54, %v6164_v3  ;;  %v7754_v55 = vld [vmem:[%s8210_s19 + $0x7cc] sm:$0xf] }
 0x1ed   : > { %4478 = vmatpush.bf16.msra.mxu1 %v5559_v34  ;;  %v6404_v5 = vld [vmem:[%s8210_s19 + $0x7d8] sm:$0xf0]  ;;  %v7658_v1 = vld [vmem:[%s8210_s19 + $0x4cc] sm:$0xf]  ;;  %v4163_v22 = vadd.f32 %v4162_v39, %v4145_v28  ;;  %v4128_v57 = vpop.f32.mrf.mxu1  ;;  %v6279_v51 = vor.u32 %v7722_v26, %v6276_v46 }
 0x1ee   : > { %v6020_v52 = vld [vmem:[%s8210_s19 + $0x4d8] sm:$0xf0]  ;;  %v7690_v61 = vld [vmem:[%s8210_s19 + $0x5cc] sm:$0xf]  ;;  %v6407_v25 = vor.u32 %v7754_v55, %v6404_v5 }
 0x1ef   : > { %4515 = vmatpush.bf16.msra.mxu3 %v5799_v40  ;;  %v6148_v6 = vld [vmem:[%s8210_s19 + $0x5d8] sm:$0xf0]  ;;  %v4751_v35 = vadd.f32 %v4163_v22, %v355_v30  ;;  %v6023_v60 = vor.u32 %v7658_v1, %v6020_v52  ;;  %v7718_v13 = vld [vmem:[%s8210_s19 + $0x6ac] sm:$0xf] }
 0x1f0   : > { %4497 = vmatpush.bf16.msra.mxu2 %v5671_v56  ;;  %4461 = vmatpush.bf16.msra.mxu0 %v5415_v8  ;;  %v6151_v27 = vor.u32 %v7690_v61, %v6148_v6  ;;  %v6260_v16 = vld [vmem:[%s8210_s19 + $0x6b8] sm:$0xf0]  ;;  %v7750_v29 = vld [vmem:[%s8210_s19 + $0x7ac] sm:$0xf] }
 0x1f1   : > { %4479 = vmatpush.bf16.msra.mxu1 %v5543_v10  ;;  %4763 = vst [vmem:[#allocation2 + $0x48] sm:$0x3] %v4751_v35  ;;  %v4146_v47 = vpop.f32.mrf.mxu2  ;;  %v6388_v34 = vld [vmem:[%s8210_s19 + $0x7b8] sm:$0xf0]  ;;  %v7654_v33 = vld [vmem:[%s8210_s19 + $0x4ac] sm:$0xf]  ;;  %v6263_v19 = vor.u32 %v7718_v13, %v6260_v16 }
 0x1f2   : > { %v6004_v48 = vld [vmem:[%s8210_s19 + $0x4b8] sm:$0xf0]  ;;  %v7686_v38 = vld [vmem:[%s8210_s19 + $0x5ac] sm:$0xf]  ;;  %v4175_v62 = vpop.f32.mrf.mxu0  ;;  %v6391_v21 = vor.u32 %v7750_v29, %v6388_v34 }
 0x1f3   : > { %4580 = vmatpush.bf16.msrb.mxu3 %v6423_v20  ;;  %v6132_v32 = vld [vmem:[%s8210_s19 + $0x5b8] sm:$0xf0]  ;;  %v7714_v23 = vld [vmem:[%s8210_s19 + $0x68c] sm:$0xf]  ;;  %v6007_v40 = vor.u32 %v7654_v33, %v6004_v48 }
 0x1f4   : > { %4562 = vmatpush.bf16.msrb.mxu2 %v6295_v24  ;;  %4526 = vmatpush.bf16.msrb.mxu0 %v6039_v58  ;;  %v4164_v63 = vpop.f32.mrf.mxu3  ;;  %v6244_v53 = vld [vmem:[%s8210_s19 + $0x698] sm:$0xf0]  ;;  %v6135_v54 = vor.u32 %v7686_v38, %v6132_v32  ;;  %v7746_v3 = vld [vmem:[%s8210_s19 + $0x78c] sm:$0xf] }
 0x1f5   : > { %4544 = vmatpush.bf16.msrb.mxu1 %v6167_v59  ;;  %v4193_v7 = vpop.f32.mrf.mxu1  ;;  %v6372_v0 = vld [vmem:[%s8210_s19 + $0x798] sm:$0xf0]  ;;  %v7650_v8 = vld [vmem:[%s8210_s19 + $0x48c] sm:$0xf]  ;;  %4462 = vmatmul.bf16.vlgmr.msra.gmra.mxu0 %v8294_v9  ;;  %v6247_v39 = vor.u32 %v7714_v23, %v6244_v53 }
 0x1f6   : > { %v4194_v56 = vadd.f32 %v4193_v7, %v4175_v62  ;;  %v5988_v10 = vld [vmem:[%s8210_s19 + $0x498] sm:$0xf0]  ;;  %v7682_v28 = vld [vmem:[%s8210_s19 + $0x58c] sm:$0xf]  ;;  %v6375_v24 = vor.u32 %v7746_v3, %v6372_v0 }
 0x1f7   : > { %4581 = vmatpush.bf16.msrb.mxu3 %v6407_v25  ;;  %v6116_v30 = vld [vmem:[%s8210_s19 + $0x598] sm:$0xf0]  ;;  %v7710_v9 = vld [vmem:[%s8210_s19 + $0x66c] sm:$0xf]  ;;  %v5991_v26 = vor.u32 %v7650_v8, %v5988_v10 }
 0x1f8   : > { %4563 = vmatpush.bf16.msrb.mxu2 %v6279_v51  ;;  %4527 = vmatpush.bf16.msrb.mxu0 %v6023_v60  ;;  %v6228_v20 = vld [vmem:[%s8210_s19 + $0x678] sm:$0xf0]  ;;  %v6119_v46 = vor.u32 %v7682_v28, %v6116_v30  ;;  %v7742_v43 = vld [vmem:[%s8210_s19 + $0x76c] sm:$0xf] }
 0x1f9   : > { %4545 = vmatpush.bf16.msrb.mxu1 %v6151_v27  ;;  %v7646_v58 = vld [vmem:[%s8210_s19 + $0x46c] sm:$0xf]  ;;  %v5972_v55 = vld [vmem:[%s8210_s19 + $0x478] sm:$0xf0]  ;;  %v6231_v61 = vor.u32 %v7710_v9, %v6228_v20 }
 0x1fa   : > { %4480 = vmatmul.bf16.vlgmr.msra.gmra.mxu1 %v8299_v14  ;;  %4516 = vmatmul.bf16.vlgmr.msra.gmra.mxu3 %v8305_v18  ;;  %v6356_v14 = vld [vmem:[%s8210_s19 + $0x778] sm:$0xf0]  ;;  %v7678_v5 = vld [vmem:[%s8210_s19 + $0x56c] sm:$0xf]  ;;  %v4177_v22 = vpop.f32.mrf.mxu0  ;;  %v5975_v60 = vor.u32 %v7646_v58, %v5972_v55 }
 0x1fb   : > { %4498 = vmatmul.bf16.vlgmr.msra.gmra.mxu2 %v8301_v15  ;;  %4582 = vmatpush.bf16.msrb.mxu3 %v6391_v21  ;;  %v4211_v15 = vpop.f32.mrf.mxu2  ;;  %v6100_v1 = vld [vmem:[%s8210_s19 + $0x578] sm:$0xf0]  ;;  %v6359_v6 = vor.u32 %v7742_v43, %v6356_v14  ;;  %v7706_v35 = vld [vmem:[%s8210_s19 + $0x64c] sm:$0xf] }
 0x1fc   : > { %4564 = vmatpush.bf16.msrb.mxu2 %v6263_v19  ;;  %4528 = vmatpush.bf16.msrb.mxu0 %v6007_v40  ;;  %v4212_v18 = vadd.f32 %v4211_v15, %v4194_v56  ;;  %v4229_v59 = vpop.f32.mrf.mxu3  ;;  %v6212_v51 = vld [vmem:[%s8210_s19 + $0x658] sm:$0xf0]  ;;  %v6103_v27 = vor.u32 %v7678_v5, %v6100_v1  ;;  %v7738_v13 = vld [vmem:[%s8210_s19 + $0x74c] sm:$0xf] }
 0x1fd   : > { %4546 = vmatpush.bf16.msrb.mxu1 %v6135_v54  ;;  %v4195_v52 = vpop.f32.mrf.mxu1  ;;  %v6340_v16 = vld [vmem:[%s8210_s19 + $0x758] sm:$0xf0]  ;;  %v7642_v47 = vld [vmem:[%s8210_s19 + $0x44c] sm:$0xf]  ;;  %v6215_v63 = vor.u32 %v7706_v35, %v6212_v51 }
 0x1fe   : > { %v9453_v57 = vadd.f32 %v4229_v59, %v4212_v18  ;;  %v4196_v25 = vadd.f32 %v4195_v52, %v4177_v22  ;;  %v5956_v29 = vld [vmem:[%s8210_s19 + $0x458] sm:$0xf0]  ;;  %v7674_v34 = vld [vmem:[%s8210_s19 + $0x54c] sm:$0xf]  ;;  %v6343_v48 = vor.u32 %v7738_v13, %v6340_v16 }
 0x1ff   : > { %4583 = vmatpush.bf16.msrb.mxu3 %v6375_v24  ;;  %v6084_v33 = vld [vmem:[%s8210_s19 + $0x558] sm:$0xf0]  ;;  %v7702_v38 = vld [vmem:[%s8210_s19 + $0x62c] sm:$0xf]  ;;  %v5959_v7 = vor.u32 %v7642_v47, %v5956_v29 }
 0x200   : > { %4565 = vmatpush.bf16.msrb.mxu2 %v6247_v39  ;;  %4529 = vmatpush.bf16.msrb.mxu0 %v5991_v26  ;;  %v6196_v32 = vld [vmem:[%s8210_s19 + $0x638] sm:$0xf0]  ;;  %v6087_v19 = vor.u32 %v7674_v34, %v6084_v33  ;;  %v7734_v21 = vld [vmem:[%s8210_s19 + $0x72c] sm:$0xf] }
 0x201   : > { %4547 = vmatpush.bf16.msrb.mxu1 %v6119_v46  ;;  %v6324_v23 = vld [vmem:[%s8210_s19 + $0x738] sm:$0xf0]  ;;  %v7638_v53 = vld [vmem:[%s8210_s19 + $0x42c] sm:$0xf]  ;;  %v6199_v39 = vor.u32 %v7702_v38, %v6196_v32 }
 0x202   : > { %v5940_v54 = vld [vmem:[%s8210_s19 + $0x438] sm:$0xf0]  ;;  %v7670_v3 = vld [vmem:[%s8210_s19 + $0x52c] sm:$0xf]  ;;  %v4180_v8 = vpop.f32.mrf.mxu0  ;;  %v6327_v24 = vor.u32 %v7734_v21, %v6324_v23 }
 0x203   : > { %4584 = vmatpush.bf16.msrb.mxu3 %v6359_v6  ;;  %v4213_v62 = vpop.f32.mrf.mxu2  ;;  %v6068_v0 = vld [vmem:[%s8210_s19 + $0x538] sm:$0xf0]  ;;  %v7698_v10 = vld [vmem:[%s8210_s19 + $0x60c] sm:$0xf]  ;;  %v5943_v46 = vor.u32 %v7638_v53, %v5940_v54 }
 0x204   : > { %4566 = vmatpush.bf16.msrb.mxu2 %v6231_v61  ;;  %4530 = vmatpush.bf16.msrb.mxu0 %v5975_v60  ;;  %v4214_v56 = vadd.f32 %v4213_v62, %v4196_v25  ;;  %v4231_v40 = vpop.f32.mrf.mxu3  ;;  %v6180_v9 = vld [vmem:[%s8210_s19 + $0x618] sm:$0xf0]  ;;  %v7730_v20 = vld [vmem:[%s8210_s19 + $0x70c] sm:$0xf]  ;;  %v6071_v43 = vor.u32 %v7670_v3, %v6068_v0 }
 0x205   : > { %4548 = vmatpush.bf16.msrb.mxu1 %v6103_v27  ;;  %v6308_v15 = vld [vmem:[%s8210_s19 + $0x718] sm:$0xf0]  ;;  %v7634_v14 = vld [vmem:[%s8210_s19 + $0x40c] sm:$0xf]  ;;  %4467 = vmatmul.bf16.gmra.mxu0 %v10148_v17  ;;  %v6183_v35 = vor.u32 %v7698_v10, %v6180_v9 }
 0x206   : > { %v9472_v28 = vadd.f32 %v4231_v40, %v4214_v56  ;;  %v5924_v58 = vld [vmem:[%s8210_s19 + $0x418] sm:$0xf0]  ;;  %v7666_v18 = vld [vmem:[%s8210_s19 + $0x50c] sm:$0xf]  ;;  %v6311_v51 = vor.u32 %v7730_v20, %v6308_v15 }
 0x207   : > { %v4198_v30 = vpop.f32.mrf.mxu1  ;;  %4585 = vmatpush.bf16.msrb.mxu3 %v6343_v48  ;;  %v6052_v59 = vld [vmem:[%s8210_s19 + $0x518] sm:$0xf0]  ;;  %v7854_v55 = vld [vmem:[%s8210_s19 + $0xaec] sm:$0xf]  ;;  %v5927_v27 = vor.u32 %v7634_v14, %v5924_v58 }
 0x208   : > { %4567 = vmatpush.bf16.msrb.mxu2 %v6215_v63  ;;  %v4199_v26 = vadd.f32 %v4198_v30, %v4180_v8  ;;  %4531 = vmatpush.bf16.msrb.mxu0 %v5959_v7  ;;  %v6804_v5 = vld [vmem:[%s8210_s19 + $0xaf8] sm:$0xf0]  ;;  %v10162_v1 = vld [vmem:[#allocation6_spill] sm:$0xff]  ;;  %v6055_v13 = vor.u32 %v7666_v18, %v6052_v59 }
 0x209   : > { %4549 = vmatpush.bf16.msrb.mxu1 %v6087_v19  ;;  %v10163_v22 = vld [vmem:[#allocation8_spill] sm:$0xff]  ;;  %v7886_v52 = vld [vmem:[%s8210_s19 + $0xbec] sm:$0xf]  ;;  %v6807_v29 = vor.u32 %v7854_v55, %v6804_v5 }
 0x20a   : > { %4485 = vmatmul.bf16.gmra.mxu1 %v10162_v1  ;;  %4521 = vmatmul.bf16.gmra.mxu3 %v10163_v22  ;;  %v6932_v61 = vld [vmem:[%s8210_s19 + $0xbf8] sm:$0xf0]  ;;  %v7790_v6 = vld [vmem:[%s8210_s19 + $0x8ec] sm:$0xf]  ;;  %v4182_v48 = vpop.f32.mrf.mxu0 }
 0x20b   : > { %4503 = vmatmul.bf16.gmra.mxu2 %v10149_v31  ;;  %4586 = vmatpush.bf16.msrb.mxu3 %v6327_v24  ;;  %v6548_v17 = vld [vmem:[%s8210_s19 + $0x8f8] sm:$0xf0]  ;;  %v7822_v25 = vld [vmem:[%s8210_s19 + $0x9ec] sm:$0xf]  ;;  %v4216_v60 = vpop.f32.mrf.mxu2  ;;  %v6935_v34 = vor.u32 %v7886_v52, %v6932_v61 }
 0x20c   : > { %4568 = vmatpush.bf16.msrb.mxu2 %v6199_v39  ;;  %v6676_v31 = vld [vmem:[%s8210_s19 + $0x9f8] sm:$0xf0]  ;;  %4532 = vmatpush.bf16.msrb.mxu0 %v5943_v46  ;;  %v4217_v16 = vadd.f32 %v4216_v60, %v4199_v26  ;;  %v4234_v47 = vpop.f32.mrf.mxu3  ;;  %v7850_v33 = vld [vmem:[%s8210_s19 + $0xacc] sm:$0xf]  ;;  %v6551_v38 = vor.u32 %v7790_v6, %v6548_v17  ;;  %v10166_v60 = vld [vmem:[#allocation11_spill] sm:$0xff] }
 0x20d   : > { %4550 = vmatpush.bf16.msrb.mxu1 %v6071_v43  ;;  %v6788_v63 = vld [vmem:[%s8210_s19 + $0xad8] sm:$0xf0]  ;;  %v6679_v32 = vor.u32 %v7822_v25, %v6676_v31  ;;  %v7882_v62 = vld [vmem:[%s8210_s19 + $0xbcc] sm:$0xf] }
 0x20e   : > { %v6916_v7 = vld [vmem:[%s8210_s19 + $0xbd8] sm:$0xf0]  ;;  %v7786_v19 = vld [vmem:[%s8210_s19 + $0x8cc] sm:$0xf]  ;;  %v9498_v21 = vadd.f32 %v4234_v47, %v4217_v16  ;;  %v6791_v54 = vor.u32 %v7850_v33, %v6788_v63 }
 0x20f   : > { %v4200_v23 = vpop.f32.mrf.mxu1  ;;  %4587 = vmatpush.bf16.msrb.mxu3 %v6311_v51  ;;  %v6532_v53 = vld [vmem:[%s8210_s19 + $0x8d8] sm:$0xf0]  ;;  %v7818_v56 = vld [vmem:[%s8210_s19 + $0x9cc] sm:$0xf]  ;;  %v6919_v3 = vor.u32 %v7882_v62, %v6916_v7 }
 0x210   : > { %4569 = vmatpush.bf16.msrb.mxu2 %v6183_v35  ;;  %v6660_v40 = vld [vmem:[%s8210_s19 + $0x9d8] sm:$0xf0]  ;;  %4533 = vmatpush.bf16.msrb.mxu0 %v5927_v27  ;;  %v6535_v0 = vor.u32 %v7786_v19, %v6532_v53  ;;  %v7846_v10 = vld [vmem:[%s8210_s19 + $0xaac] sm:$0xf]  ;;  %v10164_v35 = vld [vmem:[#allocation9_spill] sm:$0xff] }
 0x211   : > { %4551 = vmatpush.bf16.msrb.mxu1 %v6055_v13  ;;  %v6663_v8 = vor.u32 %v7818_v56, %v6660_v40  ;;  %v6772_v30 = vld [vmem:[%s8210_s19 + $0xab8] sm:$0xf0]  ;;  %v7878_v24 = vld [vmem:[%s8210_s19 + $0xbac] sm:$0xf] }
 0x212   : > { %v6900_v9 = vld [vmem:[%s8210_s19 + $0xbb8] sm:$0xf0]  ;;  %v7782_v20 = vld [vmem:[%s8210_s19 + $0x8ac] sm:$0xf]  ;;  %v9511_v14 = vpop.f32.mrf.mxu0  ;;  %v6775_v18 = vor.u32 %v7846_v10, %v6772_v30 }
 0x213   : > { %4652 = vmatpush.bf16.msra.mxu3 %v6935_v34  ;;  %v4218_v39 = vpop.f32.mrf.mxu2  ;;  %v6516_v26 = vld [vmem:[%s8210_s19 + $0x8b8] sm:$0xf0]  ;;  %v7814_v46 = vld [vmem:[%s8210_s19 + $0x9ac] sm:$0xf]  ;;  %v6903_v59 = vor.u32 %v7878_v24, %v6900_v9 }
 0x214   : > { %4634 = vmatpush.bf16.msra.mxu2 %v6807_v29  ;;  %4598 = vmatpush.bf16.msra.mxu0 %v6551_v38  ;;  %v4236_v15 = vpop.f32.mrf.mxu3  ;;  %v6644_v43 = vld [vmem:[%s8210_s19 + $0x9b8] sm:$0xf0]  ;;  %v7842_v55 = vld [vmem:[%s8210_s19 + $0xa8c] sm:$0xf]  ;;  %v6519_v1 = vor.u32 %v7782_v20, %v6516_v26 }
 0x215   : > { %4616 = vmatpush.bf16.msra.mxu1 %v6679_v32  ;;  %v6756_v5 = vld [vmem:[%s8210_s19 + $0xa98] sm:$0xf0]  ;;  %v6647_v22 = vor.u32 %v7814_v46, %v6644_v43  ;;  %v7874_v52 = vld [vmem:[%s8210_s19 + $0xb8c] sm:$0xf]  ;;  %4534 = vmatmul.bf16.vlgmr.msrb.gmra.mxu0 %v10164_v35 }
 0x216   : > { %v6884_v61 = vld [vmem:[%s8210_s19 + $0xb98] sm:$0xf0]  ;;  %v7778_v6 = vld [vmem:[%s8210_s19 + $0x88c] sm:$0xf]  ;;  %v6759_v13 = vor.u32 %v7842_v55, %v6756_v5 }
 0x217   : > { %4653 = vmatpush.bf16.msra.mxu3 %v6919_v3  ;;  %v9513_v58 = vpop.f32.mrf.mxu1  ;;  %v10165_v51 = vld [vmem:[#allocation10_spill] sm:$0xff]  ;;  %v6500_v17 = vld [vmem:[%s8210_s19 + $0x898] sm:$0xf0]  ;;  %v6887_v16 = vor.u32 %v7874_v52, %v6884_v61 }
 0x218   : > { %4635 = vmatpush.bf16.msra.mxu2 %v6791_v54  ;;  %4599 = vmatpush.bf16.msra.mxu0 %v6535_v0  ;;  %v7810_v25 = vld [vmem:[%s8210_s19 + $0x98c] sm:$0xf]  ;;  %v6628_v31 = vld [vmem:[%s8210_s19 + $0x998] sm:$0xf0]  ;;  %v6503_v33 = vor.u32 %v7778_v6, %v6500_v17 }
 0x219   : > { %4617 = vmatpush.bf16.msra.mxu1 %v6663_v8  ;;  %v10167_v27 = vld [vmem:[#allocation12_spill] sm:$0xff]  ;;  %v7838_v47 = vld [vmem:[%s8210_s19 + $0xa6c] sm:$0xf]  ;;  %v6631_v63 = vor.u32 %v7810_v25, %v6628_v31 }
 0x21a   : > { %4552 = vmatmul.bf16.vlgmr.msrb.gmra.mxu1 %v10166_v60  ;;  %4588 = vmatmul.bf16.vlgmr.msrb.gmra.mxu3 %v10167_v27  ;;  %v6740_v29 = vld [vmem:[%s8210_s19 + $0xa78] sm:$0xf0]  ;;  %v7870_v48 = vld [vmem:[%s8210_s19 + $0xb6c] sm:$0xf]  ;;  %v9539_v53 = vpop.f32.mrf.mxu0 }
 0x21b   : > { %4570 = vmatmul.bf16.vlgmr.msrb.gmra.mxu2 %v10165_v51  ;;  %4654 = vmatpush.bf16.msra.mxu3 %v6903_v59  ;;  %v6868_v38 = vld [vmem:[%s8210_s19 + $0xb78] sm:$0xf0]  ;;  %v7774_v32 = vld [vmem:[%s8210_s19 + $0x86c] sm:$0xf]  ;;  %v6743_v40 = vor.u32 %v7838_v47, %v6740_v29 }
 0x21c   : > { %4636 = vmatpush.bf16.msra.mxu2 %v6775_v18  ;;  %v9529_v34 = vpop.f32.mrf.mxu2  ;;  %4600 = vmatpush.bf16.msra.mxu0 %v6519_v1  ;;  %v9534_v62 = vpop.f32.mrf.mxu3  ;;  %v6484_v7 = vld [vmem:[%s8210_s19 + $0x878] sm:$0xf0]  ;;  %v7806_v19 = vld [vmem:[%s8210_s19 + $0x96c] sm:$0xf]  ;;  %v6871_v54 = vor.u32 %v7870_v48, %v6868_v38 }
 0x21d   : > { %4618 = vmatpush.bf16.msra.mxu1 %v6647_v22  ;;  %v6612_v23 = vld [vmem:[%s8210_s19 + $0x978] sm:$0xf0]  ;;  %v7834_v3 = vld [vmem:[%s8210_s19 + $0xa4c] sm:$0xf]  ;;  %v6487_v8 = vor.u32 %v7774_v32, %v6484_v7  ;;  %v10168_v32 = vld [vmem:[#allocation13_spill] sm:$0xff] }
 0x21e   : > { %v6724_v0 = vld [vmem:[%s8210_s19 + $0xa58] sm:$0xf0]  ;;  %v6615_v10 = vor.u32 %v7806_v19, %v6612_v23  ;;  %v7866_v30 = vld [vmem:[%s8210_s19 + $0xb4c] sm:$0xf] }
 0x21f   : > { %v9541_v56 = vpop.f32.mrf.mxu1  ;;  %4655 = vmatpush.bf16.msra.mxu3 %v6887_v16  ;;  %v6852_v39 = vld [vmem:[%s8210_s19 + $0xb58] sm:$0xf0]  ;;  %v7770_v24 = vld [vmem:[%s8210_s19 + $0x84c] sm:$0xf]  ;;  %v6727_v26 = vor.u32 %v7834_v3, %v6724_v0 }
 0x220   : > { %4637 = vmatpush.bf16.msra.mxu2 %v6759_v13  ;;  %4601 = vmatpush.bf16.msra.mxu0 %v6503_v33  ;;  %v6468_v9 = vld [vmem:[%s8210_s19 + $0x858] sm:$0xf0]  ;;  %v7802_v20 = vld [vmem:[%s8210_s19 + $0x94c] sm:$0xf]  ;;  %v6855_v46 = vor.u32 %v7866_v30, %v6852_v39 }
 0x221   : > { %4619 = vmatpush.bf16.msra.mxu1 %v6631_v63  ;;  %v6596_v15 = vld [vmem:[%s8210_s19 + $0x958] sm:$0xf0]  ;;  %v7830_v43 = vld [vmem:[%s8210_s19 + $0xa2c] sm:$0xf]  ;;  %v6471_v55 = vor.u32 %v7770_v24, %v6468_v9 }
 0x222   : > { %v6708_v18 = vld [vmem:[%s8210_s19 + $0xa38] sm:$0xf0]  ;;  %v6599_v5 = vor.u32 %v7802_v20, %v6596_v15  ;;  %v7862_v1 = vld [vmem:[%s8210_s19 + $0xb2c] sm:$0xf]  ;;  %v9563_v17 = vpop.f32.mrf.mxu0 }
 0x223   : > { %4656 = vmatpush.bf16.msra.mxu3 %v6871_v54  ;;  %v6836_v22 = vld [vmem:[%s8210_s19 + $0xb38] sm:$0xf0]  ;;  %v7766_v52 = vld [vmem:[%s8210_s19 + $0x82c] sm:$0xf]  ;;  %v6711_v60 = vor.u32 %v7830_v43, %v6708_v18  ;;  %v10170_v54 = vld [vmem:[#allocation15_spill] sm:$0xff] }
 0x224   : > { %4638 = vmatpush.bf16.msra.mxu2 %v6743_v40  ;;  %v9553_v59 = vpop.f32.mrf.mxu2  ;;  %4602 = vmatpush.bf16.msra.mxu0 %v6487_v8  ;;  %v9558_v61 = vpop.f32.mrf.mxu3  ;;  %v6452_v6 = vld [vmem:[%s8210_s19 + $0x838] sm:$0xf0]  ;;  %v7798_v35 = vld [vmem:[%s8210_s19 + $0x92c] sm:$0xf]  ;;  %v6839_v27 = vor.u32 %v7862_v1, %v6836_v22 }
 0x225   : > { %4620 = vmatpush.bf16.msra.mxu1 %v6615_v10  ;;  %v6580_v51 = vld [vmem:[%s8210_s19 + $0x938] sm:$0xf0]  ;;  %v7826_v25 = vld [vmem:[%s8210_s19 + $0xa0c] sm:$0xf]  ;;  %v6455_v29 = vor.u32 %v7766_v52, %v6452_v6  ;;  %4539 = vmatmul.bf16.gmra.mxu0 %v10168_v32 }
 0x226   : > { %v6692_v13 = vld [vmem:[%s8210_s19 + $0xa18] sm:$0xf0]  ;;  %v7858_v16 = vld [vmem:[%s8210_s19 + $0xb0c] sm:$0xf]  ;;  %v6583_v33 = vor.u32 %v7798_v35, %v6580_v51 }
 0x227   : > { %v9566_v31 = vpop.f32.mrf.mxu1  ;;  %4657 = vmatpush.bf16.msra.mxu3 %v6855_v46  ;;  %v6820_v47 = vld [vmem:[%s8210_s19 + $0xb18] sm:$0xf0]  ;;  %v7762_v63 = vld [vmem:[%s8210_s19 + $0x80c] sm:$0xf]  ;;  %v6695_v30 = vor.u32 %v7826_v25, %v6692_v13 }
 0x228   : > { %4639 = vmatpush.bf16.msra.mxu2 %v6727_v26  ;;  %4603 = vmatpush.bf16.msra.mxu0 %v6471_v55  ;;  %v6436_v48 = vld [vmem:[%s8210_s19 + $0x818] sm:$0xf0]  ;;  %v7794_v38 = vld [vmem:[%s8210_s19 + $0x90c] sm:$0xf]  ;;  %v6823_v39 = vor.u32 %v7858_v16, %v6820_v47 }
 0x229   : > { %4621 = vmatpush.bf16.msra.mxu1 %v6599_v5  ;;  %v10169_v7 = vld [vmem:[#allocation14_spill] sm:$0xff]  ;;  %v6564_v19 = vld [vmem:[%s8210_s19 + $0x918] sm:$0xf0]  ;;  %v6439_v26 = vor.u32 %v7762_v63, %v6436_v48 }
 0x22a   : > { %v7982_v23 = vld [vmem:[%s8210_s19 + $0xeec] sm:$0xf]  ;;  %v7316_v40 = vld [vmem:[%s8210_s19 + $0xef8] sm:$0xf0]  ;;  %4557 = vmatmul.bf16.gmra.mxu1 %v10170_v54  ;;  %v6567_v46 = vor.u32 %v7794_v38, %v6564_v19  ;;  %v4254_v22 = vpop.f32.mrf.mxu0 }
 0x22b   : > { %4575 = vmatmul.bf16.gmra.mxu2 %v10169_v7  ;;  %v10171_v3 = vld [vmem:[#allocation16_spill] sm:$0xff]  ;;  %v8014_v0 = vld [vmem:[%s8210_s19 + $0xfec] sm:$0xf]  ;;  %4658 = vmatpush.bf16.msra.mxu3 %v6839_v27  ;;  %v7319_v18 = vor.u32 %v7982_v23, %v7316_v40 }
 0x22c   : > { %4593 = vmatmul.bf16.gmra.mxu3 %v10171_v3  ;;  %v7444_v8 = vld [vmem:[%s8210_s19 + $0xff8] sm:$0xf0]  ;;  %v7918_v10 = vld [vmem:[%s8210_s19 + $0xcec] sm:$0xf]  ;;  %4640 = vmatpush.bf16.msra.mxu2 %v6711_v60 }
 0x22d   : > { %v7060_v24 = vld [vmem:[%s8210_s19 + $0xcf8] sm:$0xf0]  ;;  %v7950_v9 = vld [vmem:[%s8210_s19 + $0xdec] sm:$0xf]  ;;  %4604 = vmatpush.bf16.msra.mxu0 %v6455_v29  ;;  %4622 = vmatpush.bf16.msra.mxu1 %v6583_v33  ;;  %v9589_v43 = vpop.f32.mrf.mxu3  ;;  %v7447_v55 = vor.u32 %v8014_v0, %v7444_v8 }
 0x22e   : > { %v7188_v20 = vld [vmem:[%s8210_s19 + $0xdf8] sm:$0xf0]  ;;  %v9587_v15 = vpop.f32.mrf.mxu2  ;;  %v7978_v5 = vld [vmem:[%s8210_s19 + $0xecc] sm:$0xf]  ;;  %v7063_v52 = vor.u32 %v7918_v10, %v7060_v24 }
 0x22f   : > { %v7300_v1 = vld [vmem:[%s8210_s19 + $0xed8] sm:$0xf0]  ;;  %v7191_v6 = vor.u32 %v7950_v9, %v7188_v20  ;;  %v8010_v35 = vld [vmem:[%s8210_s19 + $0xfcc] sm:$0xf]  ;;  %v4272_v60 = vpop.f32.mrf.mxu1  ;;  %4659 = vmatpush.bf16.msra.mxu3 %v6823_v39 }
 0x230   : > { %v7428_v51 = vld [vmem:[%s8210_s19 + $0xfd8] sm:$0xf0]  ;;  %v7914_v25 = vld [vmem:[%s8210_s19 + $0xccc] sm:$0xf]  ;;  %4641 = vmatpush.bf16.msra.mxu2 %v6695_v30  ;;  %v7303_v47 = vor.u32 %v7978_v5, %v7300_v1 }
 0x231   : > { %v7044_v27 = vld [vmem:[%s8210_s19 + $0xcd8] sm:$0xf0]  ;;  %v7946_v13 = vld [vmem:[%s8210_s19 + $0xdcc] sm:$0xf]  ;;  %4605 = vmatpush.bf16.msra.mxu0 %v6439_v26  ;;  %4623 = vmatpush.bf16.msra.mxu1 %v6567_v46  ;;  %v7431_v29 = vor.u32 %v8010_v35, %v7428_v51 }
 0x232   : > { %v7172_v16 = vld [vmem:[%s8210_s19 + $0xdd8] sm:$0xf0]  ;;  %v7047_v33 = vor.u32 %v7914_v25, %v7044_v27  ;;  %v7974_v48 = vld [vmem:[%s8210_s19 + $0xeac] sm:$0xf]  ;;  %v9607_v8 = vpop.f32.mrf.mxu0 }
 0x233   : > { %4724 = vmatpush.bf16.msrb.mxu3 %v7447_v55  ;;  %v7175_v63 = vor.u32 %v7946_v13, %v7172_v16  ;;  %v7284_v38 = vld [vmem:[%s8210_s19 + $0xeb8] sm:$0xf0]  ;;  %v8006_v7 = vld [vmem:[%s8210_s19 + $0xfac] sm:$0xf] }
 0x234   : > { %4706 = vmatpush.bf16.msrb.mxu2 %v7319_v18  ;;  %v7412_v19 = vld [vmem:[%s8210_s19 + $0xfb8] sm:$0xf0]  ;;  %v7910_v23 = vld [vmem:[%s8210_s19 + $0xcac] sm:$0xf]  ;;  %v7287_v30 = vor.u32 %v7974_v48, %v7284_v38 }
 0x235   : > { %4670 = vmatpush.bf16.msrb.mxu0 %v7063_v52  ;;  %4688 = vmatpush.bf16.msrb.mxu1 %v7191_v6  ;;  %v4308_v40 = vpop.f32.mrf.mxu3  ;;  %v7028_v54 = vld [vmem:[%s8210_s19 + $0xcb8] sm:$0xf0]  ;;  %v7942_v3 = vld [vmem:[%s8210_s19 + $0xdac] sm:$0xf]  ;;  %v7415_v39 = vor.u32 %v8006_v7, %v7412_v19 }
 0x236   : > { %v4290_v32 = vpop.f32.mrf.mxu2  ;;  %v7156_v0 = vld [vmem:[%s8210_s19 + $0xdb8] sm:$0xf0]  ;;  %v7970_v24 = vld [vmem:[%s8210_s19 + $0xe8c] sm:$0xf]  ;;  %v7031_v20 = vor.u32 %v7910_v23, %v7028_v54  ;;  %4606 = vmatmul.bf16.vlgmr.msra.gmra.mxu0 %v8500_v44 }
 0x237   : > { %4725 = vmatpush.bf16.msrb.mxu3 %v7431_v29  ;;  %v9609_v10 = vpop.f32.mrf.mxu1  ;;  %v7268_v9 = vld [vmem:[%s8210_s19 + $0xe98] sm:$0xf0]  ;;  %v7159_v26 = vor.u32 %v7942_v3, %v7156_v0  ;;  %v8002_v46 = vld [vmem:[%s8210_s19 + $0xf8c] sm:$0xf] }
 0x238   : > { %4707 = vmatpush.bf16.msrb.mxu2 %v7303_v47  ;;  %v7396_v18 = vld [vmem:[%s8210_s19 + $0xf98] sm:$0xf0]  ;;  %v7906_v55 = vld [vmem:[%s8210_s19 + $0xc8c] sm:$0xf]  ;;  %v7271_v52 = vor.u32 %v7970_v24, %v7268_v9 }
 0x239   : > { %4671 = vmatpush.bf16.msrb.mxu0 %v7047_v33  ;;  %4689 = vmatpush.bf16.msrb.mxu1 %v7175_v63  ;;  %v7012_v5 = vld [vmem:[%s8210_s19 + $0xc98] sm:$0xf0]  ;;  %v7938_v1 = vld [vmem:[%s8210_s19 + $0xd8c] sm:$0xf]  ;;  %v7399_v6 = vor.u32 %v8002_v46, %v7396_v18  ;;  %v4248_v33 = vadd.f32 %v9511_v14, %v9453_v57 }
 0x23a   : > { %v7140_v22 = vld [vmem:[%s8210_s19 + $0xd98] sm:$0xf0]  ;;  %4624 = vmatmul.bf16.vlgmr.msra.gmra.mxu1 %v8507_v49  ;;  %v7966_v44 = vld [vmem:[%s8210_s19 + $0xe6c] sm:$0xf]  ;;  %v7015_v51 = vor.u32 %v7906_v55, %v7012_v5  ;;  %v9635_v29 = vpop.f32.mrf.mxu0 }
 0x23b   : > { %4642 = vmatmul.bf16.vlgmr.msra.gmra.mxu2 %v8502_v45  ;;  %4726 = vmatpush.bf16.msrb.mxu3 %v7415_v39  ;;  %v7252_v35 = vld [vmem:[%s8210_s19 + $0xe78] sm:$0xf0]  ;;  %v7143_v25 = vor.u32 %v7938_v1, %v7140_v22  ;;  %v7998_v49 = vld [vmem:[%s8210_s19 + $0xf6c] sm:$0xf] }
 0x23c   : > { %4660 = vmatmul.bf16.vlgmr.msra.gmra.mxu3 %v8509_v50  ;;  %4708 = vmatpush.bf16.msrb.mxu2 %v7287_v30  ;;  %v7380_v60 = vld [vmem:[%s8210_s19 + $0xf78] sm:$0xf0]  ;;  %v7902_v50 = vld [vmem:[%s8210_s19 + $0xc6c] sm:$0xf]  ;;  %v7255_v48 = vor.u32 %v7966_v44, %v7252_v35  ;;  %v4266_v30 = vadd.f32 %v9513_v58, %v4248_v33  ;;  %v4250_v35 = vadd.f32 %v9539_v53, %v9472_v28  ;;  %v10172_v53 = vld [vmem:[#allocation17_spill] sm:$0xff] }
 0x23d   : > { %4672 = vmatpush.bf16.msrb.mxu0 %v7031_v20  ;;  %4690 = vmatpush.bf16.msrb.mxu1 %v7159_v26  ;;  %v9630_v27 = vpop.f32.mrf.mxu3  ;;  %v6996_v13 = vld [vmem:[%s8210_s19 + $0xc78] sm:$0xf0]  ;;  %v7934_v16 = vld [vmem:[%s8210_s19 + $0xd6c] sm:$0xf]  ;;  %v7383_v38 = vor.u32 %v7998_v49, %v7380_v60 }
 0x23e   : > { %v9625_v45 = vpop.f32.mrf.mxu2  ;;  %v7124_v47 = vld [vmem:[%s8210_s19 + $0xd78] sm:$0xf0]  ;;  %v7962_v32 = vld [vmem:[%s8210_s19 + $0xe4c] sm:$0xf]  ;;  %v6999_v19 = vor.u32 %v7902_v50, %v6996_v13  ;;  %v4284_v1 = vadd.f32 %v9529_v34, %v4266_v30 }
 0x23f   : > { %v9639_v63 = vpop.f32.mrf.mxu1  ;;  %4727 = vmatpush.bf16.msrb.mxu3 %v7399_v6  ;;  %v7236_v7 = vld [vmem:[%s8210_s19 + $0xe58] sm:$0xf0]  ;;  %v7127_v23 = vor.u32 %v7934_v16, %v7124_v47  ;;  %v7994_v40 = vld [vmem:[%s8210_s19 + $0xf4c] sm:$0xf] }
 0x240   : > { %4709 = vmatpush.bf16.msrb.mxu2 %v7271_v52  ;;  %v7364_v54 = vld [vmem:[%s8210_s19 + $0xf58] sm:$0xf0]  ;;  %v7898_v3 = vld [vmem:[%s8210_s19 + $0xc4c] sm:$0xf]  ;;  %v7239_v39 = vor.u32 %v7962_v32, %v7236_v7  ;;  %v4302_v28 = vadd.f32 %v9534_v62, %v4284_v1 }
 0x241   : > { %4673 = vmatpush.bf16.msrb.mxu0 %v7015_v51  ;;  %4691 = vmatpush.bf16.msrb.mxu1 %v7143_v25  ;;  %v6980_v57 = vld [vmem:[%s8210_s19 + $0xc58] sm:$0xf0]  ;;  %v7930_v14 = vld [vmem:[%s8210_s19 + $0xd4c] sm:$0xf]  ;;  %v7367_v24 = vor.u32 %v7994_v40, %v7364_v54  ;;  %v10174_v40 = vld [vmem:[#allocation19_spill] sm:$0xff] }
 0x242   : > { %v7108_v0 = vld [vmem:[%s8210_s19 + $0xd58] sm:$0xf0]  ;;  %v7958_v9 = vld [vmem:[%s8210_s19 + $0xe2c] sm:$0xf]  ;;  %v6983_v46 = vor.u32 %v7898_v3, %v6980_v57  ;;  %v4324_v51 = vpop.f32.mrf.mxu0  ;;  %v4320_v3 = vadd.f32 %v9607_v8, %v4302_v28 }
 0x243   : > { %4728 = vmatpush.bf16.msrb.mxu3 %v7383_v38  ;;  %v7220_v20 = vld [vmem:[%s8210_s19 + $0xe38] sm:$0xf0]  ;;  %v7111_v18 = vor.u32 %v7930_v14, %v7108_v0  ;;  %v7990_v55 = vld [vmem:[%s8210_s19 + $0xf2c] sm:$0xf] }
 0x244   : > { %4710 = vmatpush.bf16.msrb.mxu2 %v7255_v48  ;;  %v7348_v5 = vld [vmem:[%s8210_s19 + $0xf38] sm:$0xf0]  ;;  %v7894_v58 = vld [vmem:[%s8210_s19 + $0xc2c] sm:$0xf]  ;;  %v7223_v49 = vor.u32 %v7958_v9, %v7220_v20  ;;  %v4338_v20 = vadd.f32 %v9609_v10, %v4320_v3 }
 0x245   : > { %4674 = vmatpush.bf16.msrb.mxu0 %v6999_v19  ;;  %4692 = vmatpush.bf16.msrb.mxu1 %v7127_v23  ;;  %v9658_v22 = vpop.f32.mrf.mxu3  ;;  %v6964_v52 = vld [vmem:[%s8210_s19 + $0xc38] sm:$0xf0]  ;;  %v7926_v6 = vld [vmem:[%s8210_s19 + $0xd2c] sm:$0xf]  ;;  %v7351_v34 = vor.u32 %v7990_v55, %v7348_v5  ;;  %v4268_v23 = vadd.f32 %v9541_v56, %v4250_v35  ;;  %v4253_v56 = vadd.f32 %v9563_v17, %v9498_v21 }
 0x246   : > { %v9652_v26 = vpop.f32.mrf.mxu2  ;;  %v7092_v44 = vld [vmem:[%s8210_s19 + $0xd38] sm:$0xf0]  ;;  %v7954_v60 = vld [vmem:[%s8210_s19 + $0xe0c] sm:$0xf]  ;;  %v6967_v13 = vor.u32 %v7894_v58, %v6964_v52  ;;  %4611 = vmatmul.bf16.gmra.mxu0 %v10172_v53 }
 0x247   : > { %v9665_v25 = vpop.f32.mrf.mxu1  ;;  %4729 = vmatpush.bf16.msrb.mxu3 %v7367_v24  ;;  %v7204_v50 = vld [vmem:[%s8210_s19 + $0xe18] sm:$0xf0]  ;;  %v7095_v16 = vor.u32 %v7926_v6, %v7092_v44  ;;  %v7986_v47 = vld [vmem:[%s8210_s19 + $0xf0c] sm:$0xf]  ;;  %v4271_v55 = vadd.f32 %v9566_v31, %v4253_v56 }
 0x248   : > { %4711 = vmatpush.bf16.msrb.mxu2 %v7239_v39  ;;  %v7332_v33 = vld [vmem:[%s8210_s19 + $0xf18] sm:$0xf0]  ;;  %v7890_v48 = vld [vmem:[%s8210_s19 + $0xc0c] sm:$0xf]  ;;  %v7207_v57 = vor.u32 %v7954_v60, %v7204_v50  ;;  %v4286_v39 = vadd.f32 %v9553_v59, %v4268_v23 }
 0x249   : > { %4675 = vmatpush.bf16.msrb.mxu0 %v6983_v46  ;;  %4693 = vmatpush.bf16.msrb.mxu1 %v7111_v18  ;;  %v10173_v38 = vld [vmem:[#allocation18_spill] sm:$0xff]  ;;  %v6948_v32 = vld [vmem:[%s8210_s19 + $0xc18] sm:$0xf0]  ;;  %v7335_v14 = vor.u32 %v7986_v47, %v7332_v33  ;;  %v4356_v18 = vadd.f32 %v9625_v45, %v4338_v20  ;;  %v4289_v58 = vadd.f32 %v9587_v15, %v4271_v55 }
 0x24a   : > { %v7922_v7 = vld [vmem:[%s8210_s19 + $0xd0c] sm:$0xf]  ;;  %v7076_v19 = vld [vmem:[%s8210_s19 + $0xd18] sm:$0xf0]  ;;  %4629 = vmatmul.bf16.gmra.mxu1 %v10174_v40  ;;  %v6951_v0 = vor.u32 %v7890_v48, %v6948_v32  ;;  %v4326_v9 = vpop.f32.mrf.mxu0  ;;  %v4304_v8 = vadd.f32 %v9558_v61, %v4286_v39 }
 0x24b   : > { %4647 = vmatmul.bf16.gmra.mxu2 %v10173_v38  ;;  %v10175_v54 = vld [vmem:[#allocation20_spill] sm:$0xff]  ;;  %4730 = vmatpush.bf16.msrb.mxu3 %v7351_v34  ;;  %v7079_v30 = vor.u32 %v7922_v7, %v7076_v19  ;;  %v4374_v21 = vadd.f32 %v9630_v27, %v4356_v18  ;;  %v4307_v44 = vadd.f32 %v9589_v43, %v4289_v58  ;;  %v356_v7 = vld [vmem:[#allocation2 + $0x10] sm:$0x3] }
 0x24c   : > { %4665 = vmatmul.bf16.gmra.mxu3 %v10175_v54  ;;  %4712 = vmatpush.bf16.msrb.mxu2 %v7223_v49  ;;  %v4322_v59 = vadd.f32 %v9635_v29, %v4304_v8  ;;  %v348_v35 = vld [vmem:[#allocation2 + $0x58] sm:$0xff] }
 0x24d   : > { %4676 = vmatpush.bf16.msrb.mxu0 %v6967_v13  ;;  %4694 = vmatpush.bf16.msrb.mxu1 %v7095_v16  ;;  %v4378_v24 = vpop.f32.mrf.mxu3  ;;  %v4325_v31 = vadd.f32 %v4324_v51, %v4307_v44  ;;  %v352_v16 = vld [vmem:[#allocation2 + $0x8] sm:$0xff] }
 0x24e   : > { %v4360_v62 = vpop.f32.mrf.mxu2  ;;  %v4340_v1 = vadd.f32 %v9639_v63, %v4322_v59 }
 0x24f   : > { %v4344_v46 = vpop.f32.mrf.mxu1  ;;  %4731 = vmatpush.bf16.msrb.mxu3 %v7335_v14  ;;  %v4343_v43 = vadd.f32 %v9665_v25, %v4325_v31 }
 0x250   : > { %4713 = vmatpush.bf16.msrb.mxu2 %v7207_v57  ;;  %v4358_v61 = vadd.f32 %v9652_v26, %v4340_v1 }
 0x251   : > { %4677 = vmatpush.bf16.msrb.mxu0 %v6951_v0  ;;  %4695 = vmatpush.bf16.msrb.mxu1 %v7079_v30  ;;  %v4361_v60 = vadd.f32 %v4360_v62, %v4343_v43 }
 0x252   : > { %v4391_v10 = vpop.f32.mrf.mxu0  ;;  %v4376_v27 = vadd.f32 %v9658_v22, %v4358_v61 }
 0x253   : > { %v4392_v52 = vadd.f32 %v4391_v10, %v4374_v21 }
 0x255   : > { %v4380_v17 = vpop.f32.mrf.mxu3 }
 0x256   : > { %v4362_v5 = vpop.f32.mrf.mxu2  ;;  %4678 = vmatmul.bf16.vlgmr.msrb.gmra.mxu0 %v8602_v36 }
 0x257   : > { %v4409_v6 = vpop.f32.mrf.mxu1 }
 0x258   : > { %v4410_v15 = vadd.f32 %v4409_v6, %v4392_v52 }
 0x25a   : > { %4696 = vmatmul.bf16.vlgmr.msrb.gmra.mxu1 %v8609_v41  ;;  %v4393_v49 = vpop.f32.mrf.mxu0 }
 0x25b   : > { %4714 = vmatmul.bf16.vlgmr.msrb.gmra.mxu2 %v8604_v37  ;;  %v4394_v34 = vadd.f32 %v4393_v49, %v4376_v27 }
 0x25c   : > { %4732 = vmatmul.bf16.vlgmr.msrb.gmra.mxu3 %v8611_v42  ;;  %v4379_v42 = vadd.f32 %v4378_v24, %v4361_v60 }
 0x25d   : > { %v4445_v63 = vpop.f32.mrf.mxu3 }
 0x25e   : > { %v4427_v45 = vpop.f32.mrf.mxu2 }
 0x25f   : > { %v4428_v29 = vadd.f32 %v4427_v45, %v4410_v15  ;;  %v4411_v36 = vpop.f32.mrf.mxu1 }
 0x260   : > { %v4412_v41 = vadd.f32 %v4411_v36, %v4394_v34 }
 0x261   : > { %v4446_v26 = vadd.f32 %v4445_v63, %v4428_v29 }
 0x262   : > { %v4396_v47 = vpop.f32.mrf.mxu0 }
 0x263   : > { %v4744_v37 = vadd.f32 %v4446_v26, %v348_v35  ;;  %v4397_v33 = vadd.f32 %v4396_v47, %v4379_v42 }
 0x265   : > { %4756 = vst [vmem:[#allocation2 + $0x58] sm:$0xff] %v4744_v37  ;;  %v4447_v13 = vpop.f32.mrf.mxu3 }
 0x266   : > { %v4429_v50 = vpop.f32.mrf.mxu2  ;;  %4683 = vmatmul.bf16.gmra.mxu0 %v8648_v2 }
 0x267   : > { %v4430_v51 = vadd.f32 %v4429_v50, %v4412_v41  ;;  %v4414_v48 = vpop.f32.mrf.mxu1 }
 0x268   : > { %v4415_v25 = vadd.f32 %v4414_v48, %v4397_v33 }
 0x269   : > { %v4448_v22 = vadd.f32 %v4447_v13, %v4430_v51 }
 0x26a   : > { %4701 = vmatmul.bf16.gmra.mxu1 %v8655_v11  ;;  %v4398_v19 = vpop.f32.mrf.mxu0 }
 0x26b   : > { %v4748_v28 = vadd.f32 %v4448_v22, %v352_v16  ;;  %4719 = vmatmul.bf16.gmra.mxu2 %v8650_v4 }
 0x26c   : > { %4737 = vmatmul.bf16.gmra.mxu3 %v8657_v12 }
 0x26d   : > { %4760 = vst [vmem:[#allocation2 + $0x8] sm:$0xff] %v4748_v28  ;;  %v4450_v32 = vpop.f32.mrf.mxu3 }
 0x26e   : > { %v4432_v53 = vpop.f32.mrf.mxu2 }
 0x26f   : > { %v4433_v38 = vadd.f32 %v4432_v53, %v4415_v25  ;;  %v4416_v40 = vpop.f32.mrf.mxu1 }
 0x271   : > { %v4451_v23 = vadd.f32 %v4450_v32, %v4433_v38 }
 0x272   : > { %v4463_v2 = vpop.f32.mrf.mxu0 }
 0x273   : > { %v4752_v54 = vadd.f32 %v4451_v23, %v356_v7 }
 0x275   : > { %4764 = vst [vmem:[#allocation2 + $0x10] sm:$0x3] %v4752_v54  ;;  %v4452_v57 = vpop.f32.mrf.mxu3 }
 0x276   : > { %v4434_v3 = vpop.f32.mrf.mxu2 }
 0x277   : > { %v4481_v14 = vpop.f32.mrf.mxu1 }
 0x278   : > { %v4482_v4 = vadd.f32 %v4481_v14, %v4463_v2 }
 0x27a   : > { %v4465_v12 = vpop.f32.mrf.mxu0 }
 0x27d   : > { %v4517_v0 = vpop.f32.mrf.mxu3 }
 0x27e   : > { %v4499_v62 = vpop.f32.mrf.mxu2 }
 0x27f   : > { %v4500_v11 = vadd.f32 %v4499_v62, %v4482_v4  ;;  %v4483_v39 = vpop.f32.mrf.mxu1 }
 0x280   : > { %v4484_v24 = vadd.f32 %v4483_v39, %v4465_v12 }
 0x281   : > { %v4518_v30 = vadd.f32 %v4517_v0, %v4500_v11 }
 0x282   : > { %v4468_v46 = vpop.f32.mrf.mxu0 }
 0x285   : > { %v4519_v20 = vpop.f32.mrf.mxu3 }
 0x286   : > { %v4501_v9 = vpop.f32.mrf.mxu2 }
 0x287   : > { %v4502_v56 = vadd.f32 %v4501_v9, %v4484_v24  ;;  %v4486_v18 = vpop.f32.mrf.mxu1 }
 0x288   : > { %v4487_v55 = vadd.f32 %v4486_v18, %v4468_v46 }
 0x289   : > { %v4520_v8 = vadd.f32 %v4519_v20, %v4502_v56 }
 0x28a   : > { %v4470_v21 = vpop.f32.mrf.mxu0 }
 0x28d   : > { %v4522_v58 = vpop.f32.mrf.mxu3 }
 0x28e   : > { %v4504_v59 = vpop.f32.mrf.mxu2 }
 0x28f   : > { %v4505_v5 = vadd.f32 %v4504_v59, %v4487_v55  ;;  %v4488_v10 = vpop.f32.mrf.mxu1 }
 0x291   : > { %v4523_v17 = vadd.f32 %v4522_v58, %v4505_v5 }
 0x292   : > { %v4535_v6 = vpop.f32.mrf.mxu0 }
 0x293   : > { %v4536_v13 = vadd.f32 %v4535_v6, %v4518_v30 }
 0x295   : > { %v4524_v52 = vpop.f32.mrf.mxu3 }
 0x296   : > { %v4506_v1 = vpop.f32.mrf.mxu2 }
 0x297   : > { %v4553_v44 = vpop.f32.mrf.mxu1 }
 0x298   : > { %v4554_v47 = vadd.f32 %v4553_v44, %v4536_v13 }
 0x29a   : > { %v4537_v15 = vpop.f32.mrf.mxu0 }
 0x29b   : > { %v4538_v25 = vadd.f32 %v4537_v15, %v4520_v8 }
 0x29d   : > { %v4589_v31 = vpop.f32.mrf.mxu3 }
 0x29e   : > { %v4571_v61 = vpop.f32.mrf.mxu2 }
 0x29f   : > { %v4555_v45 = vpop.f32.mrf.mxu1  ;;  %v4572_v33 = vadd.f32 %v4571_v61, %v4554_v47 }
 0x2a0   : > { %v4556_v32 = vadd.f32 %v4555_v45, %v4538_v25 }
 0x2a1   : > { %v4590_v38 = vadd.f32 %v4589_v31, %v4572_v33 }
 0x2a2   : > { %v4540_v63 = vpop.f32.mrf.mxu0 }
 0x2a3   : > { %v4541_v3 = vadd.f32 %v4540_v63, %v4523_v17  ;;  %v349_v17 = vld [vmem:[#allocation2 + $0x18] sm:$0xff] }
 0x2a5   : > { %v4591_v29 = vpop.f32.mrf.mxu3 }
 0x2a6   : > { %v4573_v27 = vpop.f32.mrf.mxu2 }
 0x2a7   : > { %v4558_v35 = vpop.f32.mrf.mxu1  ;;  %v4574_v23 = vadd.f32 %v4573_v27, %v4556_v32 }
 0x2a8   : > { %v4559_v62 = vadd.f32 %v4558_v35, %v4541_v3  ;;  %v353_v35 = vld [vmem:[#allocation2 + $0x38] sm:$0xff] }
 0x2a9   : > { %v4592_v14 = vadd.f32 %v4591_v29, %v4574_v23 }
 0x2aa   : > { %v4542_v26 = vpop.f32.mrf.mxu0 }
 0x2ae   : > { %v4576_v49 = vpop.f32.mrf.mxu2 }
 0x2af   : > { %v4594_v43 = vpop.f32.mrf.mxu3  ;;  %v4560_v34 = vpop.f32.mrf.mxu1  ;;  %v4577_v12 = vadd.f32 %v4576_v49, %v4559_v62 }
 0x2b1   : > { %v4595_v46 = vadd.f32 %v4594_v43, %v4577_v12 }
 0x2b3   : > { %v4607_v37 = vpop.f32.mrf.mxu0 }
 0x2b4   : > { %v4608_v7 = vadd.f32 %v4607_v37, %v4590_v38 }
 0x2b6   : > { %v4578_v36 = vpop.f32.mrf.mxu2 }
 0x2b7   : > { %v4596_v60 = vpop.f32.mrf.mxu3  ;;  %v4625_v41 = vpop.f32.mrf.mxu1 }
 0x2b8   : > { %v4626_v57 = vadd.f32 %v4625_v41, %v4608_v7 }
 0x2bb   : > { %v4609_v51 = vpop.f32.mrf.mxu0 }
 0x2bc   : > { %v4610_v11 = vadd.f32 %v4609_v51, %v4592_v14 }
 0x2be   : > { %v4643_v50 = vpop.f32.mrf.mxu2 }
 0x2bf   : > { %v4661_v42 = vpop.f32.mrf.mxu3  ;;  %v4627_v16 = vpop.f32.mrf.mxu1  ;;  %v4644_v4 = vadd.f32 %v4643_v50, %v4626_v57 }
 0x2c0   : > { %v4628_v9 = vadd.f32 %v4627_v16, %v4610_v11 }
 0x2c1   : > { %v4662_v30 = vadd.f32 %v4661_v42, %v4644_v4  ;;  %v357_v42 = vld [vmem:[#allocation2 + $0x40] sm:$0x3] }
 0x2c3   : > { %v4612_v28 = vpop.f32.mrf.mxu0 }
 0x2c4   : > { %v4613_v18 = vadd.f32 %v4612_v28, %v4595_v46 }
 0x2c6   : > { %v4645_v22 = vpop.f32.mrf.mxu2 }
 0x2c7   : > { %v4663_v48 = vpop.f32.mrf.mxu3  ;;  %v4630_v53 = vpop.f32.mrf.mxu1  ;;  %v4646_v8 = vadd.f32 %v4645_v22, %v4628_v9 }
 0x2c8   : > { %v4631_v1 = vadd.f32 %v4630_v53, %v4613_v18 }
 0x2c9   : > { %v4664_v5 = vadd.f32 %v4663_v48, %v4646_v8 }
 0x2cb   : > { %v4614_v54 = vpop.f32.mrf.mxu0 }
 0x2ce   : > { %v4648_v19 = vpop.f32.mrf.mxu2 }
 0x2cf   : > { %v4666_v40 = vpop.f32.mrf.mxu3  ;;  %v4632_v2 = vpop.f32.mrf.mxu1  ;;  %v4649_v61 = vadd.f32 %v4648_v19, %v4631_v1 }
 0x2d1   : > { %v4667_v27 = vadd.f32 %v4666_v40, %v4649_v61 }
 0x2d3   : > { %v4679_v24 = vpop.f32.mrf.mxu0 }
 0x2d4   : > { %v4680_v56 = vadd.f32 %v4679_v24, %v4662_v30 }
 0x2d6   : > { %v4650_v0 = vpop.f32.mrf.mxu2 }
 0x2d7   : > { %v4668_v39 = vpop.f32.mrf.mxu3  ;;  %v4697_v20 = vpop.f32.mrf.mxu1 }
 0x2d8   : > { %v4698_v55 = vadd.f32 %v4697_v20, %v4680_v56 }
 0x2db   : > { %v4681_v10 = vpop.f32.mrf.mxu0 }
 0x2dc   : > { %v4682_v6 = vadd.f32 %v4681_v10, %v4664_v5 }
 0x2de   : > { %v4715_v59 = vpop.f32.mrf.mxu2 }
 0x2df   : > { %v4716_v58 = vadd.f32 %v4715_v59, %v4698_v55  ;;  %v4733_v21 = vpop.f32.mrf.mxu3  ;;  %v4699_v44 = vpop.f32.mrf.mxu1 }
 0x2e0   : > { %v4700_v15 = vadd.f32 %v4699_v44, %v4682_v6 }
 0x2e1   : > { %v4734_v52 = vadd.f32 %v4733_v21, %v4716_v58 }
 0x2e3   : > { %v4745_v31 = vadd.f32 %v4734_v52, %v349_v17  ;;  %v4684_v49 = vpop.f32.mrf.mxu0 }
 0x2e4   : > { %v4685_v26 = vadd.f32 %v4684_v49, %v4667_v27 }
 0x2e5   : > { %4757 = vst [vmem:[#allocation2 + $0x18] sm:$0xff] %v4745_v31 }
 0x2e6   : > { %v4717_v45 = vpop.f32.mrf.mxu2 }
 0x2e7   : > { %v4718_v29 = vadd.f32 %v4717_v45, %v4700_v15  ;;  %v4735_v63 = vpop.f32.mrf.mxu3  ;;  %v4702_v34 = vpop.f32.mrf.mxu1 }
 0x2e8   : > { %v4703_v60 = vadd.f32 %v4702_v34, %v4685_v26 }
 0x2e9   : > { %v4736_v43 = vadd.f32 %v4735_v63, %v4718_v29 }
 0x2eb   : > { %v4749_v36 = vadd.f32 %v4736_v43, %v353_v35  ;;  %v4686_v51 = vpop.f32.mrf.mxu0 }
 0x2ed   : > { %4761 = vst [vmem:[#allocation2 + $0x38] sm:$0xff] %v4749_v36 }
 0x2ee   : > { %v4720_v37 = vpop.f32.mrf.mxu2 }
 0x2ef   : > { %v4721_v41 = vadd.f32 %v4720_v37, %v4703_v60  ;;  %v4738_v50 = vpop.f32.mrf.mxu3  ;;  %v4704_v16 = vpop.f32.mrf.mxu1 }
 0x2f1   : > { %v4739_v13 = vadd.f32 %v4738_v50, %v4721_v41 }
 0x2f3   : > { %v4753_v47 = vadd.f32 %v4739_v13, %v357_v42  ;;  %4769 = sbr.rel (%p7448_p10) target bundleno = 1013 (0x3f5), region = 75 }
 0x2f5   : > { %4765 = vst [vmem:[#allocation2 + $0x40] sm:$0x3] %v4753_v47 }
 0x2f6   : > { %v4722_v22 = vpop.f32.mrf.mxu2 }
 0x2f7   : > { %v4740_v33 = vpop.f32.mrf.mxu3 }
 0x2f8   : > { %v4770_v48 = vld [vmem:[#allocation2 + $0x30] sm:$0xff]  ;;  %v4771_v28 = vld [vmem:[#allocation2] sm:$0xff]  ;;  %v4772_v25 = vld [vmem:[#allocation2 + $0x58] sm:$0xff]  ;;  %vm4783_vm0 = vcmask 1041408  }
 0x2f9   : > { %v4773_v53 = vld [vmem:[#allocation2 + $0x18] sm:$0xff]  ;;  %v4774_v38 = vld [vmem:[#allocation2 + $0x50] sm:$0xff]  ;;  %v4775_v32 = vld [vmem:[#allocation2 + $0x20] sm:$0xff] }
 0x2fa   : > { %v4776_v7 = vld [vmem:[#allocation2 + $0x8] sm:$0xff]  ;;  %v4777_v19 = vld [vmem:[#allocation2 + $0x38] sm:$0xff]  ;;  %v4782_v40 = vadd.f32 %v4774_v38, %v4770_v48  ;;  %v4792_v54 = vadd.f32 %v4775_v32, %v4771_v28  ;;  %v4780_v57 = vld [vmem:[#allocation2 + $0x10] sm:$0x3] }
 0x2fb   : > { %v4778_v23 = vld [vmem:[#allocation2 + $0x28] sm:$0x3]  ;;  %v4801_v14 = vadd.f32 %v4776_v7, %v4772_v25  ;;  %v4810_v4 = vadd.f32 %v4777_v19, %v4773_v53  ;;  %v4802_v0 = vsel %vm4783_vm0, %v4780_v57, 0.0 }
 0x2fc   : > { %v4779_v3 = vld [vmem:[#allocation2 + $0x48] sm:$0x3]  ;;  %v4781_v2 = vld [vmem:[#allocation2 + $0x40] sm:$0x3]  ;;  %v4784_v62 = vsel %vm4783_vm0, %v4778_v23, 0.0 }
 0x2fd   : > { %v4793_v11 = vsel %vm4783_vm0, %v4779_v3, 0.0  ;;  %v4811_v12 = vsel %vm4783_vm0, %v4781_v2, 0.0  ;;  %v4785_v30 = vadd.f32 %v4784_v62, %v4782_v40  ;;  %v4803_v24 = vadd.f32 %v4802_v0, %v4801_v14 }
 0x2fe   : > { %v4794_v39 = vadd.f32 %v4793_v11, %v4792_v54  ;;  %v4812_v9 = vadd.f32 %v4811_v12, %v4810_v4 }
 0x2ff   : > { %v4786_v56 = vrot.slane %v4785_v30, 4  ;;  %v4804_v46 = vrot.slane %v4803_v24, 4 }
 0x300   : > { %v4795_v20 = vrot.slane %v4794_v39, 4  ;;  %v4813_v8 = vrot.slane %v4812_v9, 4 }
 0x301   : > { %v4787_v18 = vadd.f32 %v4786_v56, %v4785_v30  ;;  %v4805_v59 = vadd.f32 %v4804_v46, %v4803_v24 }
 0x302   : > { %v4796_v55 = vadd.f32 %v4795_v20, %v4794_v39  ;;  %v4814_v5 = vadd.f32 %v4813_v8, %v4812_v9 }
 0x303   : > { %v4788_v58 = vrot.slane %v4787_v18, 2  ;;  %v4806_v17 = vrot.slane %v4805_v59, 2 }
 0x304   : > { %v4797_v21 = vrot.slane %v4796_v55, 2  ;;  %v4815_v10 = vrot.slane %v4814_v5, 2 }
 0x305   : > { %v4789_v1 = vadd.f32 %v4788_v58, %v4787_v18  ;;  %v4807_v6 = vadd.f32 %v4806_v17, %v4805_v59 }
 0x306   : > { %v4798_v52 = vadd.f32 %v4797_v21, %v4796_v55  ;;  %v4816_v44 = vadd.f32 %v4815_v10, %v4814_v5 }
 0x307   : > { %v4790_v61 = vrot.slane %v4789_v1, 1  ;;  %v4808_v15 = vrot.slane %v4807_v6, 1 }
 0x308   : > { %v4799_v31 = vrot.slane %v4798_v52, 1  ;;  %v4817_v45 = vrot.slane %v4816_v44, 1 }
 0x309   : > { %v4791_v27 = vadd.f32 %v4790_v61, %v4789_v1  ;;  %v4809_v63 = vadd.f32 %v4808_v15, %v4807_v6 }
 0x30a   : > { %v4800_v29 = vadd.f32 %v4799_v31, %v4798_v52  ;;  %v4818_v35 = vadd.f32 %v4817_v45, %v4816_v44 }
 0x30b   : > { %v4819_v49 = vmul.f32 0.055555556, %v4791_v27  ;;  %v4821_v26 = vmul.f32 0.055555556, %v4809_v63 }
 0x30c   : > { %v4820_v43 = vmul.f32 0.055555556, %v4800_v29  ;;  %v4822_v34 = vmul.f32 0.055555556, %v4818_v35 }
 0x30d   : > { %v9710_v36 = vsub.f32 %v4770_v48, %v4819_v49  ;;  %v9714_v37 = vsub.f32 %v4772_v25, %v4821_v26  ;;  %v9716_v41 = vsub.f32 %v4774_v38, %v4819_v49  ;;  %v9722_v51 = vsub.f32 %v4776_v7, %v4821_v26 }
 0x30e   : > { %v9712_v60 = vsub.f32 %v4771_v28, %v4820_v43  ;;  %v9718_v50 = vsub.f32 %v4773_v53, %v4822_v34  ;;  %v9720_v42 = vsub.f32 %v4775_v32, %v4820_v43  ;;  %v9724_v13 = vsub.f32 %v4777_v19, %v4822_v34 }
 0x30f   : > { %v9726_v16 = vsub.f32 %v4778_v23, %v4819_v49  ;;  %v9728_v47 = vsub.f32 %v4779_v3, %v4820_v43  ;;  %v9730_v22 = vsub.f32 %v4780_v57, %v4821_v26  ;;  %v9732_v33 = vsub.f32 %v4781_v2, %v4822_v34 }
 0x310   : > { %v4835_v48 = vmul.f32 %v9710_v36, %v9710_v36  ;;  %v4836_v28 = vmul.f32 %v9712_v60, %v9712_v60  ;;  %v4837_v25 = vmul.f32 %v9714_v37, %v9714_v37  ;;  %v4838_v53 = vmul.f32 %v9718_v50, %v9718_v50 }
 0x311   : > { %v4839_v38 = vmul.f32 %v9716_v41, %v9716_v41  ;;  %v4840_v32 = vmul.f32 %v9720_v42, %v9720_v42  ;;  %v4841_v7 = vmul.f32 %v9722_v51, %v9722_v51  ;;  %v4842_v19 = vmul.f32 %v9724_v13, %v9724_v13 }
 0x312   : > { %v4843_v23 = vmul.f32 %v9726_v16, %v9726_v16  ;;  %v4844_v40 = vmul.f32 %v9728_v47, %v9728_v47  ;;  %v4845_v54 = vmul.f32 %v9730_v22, %v9730_v22  ;;  %v4846_v3 = vmul.f32 %v9732_v33, %v9732_v33 }
 0x313   : > { %v4847_v57 = vadd.f32 %v4839_v38, %v4835_v48  ;;  %v4856_v2 = vadd.f32 %v4840_v32, %v4836_v28  ;;  %v4865_v14 = vadd.f32 %v4841_v7, %v4837_v25  ;;  %v4874_v4 = vadd.f32 %v4842_v19, %v4838_v53  ;;  %v4943_v19 = vld [vmem:[%s10097_s2] sm:$0xf] }
 0x314   : > { %v4848_v62 = vsel %vm4783_vm0, %v4843_v23, 0.0  ;;  %v4857_v11 = vsel %vm4783_vm0, %v4844_v40, 0.0  ;;  %v4866_v0 = vsel %vm4783_vm0, %v4845_v54, 0.0  ;;  %v4875_v12 = vsel %vm4783_vm0, %v4846_v3, 0.0 }
 0x315   : > { %v4849_v30 = vadd.f32 %v4848_v62, %v4847_v57  ;;  %v4858_v39 = vadd.f32 %v4857_v11, %v4856_v2  ;;  %v4867_v24 = vadd.f32 %v4866_v0, %v4865_v14  ;;  %v4876_v9 = vadd.f32 %v4875_v12, %v4874_v4 }
 0x316   : > { %v9765_v4 = vperm.slane %v4943_v19, 0  ;;  %v9767_v62 = vperm.slane %v4943_v19, 1 }
 0x317   : > { %v4850_v56 = vrot.slane %v4849_v30, 4  ;;  %v4859_v20 = vrot.slane %v4858_v39, 4  ;;  %v4868_v46 = vrot.slane %v4867_v24, 4  ;;  %v4877_v8 = vrot.slane %v4876_v9, 4 }
 0x319   : > { %v4851_v18 = vadd.f32 %v4850_v56, %v4849_v30  ;;  %v4860_v55 = vadd.f32 %v4859_v20, %v4858_v39  ;;  %v4869_v59 = vadd.f32 %v4868_v46, %v4867_v24  ;;  %v4878_v5 = vadd.f32 %v4877_v8, %v4876_v9  ;;  %v4965_v9 = vld [vmem:[%s10098_s3] sm:$0xf] }
 0x31b   : > { %v4852_v58 = vrot.slane %v4851_v18, 2  ;;  %v4861_v21 = vrot.slane %v4860_v55, 2  ;;  %v4870_v17 = vrot.slane %v4869_v59, 2  ;;  %v4879_v10 = vrot.slane %v4878_v5, 2 }
 0x31d   : > { %v4853_v1 = vadd.f32 %v4852_v58, %v4851_v18  ;;  %v4862_v52 = vadd.f32 %v4861_v21, %v4860_v55  ;;  %v4871_v6 = vadd.f32 %v4870_v17, %v4869_v59  ;;  %v4880_v44 = vadd.f32 %v4879_v10, %v4878_v5 }
 0x31e   : > { %v9772_v18 = vperm.slane %v4943_v19, 2  ;;  %v9774_v55 = vperm.slane %v4943_v19, 3  ;;  %v9776_v58 = vperm.slane %v4965_v9, 0  ;;  %v9778_v21 = vperm.slane %v4965_v9, 1  ;;  %v7454_v19 = vld [vmem:[%s10099_s4 + $0x88] sm:$0xff] }
 0x31f   : > { %v4854_v61 = vrot.slane %v4853_v1, 1  ;;  %v4863_v31 = vrot.slane %v4862_v52, 1  ;;  %v4872_v15 = vrot.slane %v4871_v6, 1  ;;  %v4881_v45 = vrot.slane %v4880_v44, 1 }
 0x321   : > { %v4855_v27 = vadd.f32 %v4854_v61, %v4853_v1  ;;  %v4864_v29 = vadd.f32 %v4863_v31, %v4862_v52  ;;  %v4873_v63 = vadd.f32 %v4872_v15, %v4871_v6  ;;  %v4882_v35 = vadd.f32 %v4881_v45, %v4880_v44 }
 0x322   : > { %v9780_v1 = vperm.slane %v4965_v9, 2  ;;  %v9782_v52 = vperm.slane %v4965_v9, 3 }
 0x323   : > { %v4883_v49 = vmul.f32 0.055555556, %v4855_v27  ;;  %v4884_v43 = vmul.f32 0.055555556, %v4864_v29  ;;  %v4885_v26 = vmul.f32 0.055555556, %v4873_v63 }
 0x324   : > { %v4886_v34 = vmul.f32 0.055555556, %v4882_v35 }
 0x325   : > { %v4887_v48 = vadd.f32 1e-05, %v4883_v49  ;;  %v4888_v28 = vadd.f32 1e-05, %v4884_v43  ;;  %v4889_v25 = vadd.f32 1e-05, %v4885_v26 }
 0x326   : > { %v4890_v53 = vadd.f32 1e-05, %v4886_v34 }
 0x327   : > { %8044 = vrsqrt.f32 %v4887_v48  ;;  %vm4897_vm1 = vweird.f32 %v4887_v48  ;;  %vm4907_vm3 = vweird.f32 %v4888_v28  ;;  %vm4917_vm5 = vweird.f32 %v4889_v25 }
 0x328   : > { %8046 = vrsqrt.f32 %v4888_v28  ;;  %vm4927_vm8 = vweird.f32 %v4890_v53 }
 0x329   : > { %8048 = vrsqrt.f32 %v4889_v25 }
 0x32a   : > { %8050 = vrsqrt.f32 %v4890_v53 }
 0x32d   : > { %v8045_v38 = vpop.eup %8044 }
 0x32e   : > { %v8047_v32 = vpop.eup %8046  ;;  %v4892_v7 = vmul.f32 %v8045_v38, %v4887_v48  ;;  %vm4898_vm2 = vweird.f32 %v8045_v38 }
 0x32f   : > { %v8049_v23 = vpop.eup %8048  ;;  %v4902_v40 = vmul.f32 %v8047_v32, %v4888_v28  ;;  %vm4908_vm4 = vweird.f32 %v8047_v32  ;;  %vm4899_vm7 = vmor %vm4897_vm1, %vm4898_vm2 }
 0x330   : > { %v8051_v54 = vpop.eup %8050  ;;  %v4893_v3 = vmul.f32 %v8045_v38, %v4892_v7  ;;  %v4912_v57 = vmul.f32 %v8049_v23, %v4889_v25  ;;  %vm4918_vm6 = vweird.f32 %v8049_v23  ;;  %vm4909_vm10 = vmor %vm4907_vm3, %vm4908_vm4 }
 0x331   : > { %v4903_v2 = vmul.f32 %v8047_v32, %v4902_v40  ;;  %v4922_v14 = vmul.f32 %v8051_v54, %v4890_v53  ;;  %vm4928_vm9 = vweird.f32 %v8051_v54  ;;  %vm4919_vm11 = vmor %vm4917_vm5, %vm4918_vm6  ;;  %v7453_v53 = vld [vmem:[%s10099_s4 + $0x80] sm:$0xff]  ;;  %v5028_v40 = vld [vmem:[%s10099_s4 + $0x28] sm:$0xff] }
 0x332   : > { %v4894_v11 = vmul.f32 0.5, %v4893_v3  ;;  %v4913_v0 = vmul.f32 %v8049_v23, %v4912_v57  ;;  %vm4929_vm12 = vmor %vm4927_vm8, %vm4928_vm9 }
 0x333   : > { %v4904_v12 = vmul.f32 0.5, %v4903_v2  ;;  %v4923_v30 = vmul.f32 %v8051_v54, %v4922_v14  ;;  %v7455_v2 = vld [vmem:[%s10099_s4 + $0x90] sm:$0xff] }
 0x334   : > { %v4895_v39 = vsub.f32 1.5, %v4894_v11  ;;  %v4914_v24 = vmul.f32 0.5, %v4913_v0  ;;  %v5029_v14 = vld [vmem:[%s10099_s4 + $0x30] sm:$0xff] }
 0x335   : > { %v4905_v56 = vsub.f32 1.5, %v4904_v12  ;;  %v4924_v20 = vmul.f32 0.5, %v4923_v30  ;;  %v7456_v30 = vld [vmem:[%s10099_s4 + $0x98] sm:$0xff] }
 0x336   : > { %v4896_v46 = vmul.f32 %v8045_v38, %v4895_v39  ;;  %v4915_v8 = vsub.f32 1.5, %v4914_v24  ;;  %v5030_v24 = vld [vmem:[%s10099_s4 + $0x38] sm:$0xff] }
 0x337   : > { %v4906_v59 = vmul.f32 %v8047_v32, %v4905_v56  ;;  %v4925_v5 = vsub.f32 1.5, %v4924_v20 }
 0x338   : > { %v4900_v17 = vsel %vm4899_vm7, %v8045_v38, %v4896_v46  ;;  %v4916_v10 = vmul.f32 %v8049_v23, %v4915_v8 }
 0x339   : > { %v9784_v6 = vsel %vm4909_vm10, %v8047_v32, %v4906_v59  ;;  %v4926_v44 = vmul.f32 %v8051_v54, %v4925_v5  ;;  %v4935_v61 = vmul.f32 %v4900_v17, %v9716_v41  ;;  %v4931_v31 = vmul.f32 %v4900_v17, %v9710_v36 }
 0x33a   : > { %v9788_v15 = vsel %vm4919_vm11, %v8049_v23, %v4916_v10  ;;  %v4936_v45 = vmul.f32 %v9784_v6, %v9720_v42  ;;  %v4932_v27 = vmul.f32 %v9784_v6, %v9712_v60  ;;  %v9795_v29 = vmul.f32 %v4900_v17, %v9726_v16  ;;  %v5027_v23 = vld [vmem:[%s10099_s4 + $0x20] sm:$0xff] }
 0x33b   : > { %v9797_v63 = vsel %vm4929_vm12, %v8051_v54, %v4926_v44  ;;  %v4937_v35 = vmul.f32 %v9788_v15, %v9722_v51  ;;  %v4957_v41 = vmul.f32 %v9765_v4, %v4935_v61  ;;  %v4933_v36 = vmul.f32 %v9788_v15, %v9714_v37 }
 0x33c   : > { %v4938_v49 = vmul.f32 %v9797_v63, %v9724_v13  ;;  %v4958_v42 = vmul.f32 %v9767_v62, %v4936_v45  ;;  %v4934_v60 = vmul.f32 %v9797_v63, %v9718_v50  ;;  %v4953_v16 = vmul.f32 %v9765_v4, %v4931_v31  ;;  %v5023_v45 = vld [vmem:[%s10099_s4] sm:$0xff] }
 0x33d   : > { %v4959_v43 = vmul.f32 %v9772_v18, %v4937_v35  ;;  %v4979_v26 = vadd.f32 %v9776_v58, %v4957_v41  ;;  %v4954_v51 = vmul.f32 %v9767_v62, %v4932_v27  ;;  %v4955_v34 = vmul.f32 %v9772_v18, %v4933_v36 }
 0x33e   : > { %v4960_v37 = vmul.f32 %v9774_v55, %v4938_v49  ;;  %v4980_v48 = vadd.f32 %v9778_v21, %v4958_v42  ;;  %v4956_v13 = vmul.f32 %v9774_v55, %v4934_v60  ;;  %v4975_v28 = vadd.f32 %v9776_v58, %v4953_v16  ;;  %v5024_v49 = vld [vmem:[%s10099_s4 + $0x8] sm:$0xff]  ;;  %v5025_v42 = vld [vmem:[%s10099_s4 + $0x10] sm:$0xff] }
 0x33f   : > { %v4981_v50 = vadd.f32 %v9780_v1, %v4959_v43  ;;  %vm4991_vm13 = vcmp.gt.f32.partialorder %v4979_v26, 0.0  ;;  %v5003_v25 = vmul.f32 0.2, %v4979_v26  ;;  %v4976_v38 = vadd.f32 %v9778_v21, %v4954_v51  ;;  %v5026_v43 = vld [vmem:[%s10099_s4 + $0x18] sm:$0xff] }
 0x340   : > { %v4982_v32 = vadd.f32 %v9782_v52, %v4960_v37  ;;  %vm4992_vm14 = vcmp.gt.f32.partialorder %v4980_v48, 0.0  ;;  %v5004_v7 = vmul.f32 0.2, %v4980_v48  ;;  %v4977_v54 = vadd.f32 %v9780_v1, %v4955_v34 }
 0x341   : > { %vm4993_vm15 = vcmp.gt.f32.partialorder %v4981_v50, 0.0  ;;  %v5005_v3 = vmul.f32 0.2, %v4981_v50  ;;  %v9834_v57 = vsel %vm4991_vm13, %v4979_v26, %v5003_v25  ;;  %v4978_v11 = vadd.f32 %v9782_v52, %v4956_v13  ;;  %v7467_v25 = vld [vmem:[%s10099_s4 + $0xf0] sm:$0xff] }
 0x342   : > { %vm4994_vm1 = vcmp.gt.f32.partialorder %v4982_v32, 0.0  ;;  %v5006_v0 = vmul.f32 0.2, %v4982_v32  ;;  %v9843_v12 = vsel %vm4992_vm14, %v4980_v48, %v5004_v7  ;;  %v5083_v39 = vmul.f32 %v7453_v53, %v9834_v57  ;;  %v7468_v7 = vld [vmem:[%s10099_s4 + $0xf8] sm:$0xff] }
 0x343   : > { %v9852_v9 = vsel %vm4993_vm15, %v4981_v50, %v5005_v3  ;;  %v5084_v56 = vmul.f32 %v7454_v19, %v9843_v12  ;;  %v5039_v20 = vmul.f32 %v5027_v23, %v9834_v57  ;;  %v5040_v46 = vmul.f32 %v5028_v40, %v9843_v12 }
 0x344   : > { %v9857_v8 = vsel %vm4994_vm1, %v4982_v32, %v5006_v0  ;;  %v5085_v59 = vmul.f32 %v7455_v2, %v9852_v9  ;;  %v5041_v5 = vmul.f32 %v5029_v14, %v9852_v9  ;;  %vm4987_vm2 = vcmp.gt.f32.partialorder %v4975_v28, 0.0 }
 0x345   : > { %v5086_v17 = vmul.f32 %v7456_v30, %v9857_v8  ;;  %v5096_v10 = vadd.f32 %v5084_v56, %v5083_v39  ;;  %v5042_v44 = vmul.f32 %v5030_v24, %v9857_v8  ;;  %v5052_v61 = vadd.f32 %v5040_v46, %v5039_v20  ;;  %v7449_v30 = vld [vmem:[%s10099_s4 + $0x60] sm:$0xff] }
 0x346   : > { %vm4988_vm3 = vcmp.gt.f32.partialorder %v4976_v38, 0.0  ;;  %vm4989_vm4 = vcmp.gt.f32.partialorder %v4977_v54, 0.0  ;;  %vm4990_vm5 = vcmp.gt.f32.partialorder %v4978_v11, 0.0  ;;  %v4999_v31 = vmul.f32 0.2, %v4975_v28 }
 0x347   : > { %v5097_v27 = vadd.f32 %v5096_v10, %v5085_v59  ;;  %v5053_v35 = vadd.f32 %v5052_v61, %v5041_v5  ;;  %v5000_v41 = vmul.f32 0.2, %v4976_v38  ;;  %v5001_v36 = vmul.f32 0.2, %v4977_v54  ;;  %v7451_v10 = vld [vmem:[%s10099_s4 + $0x70] sm:$0xff] }
 0x348   : > { %v5002_v60 = vmul.f32 0.2, %v4978_v11  ;;  %v9873_v16 = vsel %vm4987_vm2, %v4975_v28, %v4999_v31  ;;  %v4940_v26 = vmul.f32 %v9784_v6, %v9728_v47  ;;  %v4941_v51 = vmul.f32 %v9788_v15, %v9730_v22  ;;  %v7465_v28 = vld [vmem:[%s10099_s4 + $0xe0] sm:$0xff]  ;;  %v7466_v15 = vld [vmem:[%s10099_s4 + $0xe8] sm:$0xff] }
 0x349   : > { %v5098_v34 = vadd.f32 %v5097_v27, %v5086_v17  ;;  %v5054_v37 = vadd.f32 %v5053_v35, %v5042_v44  ;;  %v9883_v48 = vsel %vm4988_vm3, %v4976_v38, %v5000_v41  ;;  %v9886_v13 = vsel %vm4989_vm4, %v4977_v54, %v5001_v36  ;;  %v7452_v44 = vld [vmem:[%s10099_s4 + $0x78] sm:$0xff]  ;;  %v7469_v41 = vld [vmem:[%s10099_s4 + $0x100] sm:$0x3]  ;;  %v7470_v36 = vld [vmem:[%s10099_s4 + $0x108] sm:$0x3] }
 0x34a   : > { %v9892_v50 = vsel %vm4990_vm5, %v4978_v11, %v5002_v60  ;;  %v5035_v47 = vmul.f32 %v5023_v45, %v9873_v16  ;;  %v5036_v6 = vmul.f32 %v5024_v49, %v9883_v48  ;;  %v5037_v22 = vmul.f32 %v5025_v42, %v9886_v13 }
 0x34b   : > { %5099 = vadd.xlane.f32.xlu1 %v5098_v34  ;;  %5055 = vadd.xlane.f32.xlu0 %v5054_v37  ;;  %v5038_v53 = vmul.f32 %v5026_v43, %v9892_v50  ;;  %v4942_v38 = vmul.f32 %v9797_v63, %v9732_v33  ;;  %v4961_v32 = vmul.f32 %v9765_v4, %v9795_v29  ;;  %vm5202_vm10 = vcmask 15360  }
 0x34c   : > { %v5047_v19 = vadd.f32 %v5036_v6, %v5035_v47  ;;  %v4962_v23 = vmul.f32 %v9767_v62, %v4940_v26  ;;  %v4963_v40 = vmul.f32 %v9772_v18, %v4941_v51  ;;  %v5127_v54 = vmul.f32 %v7465_v28, %v9834_v57  ;;  %v7457_v62 = vld [vmem:[%s10099_s4 + $0xa0] sm:$0x3]  ;;  %v7458_v18 = vld [vmem:[%s10099_s4 + $0xa8] sm:$0x3]  ;;  %v7471_v26 = vld [vmem:[%s10099_s4 + $0x110] sm:$0x3] }
 0x34d   : > { %v4964_v3 = vmul.f32 %v9774_v55, %v4942_v38  ;;  %v4983_v2 = vadd.f32 %v9776_v58, %v4961_v32  ;;  %v5128_v33 = vmul.f32 %v7466_v15, %v9843_v12  ;;  %v5129_v63 = vmul.f32 %v7467_v25, %v9852_v9  ;;  %v7472_v51 = vld [vmem:[%s10099_s4 + $0x118] sm:$0x3]  ;;  %v5031_v6 = vld [vmem:[%s10099_s4 + $0x40] sm:$0x3] }
 0x34e   : > { %v5048_v4 = vadd.f32 %v5047_v19, %v5037_v22  ;;  %v4984_v29 = vadd.f32 %v9778_v21, %v4962_v23  ;;  %v4985_v14 = vadd.f32 %v9780_v1, %v4963_v40  ;;  %v5130_v55 = vmul.f32 %v7468_v7, %v9857_v8  ;;  %v7459_v21 = vld [vmem:[%s10099_s4 + $0xb0] sm:$0x3]  ;;  %v7460_v1 = vld [vmem:[%s10099_s4 + $0xb8] sm:$0x3]  ;;  %v5032_v22 = vld [vmem:[%s10099_s4 + $0x48] sm:$0x3] }
 0x34f   : > { %v4986_v58 = vadd.f32 %v9782_v52, %v4964_v3  ;;  %vm4995_vm6 = vcmp.gt.f32.partialorder %v4983_v2, 0.0  ;;  %v5007_v11 = vmul.f32 0.2, %v4983_v2  ;;  %v5140_v0 = vadd.f32 %v5128_v33, %v5127_v54  ;;  %v7450_v52 = vld [vmem:[%s10099_s4 + $0x68] sm:$0xff]  ;;  %v5033_v40 = vld [vmem:[%s10099_s4 + $0x50] sm:$0x3] }
 0x350   : > { %v5049_v39 = vadd.f32 %v5048_v4, %v5038_v53  ;;  %vm4996_vm7 = vcmp.gt.f32.partialorder %v4984_v29, 0.0  ;;  %vm4997_vm8 = vcmp.gt.f32.partialorder %v4985_v14, 0.0  ;;  %v5008_v24 = vmul.f32 0.2, %v4984_v29  ;;  %v5034_v54 = vld [vmem:[%s10099_s4 + $0x58] sm:$0x3] }
 0x351   : > { %vm4998_vm9 = vcmp.gt.f32.partialorder %v4986_v58, 0.0  ;;  %v5009_v56 = vmul.f32 0.2, %v4985_v14  ;;  %v5010_v20 = vmul.f32 0.2, %v4986_v58  ;;  %v9940_v46 = vsel %vm4995_vm6, %v4983_v2, %v5007_v11  ;;  %v7461_v4 = vld [vmem:[%s10099_s4 + $0xc0] sm:$0xff] }
 0x352   : > { %5050 = vadd.xlane.f32.xlu2 %v5049_v39  ;;  %v9942_v59 = vsel %vm4996_vm7, %v4984_v29, %v5008_v24  ;;  %v5087_v5 = vmul.f32 %v7457_v62, %v9940_v46  ;;  %v5141_v17 = vadd.f32 %v5140_v0, %v5129_v63  ;;  %v5079_v61 = vmul.f32 %v7449_v30, %v9873_v16  ;;  %v7462_v29 = vld [vmem:[%s10099_s4 + $0xc8] sm:$0xff]  ;;  %v7463_v0 = vld [vmem:[%s10099_s4 + $0xd0] sm:$0xff]  ;;  %v7464_v30 = vld [vmem:[%s10099_s4 + $0xd8] sm:$0xff] }
 0x353   : > { %v9952_v31 = vsel %vm4997_vm8, %v4985_v14, %v5009_v56  ;;  %v9954_v45 = vsel %vm4998_vm9, %v4986_v58, %v5010_v20  ;;  %v5088_v27 = vmul.f32 %v7458_v18, %v9942_v59  ;;  %v5080_v35 = vmul.f32 %v7450_v52, %v9883_v48  ;;  %v7481_v39 = vld [vmem:[%s10099_s4 + $0x160] sm:$0x3] }
 0x354   : > { %v5089_v49 = vmul.f32 %v7459_v21, %v9952_v31  ;;  %v5090_v42 = vmul.f32 %v7460_v1, %v9954_v45  ;;  %v5101_v60 = vsel %vm4783_vm0, %v5087_v5, 0.0  ;;  %v5142_v43 = vadd.f32 %v5141_v17, %v5130_v55  ;;  %v7482_v5 = vld [vmem:[%s10099_s4 + $0x168] sm:$0x3]  ;;  %v7483_v17 = vld [vmem:[%s10099_s4 + $0x170] sm:$0x3] }
 0x355   : > { %v5102_v34 = vsel %vm4783_vm0, %v5088_v27, 0.0  ;;  %v5081_v37 = vmul.f32 %v7451_v10, %v9886_v13  ;;  %v5082_v28 = vmul.f32 %v7452_v44, %v9892_v50  ;;  %v5091_v47 = vadd.f32 %v5080_v35, %v5079_v61  ;;  %v7477_v35 = vld [vmem:[%s10099_s4 + $0x140] sm:$0xff] }
 0x356   : > { %v5103_v15 = vadd.f32 %v5102_v34, %v5101_v60  ;;  %v5104_v25 = vsel %vm4783_vm0, %v5089_v49, 0.0  ;;  %v5106_v53 = vsel %vm4783_vm0, %v5090_v42, 0.0  ;;  %5143 = vadd.xlane.f32.xlu0 %v5142_v43  ;;  %v5131_v38 = vmul.f32 %v7469_v41, %v9940_v46  ;;  %v7484_v42 = vld [vmem:[%s10099_s4 + $0x178] sm:$0x3]  ;;  %v7478_v43 = vld [vmem:[%s10099_s4 + $0x148] sm:$0xff] }
 0x357   : > { %v5092_v32 = vadd.f32 %v5091_v47, %v5081_v37  ;;  %v5132_v7 = vmul.f32 %v7470_v36, %v9942_v59  ;;  %v5133_v19 = vmul.f32 %v7471_v26, %v9952_v31  ;;  %v5134_v23 = vmul.f32 %v7472_v51, %v9954_v45  ;;  %v7479_v37 = vld [vmem:[%s10099_s4 + $0x150] sm:$0xff] }
 0x358   : > { %v5105_v3 = vadd.f32 %v5104_v25, %v5103_v15  ;;  %v5145_v2 = vsel %vm4783_vm0, %v5131_v38, 0.0  ;;  %v5043_v33 = vmul.f32 %v5031_v6, %v9940_v46  ;;  %v5044_v63 = vmul.f32 %v5032_v22, %v9942_v59 }
 0x359   : > { %v5093_v14 = vadd.f32 %v5092_v32, %v5082_v28  ;;  %v5146_v62 = vsel %vm4783_vm0, %v5132_v7, 0.0  ;;  %v5148_v18 = vsel %vm4783_vm0, %v5133_v19, 0.0  ;;  %v5150_v55 = vsel %vm4783_vm0, %v5134_v23, 0.0  ;;  %v7475_v32 = vld [vmem:[%s10099_s4 + $0x130] sm:$0xff] }
 0x35a   : > { %v5107_v58 = vadd.f32 %v5106_v53, %v5105_v3  ;;  %v5147_v11 = vadd.f32 %v5146_v62, %v5145_v2  ;;  %v5045_v21 = vmul.f32 %v5033_v40, %v9952_v31  ;;  %v5046_v1 = vmul.f32 %v5034_v54, %v9954_v45  ;;  %v7476_v40 = vld [vmem:[%s10099_s4 + $0x138] sm:$0xff] }
 0x35b   : > { %5094 = vadd.xlane.f32.xlu2 %v5093_v14  ;;  %v5057_v24 = vsel %vm4783_vm0, %v5043_v33, 0.0  ;;  %v5058_v52 = vsel %vm4783_vm0, %v5044_v63, 0.0  ;;  %v5123_v56 = vmul.f32 %v7461_v4, %v9873_v16  ;;  %v5124_v20 = vmul.f32 %v7462_v29, %v9883_v48 }
 0x35c   : > { %5108 = vadd.xlane.f32.xlu1 %v5107_v58  ;;  %v5149_v10 = vadd.f32 %v5148_v18, %v5147_v11  ;;  %v5059_v44 = vadd.f32 %v5058_v52, %v5057_v24  ;;  %v5060_v61 = vsel %vm4783_vm0, %v5045_v21, 0.0  ;;  %v5062_v27 = vsel %vm4783_vm0, %v5046_v1, 0.0 }
 0x35d   : > { %v5125_v41 = vmul.f32 %v7463_v0, %v9886_v13  ;;  %v5126_v36 = vmul.f32 %v7464_v30, %v9892_v50  ;;  %v5135_v49 = vadd.f32 %v5124_v20, %v5123_v56  ;;  %v5175_v60 = vmul.f32 %v7481_v39, %v9940_v46  ;;  %v7480_v46 = vld [vmem:[%s10099_s4 + $0x158] sm:$0xff] }
 0x35e   : > { %v5061_v26 = vadd.f32 %v5060_v61, %v5059_v44  ;;  %v5176_v51 = vmul.f32 %v7482_v5, %v9942_v59  ;;  %v5177_v34 = vmul.f32 %v7483_v17, %v9952_v31  ;;  %v5151_v28 = vadd.f32 %v5150_v55, %v5149_v10  ;;  %v7473_v59 = vld [vmem:[%s10099_s4 + $0x120] sm:$0xff]  ;;  %v7474_v31 = vld [vmem:[%s10099_s4 + $0x128] sm:$0xff] }
 0x35f   : > { %v5136_v47 = vadd.f32 %v5135_v49, %v5125_v41  ;;  %v5189_v6 = vsel %vm4783_vm0, %v5175_v60, 0.0  ;;  %v5171_v22 = vmul.f32 %v7477_v35, %v9834_v57  ;;  %v5178_v25 = vmul.f32 %v7484_v42, %v9954_v45 }
 0x360   : > { %v5063_v15 = vadd.f32 %v5062_v27, %v5061_v26  ;;  %v5190_v53 = vsel %vm4783_vm0, %v5176_v51, 0.0  ;;  %v5172_v38 = vmul.f32 %v7478_v43, %v9843_v12  ;;  %v5192_v19 = vsel %vm4783_vm0, %v5177_v34, 0.0 }
 0x361   : > { %v5137_v57 = vadd.f32 %v5136_v47, %v5126_v36  ;;  %v5191_v7 = vadd.f32 %v5190_v53, %v5189_v6  ;;  %v5173_v23 = vmul.f32 %v7479_v37, %v9852_v9  ;;  %v5174_v45 = vmul.f32 %v7480_v46, %v9857_v8 }
 0x362   : > { %5064 = vadd.xlane.f32.xlu0 %v5063_v15  ;;  %v5184_v54 = vadd.f32 %v5172_v38, %v5171_v22  ;;  %v5167_v12 = vmul.f32 %v7473_v59, %v9873_v16  ;;  %v5168_v3 = vmul.f32 %v7474_v31, %v9883_v48  ;;  %v5169_v2 = vmul.f32 %v7475_v32, %v9886_v13 }
 0x363   : > { %5138 = vadd.xlane.f32.xlu2 %v5137_v57  ;;  %v5193_v33 = vadd.f32 %v5192_v19, %v5191_v7  ;;  %v5170_v9 = vmul.f32 %v7476_v40, %v9892_v50  ;;  %v5194_v29 = vsel %vm4783_vm0, %v5178_v25, 0.0  ;;  %v5210_v21 = vlaneseq }
 0x364   : > { %5152 = vadd.xlane.f32.xlu1 %v5151_v28  ;;  %v5185_v63 = vadd.f32 %v5184_v54, %v5173_v23  ;;  %v5179_v4 = vadd.f32 %v5168_v3, %v5167_v12  ;;  %vm5198_vm0 = vcmask 7168   ;;  %vm5206_vm11 = vcmask 23552  }
 0x365   : > { %v5195_v18 = vadd.f32 %v5194_v29, %v5193_v33  ;;  %v5211_v1 = vshrl.u32 %v5210_v21, 7  ;;  %vm5232_vm14 = vcmask 31744   ;;  %vm5236_vm15 = vcmask 25600  }
 0x366   : > { %v5186_v14 = vadd.f32 %v5185_v63, %v5174_v45  ;;  %v5180_v62 = vadd.f32 %v5179_v4, %v5169_v2  ;;  %vm5275_vm2 = vcmask 1040384   ;;  %v5277_v7 = vstv %s5274_s11 }
 0x367   : > { %v5212_v39 = vadd.s32 8, %v5211_v1  ;;  %v5213_v24 = vadd.s32 16, %v5211_v1 }
 0x368   : > { %v5181_v8 = vadd.f32 %v5180_v62, %v5170_v9 }
 0x369   : > { %vm5218_vm12 = vcmp.lt.s32.totalorder %v5212_v39, 9  ;;  %vm5246_vm13 = vcmp.ge.s32.totalorder %v5212_v39, 9  ;;  %vm5250_vm1 = vcmp.lt.s32.totalorder %v5213_v24, 18 }
 0x36a   : > { %5187 = vadd.xlane.f32.xlu0 %v5186_v14 }
 0x36b   : > { %5182 = vadd.xlane.f32.xlu2 %v5181_v8 }
 0x36c   : > { %5196 = vadd.xlane.f32.xlu1 %v5195_v18 }
 0x3be   : > { %v5056_v16 = vpop.xlane.xlu0 %5055  ;;  %v5100_v48 = vpop.xlane.xlu1 %5099 }
 0x3bf   : > { %v5200_v52 = vsel %vm5198_vm0, %v5056_v16, %v5100_v48 }
 0x3c5   : > { %v5051_v55 = vpop.xlane.xlu2 %5050 }
 0x3c9   : > { %v5144_v58 = vpop.xlane.xlu0 %5143 }
 0x3ca   : > { %v5204_v20 = vsel %vm5202_vm10, %v5200_v52, %v5144_v58 }
 0x3ce   : > { %v5095_v13 = vpop.xlane.xlu2 %5094 }
 0x3cf   : > { %v5109_v11 = vpop.xlane.xlu1 %5108  ;;  %v5199_v5 = vsel %vm5198_vm0, %v5051_v55, %v5095_v13 }
 0x3d5   : > { %v5065_v0 = vpop.xlane.xlu0 %5064 }
 0x3d6   : > { %v5139_v50 = vpop.xlane.xlu2 %5138  ;;  %v5201_v56 = vsel %vm5198_vm0, %v5065_v0, %v5109_v11 }
 0x3d7   : > { %v5153_v30 = vpop.xlane.xlu1 %5152  ;;  %v5203_v10 = vsel %vm5202_vm10, %v5199_v5, %v5139_v50 }
 0x3d8   : > { %v5205_v35 = vsel %vm5202_vm10, %v5201_v56, %v5153_v30 }
 0x3dd   : > { %v5188_v17 = vpop.xlane.xlu0 %5187 }
 0x3de   : > { %v5208_v44 = vsel %vm5206_vm11, %v5204_v20, %v5188_v17  ;;  %v5183_v61 = vpop.xlane.xlu2 %5182 }
 0x3df   : > { %v5197_v27 = vpop.xlane.xlu1 %5196  ;;  %v5230_v41 = vsel %vm5218_vm12, %v5208_v44, 0.0  ;;  %v5261_v36 = vsel %vm5246_vm13, %v5208_v44, 0.0  ;;  %v5207_v49 = vsel %vm5206_vm11, %v5203_v10, %v5183_v61 }
 0x3e0   : > { %v5209_v42 = vsel %vm5206_vm11, %v5205_v35, %v5197_v27  ;;  %v5234_v60 = vsel %vm5232_vm14, %v5230_v41, 0.0  ;;  %v5264_v43 = vsel %vm5232_vm14, %v5261_v36, 0.0  ;;  %v5233_v26 = vsel %vm5232_vm14, %v5207_v49, 0.0 }
 0x3e1   : > { %v5262_v51 = vsel %vm5250_vm1, %v5209_v42, 0.0  ;;  %v5235_v34 = vadd.f32 %v5234_v60, %v5233_v26 }
 0x3e2   : > { %v5266_v37 = vsel %vm5236_vm15, %v5262_v51, 0.0 }
 0x3e3   : > { %v5267_v28 = vadd.f32 %v5266_v37, %v5264_v43  ;;  %v5239_v47 = vrot.slane %v5235_v34, 4 }
 0x3e5   : > { %v5268_v6 = vrot.slane %v5267_v28, 4  ;;  %v5240_v46 = vadd.f32 %v5239_v47, %v5235_v34 }
 0x3e7   : > { %v5269_v22 = vadd.f32 %v5268_v6, %v5267_v28  ;;  %v5241_v59 = vrot.slane %v5240_v46, 2 }
 0x3e9   : > { %v5270_v31 = vrot.slane %v5269_v22, 2  ;;  %v5242_v15 = vadd.f32 %v5241_v59, %v5240_v46 }
 0x3eb   : > { %v5271_v25 = vadd.f32 %v5270_v31, %v5269_v22  ;;  %v5243_v53 = vrot.slane %v5242_v15, 1 }
 0x3ed   : > { %v5272_v38 = vrot.slane %v5271_v25, 1  ;;  %v5244_v32 = vadd.f32 %v5243_v53, %v5242_v15 }
 0x3ef   : > { %v5273_v57 = vadd.f32 %v5272_v38, %v5271_v25 }
 0x3f1   : > { %v5276_v19 = vsel %vm5275_vm2, %v5244_v32, %v5273_v57 }
 0x3f2   : > { %v5278_v23 = vadd.f32 %v5277_v7, %v5276_v19 }
 0x3f4   : > { %5279 = vst.msk [vmem:[%s10101_s6] sm:$0x3] %vm5236_vm15, %v5278_v23 }
 0x3f5 PF: > { %p14_p11 = scmp.ge.s32.totalorder %s8134_s26, 4   ;;  %s10176_s23 = smov %s8070_s24 }
 0x3f6   : > { %s10177_s24 = smov %s8143_s29  ;;  %s10178_s25 = smov %s8134_s26 }
 0x3f7   :  { %16 = sbr.rel (!%p14_p11) target bundleno = 4 (0x4), region = 112 }

</bundles_post_ra>
